<compile_context>
chip_gen: v6e
topology: v6e:2x2x1
jax: 0.10.0
libtpu: 0.0.40
codegen_flags: <defaults>
</compile_context>

<pallas_src>
import functools

import jax
import jax.numpy as jnp
import numpy as np
from jax import lax
from jax.experimental import pallas as pl
from jax.experimental.pallas import tpu as pltpu


def _round_up(v, m):
    return (v + m - 1) // m * m


def _vmem_limit_bytes():
    # v5e/v6e: 128 MiB physical VMEM, v7x: 64 MiB -> derive the scoped limit
    # from the hardware instead of hardcoding one number for every chip.
    try:
        cap = getattr(pltpu.get_tpu_info(), "vmem_capacity_bytes", None)
        if cap:
            return int(min(cap * 3 // 4, 100 * 1024 * 1024))
    except Exception:
        pass
    return 32 * 1024 * 1024


def _pick_batch_block(n, rows_per_batch, per_batch_bytes, budget_bytes,
                      max_rows=2048):
    """Largest divisor of n (<= 8) whose per-step footprint fits the VMEM
    budget and whose matmul M stays moderate: bigger M fills the MXU, while
    leftover grid steps keep the BlockSpec pipeline / megacore busy."""
    best = 1
    for b in range(2, min(n, 8) + 1):
        if n % b:
            continue
        if b * rows_per_batch > max_rows or b * per_batch_bytes > budget_bytes:
            break
        best = b
    return best


# --------------------------------------------------------------------------
# Pass 1: conv1 -> ReLU -> conv2 (+bias), per-step BN partial sums.
# --------------------------------------------------------------------------
def _conv_conv_kernel(x_ref, w1_ref, b1_ref, w2_ref, b2_ref,
                      y2_ref, part_ref,
                      patch1_ref, y1_ref, patch2_ref,
                      *, kh, kw, cin, c1, c2, ow2):
    """Per-grid-step shapes (B batch elements per step):
      x_ref:      (B, H, Wp, Cin)          compute dtype (channels NOT padded)
      w1_ref:     (K1p, C1p)               compute dtype (K packed, padded once)
      b1_ref:     (1, C1p)                 f32
      w2_ref:     (K2p, C2p)               compute dtype
      b2_ref:     (C2p, 1)                 f32   (column: conv2 output is channel-major)
      y2_ref:     (B, C2, OH2*OW2)         f32   de-padded, NCHW-flat conv2 output
      part_ref:   (1, C2p, 2)              f32   (col 0: sum, col 1: sum of squares)
      patch1_ref: (B, OH1, OW1p, K1p)      VMEM scratch, compute dtype
      y1_ref:     (B, OH1, OW1p, C1p)      VMEM scratch, compute dtype
      patch2_ref: (B, OH2, OW2,  K2p)      VMEM scratch, compute dtype
    """
    B, H, Wp = x_ref.shape[0], x_ref.shape[1], x_ref.shape[2]
    K1p, C1p = w1_ref.shape
    K2p, C2p = w2_ref.shape
    OH1 = H - kh + 1            # real conv1 output height
    OW1p = Wp - kw + 1          # padded conv1 output width (multiple of 8)
    OH2 = OH1 - kh + 1
    S2 = OH2 * ow2
    M1 = B * OH1 * OW1p
    M2 = B * S2

    # The compact-K tail columns must be zero so they contribute nothing to the
    # matmuls (and never multiply uninitialized VMEM garbage).  Real columns
    # are fully rewritten every step, so zeroing once at step 0 is enough
    # (VMEM scratch persists across grid steps).
    @pl.when(pl.program_id(0) == 0)
    def _zero_pad_columns():
        patch1_ref[...] = jnp.zeros_like(patch1_ref)
        patch2_ref[...] = jnp.zeros_like(patch2_ref)

    # ---- Conv1: im2col with compact K (columns packed at t*cin), written as
    #      plain slice copies (no per-tap reshape), then ONE MXU matmul. ----
    for t in range(kh * kw):
        i, j = t // kw, t % kw
        patch1_ref[:, :, :, t * cin:(t + 1) * cin] = (
            x_ref[:, i:i + OH1, j:j + OW1p, :])
    p1 = patch1_ref[...].reshape(M1, K1p)          # layout no-op: OW1p % 8 == 0
    y1 = jnp.dot(p1, w1_ref[...], preferred_element_type=jnp.float32)
    y1 = jnp.maximum(y1 + b1_ref[...], 0.0)        # bias + ReLU in f32
    # (bf16 path: y1 is quantized to the compute dtype here -- intentional.)
    y1_ref[...] = y1.reshape(B, OH1, OW1p, C1p).astype(y1_ref.dtype)

    # ---- Conv2: im2col over the real y1 channels / real columns only. ----
    for t in range(kh * kw):
        i, j = t // kw, t % kw
        patch2_ref[:, :, :, t * c1:(t + 1) * c1] = (
            y1_ref[:, i:i + OH2, j:j + ow2, 0:c1])
    p2 = patch2_ref[...].reshape(M2, K2p)          # one relayout (OW2 % 8 != 0)

    # Transposed-output matmul (C2p, M2): lets us store y2 directly in the
    # final channel-major (NCHW-flat), channel-de-padded layout.
    y2t = lax.dot_general(w2_ref[...], p2,
                          dimension_numbers=(((0,), (1,)), ((), ())),
                          preferred_element_type=jnp.float32)
    y2t = y2t + b2_ref[...]                        # (C2p, M2) + (C2p, 1)

    # Per-step BatchNorm partial sums (f32); the global reduction happens in
    # the wrapper.  NOTE: E[x^2]-E[x]^2 can cancel for very large extents /
    # large-mean activations; fine at these sizes and tolerances.
    part_ref[0, :, 0:1] = jnp.sum(y2t, axis=1, keepdims=True)
    part_ref[0, :, 1:2] = jnp.sum(y2t * y2t, axis=1, keepdims=True)

    # De-padded, NCHW-flat conv2 output: only the real c2 channels reach HBM.
    for b in range(B):
        y2_ref[b] = y2t[0:c2, b * S2:(b + 1) * S2].astype(y2_ref.dtype)


# --------------------------------------------------------------------------
# Pass 2: fused per-channel scale+shift+ReLU (BatchNorm apply), in place.
# --------------------------------------------------------------------------
def _bn_relu_kernel(y2_ref, scale_ref, shift_ref, o_ref):
    # (B, C2, S2) * (1, C2, 1) + (1, C2, 1) -> ReLU
    o_ref[...] = jnp.maximum(
        y2_ref[...] * scale_ref[...] + shift_ref[...], 0.0).astype(o_ref.dtype)


# --------------------------------------------------------------------------
# Wrapper: PyTorch NCHW / OIHW in, NCHW out. Layout / padding glue only.
# --------------------------------------------------------------------------
@functools.partial(jax.jit, static_argnames=("eps", "compute_dtype"))
def two_conv_block(x_nchw, w1_oihw, b1, w2_oihw, b2, gamma, beta,
                   eps=1e-5, compute_dtype=jnp.bfloat16):
    f32 = jnp.float32
    N, Cin, H, W = x_nchw.shape
    C1, _, KH, KW = w1_oihw.shape
    C2 = w2_oihw.shape[0]
    OH1, OW1 = H - KH + 1, W - KW + 1
    OH2, OW2 = OH1 - KH + 1, OW1 - KW + 1
    S2 = OH2 * OW2

    # Internal width padding: make conv1's output width a multiple of 8 so the
    # in-kernel (B, OH1, OW1p, K) <-> (M1, K) reshapes are layout no-ops.  The
    # extra conv1 columns are never read by conv2 (valid conv only touches
    # columns < OW1), so results are unaffected.
    OW1p = _round_up(OW1, 8)
    Wp = OW1p + KW - 1

    K1, K2 = KH * KW * Cin, KH * KW * C1
    K1p, K2p = _round_up(K1, 128), _round_up(K2, 128)
    C1p, C2p = _round_up(C1, 128), _round_up(C2, 128)

    cd = jnp.dtype(compute_dtype)
    vmem_limit = _vmem_limit_bytes()

    # ---- layout glue (all tiny): NCHW -> NHWC, width pad, compact-K weights.
    x = jnp.transpose(x_nchw, (0, 2, 3, 1)).astype(compute_dtype)
    x = jnp.pad(x, ((0, 0), (0, 0), (0, Wp - W), (0, 0)))   # channels NOT padded

    w1 = jnp.transpose(w1_oihw, (2, 3, 1, 0)).reshape(K1, C1)
    w1 = jnp.pad(w1, ((0, K1p - K1), (0, C1p - C1))).astype(compute_dtype)
    w2 = jnp.transpose(w2_oihw, (2, 3, 1, 0)).reshape(K2, C2)
    w2 = jnp.pad(w2, ((0, K2p - K2), (0, C2p - C2))).astype(compute_dtype)

    b1p = jnp.pad(b1.astype(f32), (0, C1p - C1)).reshape(1, C1p)
    b2c = jnp.pad(b2.astype(f32), (0, C2p - C2)).reshape(C2p, 1)

    # ---- batch blocking: enlarge matmul M per grid step within VMEM budget.
    per_batch_bytes = ((OH1 * OW1p * (K1p + C1p) + OH2 * OW2 * K2p) * cd.itemsize
                       + 2 * (H * Wp * Cin * cd.itemsize + C2 * S2 * 4))
    weights_bytes = (K1p * C1p + K2p * C2p) * cd.itemsize
    B = _pick_batch_block(N, OH1 * OW1p, per_batch_bytes,
                          max(vmem_limit // 2 - weights_bytes, per_batch_bytes))
    NB = N // B

    # ---------------- Pass 1: conv -> ReLU -> conv (+ BN partials) ----------
    flops1 = 2 * N * (OH1 * OW1p * K1p * C1p + S2 * K2p * C2p)
    bytes1 = (x.size * cd.itemsize + (w1.size + w2.size) * cd.itemsize
              + (b1p.size + b2c.size) * 4
              + N * C2 * S2 * 4 + NB * C2p * 2 * 4)

    y2, partials = pl.pallas_call(
        functools.partial(_conv_conv_kernel, kh=KH, kw=KW, cin=Cin,
                          c1=C1, c2=C2, ow2=OW2),
        out_shape=(jax.ShapeDtypeStruct((N, C2, S2), f32),
                   jax.ShapeDtypeStruct((NB, C2p, 2), f32)),
        grid=(NB,),
        in_specs=[
            pl.BlockSpec((B, H, Wp, Cin), lambda n: (n, 0, 0, 0)),
            pl.BlockSpec((K1p, C1p), lambda n: (0, 0)),
            pl.BlockSpec((1, C1p), lambda n: (0, 0)),
            pl.BlockSpec((K2p, C2p), lambda n: (0, 0)),
            pl.BlockSpec((C2p, 1), lambda n: (0, 0)),
        ],
        out_specs=(
            pl.BlockSpec((B, C2, S2), lambda n: (n, 0, 0)),
            pl.BlockSpec((1, C2p, 2), lambda n: (n, 0, 0)),
        ),
        scratch_shapes=[
            pltpu.VMEM((B, OH1, OW1p, K1p), compute_dtype),   # conv1 im2col
            pltpu.VMEM((B, OH1, OW1p, C1p), compute_dtype),   # conv1 output
            pltpu.VMEM((B, OH2, OW2, K2p), compute_dtype),    # conv2 im2col
        ],
        compiler_params=pltpu.CompilerParams(
            dimension_semantics=("parallel",),
            vmem_limit_bytes=vmem_limit),
        cost_estimate=pl.CostEstimate(flops=flops1, transcendentals=0,
                                      bytes_accessed=bytes1),
    )(x, w1, b1p, w2, b2c)

    # ---- Global (training-mode) BatchNorm stats: tiny reduction done in XLA.
    count = float(N * S2)
    psum = jnp.sum(partials[:, :C2, 0], axis=0)
    psumsq = jnp.sum(partials[:, :C2, 1], axis=0)
    mean = psum / count
    var = psumsq / count - mean * mean             # biased variance (PyTorch BN)
    rstd = lax.rsqrt(var + eps)
    scale = (gamma.astype(f32) * rstd).reshape(1, C2, 1)
    shift = (beta.astype(f32) - mean * gamma.astype(f32) * rstd).reshape(1, C2, 1)

    # ---------------- Pass 2: fused scale + shift + ReLU, in place ----------
    out = pl.pallas_call(
        _bn_relu_kernel,
        out_shape=jax.ShapeDtypeStruct((N, C2, S2), f32),
        grid=(NB,),
        in_specs=[
            pl.BlockSpec((B, C2, S2), lambda n: (n, 0, 0)),
            pl.BlockSpec((1, C2, 1), lambda n: (0, 0, 0)),
            pl.BlockSpec((1, C2, 1), lambda n: (0, 0, 0)),
        ],
        out_specs=pl.BlockSpec((B, C2, S2), lambda n: (n, 0, 0)),
        input_output_aliases={0: 0},
        compiler_params=pltpu.CompilerParams(
            dimension_semantics=("parallel",),
            vmem_limit_bytes=vmem_limit),
        cost_estimate=pl.CostEstimate(flops=2 * N * C2 * S2, transcendentals=0,
                                      bytes_accessed=2 * N * C2 * S2 * 4),
    )(y2, scale, shift)

    # Output is already de-padded and NCHW-flat: just split the spatial axis.
    return out.reshape(N, C2, OH2, OW2)


# --------------------------------------------------------------------------
# Plain-JAX reference matching PyTorch semantics (training-mode BatchNorm).
# --------------------------------------------------------------------------
def _reference(x_nchw, w1_oihw, b1, w2_oihw, b2, gamma, beta, eps=1e-5):
    dn = ("NCHW", "OIHW", "NCHW")
    y1 = lax.conv_general_dilated(x_nchw, w1_oihw, (1, 1), "VALID",
                                  dimension_numbers=dn)
    y1 = jax.nn.relu(y1 + b1.reshape(1, -1, 1, 1))
    y2 = lax.conv_general_dilated(y1, w2_oihw, (1, 1), "VALID",
                                  dimension_numbers=dn)
    y2 = y2 + b2.reshape(1, -1, 1, 1)
    mean = jnp.mean(y2, axis=(0, 2, 3), keepdims=True)
    var = jnp.mean((y2 - mean) ** 2, axis=(0, 2, 3), keepdims=True)
    y2n = (y2 - mean) / jnp.sqrt(var + eps)
    y2n = y2n * gamma.reshape(1, -1, 1, 1) + beta.reshape(1, -1, 1, 1)
    return jax.nn.relu(y2n)


if __name__ == "__main__":
    # twoConvBlock(input_channels=4, output_channels=8, kernel=(3, 3))
    N, Cin, H, W = 2, 4, 16, 16
    Cout, KH, KW = 8, 3, 3

    key = jax.random.PRNGKey(0)
    k1, k2, k3, k4, k5 = jax.random.split(key, 5)

    x = jax.random.normal(k1, (N, Cin, H, W), dtype=jnp.float32)
    w1 = 0.1 * jax.random.normal(k2, (Cout, Cin, KH, KW), dtype=jnp.float32)
    b1 = 0.1 * jax.random.normal(k3, (Cout,), dtype=jnp.float32)
    w2 = 0.1 * jax.random.normal(k4, (Cout, Cout, KH, KW), dtype=jnp.float32)
    b2 = 0.1 * jax.random.normal(k5, (Cout,), dtype=jnp.float32)
    # BatchNorm2d default init: weight (gamma) = 1, bias (beta) = 0.
    gamma = jnp.ones((Cout,), dtype=jnp.float32)
    beta = jnp.zeros((Cout,), dtype=jnp.float32)

    ref = _reference(x, w1, b1, w2, b2, gamma, beta)

    # Exact check: f32 MXU inputs.
    out_f32 = jax.block_until_ready(
        two_conv_block(x, w1, b1, w2, b2, gamma, beta,
                       compute_dtype=jnp.float32))
    np.testing.assert_allclose(np.asarray(out_f32), np.asarray(ref),
                               rtol=1e-4, atol=1e-4)

    # Fast path: bf16 MXU inputs, f32 accumulation / BN (looser tolerance).
    out_bf16 = jax.block_until_ready(
        two_conv_block(x, w1, b1, w2, b2, gamma, beta,
                       compute_dtype=jnp.bfloat16))
    np.testing.assert_allclose(np.asarray(out_bf16), np.asarray(ref),
                               rtol=5e-2, atol=5e-2)

    print("KERNEL_OK")
</pallas_src>

<mosaic_0001>
module attributes {stable_mosaic.version = 11 : i64} {
  func.func @_bn_relu_kernel(%arg0: i32, %arg1: memref<2x8x144xf32, #tpu.memory_space<vmem>>, %arg2: memref<1x8x1xf32, #tpu.memory_space<vmem>>, %arg3: memref<1x8x1xf32, #tpu.memory_space<vmem>>, %arg4: memref<2x8x144xf32, #tpu.memory_space<vmem>>) attributes {dimension_semantics = [#tpu.dimension_semantics<parallel>], iteration_bounds = array<i64: 1>, scalar_prefetch = 0 : i64, scratch_operands = 0 : i64, tpu.core_type = #tpu.core_type<tc>, window_params = [{transform_indices = @transform_0, window_bounds = array<i64: 2, 8, 144>}, {pipeline_mode = #tpu.pipeline_mode<synchronous>, transform_indices = @transform_1, window_bounds = array<i64: 1, 8, 1>}, {pipeline_mode = #tpu.pipeline_mode<synchronous>, transform_indices = @transform_2, window_bounds = array<i64: 1, 8, 1>}, {transform_indices = @transform_3, window_bounds = array<i64: 2, 8, 144>}]} {
    %c0 = arith.constant 0 : index
    %c0_0 = arith.constant 0 : index
    %c0_1 = arith.constant 0 : index
    %0 = vector.load %arg1[%c0, %c0_0, %c0_1] : memref<2x8x144xf32, #tpu.memory_space<vmem>>, vector<2x8x144xf32>
    %c0_2 = arith.constant 0 : index
    %c0_3 = arith.constant 0 : index
    %c0_4 = arith.constant 0 : index
    %1 = vector.load %arg2[%c0_2, %c0_3, %c0_4] : memref<1x8x1xf32, #tpu.memory_space<vmem>>, vector<1x8x1xf32>
    %2 = vector.broadcast %1 : vector<1x8x1xf32> to vector<2x8x144xf32>
    %3 = arith.mulf %0, %2 : vector<2x8x144xf32>
    %c0_5 = arith.constant 0 : index
    %c0_6 = arith.constant 0 : index
    %c0_7 = arith.constant 0 : index
    %4 = vector.load %arg3[%c0_5, %c0_6, %c0_7] : memref<1x8x1xf32, #tpu.memory_space<vmem>>, vector<1x8x1xf32>
    %5 = vector.broadcast %4 : vector<1x8x1xf32> to vector<2x8x144xf32>
    %6 = arith.addf %3, %5 : vector<2x8x144xf32>
    %cst = arith.constant 0.000000e+00 : f32
    %7 = vector.broadcast %cst : f32 to vector<2x8x144xf32>
    %8 = arith.maximumf %6, %7 : vector<2x8x144xf32>
    %c0_8 = arith.constant 0 : index
    %c0_9 = arith.constant 0 : index
    %c0_10 = arith.constant 0 : index
    %9 = vector.load %arg4[%c0_8, %c0_9, %c0_10] : memref<2x8x144xf32, #tpu.memory_space<vmem>>, vector<2x8x144xf32>
    tpu.vector_store %arg4[%c0_8, %c0_9, %c0_10], %8 {strides = array<i32>} : memref<2x8x144xf32, #tpu.memory_space<vmem>>, vector<2x8x144xf32>,
    return
  }
  func.func @transform_0(%arg0: i32) -> (i32, i32, i32) {
    %c0_i32 = arith.constant 0 : i32
    %c0_i32_0 = arith.constant 0 : i32
    %c0_i32_1 = arith.constant 0 : i32
    return %arg0, %c0_i32, %c0_i32_0 : i32, i32, i32
  }
  func.func @transform_1(%arg0: i32) -> (i32, i32, i32) {
    %c0_i32 = arith.constant 0 : i32
    %c0_i32_0 = arith.constant 0 : i32
    %c0_i32_1 = arith.constant 0 : i32
    %c0_i32_2 = arith.constant 0 : i32
    return %c0_i32, %c0_i32_0, %c0_i32_1 : i32, i32, i32
  }
  func.func @transform_2(%arg0: i32) -> (i32, i32, i32) {
    %c0_i32 = arith.constant 0 : i32
    %c0_i32_0 = arith.constant 0 : i32
    %c0_i32_1 = arith.constant 0 : i32
    %c0_i32_2 = arith.constant 0 : i32
    return %c0_i32, %c0_i32_0, %c0_i32_1 : i32, i32, i32
  }
  func.func @transform_3(%arg0: i32) -> (i32, i32, i32) {
    %c0_i32 = arith.constant 0 : i32
    %c0_i32_0 = arith.constant 0 : i32
    %c0_i32_1 = arith.constant 0 : i32
    return %arg0, %c0_i32, %c0_i32_0 : i32, i32, i32
  }
}

module attributes {stable_mosaic.version = 11 : i64} {
  func.func @_conv_conv_kernel(%arg0: i32, %arg1: memref<2x16x18x4xf32, #tpu.memory_space<vmem>>, %arg2: memref<128x128xf32, #tpu.memory_space<vmem>>, %arg3: memref<1x128xf32, #tpu.memory_space<vmem>>, %arg4: memref<128x128xf32, #tpu.memory_space<vmem>>, %arg5: memref<128x1xf32, #tpu.memory_space<vmem>>, %arg6: memref<2x8x144xf32, #tpu.memory_space<vmem>>, %arg7: memref<1x128x2xf32, #tpu.memory_space<vmem>>, %arg8: memref<2x14x16x128xf32, #tpu.memory_space<vmem>>, %arg9: memref<2x14x16x128xf32, #tpu.memory_space<vmem>>, %arg10: memref<2x12x12x128xf32, #tpu.memory_space<vmem>>) attributes {dimension_semantics = [#tpu.dimension_semantics<parallel>], iteration_bounds = array<i64: 1>, scalar_prefetch = 0 : i64, scratch_operands = 3 : i64, tpu.core_type = #tpu.core_type<tc>, window_params = [{transform_indices = @transform_0, window_bounds = array<i64: 2, 16, 18, 4>}, {pipeline_mode = #tpu.pipeline_mode<synchronous>, transform_indices = @transform_1, window_bounds = array<i64: 128, 128>}, {pipeline_mode = #tpu.pipeline_mode<synchronous>, transform_indices = @transform_2, window_bounds = array<i64: 1, 128>}, {pipeline_mode = #tpu.pipeline_mode<synchronous>, transform_indices = @transform_3, window_bounds = array<i64: 128, 128>}, {pipeline_mode = #tpu.pipeline_mode<synchronous>, transform_indices = @transform_4, window_bounds = array<i64: 128, 1>}, {transform_indices = @transform_5, window_bounds = array<i64: 2, 8, 144>}, {transform_indices = @transform_6, window_bounds = array<i64: 1, 128, 2>}]} {
    %c0_i32 = arith.constant 0 : i32
    %0 = arith.cmpi eq, %arg0, %c0_i32 : i32
    %1 = arith.extui %0 : i1 to i32
    %c0_i32_0 = arith.constant 0 : i32
    %2 = arith.cmpi ne, %1, %c0_i32_0 : i32
    scf.if %2 {
      %cst_166 = arith.constant 0.000000e+00 : f32
      %76 = vector.broadcast %cst_166 : f32 to vector<2x14x16x128xf32>
      %c0_167 = arith.constant 0 : index
      %c0_168 = arith.constant 0 : index
      %c0_169 = arith.constant 0 : index
      %c0_170 = arith.constant 0 : index
      %77 = vector.load %arg8[%c0_167, %c0_168, %c0_169, %c0_170] : memref<2x14x16x128xf32, #tpu.memory_space<vmem>>, vector<2x14x16x128xf32>
      tpu.vector_store %arg8[%c0_167, %c0_168, %c0_169, %c0_170], %76 {strides = array<i32>} : memref<2x14x16x128xf32, #tpu.memory_space<vmem>>, vector<2x14x16x128xf32>,
      %cst_171 = arith.constant 0.000000e+00 : f32
      %78 = vector.broadcast %cst_171 : f32 to vector<2x12x12x128xf32>
      %c0_172 = arith.constant 0 : index
      %c0_173 = arith.constant 0 : index
      %c0_174 = arith.constant 0 : index
      %c0_175 = arith.constant 0 : index
      %79 = vector.load %arg10[%c0_172, %c0_173, %c0_174, %c0_175] : memref<2x12x12x128xf32, #tpu.memory_space<vmem>>, vector<2x12x12x128xf32>
      tpu.vector_store %arg10[%c0_172, %c0_173, %c0_174, %c0_175], %78 {strides = array<i32>} : memref<2x12x12x128xf32, #tpu.memory_space<vmem>>, vector<2x12x12x128xf32>,
    } else {
    }
    %c0 = arith.constant 0 : index
    %c0_1 = arith.constant 0 : index
    %c0_2 = arith.constant 0 : index
    %c0_3 = arith.constant 0 : index
    %3 = vector.load %arg1[%c0, %c0_1, %c0_2, %c0_3] : memref<2x16x18x4xf32, #tpu.memory_space<vmem>>, vector<2x14x16x4xf32>
    %c0_4 = arith.constant 0 : index
    %c0_5 = arith.constant 0 : index
    %c0_6 = arith.constant 0 : index
    %c0_7 = arith.constant 0 : index
    %4 = vector.load %arg8[%c0_4, %c0_5, %c0_6, %c0_7] : memref<2x14x16x128xf32, #tpu.memory_space<vmem>>, vector<2x14x16x4xf32>
    tpu.vector_store %arg8[%c0_4, %c0_5, %c0_6, %c0_7], %3 {strides = array<i32>} : memref<2x14x16x128xf32, #tpu.memory_space<vmem>>, vector<2x14x16x4xf32>,
    %c0_8 = arith.constant 0 : index
    %c0_9 = arith.constant 0 : index
    %c1 = arith.constant 1 : index
    %c0_10 = arith.constant 0 : index
    %5 = vector.load %arg1[%c0_8, %c0_9, %c1, %c0_10] : memref<2x16x18x4xf32, #tpu.memory_space<vmem>>, vector<2x14x16x4xf32>
    %c0_11 = arith.constant 0 : index
    %c0_12 = arith.constant 0 : index
    %c0_13 = arith.constant 0 : index
    %c4 = arith.constant 4 : index
    %6 = vector.load %arg8[%c0_11, %c0_12, %c0_13, %c4] : memref<2x14x16x128xf32, #tpu.memory_space<vmem>>, vector<2x14x16x4xf32>
    tpu.vector_store %arg8[%c0_11, %c0_12, %c0_13, %c4], %5 {strides = array<i32>} : memref<2x14x16x128xf32, #tpu.memory_space<vmem>>, vector<2x14x16x4xf32>,
    %c0_14 = arith.constant 0 : index
    %c0_15 = arith.constant 0 : index
    %c2 = arith.constant 2 : index
    %c0_16 = arith.constant 0 : index
    %7 = vector.load %arg1[%c0_14, %c0_15, %c2, %c0_16] : memref<2x16x18x4xf32, #tpu.memory_space<vmem>>, vector<2x14x16x4xf32>
    %c0_17 = arith.constant 0 : index
    %c0_18 = arith.constant 0 : index
    %c0_19 = arith.constant 0 : index
    %c8 = arith.constant 8 : index
    %8 = vector.load %arg8[%c0_17, %c0_18, %c0_19, %c8] : memref<2x14x16x128xf32, #tpu.memory_space<vmem>>, vector<2x14x16x4xf32>
    tpu.vector_store %arg8[%c0_17, %c0_18, %c0_19, %c8], %7 {strides = array<i32>} : memref<2x14x16x128xf32, #tpu.memory_space<vmem>>, vector<2x14x16x4xf32>,
    %c0_20 = arith.constant 0 : index
    %c1_21 = arith.constant 1 : index
    %c0_22 = arith.constant 0 : index
    %c0_23 = arith.constant 0 : index
    %9 = vector.load %arg1[%c0_20, %c1_21, %c0_22, %c0_23] : memref<2x16x18x4xf32, #tpu.memory_space<vmem>>, vector<2x14x16x4xf32>
    %c0_24 = arith.constant 0 : index
    %c0_25 = arith.constant 0 : index
    %c0_26 = arith.constant 0 : index
    %c12 = arith.constant 12 : index
    %10 = vector.load %arg8[%c0_24, %c0_25, %c0_26, %c12] : memref<2x14x16x128xf32, #tpu.memory_space<vmem>>, vector<2x14x16x4xf32>
    tpu.vector_store %arg8[%c0_24, %c0_25, %c0_26, %c12], %9 {strides = array<i32>} : memref<2x14x16x128xf32, #tpu.memory_space<vmem>>, vector<2x14x16x4xf32>,
    %c0_27 = arith.constant 0 : index
    %c1_28 = arith.constant 1 : index
    %c1_29 = arith.constant 1 : index
    %c0_30 = arith.constant 0 : index
    %11 = vector.load %arg1[%c0_27, %c1_28, %c1_29, %c0_30] : memref<2x16x18x4xf32, #tpu.memory_space<vmem>>, vector<2x14x16x4xf32>
    %c0_31 = arith.constant 0 : index
    %c0_32 = arith.constant 0 : index
    %c0_33 = arith.constant 0 : index
    %c16 = arith.constant 16 : index
    %12 = vector.load %arg8[%c0_31, %c0_32, %c0_33, %c16] : memref<2x14x16x128xf32, #tpu.memory_space<vmem>>, vector<2x14x16x4xf32>
    tpu.vector_store %arg8[%c0_31, %c0_32, %c0_33, %c16], %11 {strides = array<i32>} : memref<2x14x16x128xf32, #tpu.memory_space<vmem>>, vector<2x14x16x4xf32>,
    %c0_34 = arith.constant 0 : index
    %c1_35 = arith.constant 1 : index
    %c2_36 = arith.constant 2 : index
    %c0_37 = arith.constant 0 : index
    %13 = vector.load %arg1[%c0_34, %c1_35, %c2_36, %c0_37] : memref<2x16x18x4xf32, #tpu.memory_space<vmem>>, vector<2x14x16x4xf32>
    %c0_38 = arith.constant 0 : index
    %c0_39 = arith.constant 0 : index
    %c0_40 = arith.constant 0 : index
    %c20 = arith.constant 20 : index
    %14 = vector.load %arg8[%c0_38, %c0_39, %c0_40, %c20] : memref<2x14x16x128xf32, #tpu.memory_space<vmem>>, vector<2x14x16x4xf32>
    tpu.vector_store %arg8[%c0_38, %c0_39, %c0_40, %c20], %13 {strides = array<i32>} : memref<2x14x16x128xf32, #tpu.memory_space<vmem>>, vector<2x14x16x4xf32>,
    %c0_41 = arith.constant 0 : index
    %c2_42 = arith.constant 2 : index
    %c0_43 = arith.constant 0 : index
    %c0_44 = arith.constant 0 : index
    %15 = vector.load %arg1[%c0_41, %c2_42, %c0_43, %c0_44] : memref<2x16x18x4xf32, #tpu.memory_space<vmem>>, vector<2x14x16x4xf32>
    %c0_45 = arith.constant 0 : index
    %c0_46 = arith.constant 0 : index
    %c0_47 = arith.constant 0 : index
    %c24 = arith.constant 24 : index
    %16 = vector.load %arg8[%c0_45, %c0_46, %c0_47, %c24] : memref<2x14x16x128xf32, #tpu.memory_space<vmem>>, vector<2x14x16x4xf32>
    tpu.vector_store %arg8[%c0_45, %c0_46, %c0_47, %c24], %15 {strides = array<i32>} : memref<2x14x16x128xf32, #tpu.memory_space<vmem>>, vector<2x14x16x4xf32>,
    %c0_48 = arith.constant 0 : index
    %c2_49 = arith.constant 2 : index
    %c1_50 = arith.constant 1 : index
    %c0_51 = arith.constant 0 : index
    %17 = vector.load %arg1[%c0_48, %c2_49, %c1_50, %c0_51] : memref<2x16x18x4xf32, #tpu.memory_space<vmem>>, vector<2x14x16x4xf32>
    %c0_52 = arith.constant 0 : index
    %c0_53 = arith.constant 0 : index
    %c0_54 = arith.constant 0 : index
    %c28 = arith.constant 28 : index
    %18 = vector.load %arg8[%c0_52, %c0_53, %c0_54, %c28] : memref<2x14x16x128xf32, #tpu.memory_space<vmem>>, vector<2x14x16x4xf32>
    tpu.vector_store %arg8[%c0_52, %c0_53, %c0_54, %c28], %17 {strides = array<i32>} : memref<2x14x16x128xf32, #tpu.memory_space<vmem>>, vector<2x14x16x4xf32>,
    %c0_55 = arith.constant 0 : index
    %c2_56 = arith.constant 2 : index
    %c2_57 = arith.constant 2 : index
    %c0_58 = arith.constant 0 : index
    %19 = vector.load %arg1[%c0_55, %c2_56, %c2_57, %c0_58] : memref<2x16x18x4xf32, #tpu.memory_space<vmem>>, vector<2x14x16x4xf32>
    %c0_59 = arith.constant 0 : index
    %c0_60 = arith.constant 0 : index
    %c0_61 = arith.constant 0 : index
    %c32 = arith.constant 32 : index
    %20 = vector.load %arg8[%c0_59, %c0_60, %c0_61, %c32] : memref<2x14x16x128xf32, #tpu.memory_space<vmem>>, vector<2x14x16x4xf32>
    tpu.vector_store %arg8[%c0_59, %c0_60, %c0_61, %c32], %19 {strides = array<i32>} : memref<2x14x16x128xf32, #tpu.memory_space<vmem>>, vector<2x14x16x4xf32>,
    %c0_62 = arith.constant 0 : index
    %c0_63 = arith.constant 0 : index
    %c0_64 = arith.constant 0 : index
    %c0_65 = arith.constant 0 : index
    %21 = vector.load %arg8[%c0_62, %c0_63, %c0_64, %c0_65] : memref<2x14x16x128xf32, #tpu.memory_space<vmem>>, vector<2x14x16x128xf32>
    %22 = vector.shape_cast %21 : vector<2x14x16x128xf32> to vector<448x128xf32>
    %c0_66 = arith.constant 0 : index
    %c0_67 = arith.constant 0 : index
    %23 = vector.load %arg2[%c0_66, %c0_67] : memref<128x128xf32, #tpu.memory_space<vmem>>, vector<128x128xf32>
    %cst = arith.constant dense<0.000000e+00> : vector<448x128xf32>
    %24 = tpu.matmul %22, %23, %cst {dimension_numbers = #tpu.dot_dimension_numbers<[1], [0], [0], [1], [0, 0, 1, 1], [], []>} : vector<448x128xf32>, vector<128x128xf32>, vector<448x128xf32> -> vector<448x128xf32>
    %c0_68 = arith.constant 0 : index
    %c0_69 = arith.constant 0 : index
    %25 = vector.load %arg3[%c0_68, %c0_69] : memref<1x128xf32, #tpu.memory_space<vmem>>, vector<1x128xf32>
    %26 = vector.broadcast %25 : vector<1x128xf32> to vector<448x128xf32>
    %27 = arith.addf %24, %26 : vector<448x128xf32>
    %cst_70 = arith.constant 0.000000e+00 : f32
    %28 = vector.broadcast %cst_70 : f32 to vector<448x128xf32>
    %29 = arith.maximumf %27, %28 : vector<448x128xf32>
    %30 = vector.shape_cast %29 : vector<448x128xf32> to vector<2x14x16x128xf32>
    %c0_71 = arith.constant 0 : index
    %c0_72 = arith.constant 0 : index
    %c0_73 = arith.constant 0 : index
    %c0_74 = arith.constant 0 : index
    %31 = vector.load %arg9[%c0_71, %c0_72, %c0_73, %c0_74] : memref<2x14x16x128xf32, #tpu.memory_space<vmem>>, vector<2x14x16x128xf32>
    tpu.vector_store %arg9[%c0_71, %c0_72, %c0_73, %c0_74], %30 {strides = array<i32>} : memref<2x14x16x128xf32, #tpu.memory_space<vmem>>, vector<2x14x16x128xf32>,
    %c0_75 = arith.constant 0 : index
    %c0_76 = arith.constant 0 : index
    %c0_77 = arith.constant 0 : index
    %c0_78 = arith.constant 0 : index
    %32 = vector.load %arg9[%c0_75, %c0_76, %c0_77, %c0_78] : memref<2x14x16x128xf32, #tpu.memory_space<vmem>>, vector<2x12x12x8xf32>
    %c0_79 = arith.constant 0 : index
    %c0_80 = arith.constant 0 : index
    %c0_81 = arith.constant 0 : index
    %c0_82 = arith.constant 0 : index
    %33 = vector.load %arg10[%c0_79, %c0_80, %c0_81, %c0_82] : memref<2x12x12x128xf32, #tpu.memory_space<vmem>>, vector<2x12x12x8xf32>
    tpu.vector_store %arg10[%c0_79, %c0_80, %c0_81, %c0_82], %32 {strides = array<i32>} : memref<2x12x12x128xf32, #tpu.memory_space<vmem>>, vector<2x12x12x8xf32>,
    %c0_83 = arith.constant 0 : index
    %c0_84 = arith.constant 0 : index
    %c1_85 = arith.constant 1 : index
    %c0_86 = arith.constant 0 : index
    %34 = vector.load %arg9[%c0_83, %c0_84, %c1_85, %c0_86] : memref<2x14x16x128xf32, #tpu.memory_space<vmem>>, vector<2x12x12x8xf32>
    %c0_87 = arith.constant 0 : index
    %c0_88 = arith.constant 0 : index
    %c0_89 = arith.constant 0 : index
    %c8_90 = arith.constant 8 : index
    %35 = vector.load %arg10[%c0_87, %c0_88, %c0_89, %c8_90] : memref<2x12x12x128xf32, #tpu.memory_space<vmem>>, vector<2x12x12x8xf32>
    tpu.vector_store %arg10[%c0_87, %c0_88, %c0_89, %c8_90], %34 {strides = array<i32>} : memref<2x12x12x128xf32, #tpu.memory_space<vmem>>, vector<2x12x12x8xf32>,
    %c0_91 = arith.constant 0 : index
    %c0_92 = arith.constant 0 : index
    %c2_93 = arith.constant 2 : index
    %c0_94 = arith.constant 0 : index
    %36 = vector.load %arg9[%c0_91, %c0_92, %c2_93, %c0_94] : memref<2x14x16x128xf32, #tpu.memory_space<vmem>>, vector<2x12x12x8xf32>
    %c0_95 = arith.constant 0 : index
    %c0_96 = arith.constant 0 : index
    %c0_97 = arith.constant 0 : index
    %c16_98 = arith.constant 16 : index
    %37 = vector.load %arg10[%c0_95, %c0_96, %c0_97, %c16_98] : memref<2x12x12x128xf32, #tpu.memory_space<vmem>>, vector<2x12x12x8xf32>
    tpu.vector_store %arg10[%c0_95, %c0_96, %c0_97, %c16_98], %36 {strides = array<i32>} : memref<2x12x12x128xf32, #tpu.memory_space<vmem>>, vector<2x12x12x8xf32>,
    %c0_99 = arith.constant 0 : index
    %c1_100 = arith.constant 1 : index
    %c0_101 = arith.constant 0 : index
    %c0_102 = arith.constant 0 : index
    %38 = vector.load %arg9[%c0_99, %c1_100, %c0_101, %c0_102] : memref<2x14x16x128xf32, #tpu.memory_space<vmem>>, vector<2x12x12x8xf32>
    %c0_103 = arith.constant 0 : index
    %c0_104 = arith.constant 0 : index
    %c0_105 = arith.constant 0 : index
    %c24_106 = arith.constant 24 : index
    %39 = vector.load %arg10[%c0_103, %c0_104, %c0_105, %c24_106] : memref<2x12x12x128xf32, #tpu.memory_space<vmem>>, vector<2x12x12x8xf32>
    tpu.vector_store %arg10[%c0_103, %c0_104, %c0_105, %c24_106], %38 {strides = array<i32>} : memref<2x12x12x128xf32, #tpu.memory_space<vmem>>, vector<2x12x12x8xf32>,
    %c0_107 = arith.constant 0 : index
    %c1_108 = arith.constant 1 : index
    %c1_109 = arith.constant 1 : index
    %c0_110 = arith.constant 0 : index
    %40 = vector.load %arg9[%c0_107, %c1_108, %c1_109, %c0_110] : memref<2x14x16x128xf32, #tpu.memory_space<vmem>>, vector<2x12x12x8xf32>
    %c0_111 = arith.constant 0 : index
    %c0_112 = arith.constant 0 : index
    %c0_113 = arith.constant 0 : index
    %c32_114 = arith.constant 32 : index
    %41 = vector.load %arg10[%c0_111, %c0_112, %c0_113, %c32_114] : memref<2x12x12x128xf32, #tpu.memory_space<vmem>>, vector<2x12x12x8xf32>
    tpu.vector_store %arg10[%c0_111, %c0_112, %c0_113, %c32_114], %40 {strides = array<i32>} : memref<2x12x12x128xf32, #tpu.memory_space<vmem>>, vector<2x12x12x8xf32>,
    %c0_115 = arith.constant 0 : index
    %c1_116 = arith.constant 1 : index
    %c2_117 = arith.constant 2 : index
    %c0_118 = arith.constant 0 : index
    %42 = vector.load %arg9[%c0_115, %c1_116, %c2_117, %c0_118] : memref<2x14x16x128xf32, #tpu.memory_space<vmem>>, vector<2x12x12x8xf32>
    %c0_119 = arith.constant 0 : index
    %c0_120 = arith.constant 0 : index
    %c0_121 = arith.constant 0 : index
    %c40 = arith.constant 40 : index
    %43 = vector.load %arg10[%c0_119, %c0_120, %c0_121, %c40] : memref<2x12x12x128xf32, #tpu.memory_space<vmem>>, vector<2x12x12x8xf32>
    tpu.vector_store %arg10[%c0_119, %c0_120, %c0_121, %c40], %42 {strides = array<i32>} : memref<2x12x12x128xf32, #tpu.memory_space<vmem>>, vector<2x12x12x8xf32>,
    %c0_122 = arith.constant 0 : index
    %c2_123 = arith.constant 2 : index
    %c0_124 = arith.constant 0 : index
    %c0_125 = arith.constant 0 : index
    %44 = vector.load %arg9[%c0_122, %c2_123, %c0_124, %c0_125] : memref<2x14x16x128xf32, #tpu.memory_space<vmem>>, vector<2x12x12x8xf32>
    %c0_126 = arith.constant 0 : index
    %c0_127 = arith.constant 0 : index
    %c0_128 = arith.constant 0 : index
    %c48 = arith.constant 48 : index
    %45 = vector.load %arg10[%c0_126, %c0_127, %c0_128, %c48] : memref<2x12x12x128xf32, #tpu.memory_space<vmem>>, vector<2x12x12x8xf32>
    tpu.vector_store %arg10[%c0_126, %c0_127, %c0_128, %c48], %44 {strides = array<i32>} : memref<2x12x12x128xf32, #tpu.memory_space<vmem>>, vector<2x12x12x8xf32>,
    %c0_129 = arith.constant 0 : index
    %c2_130 = arith.constant 2 : index
    %c1_131 = arith.constant 1 : index
    %c0_132 = arith.constant 0 : index
    %46 = vector.load %arg9[%c0_129, %c2_130, %c1_131, %c0_132] : memref<2x14x16x128xf32, #tpu.memory_space<vmem>>, vector<2x12x12x8xf32>
    %c0_133 = arith.constant 0 : index
    %c0_134 = arith.constant 0 : index
    %c0_135 = arith.constant 0 : index
    %c56 = arith.constant 56 : index
    %47 = vector.load %arg10[%c0_133, %c0_134, %c0_135, %c56] : memref<2x12x12x128xf32, #tpu.memory_space<vmem>>, vector<2x12x12x8xf32>
    tpu.vector_store %arg10[%c0_133, %c0_134, %c0_135, %c56], %46 {strides = array<i32>} : memref<2x12x12x128xf32, #tpu.memory_space<vmem>>, vector<2x12x12x8xf32>,
    %c0_136 = arith.constant 0 : index
    %c2_137 = arith.constant 2 : index
    %c2_138 = arith.constant 2 : index
    %c0_139 = arith.constant 0 : index
    %48 = vector.load %arg9[%c0_136, %c2_137, %c2_138, %c0_139] : memref<2x14x16x128xf32, #tpu.memory_space<vmem>>, vector<2x12x12x8xf32>
    %c0_140 = arith.constant 0 : index
    %c0_141 = arith.constant 0 : index
    %c0_142 = arith.constant 0 : index
    %c64 = arith.constant 64 : index
    %49 = vector.load %arg10[%c0_140, %c0_141, %c0_142, %c64] : memref<2x12x12x128xf32, #tpu.memory_space<vmem>>, vector<2x12x12x8xf32>
    tpu.vector_store %arg10[%c0_140, %c0_141, %c0_142, %c64], %48 {strides = array<i32>} : memref<2x12x12x128xf32, #tpu.memory_space<vmem>>, vector<2x12x12x8xf32>,
    %c0_143 = arith.constant 0 : index
    %c0_144 = arith.constant 0 : index
    %c0_145 = arith.constant 0 : index
    %c0_146 = arith.constant 0 : index
    %50 = vector.load %arg10[%c0_143, %c0_144, %c0_145, %c0_146] : memref<2x12x12x128xf32, #tpu.memory_space<vmem>>, vector<2x12x12x128xf32>
    %51 = vector.shape_cast %50 : vector<2x12x12x128xf32> to vector<288x128xf32>
    %c0_147 = arith.constant 0 : index
    %c0_148 = arith.constant 0 : index
    %52 = vector.load %arg4[%c0_147, %c0_148] : memref<128x128xf32, #tpu.memory_space<vmem>>, vector<128x128xf32>
    %cst_149 = arith.constant dense<0.000000e+00> : vector<128x288xf32>
    %53 = tpu.matmul %52, %51, %cst_149 {dimension_numbers = #tpu.dot_dimension_numbers<[0], [1], [1], [0], [0, 1, 1, 0], [], []>} : vector<128x128xf32>, vector<288x128xf32>, vector<128x288xf32> -> vector<128x288xf32>
    %c0_150 = arith.constant 0 : index
    %c0_151 = arith.constant 0 : index
    %54 = vector.load %arg5[%c0_150, %c0_151] : memref<128x1xf32, #tpu.memory_space<vmem>>, vector<128x1xf32>
    %55 = vector.broadcast %54 : vector<128x1xf32> to vector<128x288xf32>
    %56 = arith.addf %53, %55 : vector<128x288xf32>
    %cst_152 = arith.constant dense<0.000000e+00> : vector<128xf32>
    %57 = vector.multi_reduction <add>, %56, %cst_152 [1] : vector<128x288xf32> to vector<128xf32>
    %58 = vector.shape_cast %57 : vector<128xf32> to vector<128x1xf32>
    %c0_153 = arith.constant 0 : index
    %c0_154 = arith.constant 0 : index
    %c0_155 = arith.constant 0 : index
    %59 = vector.load %arg7[%c0_153, %c0_154, %c0_155] : memref<1x128x2xf32, #tpu.memory_space<vmem>>, vector<1x128x1xf32>
    %60 = vector.shape_cast %59 : vector<1x128x1xf32> to vector<128x1xf32>
    %61 = vector.shape_cast %58 : vector<128x1xf32> to vector<1x128x1xf32>
    tpu.vector_store %arg7[%c0_153, %c0_154, %c0_155], %61 {strides = array<i32>} : memref<1x128x2xf32, #tpu.memory_space<vmem>>, vector<1x128x1xf32>,
    %62 = arith.mulf %56, %56 : vector<128x288xf32>
    %cst_156 = arith.constant dense<0.000000e+00> : vector<128xf32>
    %63 = vector.multi_reduction <add>, %62, %cst_156 [1] : vector<128x288xf32> to vector<128xf32>
    %64 = vector.shape_cast %63 : vector<128xf32> to vector<128x1xf32>
    %c0_157 = arith.constant 0 : index
    %c0_158 = arith.constant 0 : index
    %c1_159 = arith.constant 1 : index
    %65 = vector.load %arg7[%c0_157, %c0_158, %c1_159] : memref<1x128x2xf32, #tpu.memory_space<vmem>>, vector<1x128x1xf32>
    %66 = vector.shape_cast %65 : vector<1x128x1xf32> to vector<128x1xf32>
    %67 = vector.shape_cast %64 : vector<128x1xf32> to vector<1x128x1xf32>
    tpu.vector_store %arg7[%c0_157, %c0_158, %c1_159], %67 {strides = array<i32>} : memref<1x128x2xf32, #tpu.memory_space<vmem>>, vector<1x128x1xf32>,
    %68 = vector.extract_strided_slice %56 {offsets = [0, 0], sizes = [8, 144], strides = [1, 1]} : vector<128x288xf32> to vector<8x144xf32>
    %c0_160 = arith.constant 0 : index
    %c0_161 = arith.constant 0 : index
    %c0_162 = arith.constant 0 : index
    %69 = vector.load %arg6[%c0_160, %c0_161, %c0_162] : memref<2x8x144xf32, #tpu.memory_space<vmem>>, vector<1x8x144xf32>
    %70 = vector.shape_cast %69 : vector<1x8x144xf32> to vector<8x144xf32>
    %71 = vector.shape_cast %68 : vector<8x144xf32> to vector<1x8x144xf32>
    tpu.vector_store %arg6[%c0_160, %c0_161, %c0_162], %71 {strides = array<i32>} : memref<2x8x144xf32, #tpu.memory_space<vmem>>, vector<1x8x144xf32>,
    %72 = vector.extract_strided_slice %56 {offsets = [0, 144], sizes = [8, 144], strides = [1, 1]} : vector<128x288xf32> to vector<8x144xf32>
    %c1_163 = arith.constant 1 : index
    %c0_164 = arith.constant 0 : index
    %c0_165 = arith.constant 0 : index
    %73 = vector.load %arg6[%c1_163, %c0_164, %c0_165] : memref<2x8x144xf32, #tpu.memory_space<vmem>>, vector<1x8x144xf32>
    %74 = vector.shape_cast %73 : vector<1x8x144xf32> to vector<8x144xf32>
    %75 = vector.shape_cast %72 : vector<8x144xf32> to vector<1x8x144xf32>
    tpu.vector_store %arg6[%c1_163, %c0_164, %c0_165], %75 {strides = array<i32>} : memref<2x8x144xf32, #tpu.memory_space<vmem>>, vector<1x8x144xf32>,
    return
  }
  func.func @transform_0(%arg0: i32) -> (i32, i32, i32, i32) {
    %c0_i32 = arith.constant 0 : i32
    %c0_i32_0 = arith.constant 0 : i32
    %c0_i32_1 = arith.constant 0 : i32
    %c0_i32_2 = arith.constant 0 : i32
    return %arg0, %c0_i32, %c0_i32_0, %c0_i32_1 : i32, i32, i32, i32
  }
  func.func @transform_1(%arg0: i32) -> (i32, i32) {
    %c0_i32 = arith.constant 0 : i32
    %c0_i32_0 = arith.constant 0 : i32
    %c0_i32_1 = arith.constant 0 : i32
    return %c0_i32, %c0_i32_0 : i32, i32
  }
  func.func @transform_2(%arg0: i32) -> (i32, i32) {
    %c0_i32 = arith.constant 0 : i32
    %c0_i32_0 = arith.constant 0 : i32
    %c0_i32_1 = arith.constant 0 : i32
    return %c0_i32, %c0_i32_0 : i32, i32
  }
  func.func @transform_3(%arg0: i32) -> (i32, i32) {
    %c0_i32 = arith.constant 0 : i32
    %c0_i32_0 = arith.constant 0 : i32
    %c0_i32_1 = arith.constant 0 : i32
    return %c0_i32, %c0_i32_0 : i32, i32
  }
  func.func @transform_4(%arg0: i32) -> (i32, i32) {
    %c0_i32 = arith.constant 0 : i32
    %c0_i32_0 = arith.constant 0 : i32
    %c0_i32_1 = arith.constant 0 : i32
    return %c0_i32, %c0_i32_0 : i32, i32
  }
  func.func @transform_5(%arg0: i32) -> (i32, i32, i32) {
    %c0_i32 = arith.constant 0 : i32
    %c0_i32_0 = arith.constant 0 : i32
    %c0_i32_1 = arith.constant 0 : i32
    return %arg0, %c0_i32, %c0_i32_0 : i32, i32, i32
  }
  func.func @transform_6(%arg0: i32) -> (i32, i32, i32) {
    %c0_i32 = arith.constant 0 : i32
    %c0_i32_0 = arith.constant 0 : i32
    %c0_i32_1 = arith.constant 0 : i32
    return %arg0, %c0_i32, %c0_i32_0 : i32, i32, i32
  }
}

</mosaic_0001>

<bundles_post_ra>
// kernel: two_conv_block.3
= control target key start
LH: loop header
LB: loop body
LE: loop exit
PB: predicated region body
PF: predicated region fallthrough
CT: control target
= control target key end

     0   :  { %v53_v0 = vmov 0   ;;  %vm43_vm0 = vcmask 130048   ;;  %s104_s1 = inlined_call_operand.vmem [shape: f32[1,8,1], index: 1, kind: input, shape index: {}]   ;;  %s105_s2 = inlined_call_operand.vmem [shape: f32[1,8,1], index: 2, kind: input, shape index: {}]   ;;  %s106_s0 = inlined_call_operand.vmem [shape: f32[2,8,144], index: 0, kind: input, shape index: {}, may-alias: {0,3}]   ;;  %s107_s3 = inlined_call_operand.vmem [shape: f32[2,8,144], index: 3, kind: output, shape index: {}, may-alias: {0,3}]  }
   0x1   :  { %52 = vset.pattern.permute.xlu0 %v53_v0  ;;  %v18_v1 = vld [vmem:[%s104_s1] sm:$0xff]  ;;  %v15_v5 = vld [vmem:[%s106_s0 + $0x8] sm:$0xff]  ;;  %v16_v6 = vld [vmem:[%s106_s0 + $0x10] sm:$0xff] }
   0x2   :  { %21 = vperm.xlu0 %52, %v18_v1   ;;  %v28_v2 = vld [vmem:[%s105_s2] sm:$0xff]  ;;  %v17_v7 = vld [vmem:[%s106_s0 + $0x18] sm:$0xff] }
   0x3   :  { %v14_v3 = vld [vmem:[%s106_s0] sm:$0xff] }
   0x6   :  { %31 = vperm.xlu0 %52, %v28_v2  }
  0x7d   :  { %v22_v4 = vpop.permute.xlu0 %21 }
  0x7e   :  { %v24_v8 = vmul.f32 %v22_v4, %v14_v3  ;;  %v25_v9 = vmul.f32 %v22_v4, %v15_v5  ;;  %v26_v10 = vmul.f32 %v22_v4, %v16_v6  ;;  %v27_v11 = vmul.f32 %v22_v4, %v17_v7 }
  0x81   :  { %v32_v12 = vpop.permute.xlu0 %31 }
  0x82   :  { %v34_v13 = vadd.f32 %v32_v12, %v24_v8  ;;  %v35_v14 = vadd.f32 %v32_v12, %v25_v9  ;;  %v36_v15 = vadd.f32 %v32_v12, %v26_v10  ;;  %v37_v16 = vadd.f32 %v32_v12, %v27_v11 }
  0x84   :  { %v38_v17 = vmax.f32 %v34_v13, 0.0  ;;  %v39_v18 = vmax.f32 %v35_v14, 0.0  ;;  %v40_v19 = vmax.f32 %v36_v15, 0.0  ;;  %v41_v20 = vmax.f32 %v37_v16, 0.0 }
  0x86   :  { %42 = vst [vmem:[%s107_s3] sm:$0xff] %v38_v17  ;;  %44 = vst.msk [vmem:[%s107_s3 + $0x8] sm:$0xff] %vm43_vm0, %v39_v18 }
  0x87   :  { %45 = vst [vmem:[%s107_s3 + $0x10] sm:$0xff] %v40_v19  ;;  %46 = vst.msk [vmem:[%s107_s3 + $0x18] sm:$0xff] %vm43_vm0, %v41_v20 }

// kernel: two_conv_block.2
= control target key start
LH: loop header
LB: loop body
LE: loop exit
PB: predicated region body
PF: predicated region fallthrough
CT: control target
= control target key end

     0   :  { %v7524_v2 = vmov 0.0   ;;  %s7525_s25 = smov 4   ;;  %vm186_vm0 = vcmask 31744   ;;  %s7526_s19 = smov 8   ;;  %vm523_vm1 = vcmask 64544   ;;  %vm860_vm2 = vcmask 97344   ;;  %s11890_s0 = inlined_call_operand.vmem [shape: f32[2,16,18,4], index: 0, kind: input, shape index: {}]   ;;  %s11891_s1 = inlined_call_operand.vmem [shape: f32[128,128], index: 1, kind: input, shape index: {}]   ;;  %s11892_s2 = inlined_call_operand.vmem [shape: f32[1,128], index: 2, kind: input, shape index: {}]   ;;  %s11893_s3 = inlined_call_operand.vmem [shape: f32[128,128], index: 3, kind: input, shape index: {}]   ;;  %s11894_s4 = inlined_call_operand.vmem [shape: f32[128,1], index: 4, kind: input, shape index: {}]   ;;  %s11895_s5 = inlined_call_operand.vmem [shape: f32[2,8,144], index: 5, kind: output, shape index: {0}]   ;;  %s11896_s6 = inlined_call_operand.vmem [shape: f32[1,128,2], index: 6, kind: output, shape index: {1}]  }
   0x1   :  { %v7577_v0 = vld [vmem:[%s11890_s0 + $0x1] sm:$0xff]  ;;  %v7582_v1 = vld [vmem:[%s11890_s0 + $0x19] sm:$0xff]  ;;  %26 = vst [vmem:[#allocation2] sm:$0xff] %v7524_v2  ;;  %27 = vst [vmem:[#allocation2 + $0x8] sm:$0xff] %v7524_v2  ;;  %s7527_s12 = smov 12   ;;  %s7528_s26 = smov 16  }
   0x2   :  { %28 = vst [vmem:[#allocation2 + $0x10] sm:$0xff] %v7524_v2  ;;  %29 = vst [vmem:[#allocation2 + $0x18] sm:$0xff] %v7524_v2  ;;  %355 = vrot.lane.b32.xlu0 %v7577_v0, %s7525_s25  ;;  %359 = vrot.lane.b32.xlu1 %v7582_v1, %s7525_s25  ;;  %v244_v3 = vld [vmem:[%s11890_s0 + $0x9] sm:$0xff]  ;;  %v246_v4 = vld [vmem:[%s11890_s0 + $0x21] sm:$0xff]  ;;  %vm1198_vm3 = vcmask 130144   ;;  %s7529_s29 = smov 20  }
   0x3   :  { %30 = vst [vmem:[#allocation2 + $0x20] sm:$0xff] %v7524_v2  ;;  %31 = vst [vmem:[#allocation2 + $0x28] sm:$0xff] %v7524_v2  ;;  %v247_v5 = vld [vmem:[%s11890_s0 + $0x31] sm:$0xff]  ;;  %v248_v6 = vld [vmem:[%s11890_s0 + $0x39] sm:$0xff]  ;;  %vm1535_vm4 = vcmask 162944   ;;  %s7530_s13 = smov 24  }
   0x4   :  { %32 = vst [vmem:[#allocation2 + $0x30] sm:$0xff] %v7524_v2  ;;  %33 = vst [vmem:[#allocation2 + $0x38] sm:$0xff] %v7524_v2  ;;  %v249_v7 = vld [vmem:[%s11890_s0 + $0x49] sm:$0xff]  ;;  %v250_v8 = vld [vmem:[%s11890_s0 + $0x51] sm:$0xff]  ;;  %vm1872_vm5 = vcmask 195744   ;;  %s7531_s21 = smov 28  }
   0x5   :  { %34 = vst [vmem:[#allocation2 + $0x40] sm:$0xff] %v7524_v2  ;;  %35 = vst [vmem:[#allocation2 + $0x48] sm:$0xff] %v7524_v2  ;;  %v251_v9 = vld [vmem:[%s11890_s0 + $0x61] sm:$0xff]  ;;  %v252_v10 = vld [vmem:[%s11890_s0 + $0x69] sm:$0xff]  ;;  %vm2210_vm6 = vcmask 228544   ;;  %vm2547_vm7 = vcmask 261344  }
   0x6   :  { %36 = vst [vmem:[#allocation2 + $0x50] sm:$0xff] %v7524_v2  ;;  %37 = vst [vmem:[#allocation2 + $0x58] sm:$0xff] %v7524_v2  ;;  %357 = vrot.lane.b32.xlu0 %v244_v3, %s7525_s25  ;;  %361 = vrot.lane.b32.xlu1 %v246_v4, %s7525_s25  ;;  %v253_v11 = vld [vmem:[%s11890_s0 + $0x79] sm:$0xff]  ;;  %v254_v12 = vld [vmem:[%s11890_s0 + $0x81] sm:$0xff]  ;;  %vm2884_vm8 = vcmask 294144   ;;  %vm3525_vm9 = vcmask 64512  }
   0x7   :  { %38 = vst [vmem:[#allocation2 + $0x60] sm:$0xff] %v7524_v2  ;;  %39 = vst [vmem:[#allocation2 + $0x68] sm:$0xff] %v7524_v2  ;;  %v130_v13 = vld [vmem:[%s11890_s0] sm:$0xff]  ;;  %v7738_v14 = vld [vmem:[%s11890_s0 + $0x18] sm:$0xff]  ;;  %vm3527_vm10 = vcmask 60416   ;;  %vm3817_vm11 = vcmask 126016  }
   0x8   :  { %40 = vst [vmem:[#allocation2 + $0x70] sm:$0xff] %v7524_v2  ;;  %41 = vst [vmem:[#allocation2 + $0x78] sm:$0xff] %v7524_v2  ;;  %v255_v15 = vld [vmem:[%s11890_s0 + $0x91] sm:$0xff]  ;;  %v256_v16 = vld [vmem:[%s11890_s0 + $0x99] sm:$0xff]  ;;  %vm3815_vm12 = vcmask 130112   ;;  %vm4107_vm13 = vcmask 191616  }
   0x9   :  { %42 = vst [vmem:[#allocation2 + $0x80] sm:$0xff] %v7524_v2  ;;  %43 = vst [vmem:[#allocation2 + $0x88] sm:$0xff] %v7524_v2  ;;  %v131_v17 = vld [vmem:[%s11890_s0 + $0x8] sm:$0xff]  ;;  %v7756_v18 = vld [vmem:[%s11890_s0 + $0x20] sm:$0xff]  ;;  %vm4105_vm14 = vcmask 195712   ;;  %vm4398_vm15 = vcmask 257216  }
   0xa   :  { %44 = vst [vmem:[#allocation2 + $0x90] sm:$0xff] %v7524_v2  ;;  %45 = vst [vmem:[#allocation2 + $0x98] sm:$0xff] %v7524_v2  ;;  %363 = vrot.lane.b32.xlu0 %v247_v5, %s7525_s25  ;;  %365 = vrot.lane.b32.xlu1 %v248_v6, %s7525_s25  ;;  %v7763_v19 = vld [vmem:[%s11890_s0 + $0x30] sm:$0xff]  ;;  %v7768_v20 = vld [vmem:[%s11890_s0 + $0x38] sm:$0xff]  ;;  %s7538_s20 = smov 112  }
   0xb   :  { %46 = vst [vmem:[#allocation2 + $0xa0] sm:$0xff] %v7524_v2  ;;  %47 = vst [vmem:[#allocation2 + $0xa8] sm:$0xff] %v7524_v2  ;;  %v7779_v21 = vld [vmem:[%s11890_s0 + $0x48] sm:$0xff]  ;;  %v258_v23 = vld [vmem:[%s11890_s0 + $0xb1] sm:$0xff] }
   0xc   :  { %48 = vst [vmem:[#allocation2 + $0xb0] sm:$0xff] %v7524_v2  ;;  %49 = vst [vmem:[#allocation2 + $0xb8] sm:$0xff] %v7524_v2  ;;  %v257_v22 = vld [vmem:[%s11890_s0 + $0xa9] sm:$0xff]  ;;  %v7799_v25 = vld [vmem:[%s11890_s0 + $0x60] sm:$0xff] }
   0xd   :  { %50 = vst [vmem:[#allocation2 + $0xc0] sm:$0xff] %v7524_v2  ;;  %51 = vst [vmem:[#allocation2 + $0xc8] sm:$0xff] %v7524_v2  ;;  %v7792_v24 = vld [vmem:[%s11890_s0 + $0x50] sm:$0xff]  ;;  %v7804_v26 = vld [vmem:[%s11890_s0 + $0x68] sm:$0xff] }
   0xe   :  { %52 = vst [vmem:[#allocation2 + $0xd0] sm:$0xff] %v7524_v2  ;;  %53 = vst [vmem:[#allocation2 + $0xd8] sm:$0xff] %v7524_v2  ;;  %367 = vrot.lane.b32.xlu0 %v249_v7, %s7525_s25  ;;  %369 = vrot.lane.b32.xlu1 %v250_v8, %s7525_s25  ;;  %v7813_v27 = vld [vmem:[%s11890_s0 + $0x78] sm:$0xff]  ;;  %v7818_v28 = vld [vmem:[%s11890_s0 + $0x80] sm:$0xff] }
   0xf   :  { %54 = vst [vmem:[#allocation2 + $0xe0] sm:$0xff] %v7524_v2  ;;  %55 = vst [vmem:[#allocation2 + $0xe8] sm:$0xff] %v7524_v2  ;;  %v259_v29 = vld [vmem:[%s11890_s0 + $0xc1] sm:$0xff]  ;;  %v260_v30 = vld [vmem:[%s11890_s0 + $0xc9] sm:$0xff] }
  0x10   :  { %56 = vst [vmem:[#allocation2 + $0xf0] sm:$0xff] %v7524_v2  ;;  %57 = vst [vmem:[#allocation2 + $0xf8] sm:$0xff] %v7524_v2  ;;  %v7835_v31 = vld [vmem:[%s11890_s0 + $0x90] sm:$0xff]  ;;  %v7840_v32 = vld [vmem:[%s11890_s0 + $0x98] sm:$0xff] }
  0x11   :  { %58 = vst [vmem:[#allocation2 + $0x100] sm:$0xff] %v7524_v2  ;;  %59 = vst [vmem:[#allocation2 + $0x108] sm:$0xff] %v7524_v2  ;;  %v7849_v33 = vld [vmem:[%s11890_s0 + $0xa8] sm:$0xff]  ;;  %v7854_v34 = vld [vmem:[%s11890_s0 + $0xb0] sm:$0xff] }
  0x12   :  { %60 = vst [vmem:[#allocation2 + $0x110] sm:$0xff] %v7524_v2  ;;  %61 = vst [vmem:[#allocation2 + $0x118] sm:$0xff] %v7524_v2  ;;  %371 = vrot.lane.b32.xlu0 %v251_v9, %s7525_s25  ;;  %373 = vrot.lane.b32.xlu1 %v252_v10, %s7525_s25  ;;  %v7863_v35 = vld [vmem:[%s11890_s0 + $0xc0] sm:$0xff]  ;;  %v7875_v37 = vld [vmem:[%s11890_s0 + $0xc8] sm:$0xff] }
  0x13   :  { %62 = vst [vmem:[#allocation2 + $0x120] sm:$0xff] %v7524_v2  ;;  %63 = vst [vmem:[#allocation2 + $0x128] sm:$0xff] %v7524_v2  ;;  %v261_v36 = vld [vmem:[%s11890_s0 + $0xd9] sm:$0xff]  ;;  %v262_v38 = vld [vmem:[%s11890_s0 + $0xe1] sm:$0xff] }
  0x14   :  { %64 = vst [vmem:[#allocation2 + $0x130] sm:$0xff] %v7524_v2  ;;  %65 = vst [vmem:[#allocation2 + $0x138] sm:$0xff] %v7524_v2  ;;  %v7885_v39 = vld [vmem:[%s11890_s0 + $0xd8] sm:$0xff]  ;;  %v7890_v40 = vld [vmem:[%s11890_s0 + $0xe0] sm:$0xff] }
  0x15   :  { %66 = vst [vmem:[#allocation2 + $0x140] sm:$0xff] %v7524_v2  ;;  %67 = vst [vmem:[#allocation2 + $0x148] sm:$0xff] %v7524_v2  ;;  %v7899_v41 = vld [vmem:[%s11890_s0 + $0xf0] sm:$0xff]  ;;  %v7906_v42 = vld [vmem:[%s11890_s0 + $0xf8] sm:$0xff] }
  0x16   :  { %68 = vst [vmem:[#allocation2 + $0x150] sm:$0xff] %v7524_v2  ;;  %69 = vst [vmem:[#allocation2 + $0x158] sm:$0xff] %v7524_v2  ;;  %375 = vrot.lane.b32.xlu0 %v253_v11, %s7525_s25  ;;  %377 = vrot.lane.b32.xlu1 %v254_v12, %s7525_s25  ;;  %v7915_v43 = vld [vmem:[%s11890_s0 + $0x108] sm:$0xff]  ;;  %v7920_v44 = vld [vmem:[%s11890_s0 + $0x110] sm:$0xff] }
  0x17   :  { %70 = vst [vmem:[#allocation2 + $0x160] sm:$0xff] %v7524_v2  ;;  %71 = vst [vmem:[#allocation2 + $0x168] sm:$0xff] %v7524_v2  ;;  %v263_v45 = vld [vmem:[%s11890_s0 + $0xf1] sm:$0xff]  ;;  %v264_v46 = vld [vmem:[%s11890_s0 + $0xf9] sm:$0xff] }
  0x18   :  { %72 = vst [vmem:[#allocation2 + $0x170] sm:$0xff] %v7524_v2  ;;  %73 = vst [vmem:[#allocation2 + $0x178] sm:$0xff] %v7524_v2  ;;  %v7935_v47 = vld [vmem:[%s11890_s0 + $0x120] sm:$0xff]  ;;  %v7942_v48 = vld [vmem:[%s11890_s0 + $0x128] sm:$0xff] }
  0x19   :  { %74 = vst [vmem:[#allocation2 + $0x180] sm:$0xff] %v7524_v2  ;;  %75 = vst [vmem:[#allocation2 + $0x188] sm:$0xff] %v7524_v2  ;;  %v7949_v49 = vld [vmem:[%s11890_s0 + $0x138] sm:$0xff]  ;;  %v7954_v50 = vld [vmem:[%s11890_s0 + $0x140] sm:$0xff] }
  0x1a   :  { %76 = vst [vmem:[#allocation2 + $0x190] sm:$0xff] %v7524_v2  ;;  %77 = vst [vmem:[#allocation2 + $0x198] sm:$0xff] %v7524_v2  ;;  %379 = vrot.lane.b32.xlu0 %v255_v15, %s7525_s25  ;;  %381 = vrot.lane.b32.xlu1 %v256_v16, %s7525_s25  ;;  %v265_v51 = vld [vmem:[%s11890_s0 + $0x109] sm:$0xff]  ;;  %v266_v52 = vld [vmem:[%s11890_s0 + $0x111] sm:$0xff] }
  0x1b   :  { %78 = vst [vmem:[#allocation2 + $0x1a0] sm:$0xff] %v7524_v2  ;;  %79 = vst [vmem:[#allocation2 + $0x1a8] sm:$0xff] %v7524_v2  ;;  %v158_v53 = vld [vmem:[%s11890_s0 + $0x180] sm:$0xff]  ;;  %v159_v54 = vld [vmem:[%s11890_s0 + $0x188] sm:$0xff] }
  0x1c   :  { %80 = vst [vmem:[#allocation2 + $0x1b0] sm:$0xff] %v7524_v2  ;;  %81 = vst [vmem:[#allocation2 + $0x1b8] sm:$0xff] %v7524_v2  ;;  %v267_v55 = vld [vmem:[%s11890_s0 + $0x121] sm:$0xff]  ;;  %v268_v56 = vld [vmem:[%s11890_s0 + $0x129] sm:$0xff] }
  0x1d   :  { %82 = vst [vmem:[#allocation4] sm:$0xff] %v7524_v2  ;;  %83 = vst [vmem:[#allocation4 + $0x8] sm:$0xf] %v7524_v2  ;;  %v7987_v57 = vld [vmem:[%s11890_s0 + $0x198] sm:$0xff]  ;;  %v7994_v58 = vld [vmem:[%s11890_s0 + $0x1a0] sm:$0xff] }
  0x1e   :  { %84 = vst [vmem:[#allocation4 + $0x10] sm:$0xff] %v7524_v2  ;;  %85 = vst [vmem:[#allocation4 + $0x18] sm:$0xf] %v7524_v2  ;;  %383 = vrot.lane.b32.xlu0 %v257_v22, %s7525_s25  ;;  %385 = vrot.lane.b32.xlu1 %v258_v23, %s7525_s25  ;;  %v269_v59 = vld [vmem:[%s11890_s0 + $0x139] sm:$0xff]  ;;  %v270_v60 = vld [vmem:[%s11890_s0 + $0x141] sm:$0xff] }
  0x1f   :  { %86 = vst [vmem:[#allocation4 + $0x20] sm:$0xff] %v7524_v2  ;;  %87 = vst [vmem:[#allocation4 + $0x28] sm:$0xf] %v7524_v2  ;;  %v8009_v61 = vld [vmem:[%s11890_s0 + $0x1b0] sm:$0xff]  ;;  %v8016_v62 = vld [vmem:[%s11890_s0 + $0x1b8] sm:$0xff] }
  0x20   :  { %88 = vst [vmem:[#allocation4 + $0x30] sm:$0xff] %v7524_v2  ;;  %89 = vst [vmem:[#allocation4 + $0x38] sm:$0xf] %v7524_v2  ;;  %v271_v63 = vld [vmem:[%s11890_s0 + $0x181] sm:$0xff]  ;;  %v272_v0 = vld [vmem:[%s11890_s0 + $0x189] sm:$0xff] }
  0x21   :  { %90 = vst [vmem:[#allocation4 + $0x40] sm:$0xff] %v7524_v2  ;;  %91 = vst [vmem:[#allocation4 + $0x48] sm:$0xf] %v7524_v2  ;;  %v8031_v1 = vld [vmem:[%s11890_s0 + $0x1c8] sm:$0xff]  ;;  %v273_v3 = vld [vmem:[%s11890_s0 + $0x199] sm:$0xff] }
  0x22   :  { %92 = vst [vmem:[#allocation4 + $0x50] sm:$0xff] %v7524_v2  ;;  %93 = vst [vmem:[#allocation4 + $0x58] sm:$0xf] %v7524_v2  ;;  %387 = vrot.lane.b32.xlu0 %v259_v29, %s7525_s25  ;;  %389 = vrot.lane.b32.xlu1 %v260_v30, %s7525_s25  ;;  %v274_v4 = vld [vmem:[%s11890_s0 + $0x1a1] sm:$0xff]  ;;  %v275_v7 = vld [vmem:[%s11890_s0 + $0x1b1] sm:$0xff] }
  0x23   :  { %94 = vst [vmem:[#allocation4 + $0x60] sm:$0xff] %v7524_v2  ;;  %95 = vst [vmem:[#allocation4 + $0x68] sm:$0xf] %v7524_v2  ;;  %v8053_v5 = vld [vmem:[%s11890_s0 + $0x1e0] sm:$0xff]  ;;  %v8060_v6 = vld [vmem:[%s11890_s0 + $0x1e8] sm:$0xff] }
  0x24   :  { %96 = vst [vmem:[#allocation4 + $0x70] sm:$0xff] %v7524_v2  ;;  %97 = vst [vmem:[#allocation4 + $0x78] sm:$0xf] %v7524_v2  ;;  %v276_v8 = vld [vmem:[%s11890_s0 + $0x1b9] sm:$0xff]  ;;  %v277_v11 = vld [vmem:[%s11890_s0 + $0x1c9] sm:$0xff] }
  0x25   :  { %98 = vst [vmem:[#allocation4 + $0x80] sm:$0xff] %v7524_v2  ;;  %99 = vst [vmem:[#allocation4 + $0x88] sm:$0xf] %v7524_v2  ;;  %v8075_v9 = vld [vmem:[%s11890_s0 + $0x1f8] sm:$0xff]  ;;  %v8082_v10 = vld [vmem:[%s11890_s0 + $0x200] sm:$0xff] }
  0x26   :  { %100 = vst [vmem:[#allocation4 + $0x90] sm:$0xff] %v7524_v2  ;;  %101 = vst [vmem:[#allocation4 + $0x98] sm:$0xf] %v7524_v2  ;;  %391 = vrot.lane.b32.xlu0 %v261_v36, %s7525_s25  ;;  %393 = vrot.lane.b32.xlu1 %v262_v38, %s7525_s25  ;;  %v278_v12 = vld [vmem:[%s11890_s0 + $0x1d1] sm:$0xff]  ;;  %v279_v16 = vld [vmem:[%s11890_s0 + $0x1e1] sm:$0xff] }
  0x27   :  { %102 = vst [vmem:[#allocation4 + $0xa0] sm:$0xff] %v7524_v2  ;;  %103 = vst [vmem:[#allocation4 + $0xa8] sm:$0xf] %v7524_v2  ;;  %v8104_v15 = vld [vmem:[%s11890_s0 + $0x218] sm:$0xff]  ;;  %v8119_v22 = vld [vmem:[%s11890_s0 + $0x228] sm:$0xff] }
  0x28   :  { %104 = vst [vmem:[#allocation4 + $0xb0] sm:$0xff] %v7524_v2  ;;  %105 = vst [vmem:[#allocation4 + $0xb8] sm:$0xf] %v7524_v2  ;;  %v8126_v23 = vld [vmem:[%s11890_s0 + $0x230] sm:$0xff]  ;;  %v281_v29 = vld [vmem:[%s11890_s0 + $0x1f9] sm:$0xff] }
  0x29   :  { %106 = vst [vmem:[#allocation4 + $0xc0] sm:$0xff] %v7524_v2  ;;  %107 = vst [vmem:[#allocation4 + $0xc8] sm:$0xf] %v7524_v2  ;;  %v282_v30 = vld [vmem:[%s11890_s0 + $0x201] sm:$0xff] }
  0x2a   :  { %108 = vst [vmem:[#allocation4 + $0xd0] sm:$0xff] %v7524_v2  ;;  %109 = vst [vmem:[#allocation4 + $0xd8] sm:$0xf] %v7524_v2  ;;  %395 = vrot.lane.b32.xlu0 %v263_v45, %s7525_s25  ;;  %397 = vrot.lane.b32.xlu1 %v264_v46, %s7525_s25  ;;  %v8141_v36 = vld [vmem:[%s11890_s0 + $0x240] sm:$0xff]  ;;  %v8148_v38 = vld [vmem:[%s11890_s0 + $0x248] sm:$0xff] }
  0x2b   :  { %110 = vst [vmem:[#allocation4 + $0xe0] sm:$0xff] %v7524_v2  ;;  %111 = vst [vmem:[#allocation4 + $0xe8] sm:$0xf] %v7524_v2  ;;  %v283_v45 = vld [vmem:[%s11890_s0 + $0x211] sm:$0xff]  ;;  %v284_v46 = vld [vmem:[%s11890_s0 + $0x219] sm:$0xff] }
  0x2c   :  { %112 = vst [vmem:[#allocation4 + $0xf0] sm:$0xff] %v7524_v2  ;;  %113 = vst [vmem:[#allocation4 + $0xf8] sm:$0xf] %v7524_v2 }
  0x2d   :  { %114 = vst [vmem:[#allocation4 + $0x100] sm:$0xff] %v7524_v2  ;;  %115 = vst [vmem:[#allocation4 + $0x108] sm:$0xf] %v7524_v2 }
  0x2e   :  { %116 = vst [vmem:[#allocation4 + $0x110] sm:$0xff] %v7524_v2  ;;  %117 = vst [vmem:[#allocation4 + $0x118] sm:$0xf] %v7524_v2  ;;  %399 = vrot.lane.b32.xlu0 %v265_v51, %s7525_s25  ;;  %401 = vrot.lane.b32.xlu1 %v266_v52, %s7525_s25  ;;  %v8163_v51 = vld [vmem:[%s11890_s0 + $0x258] sm:$0xff]  ;;  %v8170_v52 = vld [vmem:[%s11890_s0 + $0x260] sm:$0xff] }
  0x2f   :  { %118 = vst [vmem:[#allocation4 + $0x120] sm:$0xff] %v7524_v2  ;;  %119 = vst [vmem:[#allocation4 + $0x128] sm:$0xf] %v7524_v2 }
  0x30   :  { %120 = vst [vmem:[#allocation4 + $0x130] sm:$0xff] %v7524_v2  ;;  %121 = vst [vmem:[#allocation4 + $0x138] sm:$0xf] %v7524_v2 }
  0x31   :  { %122 = vst [vmem:[#allocation4 + $0x140] sm:$0xff] %v7524_v2  ;;  %123 = vst [vmem:[#allocation4 + $0x148] sm:$0xf] %v7524_v2 }
  0x32   :  { %124 = vst [vmem:[#allocation4 + $0x150] sm:$0xff] %v7524_v2  ;;  %125 = vst [vmem:[#allocation4 + $0x158] sm:$0xf] %v7524_v2  ;;  %403 = vrot.lane.b32.xlu0 %v267_v55, %s7525_s25  ;;  %405 = vrot.lane.b32.xlu1 %v268_v56, %s7525_s25  ;;  %v8185_v55 = vld [vmem:[%s11890_s0 + $0x270] sm:$0xff]  ;;  %v8192_v56 = vld [vmem:[%s11890_s0 + $0x278] sm:$0xff] }
  0x33   :  { %126 = vst [vmem:[#allocation4 + $0x160] sm:$0xff] %v7524_v2  ;;  %127 = vst [vmem:[#allocation4 + $0x168] sm:$0xf] %v7524_v2 }
  0x34   :  { %128 = vst [vmem:[#allocation4 + $0x170] sm:$0xff] %v7524_v2  ;;  %129 = vst [vmem:[#allocation4 + $0x178] sm:$0xf] %v7524_v2  ;;  %v8038_v2 = vld [vmem:[%s11890_s0 + $0x1d0] sm:$0xff] }
  0x35   :  { %187 = vst.msk [vmem:[#allocation2] sm:$0xff] %vm186_vm0, %v130_v13  ;;  %189 = vst.msk [vmem:[#allocation2 + $0x10] sm:$0xff] %vm186_vm0, %v7738_v14  ;;  %v8097_v13 = vld [vmem:[%s11890_s0 + $0x210] sm:$0xff] }
  0x36   :  { %188 = vst.msk [vmem:[#allocation2 + $0x8] sm:$0xff] %vm186_vm0, %v131_v17  ;;  %190 = vst.msk [vmem:[#allocation2 + $0x18] sm:$0xff] %vm186_vm0, %v7756_v18  ;;  %407 = vrot.lane.b32.xlu0 %v269_v59, %s7525_s25  ;;  %409 = vrot.lane.b32.xlu1 %v270_v60, %s7525_s25  ;;  %v280_v17 = vld [vmem:[%s11890_s0 + $0x1e9] sm:$0xff]  ;;  %v287_v59 = vld [vmem:[%s11890_s0 + $0x241] sm:$0xff] }
  0x37   :  { %191 = vst.msk [vmem:[#allocation2 + $0x20] sm:$0xff] %vm186_vm0, %v7763_v19  ;;  %192 = vst.msk [vmem:[#allocation2 + $0x28] sm:$0xff] %vm186_vm0, %v7768_v20  ;;  %v288_v60 = vld [vmem:[%s11890_s0 + $0x249] sm:$0xff] }
  0x38   :  { %193 = vst.msk [vmem:[#allocation2 + $0x30] sm:$0xff] %vm186_vm0, %v7779_v21  ;;  %194 = vst.msk [vmem:[#allocation2 + $0x38] sm:$0xff] %vm186_vm0, %v7792_v24 }
  0x39   :  { %195 = vst.msk [vmem:[#allocation2 + $0x40] sm:$0xff] %vm186_vm0, %v7799_v25  ;;  %196 = vst.msk [vmem:[#allocation2 + $0x48] sm:$0xff] %vm186_vm0, %v7804_v26 }
  0x3a   :  { %197 = vst.msk [vmem:[#allocation2 + $0x50] sm:$0xff] %vm186_vm0, %v7813_v27  ;;  %198 = vst.msk [vmem:[#allocation2 + $0x58] sm:$0xff] %vm186_vm0, %v7818_v28  ;;  %411 = vrot.lane.b32.xlu0 %v271_v63, %s7525_s25  ;;  %413 = vrot.lane.b32.xlu1 %v272_v0, %s7525_s25  ;;  %v8207_v63 = vld [vmem:[%s11890_s0 + $0x288] sm:$0xff]  ;;  %v8214_v0 = vld [vmem:[%s11890_s0 + $0x290] sm:$0xff] }
  0x3b   :  { %199 = vst.msk [vmem:[#allocation2 + $0x60] sm:$0xff] %vm186_vm0, %v7835_v31  ;;  %200 = vst.msk [vmem:[#allocation2 + $0x68] sm:$0xff] %vm186_vm0, %v7840_v32 }
  0x3c   :  { %201 = vst.msk [vmem:[#allocation2 + $0x70] sm:$0xff] %vm186_vm0, %v7849_v33  ;;  %202 = vst.msk [vmem:[#allocation2 + $0x78] sm:$0xff] %vm186_vm0, %v7854_v34 }
  0x3d   :  { %203 = vst.msk [vmem:[#allocation2 + $0x80] sm:$0xff] %vm186_vm0, %v7863_v35  ;;  %204 = vst.msk [vmem:[#allocation2 + $0x88] sm:$0xff] %vm186_vm0, %v7875_v37 }
  0x3e   :  { %205 = vst.msk [vmem:[#allocation2 + $0x90] sm:$0xff] %vm186_vm0, %v7885_v39  ;;  %206 = vst.msk [vmem:[#allocation2 + $0x98] sm:$0xff] %vm186_vm0, %v7890_v40  ;;  %415 = vrot.lane.b32.xlu0 %v273_v3, %s7525_s25  ;;  %417 = vrot.lane.b32.xlu1 %v274_v4, %s7525_s25  ;;  %v289_v3 = vld [vmem:[%s11890_s0 + $0x259] sm:$0xff]  ;;  %v290_v4 = vld [vmem:[%s11890_s0 + $0x261] sm:$0xff] }
  0x3f   :  { %207 = vst.msk [vmem:[#allocation2 + $0xa0] sm:$0xff] %vm186_vm0, %v7899_v41  ;;  %208 = vst.msk [vmem:[#allocation2 + $0xa8] sm:$0xff] %vm186_vm0, %v7906_v42 }
  0x40   :  { %209 = vst.msk [vmem:[#allocation2 + $0xb0] sm:$0xff] %vm186_vm0, %v7915_v43  ;;  %210 = vst.msk [vmem:[#allocation2 + $0xb8] sm:$0xff] %vm186_vm0, %v7920_v44 }
  0x41   :  { %211 = vst.msk [vmem:[#allocation2 + $0xc0] sm:$0xff] %vm186_vm0, %v7935_v47  ;;  %212 = vst.msk [vmem:[#allocation2 + $0xc8] sm:$0xff] %vm186_vm0, %v7942_v48 }
  0x42   :  { %213 = vst.msk [vmem:[#allocation2 + $0xd0] sm:$0xff] %vm186_vm0, %v7949_v49  ;;  %214 = vst.msk [vmem:[#allocation2 + $0xd8] sm:$0xff] %vm186_vm0, %v7954_v50  ;;  %419 = vrot.lane.b32.xlu0 %v275_v7, %s7525_s25  ;;  %421 = vrot.lane.b32.xlu1 %v276_v8, %s7525_s25  ;;  %v8229_v7 = vld [vmem:[%s11890_s0 + $0x2a0] sm:$0xff]  ;;  %v8236_v8 = vld [vmem:[%s11890_s0 + $0x2a8] sm:$0xff] }
  0x43   :  { %215 = vst.msk [vmem:[#allocation2 + $0xe0] sm:$0xff] %vm186_vm0, %v158_v53  ;;  %216 = vst.msk [vmem:[#allocation2 + $0xe8] sm:$0xff] %vm186_vm0, %v159_v54  ;;  %v285_v53 = vld [vmem:[%s11890_s0 + $0x229] sm:$0xff]  ;;  %v286_v54 = vld [vmem:[%s11890_s0 + $0x231] sm:$0xff] }
  0x44   :  { %217 = vst.msk [vmem:[#allocation2 + $0xf0] sm:$0xff] %vm186_vm0, %v7987_v57  ;;  %218 = vst.msk [vmem:[#allocation2 + $0xf8] sm:$0xff] %vm186_vm0, %v7994_v58 }
  0x45   :  { %219 = vst.msk [vmem:[#allocation2 + $0x100] sm:$0xff] %vm186_vm0, %v8009_v61  ;;  %220 = vst.msk [vmem:[#allocation2 + $0x108] sm:$0xff] %vm186_vm0, %v8016_v62 }
  0x46   :  { %221 = vst.msk [vmem:[#allocation2 + $0x110] sm:$0xff] %vm186_vm0, %v8031_v1  ;;  %222 = vst.msk [vmem:[#allocation2 + $0x118] sm:$0xff] %vm186_vm0, %v8038_v2  ;;  %423 = vrot.lane.b32.xlu0 %v277_v11, %s7525_s25  ;;  %425 = vrot.lane.b32.xlu1 %v278_v12, %s7525_s25  ;;  %v291_v11 = vld [vmem:[%s11890_s0 + $0x271] sm:$0xff]  ;;  %v292_v12 = vld [vmem:[%s11890_s0 + $0x279] sm:$0xff] }
  0x47   :  { %223 = vst.msk [vmem:[#allocation2 + $0x120] sm:$0xff] %vm186_vm0, %v8053_v5  ;;  %224 = vst.msk [vmem:[#allocation2 + $0x128] sm:$0xff] %vm186_vm0, %v8060_v6 }
  0x48   :  { %225 = vst.msk [vmem:[#allocation2 + $0x130] sm:$0xff] %vm186_vm0, %v8075_v9  ;;  %226 = vst.msk [vmem:[#allocation2 + $0x138] sm:$0xff] %vm186_vm0, %v8082_v10 }
  0x49   :  { %227 = vst.msk [vmem:[#allocation2 + $0x140] sm:$0xff] %vm186_vm0, %v8097_v13  ;;  %228 = vst.msk [vmem:[#allocation2 + $0x148] sm:$0xff] %vm186_vm0, %v8104_v15 }
  0x4a   :  { %229 = vst.msk [vmem:[#allocation2 + $0x150] sm:$0xff] %vm186_vm0, %v8119_v22  ;;  %230 = vst.msk [vmem:[#allocation2 + $0x158] sm:$0xff] %vm186_vm0, %v8126_v23  ;;  %427 = vrot.lane.b32.xlu0 %v279_v16, %s7525_s25  ;;  %429 = vrot.lane.b32.xlu1 %v280_v17, %s7525_s25  ;;  %v8251_v16 = vld [vmem:[%s11890_s0 + $0x2b8] sm:$0xff]  ;;  %v8258_v17 = vld [vmem:[%s11890_s0 + $0x2c0] sm:$0xff] }
  0x4b   :  { %231 = vst.msk [vmem:[#allocation2 + $0x160] sm:$0xff] %vm186_vm0, %v8141_v36  ;;  %232 = vst.msk [vmem:[#allocation2 + $0x168] sm:$0xff] %vm186_vm0, %v8148_v38 }
  0x4c   :  { %233 = vst.msk [vmem:[#allocation2 + $0x170] sm:$0xff] %vm186_vm0, %v8163_v51  ;;  %234 = vst.msk [vmem:[#allocation2 + $0x178] sm:$0xff] %vm186_vm0, %v8170_v52 }
  0x4d   :  { %235 = vst.msk [vmem:[#allocation2 + $0x180] sm:$0xff] %vm186_vm0, %v8185_v55  ;;  %236 = vst.msk [vmem:[#allocation2 + $0x188] sm:$0xff] %vm186_vm0, %v8192_v56 }
  0x4e   :  { %431 = vrot.lane.b32.xlu0 %v281_v29, %s7525_s25  ;;  %433 = vrot.lane.b32.xlu1 %v282_v30, %s7525_s25  ;;  %237 = vst.msk [vmem:[#allocation2 + $0x190] sm:$0xff] %vm186_vm0, %v8207_v63  ;;  %238 = vst.msk [vmem:[#allocation2 + $0x198] sm:$0xff] %vm186_vm0, %v8214_v0  ;;  %v293_v29 = vld [vmem:[%s11890_s0 + $0x289] sm:$0xff]  ;;  %v294_v30 = vld [vmem:[%s11890_s0 + $0x291] sm:$0xff] }
  0x4f   :  { %239 = vst.msk [vmem:[#allocation2 + $0x1a0] sm:$0xff] %vm186_vm0, %v8229_v7  ;;  %240 = vst.msk [vmem:[#allocation2 + $0x1a8] sm:$0xff] %vm186_vm0, %v8236_v8 }
  0x50   :  { %241 = vst.msk [vmem:[#allocation2 + $0x1b0] sm:$0xff] %vm186_vm0, %v8251_v16  ;;  %242 = vst.msk [vmem:[#allocation2 + $0x1b8] sm:$0xff] %vm186_vm0, %v8258_v17  ;;  %vm4396_vm0 = vcmask 261312  }
  0x52   :  { %435 = vrot.lane.b32.xlu0 %v283_v45, %s7525_s25  ;;  %437 = vrot.lane.b32.xlu1 %v284_v46, %s7525_s25  ;;  %v295_v45 = vld [vmem:[%s11890_s0 + $0x2a1] sm:$0xff]  ;;  %v296_v46 = vld [vmem:[%s11890_s0 + $0x2a9] sm:$0xff] }
  0x56   :  { %439 = vrot.lane.b32.xlu0 %v285_v53, %s7525_s25  ;;  %441 = vrot.lane.b32.xlu1 %v286_v54, %s7525_s25  ;;  %v297_v53 = vld [vmem:[%s11890_s0 + $0x2b9] sm:$0xff]  ;;  %v298_v54 = vld [vmem:[%s11890_s0 + $0x2c1] sm:$0xff] }
  0x5a   :  { %443 = vrot.lane.b32.xlu0 %v287_v59, %s7525_s25  ;;  %445 = vrot.lane.b32.xlu1 %v288_v60, %s7525_s25  ;;  %v580_v59 = vld [vmem:[%s11890_s0 + $0x2] sm:$0xff]  ;;  %v581_v60 = vld [vmem:[%s11890_s0 + $0xa] sm:$0xff] }
  0x5e   :  { %447 = vrot.lane.b32.xlu0 %v289_v3, %s7525_s25  ;;  %449 = vrot.lane.b32.xlu1 %v290_v4, %s7525_s25  ;;  %v582_v3 = vld [vmem:[%s11890_s0 + $0x1a] sm:$0xff]  ;;  %v583_v4 = vld [vmem:[%s11890_s0 + $0x22] sm:$0xff] }
  0x62   :  { %451 = vrot.lane.b32.xlu0 %v291_v11, %s7525_s25  ;;  %453 = vrot.lane.b32.xlu1 %v292_v12, %s7525_s25 }
  0x66   :  { %455 = vrot.lane.b32.xlu0 %v293_v29, %s7525_s25  ;;  %457 = vrot.lane.b32.xlu1 %v294_v30, %s7525_s25  ;;  %v584_v29 = vld [vmem:[%s11890_s0 + $0x32] sm:$0xff]  ;;  %v585_v30 = vld [vmem:[%s11890_s0 + $0x3a] sm:$0xff] }
  0x6a   :  { %459 = vrot.lane.b32.xlu0 %v295_v45, %s7525_s25  ;;  %461 = vrot.lane.b32.xlu1 %v296_v46, %s7525_s25 }
  0x6e   :  { %463 = vrot.lane.b32.xlu0 %v297_v53, %s7525_s25  ;;  %465 = vrot.lane.b32.xlu1 %v298_v54, %s7525_s25  ;;  %v586_v53 = vld [vmem:[%s11890_s0 + $0x4a] sm:$0xff]  ;;  %v587_v54 = vld [vmem:[%s11890_s0 + $0x52] sm:$0xff]  ;;  %s7532_s25 = smov 32  }
  0x72   :  { %692 = vrot.lane.b32.xlu0 %v580_v59, %s7526_s19  ;;  %694 = vrot.lane.b32.xlu1 %v581_v60, %s7526_s19 }
  0x74   :  { %v356_v11 = vpop.permute.xlu0 %355  ;;  %v360_v12 = vpop.permute.xlu1 %359 }
  0x75   :  { %524 = vst.msk [vmem:[#allocation2] sm:$0xff] %vm523_vm1, %v356_v11  ;;  %526 = vst.msk [vmem:[#allocation2 + $0x10] sm:$0xff] %vm523_vm1, %v360_v12 }
  0x76   :  { %696 = vrot.lane.b32.xlu0 %v582_v3, %s7526_s19  ;;  %698 = vrot.lane.b32.xlu1 %v583_v4, %s7526_s19  ;;  %v588_v3 = vld [vmem:[%s11890_s0 + $0x62] sm:$0xff]  ;;  %v589_v4 = vld [vmem:[%s11890_s0 + $0x6a] sm:$0xff] }
  0x78   :  { %v358_v45 = vpop.permute.xlu0 %357  ;;  %v362_v46 = vpop.permute.xlu1 %361 }
  0x79   :  { %525 = vst.msk [vmem:[#allocation2 + $0x8] sm:$0xff] %vm523_vm1, %v358_v45  ;;  %527 = vst.msk [vmem:[#allocation2 + $0x18] sm:$0xff] %vm523_vm1, %v362_v46 }
  0x7a   :  { %700 = vrot.lane.b32.xlu0 %v584_v29, %s7526_s19  ;;  %702 = vrot.lane.b32.xlu1 %v585_v30, %s7526_s19  ;;  %v590_v29 = vld [vmem:[%s11890_s0 + $0x7a] sm:$0xff]  ;;  %v591_v30 = vld [vmem:[%s11890_s0 + $0x82] sm:$0xff] }
  0x7c   :  { %v364_v59 = vpop.permute.xlu0 %363  ;;  %v366_v60 = vpop.permute.xlu1 %365 }
  0x7d   :  { %528 = vst.msk [vmem:[#allocation2 + $0x20] sm:$0xff] %vm523_vm1, %v364_v59  ;;  %529 = vst.msk [vmem:[#allocation2 + $0x28] sm:$0xff] %vm523_vm1, %v366_v60 }
  0x7e   :  { %704 = vrot.lane.b32.xlu0 %v586_v53, %s7526_s19  ;;  %706 = vrot.lane.b32.xlu1 %v587_v54, %s7526_s19  ;;  %v592_v53 = vld [vmem:[%s11890_s0 + $0x92] sm:$0xff]  ;;  %v593_v54 = vld [vmem:[%s11890_s0 + $0x9a] sm:$0xff] }
  0x80   :  { %v368_v11 = vpop.permute.xlu0 %367  ;;  %v370_v12 = vpop.permute.xlu1 %369 }
  0x81   :  { %530 = vst.msk [vmem:[#allocation2 + $0x30] sm:$0xff] %vm523_vm1, %v368_v11  ;;  %531 = vst.msk [vmem:[#allocation2 + $0x38] sm:$0xff] %vm523_vm1, %v370_v12 }
  0x82   :  { %708 = vrot.lane.b32.xlu0 %v588_v3, %s7526_s19  ;;  %710 = vrot.lane.b32.xlu1 %v589_v4, %s7526_s19  ;;  %v594_v3 = vld [vmem:[%s11890_s0 + $0xaa] sm:$0xff]  ;;  %v595_v4 = vld [vmem:[%s11890_s0 + $0xb2] sm:$0xff] }
  0x84   :  { %v372_v45 = vpop.permute.xlu0 %371  ;;  %v374_v46 = vpop.permute.xlu1 %373 }
  0x85   :  { %532 = vst.msk [vmem:[#allocation2 + $0x40] sm:$0xff] %vm523_vm1, %v372_v45  ;;  %533 = vst.msk [vmem:[#allocation2 + $0x48] sm:$0xff] %vm523_vm1, %v374_v46 }
  0x86   :  { %712 = vrot.lane.b32.xlu0 %v590_v29, %s7526_s19  ;;  %714 = vrot.lane.b32.xlu1 %v591_v30, %s7526_s19  ;;  %v596_v29 = vld [vmem:[%s11890_s0 + $0xc2] sm:$0xff]  ;;  %v597_v30 = vld [vmem:[%s11890_s0 + $0xca] sm:$0xff] }
  0x88   :  { %v376_v59 = vpop.permute.xlu0 %375  ;;  %v378_v60 = vpop.permute.xlu1 %377 }
  0x89   :  { %534 = vst.msk [vmem:[#allocation2 + $0x50] sm:$0xff] %vm523_vm1, %v376_v59  ;;  %535 = vst.msk [vmem:[#allocation2 + $0x58] sm:$0xff] %vm523_vm1, %v378_v60 }
  0x8a   :  { %716 = vrot.lane.b32.xlu0 %v592_v53, %s7526_s19  ;;  %718 = vrot.lane.b32.xlu1 %v593_v54, %s7526_s19  ;;  %v598_v53 = vld [vmem:[%s11890_s0 + $0xda] sm:$0xff]  ;;  %v599_v54 = vld [vmem:[%s11890_s0 + $0xe2] sm:$0xff] }
  0x8c   :  { %v380_v11 = vpop.permute.xlu0 %379  ;;  %v382_v12 = vpop.permute.xlu1 %381 }
  0x8d   :  { %536 = vst.msk [vmem:[#allocation2 + $0x60] sm:$0xff] %vm523_vm1, %v380_v11  ;;  %537 = vst.msk [vmem:[#allocation2 + $0x68] sm:$0xff] %vm523_vm1, %v382_v12 }
  0x8e   :  { %720 = vrot.lane.b32.xlu0 %v594_v3, %s7526_s19  ;;  %722 = vrot.lane.b32.xlu1 %v595_v4, %s7526_s19  ;;  %v600_v3 = vld [vmem:[%s11890_s0 + $0xf2] sm:$0xff]  ;;  %v601_v4 = vld [vmem:[%s11890_s0 + $0xfa] sm:$0xff] }
  0x90   :  { %v384_v45 = vpop.permute.xlu0 %383  ;;  %v386_v46 = vpop.permute.xlu1 %385 }
  0x91   :  { %538 = vst.msk [vmem:[#allocation2 + $0x70] sm:$0xff] %vm523_vm1, %v384_v45  ;;  %539 = vst.msk [vmem:[#allocation2 + $0x78] sm:$0xff] %vm523_vm1, %v386_v46 }
  0x92   :  { %724 = vrot.lane.b32.xlu0 %v596_v29, %s7526_s19  ;;  %726 = vrot.lane.b32.xlu1 %v597_v30, %s7526_s19  ;;  %v602_v29 = vld [vmem:[%s11890_s0 + $0x10a] sm:$0xff]  ;;  %v603_v30 = vld [vmem:[%s11890_s0 + $0x112] sm:$0xff] }
  0x94   :  { %v388_v59 = vpop.permute.xlu0 %387  ;;  %v390_v60 = vpop.permute.xlu1 %389 }
  0x95   :  { %540 = vst.msk [vmem:[#allocation2 + $0x80] sm:$0xff] %vm523_vm1, %v388_v59  ;;  %541 = vst.msk [vmem:[#allocation2 + $0x88] sm:$0xff] %vm523_vm1, %v390_v60 }
  0x96   :  { %728 = vrot.lane.b32.xlu0 %v598_v53, %s7526_s19  ;;  %730 = vrot.lane.b32.xlu1 %v599_v54, %s7526_s19  ;;  %v604_v53 = vld [vmem:[%s11890_s0 + $0x122] sm:$0xff]  ;;  %v605_v54 = vld [vmem:[%s11890_s0 + $0x12a] sm:$0xff] }
  0x98   :  { %v392_v11 = vpop.permute.xlu0 %391  ;;  %v394_v12 = vpop.permute.xlu1 %393 }
  0x99   :  { %542 = vst.msk [vmem:[#allocation2 + $0x90] sm:$0xff] %vm523_vm1, %v392_v11  ;;  %543 = vst.msk [vmem:[#allocation2 + $0x98] sm:$0xff] %vm523_vm1, %v394_v12 }
  0x9a   :  { %732 = vrot.lane.b32.xlu0 %v600_v3, %s7526_s19  ;;  %734 = vrot.lane.b32.xlu1 %v601_v4, %s7526_s19  ;;  %v606_v3 = vld [vmem:[%s11890_s0 + $0x13a] sm:$0xff]  ;;  %v607_v4 = vld [vmem:[%s11890_s0 + $0x142] sm:$0xff] }
  0x9c   :  { %v396_v45 = vpop.permute.xlu0 %395  ;;  %v398_v46 = vpop.permute.xlu1 %397 }
  0x9d   :  { %544 = vst.msk [vmem:[#allocation2 + $0xa0] sm:$0xff] %vm523_vm1, %v396_v45  ;;  %545 = vst.msk [vmem:[#allocation2 + $0xa8] sm:$0xff] %vm523_vm1, %v398_v46 }
  0x9e   :  { %736 = vrot.lane.b32.xlu0 %v602_v29, %s7526_s19  ;;  %738 = vrot.lane.b32.xlu1 %v603_v30, %s7526_s19  ;;  %v608_v29 = vld [vmem:[%s11890_s0 + $0x182] sm:$0xff]  ;;  %v609_v30 = vld [vmem:[%s11890_s0 + $0x18a] sm:$0xff] }
  0xa0   :  { %v400_v59 = vpop.permute.xlu0 %399  ;;  %v402_v60 = vpop.permute.xlu1 %401 }
  0xa1   :  { %546 = vst.msk [vmem:[#allocation2 + $0xb0] sm:$0xff] %vm523_vm1, %v400_v59  ;;  %547 = vst.msk [vmem:[#allocation2 + $0xb8] sm:$0xff] %vm523_vm1, %v402_v60 }
  0xa2   :  { %740 = vrot.lane.b32.xlu0 %v604_v53, %s7526_s19  ;;  %742 = vrot.lane.b32.xlu1 %v605_v54, %s7526_s19  ;;  %v610_v53 = vld [vmem:[%s11890_s0 + $0x19a] sm:$0xff]  ;;  %v611_v54 = vld [vmem:[%s11890_s0 + $0x1a2] sm:$0xff] }
  0xa4   :  { %v404_v11 = vpop.permute.xlu0 %403  ;;  %v406_v12 = vpop.permute.xlu1 %405 }
  0xa5   :  { %548 = vst.msk [vmem:[#allocation2 + $0xc0] sm:$0xff] %vm523_vm1, %v404_v11  ;;  %549 = vst.msk [vmem:[#allocation2 + $0xc8] sm:$0xff] %vm523_vm1, %v406_v12 }
  0xa6   :  { %744 = vrot.lane.b32.xlu0 %v606_v3, %s7526_s19  ;;  %746 = vrot.lane.b32.xlu1 %v607_v4, %s7526_s19  ;;  %v612_v3 = vld [vmem:[%s11890_s0 + $0x1b2] sm:$0xff]  ;;  %v613_v4 = vld [vmem:[%s11890_s0 + $0x1ba] sm:$0xff] }
  0xa8   :  { %v408_v45 = vpop.permute.xlu0 %407  ;;  %v410_v46 = vpop.permute.xlu1 %409 }
  0xa9   :  { %550 = vst.msk [vmem:[#allocation2 + $0xd0] sm:$0xff] %vm523_vm1, %v408_v45  ;;  %551 = vst.msk [vmem:[#allocation2 + $0xd8] sm:$0xff] %vm523_vm1, %v410_v46 }
  0xaa   :  { %748 = vrot.lane.b32.xlu0 %v608_v29, %s7526_s19  ;;  %750 = vrot.lane.b32.xlu1 %v609_v30, %s7526_s19  ;;  %v614_v29 = vld [vmem:[%s11890_s0 + $0x1ca] sm:$0xff]  ;;  %v615_v30 = vld [vmem:[%s11890_s0 + $0x1d2] sm:$0xff] }
  0xac   :  { %v412_v59 = vpop.permute.xlu0 %411  ;;  %v414_v60 = vpop.permute.xlu1 %413 }
  0xad   :  { %552 = vst.msk [vmem:[#allocation2 + $0xe0] sm:$0xff] %vm523_vm1, %v412_v59  ;;  %553 = vst.msk [vmem:[#allocation2 + $0xe8] sm:$0xff] %vm523_vm1, %v414_v60 }
  0xae   :  { %752 = vrot.lane.b32.xlu0 %v610_v53, %s7526_s19  ;;  %754 = vrot.lane.b32.xlu1 %v611_v54, %s7526_s19  ;;  %v616_v53 = vld [vmem:[%s11890_s0 + $0x1e2] sm:$0xff]  ;;  %v617_v54 = vld [vmem:[%s11890_s0 + $0x1ea] sm:$0xff] }
  0xb0   :  { %v416_v11 = vpop.permute.xlu0 %415  ;;  %v418_v12 = vpop.permute.xlu1 %417 }
  0xb1   :  { %554 = vst.msk [vmem:[#allocation2 + $0xf0] sm:$0xff] %vm523_vm1, %v416_v11  ;;  %555 = vst.msk [vmem:[#allocation2 + $0xf8] sm:$0xff] %vm523_vm1, %v418_v12 }
  0xb2   :  { %756 = vrot.lane.b32.xlu0 %v612_v3, %s7526_s19  ;;  %758 = vrot.lane.b32.xlu1 %v613_v4, %s7526_s19  ;;  %v618_v3 = vld [vmem:[%s11890_s0 + $0x1fa] sm:$0xff]  ;;  %v619_v4 = vld [vmem:[%s11890_s0 + $0x202] sm:$0xff] }
  0xb4   :  { %v420_v45 = vpop.permute.xlu0 %419  ;;  %v422_v46 = vpop.permute.xlu1 %421 }
  0xb5   :  { %556 = vst.msk [vmem:[#allocation2 + $0x100] sm:$0xff] %vm523_vm1, %v420_v45  ;;  %557 = vst.msk [vmem:[#allocation2 + $0x108] sm:$0xff] %vm523_vm1, %v422_v46 }
  0xb6   :  { %760 = vrot.lane.b32.xlu0 %v614_v29, %s7526_s19  ;;  %762 = vrot.lane.b32.xlu1 %v615_v30, %s7526_s19  ;;  %v620_v29 = vld [vmem:[%s11890_s0 + $0x212] sm:$0xff]  ;;  %v621_v30 = vld [vmem:[%s11890_s0 + $0x21a] sm:$0xff] }
  0xb8   :  { %v424_v59 = vpop.permute.xlu0 %423  ;;  %v426_v60 = vpop.permute.xlu1 %425 }
  0xb9   :  { %558 = vst.msk [vmem:[#allocation2 + $0x110] sm:$0xff] %vm523_vm1, %v424_v59  ;;  %559 = vst.msk [vmem:[#allocation2 + $0x118] sm:$0xff] %vm523_vm1, %v426_v60 }
  0xba   :  { %764 = vrot.lane.b32.xlu0 %v616_v53, %s7526_s19  ;;  %766 = vrot.lane.b32.xlu1 %v617_v54, %s7526_s19  ;;  %v622_v53 = vld [vmem:[%s11890_s0 + $0x22a] sm:$0xff]  ;;  %v623_v54 = vld [vmem:[%s11890_s0 + $0x232] sm:$0xff] }
  0xbc   :  { %v428_v11 = vpop.permute.xlu0 %427  ;;  %v430_v12 = vpop.permute.xlu1 %429 }
  0xbd   :  { %560 = vst.msk [vmem:[#allocation2 + $0x120] sm:$0xff] %vm523_vm1, %v428_v11  ;;  %561 = vst.msk [vmem:[#allocation2 + $0x128] sm:$0xff] %vm523_vm1, %v430_v12 }
  0xbe   :  { %768 = vrot.lane.b32.xlu0 %v618_v3, %s7526_s19  ;;  %770 = vrot.lane.b32.xlu1 %v619_v4, %s7526_s19  ;;  %v624_v3 = vld [vmem:[%s11890_s0 + $0x242] sm:$0xff]  ;;  %v625_v4 = vld [vmem:[%s11890_s0 + $0x24a] sm:$0xff] }
  0xc0   :  { %v432_v45 = vpop.permute.xlu0 %431  ;;  %v434_v46 = vpop.permute.xlu1 %433 }
  0xc1   :  { %562 = vst.msk [vmem:[#allocation2 + $0x130] sm:$0xff] %vm523_vm1, %v432_v45  ;;  %563 = vst.msk [vmem:[#allocation2 + $0x138] sm:$0xff] %vm523_vm1, %v434_v46 }
  0xc2   :  { %772 = vrot.lane.b32.xlu0 %v620_v29, %s7526_s19  ;;  %774 = vrot.lane.b32.xlu1 %v621_v30, %s7526_s19  ;;  %v626_v29 = vld [vmem:[%s11890_s0 + $0x25a] sm:$0xff]  ;;  %v627_v30 = vld [vmem:[%s11890_s0 + $0x262] sm:$0xff] }
  0xc4   :  { %v436_v59 = vpop.permute.xlu0 %435  ;;  %v438_v60 = vpop.permute.xlu1 %437 }
  0xc5   :  { %564 = vst.msk [vmem:[#allocation2 + $0x140] sm:$0xff] %vm523_vm1, %v436_v59  ;;  %565 = vst.msk [vmem:[#allocation2 + $0x148] sm:$0xff] %vm523_vm1, %v438_v60 }
  0xc6   :  { %776 = vrot.lane.b32.xlu0 %v622_v53, %s7526_s19  ;;  %778 = vrot.lane.b32.xlu1 %v623_v54, %s7526_s19  ;;  %v628_v53 = vld [vmem:[%s11890_s0 + $0x272] sm:$0xff]  ;;  %v629_v54 = vld [vmem:[%s11890_s0 + $0x27a] sm:$0xff] }
  0xc8   :  { %v440_v11 = vpop.permute.xlu0 %439  ;;  %v442_v12 = vpop.permute.xlu1 %441 }
  0xc9   :  { %566 = vst.msk [vmem:[#allocation2 + $0x150] sm:$0xff] %vm523_vm1, %v440_v11  ;;  %567 = vst.msk [vmem:[#allocation2 + $0x158] sm:$0xff] %vm523_vm1, %v442_v12 }
  0xca   :  { %780 = vrot.lane.b32.xlu0 %v624_v3, %s7526_s19  ;;  %782 = vrot.lane.b32.xlu1 %v625_v4, %s7526_s19  ;;  %v630_v3 = vld [vmem:[%s11890_s0 + $0x28a] sm:$0xff]  ;;  %v631_v4 = vld [vmem:[%s11890_s0 + $0x292] sm:$0xff] }
  0xcc   :  { %v444_v45 = vpop.permute.xlu0 %443  ;;  %v446_v46 = vpop.permute.xlu1 %445 }
  0xcd   :  { %568 = vst.msk [vmem:[#allocation2 + $0x160] sm:$0xff] %vm523_vm1, %v444_v45  ;;  %569 = vst.msk [vmem:[#allocation2 + $0x168] sm:$0xff] %vm523_vm1, %v446_v46 }
  0xce   :  { %784 = vrot.lane.b32.xlu0 %v626_v29, %s7526_s19  ;;  %786 = vrot.lane.b32.xlu1 %v627_v30, %s7526_s19  ;;  %v632_v29 = vld [vmem:[%s11890_s0 + $0x2a2] sm:$0xff]  ;;  %v633_v30 = vld [vmem:[%s11890_s0 + $0x2aa] sm:$0xff] }
  0xd0   :  { %v448_v59 = vpop.permute.xlu0 %447  ;;  %v450_v60 = vpop.permute.xlu1 %449 }
  0xd1   :  { %570 = vst.msk [vmem:[#allocation2 + $0x170] sm:$0xff] %vm523_vm1, %v448_v59  ;;  %571 = vst.msk [vmem:[#allocation2 + $0x178] sm:$0xff] %vm523_vm1, %v450_v60 }
  0xd2   :  { %788 = vrot.lane.b32.xlu0 %v628_v53, %s7526_s19  ;;  %790 = vrot.lane.b32.xlu1 %v629_v54, %s7526_s19  ;;  %v634_v53 = vld [vmem:[%s11890_s0 + $0x2ba] sm:$0xff]  ;;  %v635_v54 = vld [vmem:[%s11890_s0 + $0x2c2] sm:$0xff] }
  0xd4   :  { %v452_v11 = vpop.permute.xlu0 %451  ;;  %v454_v12 = vpop.permute.xlu1 %453 }
  0xd5   :  { %572 = vst.msk [vmem:[#allocation2 + $0x180] sm:$0xff] %vm523_vm1, %v452_v11  ;;  %573 = vst.msk [vmem:[#allocation2 + $0x188] sm:$0xff] %vm523_vm1, %v454_v12 }
  0xd6   :  { %792 = vrot.lane.b32.xlu0 %v630_v3, %s7526_s19  ;;  %794 = vrot.lane.b32.xlu1 %v631_v4, %s7526_s19 }
  0xd8   :  { %v456_v45 = vpop.permute.xlu0 %455  ;;  %v458_v46 = vpop.permute.xlu1 %457 }
  0xd9   :  { %574 = vst.msk [vmem:[#allocation2 + $0x190] sm:$0xff] %vm523_vm1, %v456_v45  ;;  %575 = vst.msk [vmem:[#allocation2 + $0x198] sm:$0xff] %vm523_vm1, %v458_v46 }
  0xda   :  { %796 = vrot.lane.b32.xlu0 %v632_v29, %s7526_s19  ;;  %798 = vrot.lane.b32.xlu1 %v633_v30, %s7526_s19 }
  0xdc   :  { %v460_v59 = vpop.permute.xlu0 %459  ;;  %v462_v60 = vpop.permute.xlu1 %461 }
  0xdd   :  { %576 = vst.msk [vmem:[#allocation2 + $0x1a0] sm:$0xff] %vm523_vm1, %v460_v59  ;;  %577 = vst.msk [vmem:[#allocation2 + $0x1a8] sm:$0xff] %vm523_vm1, %v462_v60 }
  0xde   :  { %800 = vrot.lane.b32.xlu0 %v634_v53, %s7526_s19  ;;  %802 = vrot.lane.b32.xlu1 %v635_v54, %s7526_s19 }
  0xe0   :  { %v464_v3 = vpop.permute.xlu0 %463  ;;  %v466_v4 = vpop.permute.xlu1 %465 }
  0xe1   :  { %578 = vst.msk [vmem:[#allocation2 + $0x1b0] sm:$0xff] %vm523_vm1, %v464_v3  ;;  %579 = vst.msk [vmem:[#allocation2 + $0x1b8] sm:$0xff] %vm523_vm1, %v466_v4  ;;  %v6864_v3 = vld [vmem:[%s11890_s0 + $0x31] sm:$0xff]  ;;  %v6865_v4 = vld [vmem:[%s11890_s0 + $0x39] sm:$0xff]  ;;  %vm4688_vm1 = vcmask 322816  }
  0xe2   :  { %1030 = vrot.lane.b32.xlu0 %v7738_v14, %s7527_s12  ;;  %1032 = vrot.lane.b32.xlu1 %v7756_v18, %s7527_s12 }
  0xe4   :  { %v693_v11 = vpop.permute.xlu0 %692  ;;  %v695_v12 = vpop.permute.xlu1 %694 }
  0xe5   :  { %861 = vst.msk [vmem:[#allocation2] sm:$0xff] %vm860_vm2, %v693_v11  ;;  %862 = vst.msk [vmem:[#allocation2 + $0x8] sm:$0xff] %vm860_vm2, %v695_v12 }
  0xe6   :  { %1034 = vrot.lane.b32.xlu0 %v7763_v19, %s7527_s12  ;;  %1036 = vrot.lane.b32.xlu1 %v7768_v20, %s7527_s12 }
  0xe8   :  { %v697_v29 = vpop.permute.xlu0 %696  ;;  %v699_v30 = vpop.permute.xlu1 %698 }
  0xe9   :  { %863 = vst.msk [vmem:[#allocation2 + $0x10] sm:$0xff] %vm860_vm2, %v697_v29  ;;  %864 = vst.msk [vmem:[#allocation2 + $0x18] sm:$0xff] %vm860_vm2, %v699_v30  ;;  %v6866_v29 = vld [vmem:[%s11890_s0 + $0x49] sm:$0xff]  ;;  %v6867_v30 = vld [vmem:[%s11890_s0 + $0x51] sm:$0xff] }
  0xea   :  { %1038 = vrot.lane.b32.xlu0 %v7779_v21, %s7527_s12  ;;  %1040 = vrot.lane.b32.xlu1 %v7792_v24, %s7527_s12 }
  0xec   :  { %v701_v14 = vpop.permute.xlu0 %700  ;;  %v703_v18 = vpop.permute.xlu1 %702 }
  0xed   :  { %865 = vst.msk [vmem:[#allocation2 + $0x20] sm:$0xff] %vm860_vm2, %v701_v14  ;;  %866 = vst.msk [vmem:[#allocation2 + $0x28] sm:$0xff] %vm860_vm2, %v703_v18 }
  0xee   :  { %1042 = vrot.lane.b32.xlu0 %v7799_v25, %s7527_s12  ;;  %1044 = vrot.lane.b32.xlu1 %v7804_v26, %s7527_s12 }
  0xf0   :  { %v705_v19 = vpop.permute.xlu0 %704  ;;  %v707_v20 = vpop.permute.xlu1 %706 }
  0xf1   :  { %867 = vst.msk [vmem:[#allocation2 + $0x30] sm:$0xff] %vm860_vm2, %v705_v19  ;;  %868 = vst.msk [vmem:[#allocation2 + $0x38] sm:$0xff] %vm860_vm2, %v707_v20  ;;  %v6868_v19 = vld [vmem:[%s11890_s0 + $0x61] sm:$0xff]  ;;  %v6869_v20 = vld [vmem:[%s11890_s0 + $0x69] sm:$0xff] }
  0xf2   :  { %1046 = vrot.lane.b32.xlu0 %v7813_v27, %s7527_s12  ;;  %1048 = vrot.lane.b32.xlu1 %v7818_v28, %s7527_s12 }
  0xf4   :  { %v709_v21 = vpop.permute.xlu0 %708  ;;  %v711_v24 = vpop.permute.xlu1 %710 }
  0xf5   :  { %869 = vst.msk [vmem:[#allocation2 + $0x40] sm:$0xff] %vm860_vm2, %v709_v21  ;;  %870 = vst.msk [vmem:[#allocation2 + $0x48] sm:$0xff] %vm860_vm2, %v711_v24 }
  0xf6   :  { %1050 = vrot.lane.b32.xlu0 %v7835_v31, %s7527_s12  ;;  %1052 = vrot.lane.b32.xlu1 %v7840_v32, %s7527_s12 }
  0xf8   :  { %v713_v25 = vpop.permute.xlu0 %712  ;;  %v715_v26 = vpop.permute.xlu1 %714 }
  0xf9   :  { %871 = vst.msk [vmem:[#allocation2 + $0x50] sm:$0xff] %vm860_vm2, %v713_v25  ;;  %872 = vst.msk [vmem:[#allocation2 + $0x58] sm:$0xff] %vm860_vm2, %v715_v26  ;;  %v6870_v25 = vld [vmem:[%s11890_s0 + $0x79] sm:$0xff]  ;;  %v6871_v26 = vld [vmem:[%s11890_s0 + $0x81] sm:$0xff] }
  0xfa   :  { %1054 = vrot.lane.b32.xlu0 %v7849_v33, %s7527_s12  ;;  %1056 = vrot.lane.b32.xlu1 %v7854_v34, %s7527_s12 }
  0xfc   :  { %v717_v27 = vpop.permute.xlu0 %716  ;;  %v719_v28 = vpop.permute.xlu1 %718 }
  0xfd   :  { %873 = vst.msk [vmem:[#allocation2 + $0x60] sm:$0xff] %vm860_vm2, %v717_v27  ;;  %874 = vst.msk [vmem:[#allocation2 + $0x68] sm:$0xff] %vm860_vm2, %v719_v28 }
  0xfe   :  { %1058 = vrot.lane.b32.xlu0 %v7863_v35, %s7527_s12  ;;  %1060 = vrot.lane.b32.xlu1 %v7875_v37, %s7527_s12 }
 0x100   :  { %v721_v31 = vpop.permute.xlu0 %720  ;;  %v723_v32 = vpop.permute.xlu1 %722 }
 0x101   :  { %875 = vst.msk [vmem:[#allocation2 + $0x70] sm:$0xff] %vm860_vm2, %v721_v31  ;;  %876 = vst.msk [vmem:[#allocation2 + $0x78] sm:$0xff] %vm860_vm2, %v723_v32  ;;  %v6872_v31 = vld [vmem:[%s11890_s0 + $0x91] sm:$0xff]  ;;  %v6873_v32 = vld [vmem:[%s11890_s0 + $0x99] sm:$0xff] }
 0x102   :  { %1062 = vrot.lane.b32.xlu0 %v7885_v39, %s7527_s12  ;;  %1064 = vrot.lane.b32.xlu1 %v7890_v40, %s7527_s12 }
 0x104   :  { %v725_v33 = vpop.permute.xlu0 %724  ;;  %v727_v34 = vpop.permute.xlu1 %726 }
 0x105   :  { %877 = vst.msk [vmem:[#allocation2 + $0x80] sm:$0xff] %vm860_vm2, %v725_v33  ;;  %878 = vst.msk [vmem:[#allocation2 + $0x88] sm:$0xff] %vm860_vm2, %v727_v34 }
 0x106   :  { %1066 = vrot.lane.b32.xlu0 %v7899_v41, %s7527_s12  ;;  %1068 = vrot.lane.b32.xlu1 %v7906_v42, %s7527_s12 }
 0x108   :  { %v729_v35 = vpop.permute.xlu0 %728  ;;  %v731_v37 = vpop.permute.xlu1 %730 }
 0x109   :  { %879 = vst.msk [vmem:[#allocation2 + $0x90] sm:$0xff] %vm860_vm2, %v729_v35  ;;  %880 = vst.msk [vmem:[#allocation2 + $0x98] sm:$0xff] %vm860_vm2, %v731_v37  ;;  %v6874_v35 = vld [vmem:[%s11890_s0 + $0xa9] sm:$0xff]  ;;  %v6875_v37 = vld [vmem:[%s11890_s0 + $0xb1] sm:$0xff] }
 0x10a   :  { %1070 = vrot.lane.b32.xlu0 %v7915_v43, %s7527_s12  ;;  %1072 = vrot.lane.b32.xlu1 %v7920_v44, %s7527_s12  ;;  %v6832_v43 = vld [vmem:[%s11890_s0 + $0x150] sm:$0xff]  ;;  %v6833_v44 = vld [vmem:[%s11890_s0 + $0x158] sm:$0xff] }
 0x10c   :  { %v733_v39 = vpop.permute.xlu0 %732  ;;  %v735_v40 = vpop.permute.xlu1 %734 }
 0x10d   :  { %881 = vst.msk [vmem:[#allocation2 + $0xa0] sm:$0xff] %vm860_vm2, %v733_v39  ;;  %882 = vst.msk [vmem:[#allocation2 + $0xa8] sm:$0xff] %vm860_vm2, %v735_v40 }
 0x10e   :  { %1074 = vrot.lane.b32.xlu0 %v7935_v47, %s7527_s12  ;;  %1076 = vrot.lane.b32.xlu1 %v7942_v48, %s7527_s12 }
 0x110   :  { %v737_v41 = vpop.permute.xlu0 %736  ;;  %v739_v42 = vpop.permute.xlu1 %738 }
 0x111   :  { %883 = vst.msk [vmem:[#allocation2 + $0xb0] sm:$0xff] %vm860_vm2, %v737_v41  ;;  %884 = vst.msk [vmem:[#allocation2 + $0xb8] sm:$0xff] %vm860_vm2, %v739_v42  ;;  %v6876_v41 = vld [vmem:[%s11890_s0 + $0xc1] sm:$0xff]  ;;  %v6877_v42 = vld [vmem:[%s11890_s0 + $0xc9] sm:$0xff] }
 0x112   :  { %1078 = vrot.lane.b32.xlu0 %v7949_v49, %s7527_s12  ;;  %1080 = vrot.lane.b32.xlu1 %v7954_v50, %s7527_s12 }
 0x114   :  { %v741_v47 = vpop.permute.xlu0 %740  ;;  %v743_v48 = vpop.permute.xlu1 %742 }
 0x115   :  { %885 = vst.msk [vmem:[#allocation2 + $0xc0] sm:$0xff] %vm860_vm2, %v741_v47  ;;  %886 = vst.msk [vmem:[#allocation2 + $0xc8] sm:$0xff] %vm860_vm2, %v743_v48  ;;  %v6878_v47 = vld [vmem:[%s11890_s0 + $0xd9] sm:$0xff]  ;;  %v6879_v48 = vld [vmem:[%s11890_s0 + $0xe1] sm:$0xff] }
 0x116   :  { %1082 = vrot.lane.b32.xlu0 %v6832_v43, %s7527_s12  ;;  %1084 = vrot.lane.b32.xlu1 %v6833_v44, %s7527_s12 }
 0x118   :  { %v745_v49 = vpop.permute.xlu0 %744  ;;  %v747_v50 = vpop.permute.xlu1 %746 }
 0x119   :  { %887 = vst.msk [vmem:[#allocation2 + $0xd0] sm:$0xff] %vm860_vm2, %v745_v49  ;;  %888 = vst.msk [vmem:[#allocation2 + $0xd8] sm:$0xff] %vm860_vm2, %v747_v50 }
 0x11a   :  { %1086 = vrot.lane.b32.xlu0 %v7987_v57, %s7527_s12  ;;  %1088 = vrot.lane.b32.xlu1 %v7994_v58, %s7527_s12 }
 0x11c   :  { %v749_v45 = vpop.permute.xlu0 %748  ;;  %v751_v46 = vpop.permute.xlu1 %750 }
 0x11d   :  { %889 = vst.msk [vmem:[#allocation2 + $0xe0] sm:$0xff] %vm860_vm2, %v749_v45  ;;  %890 = vst.msk [vmem:[#allocation2 + $0xe8] sm:$0xff] %vm860_vm2, %v751_v46  ;;  %v6880_v45 = vld [vmem:[%s11890_s0 + $0xf1] sm:$0xff]  ;;  %v6881_v46 = vld [vmem:[%s11890_s0 + $0xf9] sm:$0xff] }
 0x11e   :  { %1090 = vrot.lane.b32.xlu0 %v8009_v61, %s7527_s12  ;;  %1092 = vrot.lane.b32.xlu1 %v8016_v62, %s7527_s12 }
 0x120   :  { %v753_v53 = vpop.permute.xlu0 %752  ;;  %v755_v54 = vpop.permute.xlu1 %754 }
 0x121   :  { %891 = vst.msk [vmem:[#allocation2 + $0xf0] sm:$0xff] %vm860_vm2, %v753_v53  ;;  %892 = vst.msk [vmem:[#allocation2 + $0xf8] sm:$0xff] %vm860_vm2, %v755_v54 }
 0x122   :  { %1094 = vrot.lane.b32.xlu0 %v8031_v1, %s7527_s12  ;;  %1096 = vrot.lane.b32.xlu1 %v8038_v2, %s7527_s12 }
 0x124   :  { %v757_v57 = vpop.permute.xlu0 %756  ;;  %v759_v58 = vpop.permute.xlu1 %758 }
 0x125   :  { %893 = vst.msk [vmem:[#allocation2 + $0x100] sm:$0xff] %vm860_vm2, %v757_v57  ;;  %894 = vst.msk [vmem:[#allocation2 + $0x108] sm:$0xff] %vm860_vm2, %v759_v58  ;;  %v6882_v57 = vld [vmem:[%s11890_s0 + $0x109] sm:$0xff]  ;;  %v6883_v58 = vld [vmem:[%s11890_s0 + $0x111] sm:$0xff] }
 0x126   :  { %1098 = vrot.lane.b32.xlu0 %v8053_v5, %s7527_s12  ;;  %1100 = vrot.lane.b32.xlu1 %v8060_v6, %s7527_s12 }
 0x128   :  { %v761_v61 = vpop.permute.xlu0 %760  ;;  %v763_v62 = vpop.permute.xlu1 %762 }
 0x129   :  { %895 = vst.msk [vmem:[#allocation2 + $0x110] sm:$0xff] %vm860_vm2, %v761_v61  ;;  %896 = vst.msk [vmem:[#allocation2 + $0x118] sm:$0xff] %vm860_vm2, %v763_v62 }
 0x12a   :  { %1102 = vrot.lane.b32.xlu0 %v8075_v9, %s7527_s12  ;;  %1104 = vrot.lane.b32.xlu1 %v8082_v10, %s7527_s12 }
 0x12c   :  { %v765_v1 = vpop.permute.xlu0 %764  ;;  %v767_v2 = vpop.permute.xlu1 %766 }
 0x12d   :  { %897 = vst.msk [vmem:[#allocation2 + $0x120] sm:$0xff] %vm860_vm2, %v765_v1  ;;  %898 = vst.msk [vmem:[#allocation2 + $0x128] sm:$0xff] %vm860_vm2, %v767_v2  ;;  %v6884_v1 = vld [vmem:[%s11890_s0 + $0x121] sm:$0xff]  ;;  %v6885_v2 = vld [vmem:[%s11890_s0 + $0x129] sm:$0xff] }
 0x12e   :  { %1106 = vrot.lane.b32.xlu0 %v8097_v13, %s7527_s12  ;;  %1108 = vrot.lane.b32.xlu1 %v8104_v15, %s7527_s12 }
 0x130   :  { %v769_v5 = vpop.permute.xlu0 %768  ;;  %v771_v6 = vpop.permute.xlu1 %770 }
 0x131   :  { %899 = vst.msk [vmem:[#allocation2 + $0x130] sm:$0xff] %vm860_vm2, %v769_v5  ;;  %900 = vst.msk [vmem:[#allocation2 + $0x138] sm:$0xff] %vm860_vm2, %v771_v6 }
 0x132   :  { %1110 = vrot.lane.b32.xlu0 %v8119_v22, %s7527_s12  ;;  %1112 = vrot.lane.b32.xlu1 %v8126_v23, %s7527_s12 }
 0x134   :  { %v773_v9 = vpop.permute.xlu0 %772  ;;  %v775_v10 = vpop.permute.xlu1 %774 }
 0x135   :  { %901 = vst.msk [vmem:[#allocation2 + $0x140] sm:$0xff] %vm860_vm2, %v773_v9  ;;  %902 = vst.msk [vmem:[#allocation2 + $0x148] sm:$0xff] %vm860_vm2, %v775_v10  ;;  %v6886_v9 = vld [vmem:[%s11890_s0 + $0x139] sm:$0xff]  ;;  %v6887_v10 = vld [vmem:[%s11890_s0 + $0x141] sm:$0xff] }
 0x136   :  { %1114 = vrot.lane.b32.xlu0 %v8141_v36, %s7527_s12  ;;  %1116 = vrot.lane.b32.xlu1 %v8148_v38, %s7527_s12 }
 0x138   :  { %v777_v13 = vpop.permute.xlu0 %776  ;;  %v779_v15 = vpop.permute.xlu1 %778 }
 0x139   :  { %903 = vst.msk [vmem:[#allocation2 + $0x150] sm:$0xff] %vm860_vm2, %v777_v13  ;;  %904 = vst.msk [vmem:[#allocation2 + $0x158] sm:$0xff] %vm860_vm2, %v779_v15 }
 0x13a   :  { %1118 = vrot.lane.b32.xlu0 %v8163_v51, %s7527_s12  ;;  %1120 = vrot.lane.b32.xlu1 %v8170_v52, %s7527_s12 }
 0x13c   :  { %v781_v22 = vpop.permute.xlu0 %780  ;;  %v783_v23 = vpop.permute.xlu1 %782 }
 0x13d   :  { %905 = vst.msk [vmem:[#allocation2 + $0x160] sm:$0xff] %vm860_vm2, %v781_v22  ;;  %906 = vst.msk [vmem:[#allocation2 + $0x168] sm:$0xff] %vm860_vm2, %v783_v23  ;;  %v6888_v22 = vld [vmem:[%s11890_s0 + $0x151] sm:$0xff]  ;;  %v6889_v23 = vld [vmem:[%s11890_s0 + $0x159] sm:$0xff] }
 0x13e   :  { %1122 = vrot.lane.b32.xlu0 %v8185_v55, %s7527_s12  ;;  %1124 = vrot.lane.b32.xlu1 %v8192_v56, %s7527_s12 }
 0x140   :  { %v785_v36 = vpop.permute.xlu0 %784  ;;  %v787_v38 = vpop.permute.xlu1 %786 }
 0x141   :  { %907 = vst.msk [vmem:[#allocation2 + $0x170] sm:$0xff] %vm860_vm2, %v785_v36  ;;  %908 = vst.msk [vmem:[#allocation2 + $0x178] sm:$0xff] %vm860_vm2, %v787_v38 }
 0x142   :  { %1126 = vrot.lane.b32.xlu0 %v8207_v63, %s7527_s12  ;;  %1128 = vrot.lane.b32.xlu1 %v8214_v0, %s7527_s12  ;;  %v6860_v63 = vld [vmem:[%s11890_s0 + $0x2d0] sm:$0xff]  ;;  %v6861_v0 = vld [vmem:[%s11890_s0 + $0x2d8] sm:$0xff] }
 0x144   :  { %v789_v51 = vpop.permute.xlu0 %788  ;;  %v791_v52 = vpop.permute.xlu1 %790 }
 0x145   :  { %909 = vst.msk [vmem:[#allocation2 + $0x180] sm:$0xff] %vm860_vm2, %v789_v51  ;;  %910 = vst.msk [vmem:[#allocation2 + $0x188] sm:$0xff] %vm860_vm2, %v791_v52  ;;  %v6890_v51 = vld [vmem:[%s11890_s0 + $0x199] sm:$0xff]  ;;  %v6891_v52 = vld [vmem:[%s11890_s0 + $0x1a1] sm:$0xff] }
 0x146   :  { %1130 = vrot.lane.b32.xlu0 %v8229_v7, %s7527_s12  ;;  %1132 = vrot.lane.b32.xlu1 %v8236_v8, %s7527_s12 }
 0x148   :  { %v793_v55 = vpop.permute.xlu0 %792  ;;  %v795_v56 = vpop.permute.xlu1 %794 }
 0x149   :  { %911 = vst.msk [vmem:[#allocation2 + $0x190] sm:$0xff] %vm860_vm2, %v793_v55  ;;  %912 = vst.msk [vmem:[#allocation2 + $0x198] sm:$0xff] %vm860_vm2, %v795_v56 }
 0x14a   :  { %1134 = vrot.lane.b32.xlu0 %v8251_v16, %s7527_s12  ;;  %1136 = vrot.lane.b32.xlu1 %v8258_v17, %s7527_s12  ;;  %v6862_v16 = vld [vmem:[%s11890_s0 + $0x19] sm:$0xff]  ;;  %v6863_v17 = vld [vmem:[%s11890_s0 + $0x21] sm:$0xff] }
 0x14c   :  { %v797_v7 = vpop.permute.xlu0 %796  ;;  %v799_v8 = vpop.permute.xlu1 %798 }
 0x14d   :  { %913 = vst.msk [vmem:[#allocation2 + $0x1a0] sm:$0xff] %vm860_vm2, %v797_v7  ;;  %914 = vst.msk [vmem:[#allocation2 + $0x1a8] sm:$0xff] %vm860_vm2, %v799_v8 }
 0x14e   :  { %1138 = vrot.lane.b32.xlu0 %v6860_v63, %s7527_s12  ;;  %1140 = vrot.lane.b32.xlu1 %v6861_v0, %s7527_s12  ;;  %v6892_v63 = vld [vmem:[%s11890_s0 + $0x1b1] sm:$0xff]  ;;  %v6893_v0 = vld [vmem:[%s11890_s0 + $0x1b9] sm:$0xff] }
 0x150   :  { %v801_v59 = vpop.permute.xlu0 %800  ;;  %v803_v60 = vpop.permute.xlu1 %802 }
 0x151   :  { %915 = vst.msk [vmem:[#allocation2 + $0x1b0] sm:$0xff] %vm860_vm2, %v801_v59  ;;  %916 = vst.msk [vmem:[#allocation2 + $0x1b8] sm:$0xff] %vm860_vm2, %v803_v60  ;;  %vm4686_vm2 = vcmask 326912  }
 0x152   :  { %1367 = vrot.lane.b32.xlu0 %v6862_v16, %s7528_s26  ;;  %1369 = vrot.lane.b32.xlu1 %v6863_v17, %s7528_s26  ;;  %v6894_v16 = vld [vmem:[%s11890_s0 + $0x1c9] sm:$0xff]  ;;  %v6895_v17 = vld [vmem:[%s11890_s0 + $0x1d1] sm:$0xff] }
 0x154   :  { %v1031_v11 = vpop.permute.xlu0 %1030  ;;  %v1033_v12 = vpop.permute.xlu1 %1032 }
 0x155   :  { %1199 = vst.msk [vmem:[#allocation2] sm:$0xff] %vm1198_vm3, %v1031_v11  ;;  %1200 = vst.msk [vmem:[#allocation2 + $0x8] sm:$0xff] %vm1198_vm3, %v1033_v12 }
 0x156   :  { %1371 = vrot.lane.b32.xlu0 %v6864_v3, %s7528_s26  ;;  %1373 = vrot.lane.b32.xlu1 %v6865_v4, %s7528_s26  ;;  %v6896_v3 = vld [vmem:[%s11890_s0 + $0x1e1] sm:$0xff]  ;;  %v6897_v4 = vld [vmem:[%s11890_s0 + $0x1e9] sm:$0xff] }
 0x158   :  { %v1035_v14 = vpop.permute.xlu0 %1034  ;;  %v1037_v18 = vpop.permute.xlu1 %1036 }
 0x159   :  { %1201 = vst.msk [vmem:[#allocation2 + $0x10] sm:$0xff] %vm1198_vm3, %v1035_v14  ;;  %1202 = vst.msk [vmem:[#allocation2 + $0x18] sm:$0xff] %vm1198_vm3, %v1037_v18 }
 0x15a   :  { %1375 = vrot.lane.b32.xlu0 %v6866_v29, %s7528_s26  ;;  %1377 = vrot.lane.b32.xlu1 %v6867_v30, %s7528_s26  ;;  %v6898_v29 = vld [vmem:[%s11890_s0 + $0x1f9] sm:$0xff]  ;;  %v6899_v30 = vld [vmem:[%s11890_s0 + $0x201] sm:$0xff] }
 0x15c   :  { %v1039_v21 = vpop.permute.xlu0 %1038  ;;  %v1041_v24 = vpop.permute.xlu1 %1040 }
 0x15d   :  { %1203 = vst.msk [vmem:[#allocation2 + $0x20] sm:$0xff] %vm1198_vm3, %v1039_v21  ;;  %1204 = vst.msk [vmem:[#allocation2 + $0x28] sm:$0xff] %vm1198_vm3, %v1041_v24 }
 0x15e   :  { %1379 = vrot.lane.b32.xlu0 %v6868_v19, %s7528_s26  ;;  %1381 = vrot.lane.b32.xlu1 %v6869_v20, %s7528_s26  ;;  %v6900_v19 = vld [vmem:[%s11890_s0 + $0x211] sm:$0xff]  ;;  %v6901_v20 = vld [vmem:[%s11890_s0 + $0x219] sm:$0xff] }
 0x160   :  { %v1043_v27 = vpop.permute.xlu0 %1042  ;;  %v1045_v28 = vpop.permute.xlu1 %1044 }
 0x161   :  { %1205 = vst.msk [vmem:[#allocation2 + $0x30] sm:$0xff] %vm1198_vm3, %v1043_v27  ;;  %1206 = vst.msk [vmem:[#allocation2 + $0x38] sm:$0xff] %vm1198_vm3, %v1045_v28 }
 0x162   :  { %1383 = vrot.lane.b32.xlu0 %v6870_v25, %s7528_s26  ;;  %1385 = vrot.lane.b32.xlu1 %v6871_v26, %s7528_s26  ;;  %v6902_v25 = vld [vmem:[%s11890_s0 + $0x229] sm:$0xff]  ;;  %v6903_v26 = vld [vmem:[%s11890_s0 + $0x231] sm:$0xff] }
 0x164   :  { %v1047_v33 = vpop.permute.xlu0 %1046  ;;  %v1049_v34 = vpop.permute.xlu1 %1048 }
 0x165   :  { %1207 = vst.msk [vmem:[#allocation2 + $0x40] sm:$0xff] %vm1198_vm3, %v1047_v33  ;;  %1208 = vst.msk [vmem:[#allocation2 + $0x48] sm:$0xff] %vm1198_vm3, %v1049_v34 }
 0x166   :  { %1387 = vrot.lane.b32.xlu0 %v6872_v31, %s7528_s26  ;;  %1389 = vrot.lane.b32.xlu1 %v6873_v32, %s7528_s26  ;;  %v6904_v31 = vld [vmem:[%s11890_s0 + $0x241] sm:$0xff]  ;;  %v6905_v32 = vld [vmem:[%s11890_s0 + $0x249] sm:$0xff] }
 0x168   :  { %v1051_v39 = vpop.permute.xlu0 %1050  ;;  %v1053_v40 = vpop.permute.xlu1 %1052 }
 0x169   :  { %1209 = vst.msk [vmem:[#allocation2 + $0x50] sm:$0xff] %vm1198_vm3, %v1051_v39  ;;  %1210 = vst.msk [vmem:[#allocation2 + $0x58] sm:$0xff] %vm1198_vm3, %v1053_v40 }
 0x16a   :  { %1391 = vrot.lane.b32.xlu0 %v6874_v35, %s7528_s26  ;;  %1393 = vrot.lane.b32.xlu1 %v6875_v37, %s7528_s26  ;;  %v6906_v35 = vld [vmem:[%s11890_s0 + $0x259] sm:$0xff]  ;;  %v6907_v37 = vld [vmem:[%s11890_s0 + $0x261] sm:$0xff] }
 0x16c   :  { %v1055_v43 = vpop.permute.xlu0 %1054  ;;  %v1057_v44 = vpop.permute.xlu1 %1056 }
 0x16d   :  { %1211 = vst.msk [vmem:[#allocation2 + $0x60] sm:$0xff] %vm1198_vm3, %v1055_v43  ;;  %1212 = vst.msk [vmem:[#allocation2 + $0x68] sm:$0xff] %vm1198_vm3, %v1057_v44 }
 0x16e   :  { %1395 = vrot.lane.b32.xlu0 %v6876_v41, %s7528_s26  ;;  %1397 = vrot.lane.b32.xlu1 %v6877_v42, %s7528_s26  ;;  %v6908_v41 = vld [vmem:[%s11890_s0 + $0x271] sm:$0xff]  ;;  %v6909_v42 = vld [vmem:[%s11890_s0 + $0x279] sm:$0xff] }
 0x170   :  { %v1059_v49 = vpop.permute.xlu0 %1058  ;;  %v1061_v50 = vpop.permute.xlu1 %1060 }
 0x171   :  { %1213 = vst.msk [vmem:[#allocation2 + $0x70] sm:$0xff] %vm1198_vm3, %v1059_v49  ;;  %1214 = vst.msk [vmem:[#allocation2 + $0x78] sm:$0xff] %vm1198_vm3, %v1061_v50 }
 0x172   :  { %1399 = vrot.lane.b32.xlu0 %v6878_v47, %s7528_s26  ;;  %1401 = vrot.lane.b32.xlu1 %v6879_v48, %s7528_s26  ;;  %v6910_v47 = vld [vmem:[%s11890_s0 + $0x289] sm:$0xff]  ;;  %v6911_v48 = vld [vmem:[%s11890_s0 + $0x291] sm:$0xff] }
 0x174   :  { %v1063_v53 = vpop.permute.xlu0 %1062  ;;  %v1065_v54 = vpop.permute.xlu1 %1064 }
 0x175   :  { %1215 = vst.msk [vmem:[#allocation2 + $0x80] sm:$0xff] %vm1198_vm3, %v1063_v53  ;;  %1216 = vst.msk [vmem:[#allocation2 + $0x88] sm:$0xff] %vm1198_vm3, %v1065_v54 }
 0x176   :  { %1403 = vrot.lane.b32.xlu0 %v6880_v45, %s7528_s26  ;;  %1405 = vrot.lane.b32.xlu1 %v6881_v46, %s7528_s26  ;;  %v6912_v45 = vld [vmem:[%s11890_s0 + $0x2a1] sm:$0xff]  ;;  %v6913_v46 = vld [vmem:[%s11890_s0 + $0x2a9] sm:$0xff] }
 0x178   :  { %v1067_v61 = vpop.permute.xlu0 %1066  ;;  %v1069_v62 = vpop.permute.xlu1 %1068 }
 0x179   :  { %1217 = vst.msk [vmem:[#allocation2 + $0x90] sm:$0xff] %vm1198_vm3, %v1067_v61  ;;  %1218 = vst.msk [vmem:[#allocation2 + $0x98] sm:$0xff] %vm1198_vm3, %v1069_v62 }
 0x17a   :  { %1407 = vrot.lane.b32.xlu0 %v6882_v57, %s7528_s26  ;;  %1409 = vrot.lane.b32.xlu1 %v6883_v58, %s7528_s26  ;;  %v6914_v57 = vld [vmem:[%s11890_s0 + $0x2b9] sm:$0xff]  ;;  %v6915_v58 = vld [vmem:[%s11890_s0 + $0x2c1] sm:$0xff] }
 0x17c   :  { %v1071_v5 = vpop.permute.xlu0 %1070  ;;  %v1073_v6 = vpop.permute.xlu1 %1072 }
 0x17d   :  { %1219 = vst.msk [vmem:[#allocation2 + $0xa0] sm:$0xff] %vm1198_vm3, %v1071_v5  ;;  %1220 = vst.msk [vmem:[#allocation2 + $0xa8] sm:$0xff] %vm1198_vm3, %v1073_v6 }
 0x17e   :  { %1411 = vrot.lane.b32.xlu0 %v6884_v1, %s7528_s26  ;;  %1413 = vrot.lane.b32.xlu1 %v6885_v2, %s7528_s26  ;;  %v6916_v1 = vld [vmem:[%s11890_s0 + $0x2d1] sm:$0xff]  ;;  %v6917_v2 = vld [vmem:[%s11890_s0 + $0x2d9] sm:$0xff] }
 0x180   :  { %v1075_v13 = vpop.permute.xlu0 %1074  ;;  %v1077_v15 = vpop.permute.xlu1 %1076 }
 0x181   :  { %1221 = vst.msk [vmem:[#allocation2 + $0xb0] sm:$0xff] %vm1198_vm3, %v1075_v13  ;;  %1222 = vst.msk [vmem:[#allocation2 + $0xb8] sm:$0xff] %vm1198_vm3, %v1077_v15 }
 0x182   :  { %1415 = vrot.lane.b32.xlu0 %v6886_v9, %s7528_s26  ;;  %1417 = vrot.lane.b32.xlu1 %v6887_v10, %s7528_s26  ;;  %v6918_v9 = vld [vmem:[%s11890_s0 + $0x1a] sm:$0xff]  ;;  %v6919_v10 = vld [vmem:[%s11890_s0 + $0x22] sm:$0xff] }
 0x184   :  { %v1079_v36 = vpop.permute.xlu0 %1078  ;;  %v1081_v38 = vpop.permute.xlu1 %1080 }
 0x185   :  { %1223 = vst.msk [vmem:[#allocation2 + $0xc0] sm:$0xff] %vm1198_vm3, %v1079_v36  ;;  %1224 = vst.msk [vmem:[#allocation2 + $0xc8] sm:$0xff] %vm1198_vm3, %v1081_v38 }
 0x186   :  { %1419 = vrot.lane.b32.xlu0 %v6888_v22, %s7528_s26  ;;  %1421 = vrot.lane.b32.xlu1 %v6889_v23, %s7528_s26  ;;  %v6920_v22 = vld [vmem:[%s11890_s0 + $0x32] sm:$0xff]  ;;  %v6921_v23 = vld [vmem:[%s11890_s0 + $0x3a] sm:$0xff] }
 0x188   :  { %v1083_v55 = vpop.permute.xlu0 %1082  ;;  %v1085_v56 = vpop.permute.xlu1 %1084 }
 0x189   :  { %1225 = vst.msk [vmem:[#allocation2 + $0xd0] sm:$0xff] %vm1198_vm3, %v1083_v55  ;;  %1226 = vst.msk [vmem:[#allocation2 + $0xd8] sm:$0xff] %vm1198_vm3, %v1085_v56 }
 0x18a   :  { %1423 = vrot.lane.b32.xlu0 %v6890_v51, %s7528_s26  ;;  %1425 = vrot.lane.b32.xlu1 %v6891_v52, %s7528_s26  ;;  %v6922_v51 = vld [vmem:[%s11890_s0 + $0x4a] sm:$0xff]  ;;  %v6923_v52 = vld [vmem:[%s11890_s0 + $0x52] sm:$0xff] }
 0x18c   :  { %v1087_v7 = vpop.permute.xlu0 %1086  ;;  %v1089_v8 = vpop.permute.xlu1 %1088 }
 0x18d   :  { %1227 = vst.msk [vmem:[#allocation2 + $0xe0] sm:$0xff] %vm1198_vm3, %v1087_v7  ;;  %1228 = vst.msk [vmem:[#allocation2 + $0xe8] sm:$0xff] %vm1198_vm3, %v1089_v8 }
 0x18e   :  { %1427 = vrot.lane.b32.xlu0 %v6892_v63, %s7528_s26  ;;  %1429 = vrot.lane.b32.xlu1 %v6893_v0, %s7528_s26  ;;  %v6924_v63 = vld [vmem:[%s11890_s0 + $0x62] sm:$0xff]  ;;  %v6925_v0 = vld [vmem:[%s11890_s0 + $0x6a] sm:$0xff] }
 0x190   :  { %v1091_v59 = vpop.permute.xlu0 %1090  ;;  %v1093_v60 = vpop.permute.xlu1 %1092 }
 0x191   :  { %1229 = vst.msk [vmem:[#allocation2 + $0xf0] sm:$0xff] %vm1198_vm3, %v1091_v59  ;;  %1230 = vst.msk [vmem:[#allocation2 + $0xf8] sm:$0xff] %vm1198_vm3, %v1093_v60 }
 0x192   :  { %1431 = vrot.lane.b32.xlu0 %v6894_v16, %s7528_s26  ;;  %1433 = vrot.lane.b32.xlu1 %v6895_v17, %s7528_s26  ;;  %v6926_v16 = vld [vmem:[%s11890_s0 + $0x7a] sm:$0xff]  ;;  %v6927_v17 = vld [vmem:[%s11890_s0 + $0x82] sm:$0xff] }
 0x194   :  { %v1095_v11 = vpop.permute.xlu0 %1094  ;;  %v1097_v12 = vpop.permute.xlu1 %1096 }
 0x195   :  { %1231 = vst.msk [vmem:[#allocation2 + $0x100] sm:$0xff] %vm1198_vm3, %v1095_v11  ;;  %1232 = vst.msk [vmem:[#allocation2 + $0x108] sm:$0xff] %vm1198_vm3, %v1097_v12 }
 0x196   :  { %1435 = vrot.lane.b32.xlu0 %v6896_v3, %s7528_s26  ;;  %1437 = vrot.lane.b32.xlu1 %v6897_v4, %s7528_s26  ;;  %v6928_v3 = vld [vmem:[%s11890_s0 + $0x92] sm:$0xff]  ;;  %v6929_v4 = vld [vmem:[%s11890_s0 + $0x9a] sm:$0xff] }
 0x198   :  { %v1099_v14 = vpop.permute.xlu0 %1098  ;;  %v1101_v18 = vpop.permute.xlu1 %1100 }
 0x199   :  { %1233 = vst.msk [vmem:[#allocation2 + $0x110] sm:$0xff] %vm1198_vm3, %v1099_v14  ;;  %1234 = vst.msk [vmem:[#allocation2 + $0x118] sm:$0xff] %vm1198_vm3, %v1101_v18 }
 0x19a   :  { %1439 = vrot.lane.b32.xlu0 %v6898_v29, %s7528_s26  ;;  %1441 = vrot.lane.b32.xlu1 %v6899_v30, %s7528_s26  ;;  %v6930_v29 = vld [vmem:[%s11890_s0 + $0xaa] sm:$0xff]  ;;  %v6931_v30 = vld [vmem:[%s11890_s0 + $0xb2] sm:$0xff] }
 0x19c   :  { %v1103_v21 = vpop.permute.xlu0 %1102  ;;  %v1105_v24 = vpop.permute.xlu1 %1104 }
 0x19d   :  { %1235 = vst.msk [vmem:[#allocation2 + $0x120] sm:$0xff] %vm1198_vm3, %v1103_v21  ;;  %1236 = vst.msk [vmem:[#allocation2 + $0x128] sm:$0xff] %vm1198_vm3, %v1105_v24 }
 0x19e   :  { %1443 = vrot.lane.b32.xlu0 %v6900_v19, %s7528_s26  ;;  %1445 = vrot.lane.b32.xlu1 %v6901_v20, %s7528_s26  ;;  %v6932_v19 = vld [vmem:[%s11890_s0 + $0xc2] sm:$0xff]  ;;  %v6933_v20 = vld [vmem:[%s11890_s0 + $0xca] sm:$0xff] }
 0x1a0   :  { %v1107_v27 = vpop.permute.xlu0 %1106  ;;  %v1109_v28 = vpop.permute.xlu1 %1108 }
 0x1a1   :  { %1237 = vst.msk [vmem:[#allocation2 + $0x130] sm:$0xff] %vm1198_vm3, %v1107_v27  ;;  %1238 = vst.msk [vmem:[#allocation2 + $0x138] sm:$0xff] %vm1198_vm3, %v1109_v28 }
 0x1a2   :  { %1447 = vrot.lane.b32.xlu0 %v6902_v25, %s7528_s26  ;;  %1449 = vrot.lane.b32.xlu1 %v6903_v26, %s7528_s26  ;;  %v6934_v25 = vld [vmem:[%s11890_s0 + $0xda] sm:$0xff]  ;;  %v6935_v26 = vld [vmem:[%s11890_s0 + $0xe2] sm:$0xff] }
 0x1a4   :  { %v1111_v33 = vpop.permute.xlu0 %1110  ;;  %v1113_v34 = vpop.permute.xlu1 %1112 }
 0x1a5   :  { %1239 = vst.msk [vmem:[#allocation2 + $0x140] sm:$0xff] %vm1198_vm3, %v1111_v33  ;;  %1240 = vst.msk [vmem:[#allocation2 + $0x148] sm:$0xff] %vm1198_vm3, %v1113_v34 }
 0x1a6   :  { %1451 = vrot.lane.b32.xlu0 %v6904_v31, %s7528_s26  ;;  %1453 = vrot.lane.b32.xlu1 %v6905_v32, %s7528_s26  ;;  %v6936_v31 = vld [vmem:[%s11890_s0 + $0xf2] sm:$0xff]  ;;  %v6937_v32 = vld [vmem:[%s11890_s0 + $0xfa] sm:$0xff] }
 0x1a8   :  { %v1115_v39 = vpop.permute.xlu0 %1114  ;;  %v1117_v40 = vpop.permute.xlu1 %1116 }
 0x1a9   :  { %1241 = vst.msk [vmem:[#allocation2 + $0x150] sm:$0xff] %vm1198_vm3, %v1115_v39  ;;  %1242 = vst.msk [vmem:[#allocation2 + $0x158] sm:$0xff] %vm1198_vm3, %v1117_v40 }
 0x1aa   :  { %1455 = vrot.lane.b32.xlu0 %v6906_v35, %s7528_s26  ;;  %1457 = vrot.lane.b32.xlu1 %v6907_v37, %s7528_s26  ;;  %v6938_v35 = vld [vmem:[%s11890_s0 + $0x10a] sm:$0xff]  ;;  %v6939_v37 = vld [vmem:[%s11890_s0 + $0x112] sm:$0xff] }
 0x1ac   :  { %v1119_v43 = vpop.permute.xlu0 %1118  ;;  %v1121_v44 = vpop.permute.xlu1 %1120 }
 0x1ad   :  { %1243 = vst.msk [vmem:[#allocation2 + $0x160] sm:$0xff] %vm1198_vm3, %v1119_v43  ;;  %1244 = vst.msk [vmem:[#allocation2 + $0x168] sm:$0xff] %vm1198_vm3, %v1121_v44 }
 0x1ae   :  { %1459 = vrot.lane.b32.xlu0 %v6908_v41, %s7528_s26  ;;  %1461 = vrot.lane.b32.xlu1 %v6909_v42, %s7528_s26  ;;  %v6940_v41 = vld [vmem:[%s11890_s0 + $0x122] sm:$0xff]  ;;  %v6941_v42 = vld [vmem:[%s11890_s0 + $0x12a] sm:$0xff] }
 0x1b0   :  { %v1123_v49 = vpop.permute.xlu0 %1122  ;;  %v1125_v50 = vpop.permute.xlu1 %1124 }
 0x1b1   :  { %1245 = vst.msk [vmem:[#allocation2 + $0x170] sm:$0xff] %vm1198_vm3, %v1123_v49  ;;  %1246 = vst.msk [vmem:[#allocation2 + $0x178] sm:$0xff] %vm1198_vm3, %v1125_v50 }
 0x1b2   :  { %1463 = vrot.lane.b32.xlu0 %v6910_v47, %s7528_s26  ;;  %1465 = vrot.lane.b32.xlu1 %v6911_v48, %s7528_s26  ;;  %v6942_v47 = vld [vmem:[%s11890_s0 + $0x13a] sm:$0xff]  ;;  %v6943_v48 = vld [vmem:[%s11890_s0 + $0x142] sm:$0xff] }
 0x1b4   :  { %v1127_v53 = vpop.permute.xlu0 %1126  ;;  %v1129_v54 = vpop.permute.xlu1 %1128 }
 0x1b5   :  { %1247 = vst.msk [vmem:[#allocation2 + $0x180] sm:$0xff] %vm1198_vm3, %v1127_v53  ;;  %1248 = vst.msk [vmem:[#allocation2 + $0x188] sm:$0xff] %vm1198_vm3, %v1129_v54 }
 0x1b6   :  { %1467 = vrot.lane.b32.xlu0 %v6912_v45, %s7528_s26  ;;  %1469 = vrot.lane.b32.xlu1 %v6913_v46, %s7528_s26  ;;  %v6944_v45 = vld [vmem:[%s11890_s0 + $0x152] sm:$0xff]  ;;  %v6945_v46 = vld [vmem:[%s11890_s0 + $0x15a] sm:$0xff] }
 0x1b8   :  { %v1131_v61 = vpop.permute.xlu0 %1130  ;;  %v1133_v62 = vpop.permute.xlu1 %1132 }
 0x1b9   :  { %1249 = vst.msk [vmem:[#allocation2 + $0x190] sm:$0xff] %vm1198_vm3, %v1131_v61  ;;  %1250 = vst.msk [vmem:[#allocation2 + $0x198] sm:$0xff] %vm1198_vm3, %v1133_v62 }
 0x1ba   :  { %1471 = vrot.lane.b32.xlu0 %v6914_v57, %s7528_s26  ;;  %1473 = vrot.lane.b32.xlu1 %v6915_v58, %s7528_s26  ;;  %v6946_v57 = vld [vmem:[%s11890_s0 + $0x19a] sm:$0xff]  ;;  %v6947_v58 = vld [vmem:[%s11890_s0 + $0x1a2] sm:$0xff] }
 0x1bc   :  { %v1135_v5 = vpop.permute.xlu0 %1134  ;;  %v1137_v6 = vpop.permute.xlu1 %1136 }
 0x1bd   :  { %1251 = vst.msk [vmem:[#allocation2 + $0x1a0] sm:$0xff] %vm1198_vm3, %v1135_v5  ;;  %1252 = vst.msk [vmem:[#allocation2 + $0x1a8] sm:$0xff] %vm1198_vm3, %v1137_v6 }
 0x1be   :  { %1475 = vrot.lane.b32.xlu0 %v6916_v1, %s7528_s26  ;;  %1477 = vrot.lane.b32.xlu1 %v6917_v2, %s7528_s26  ;;  %v6948_v1 = vld [vmem:[%s11890_s0 + $0x1b2] sm:$0xff]  ;;  %v6949_v2 = vld [vmem:[%s11890_s0 + $0x1ba] sm:$0xff] }
 0x1c0   :  { %v1139_v13 = vpop.permute.xlu0 %1138  ;;  %v1141_v15 = vpop.permute.xlu1 %1140 }
 0x1c1   :  { %1253 = vst.msk [vmem:[#allocation2 + $0x1b0] sm:$0xff] %vm1198_vm3, %v1139_v13  ;;  %1254 = vst.msk [vmem:[#allocation2 + $0x1b8] sm:$0xff] %vm1198_vm3, %v1141_v15  ;;  %vm4978_vm3 = vcmask 388416  }
 0x1c2   :  { %1704 = vrot.lane.b32.xlu0 %v6918_v9, %s7529_s29  ;;  %1706 = vrot.lane.b32.xlu1 %v6919_v10, %s7529_s29  ;;  %v6950_v9 = vld [vmem:[%s11890_s0 + $0x1ca] sm:$0xff]  ;;  %v6951_v10 = vld [vmem:[%s11890_s0 + $0x1d2] sm:$0xff] }
 0x1c4   :  { %v1368_v36 = vpop.permute.xlu0 %1367  ;;  %v1370_v38 = vpop.permute.xlu1 %1369 }
 0x1c5   :  { %1536 = vst.msk [vmem:[#allocation2] sm:$0xff] %vm1535_vm4, %v1368_v36  ;;  %1537 = vst.msk [vmem:[#allocation2 + $0x8] sm:$0xff] %vm1535_vm4, %v1370_v38 }
 0x1c6   :  { %1708 = vrot.lane.b32.xlu0 %v6920_v22, %s7529_s29  ;;  %1710 = vrot.lane.b32.xlu1 %v6921_v23, %s7529_s29  ;;  %v6952_v22 = vld [vmem:[%s11890_s0 + $0x1e2] sm:$0xff]  ;;  %v6953_v23 = vld [vmem:[%s11890_s0 + $0x1ea] sm:$0xff] }
 0x1c8   :  { %v1372_v55 = vpop.permute.xlu0 %1371  ;;  %v1374_v56 = vpop.permute.xlu1 %1373 }
 0x1c9   :  { %1538 = vst.msk [vmem:[#allocation2 + $0x10] sm:$0xff] %vm1535_vm4, %v1372_v55  ;;  %1539 = vst.msk [vmem:[#allocation2 + $0x18] sm:$0xff] %vm1535_vm4, %v1374_v56 }
 0x1ca   :  { %1712 = vrot.lane.b32.xlu0 %v6922_v51, %s7529_s29  ;;  %1714 = vrot.lane.b32.xlu1 %v6923_v52, %s7529_s29  ;;  %v6954_v51 = vld [vmem:[%s11890_s0 + $0x1fa] sm:$0xff]  ;;  %v6955_v52 = vld [vmem:[%s11890_s0 + $0x202] sm:$0xff] }
 0x1cc   :  { %v1376_v7 = vpop.permute.xlu0 %1375  ;;  %v1378_v8 = vpop.permute.xlu1 %1377 }
 0x1cd   :  { %1540 = vst.msk [vmem:[#allocation2 + $0x20] sm:$0xff] %vm1535_vm4, %v1376_v7  ;;  %1541 = vst.msk [vmem:[#allocation2 + $0x28] sm:$0xff] %vm1535_vm4, %v1378_v8 }
 0x1ce   :  { %1716 = vrot.lane.b32.xlu0 %v6924_v63, %s7529_s29  ;;  %1718 = vrot.lane.b32.xlu1 %v6925_v0, %s7529_s29  ;;  %v6956_v63 = vld [vmem:[%s11890_s0 + $0x212] sm:$0xff]  ;;  %v6957_v0 = vld [vmem:[%s11890_s0 + $0x21a] sm:$0xff] }
 0x1d0   :  { %v1380_v59 = vpop.permute.xlu0 %1379  ;;  %v1382_v60 = vpop.permute.xlu1 %1381 }
 0x1d1   :  { %1542 = vst.msk [vmem:[#allocation2 + $0x30] sm:$0xff] %vm1535_vm4, %v1380_v59  ;;  %1543 = vst.msk [vmem:[#allocation2 + $0x38] sm:$0xff] %vm1535_vm4, %v1382_v60 }
 0x1d2   :  { %1720 = vrot.lane.b32.xlu0 %v6926_v16, %s7529_s29  ;;  %1722 = vrot.lane.b32.xlu1 %v6927_v17, %s7529_s29  ;;  %v6958_v16 = vld [vmem:[%s11890_s0 + $0x22a] sm:$0xff]  ;;  %v6959_v17 = vld [vmem:[%s11890_s0 + $0x232] sm:$0xff] }
 0x1d4   :  { %v1384_v11 = vpop.permute.xlu0 %1383  ;;  %v1386_v12 = vpop.permute.xlu1 %1385 }
 0x1d5   :  { %1544 = vst.msk [vmem:[#allocation2 + $0x40] sm:$0xff] %vm1535_vm4, %v1384_v11  ;;  %1545 = vst.msk [vmem:[#allocation2 + $0x48] sm:$0xff] %vm1535_vm4, %v1386_v12 }
 0x1d6   :  { %1724 = vrot.lane.b32.xlu0 %v6928_v3, %s7529_s29  ;;  %1726 = vrot.lane.b32.xlu1 %v6929_v4, %s7529_s29  ;;  %v6960_v3 = vld [vmem:[%s11890_s0 + $0x242] sm:$0xff]  ;;  %v6961_v4 = vld [vmem:[%s11890_s0 + $0x24a] sm:$0xff] }
 0x1d8   :  { %v1388_v14 = vpop.permute.xlu0 %1387  ;;  %v1390_v18 = vpop.permute.xlu1 %1389 }
 0x1d9   :  { %1546 = vst.msk [vmem:[#allocation2 + $0x50] sm:$0xff] %vm1535_vm4, %v1388_v14  ;;  %1547 = vst.msk [vmem:[#allocation2 + $0x58] sm:$0xff] %vm1535_vm4, %v1390_v18 }
 0x1da   :  { %1728 = vrot.lane.b32.xlu0 %v6930_v29, %s7529_s29  ;;  %1730 = vrot.lane.b32.xlu1 %v6931_v30, %s7529_s29  ;;  %v6962_v29 = vld [vmem:[%s11890_s0 + $0x25a] sm:$0xff]  ;;  %v6963_v30 = vld [vmem:[%s11890_s0 + $0x262] sm:$0xff] }
 0x1dc   :  { %v1392_v21 = vpop.permute.xlu0 %1391  ;;  %v1394_v24 = vpop.permute.xlu1 %1393 }
 0x1dd   :  { %1548 = vst.msk [vmem:[#allocation2 + $0x60] sm:$0xff] %vm1535_vm4, %v1392_v21  ;;  %1549 = vst.msk [vmem:[#allocation2 + $0x68] sm:$0xff] %vm1535_vm4, %v1394_v24 }
 0x1de   :  { %1732 = vrot.lane.b32.xlu0 %v6932_v19, %s7529_s29  ;;  %1734 = vrot.lane.b32.xlu1 %v6933_v20, %s7529_s29  ;;  %v6964_v19 = vld [vmem:[%s11890_s0 + $0x272] sm:$0xff]  ;;  %v6965_v20 = vld [vmem:[%s11890_s0 + $0x27a] sm:$0xff] }
 0x1e0   :  { %v1396_v27 = vpop.permute.xlu0 %1395  ;;  %v1398_v28 = vpop.permute.xlu1 %1397 }
 0x1e1   :  { %1550 = vst.msk [vmem:[#allocation2 + $0x70] sm:$0xff] %vm1535_vm4, %v1396_v27  ;;  %1551 = vst.msk [vmem:[#allocation2 + $0x78] sm:$0xff] %vm1535_vm4, %v1398_v28 }
 0x1e2   :  { %1736 = vrot.lane.b32.xlu0 %v6934_v25, %s7529_s29  ;;  %1738 = vrot.lane.b32.xlu1 %v6935_v26, %s7529_s29  ;;  %v6966_v25 = vld [vmem:[%s11890_s0 + $0x28a] sm:$0xff]  ;;  %v6967_v26 = vld [vmem:[%s11890_s0 + $0x292] sm:$0xff] }
 0x1e4   :  { %v1400_v33 = vpop.permute.xlu0 %1399  ;;  %v1402_v34 = vpop.permute.xlu1 %1401 }
 0x1e5   :  { %1552 = vst.msk [vmem:[#allocation2 + $0x80] sm:$0xff] %vm1535_vm4, %v1400_v33  ;;  %1553 = vst.msk [vmem:[#allocation2 + $0x88] sm:$0xff] %vm1535_vm4, %v1402_v34 }
 0x1e6   :  { %1740 = vrot.lane.b32.xlu0 %v6936_v31, %s7529_s29  ;;  %1742 = vrot.lane.b32.xlu1 %v6937_v32, %s7529_s29  ;;  %v6968_v31 = vld [vmem:[%s11890_s0 + $0x2a2] sm:$0xff]  ;;  %v6969_v32 = vld [vmem:[%s11890_s0 + $0x2aa] sm:$0xff] }
 0x1e8   :  { %v1404_v39 = vpop.permute.xlu0 %1403  ;;  %v1406_v40 = vpop.permute.xlu1 %1405 }
 0x1e9   :  { %1554 = vst.msk [vmem:[#allocation2 + $0x90] sm:$0xff] %vm1535_vm4, %v1404_v39  ;;  %1555 = vst.msk [vmem:[#allocation2 + $0x98] sm:$0xff] %vm1535_vm4, %v1406_v40 }
 0x1ea   :  { %1744 = vrot.lane.b32.xlu0 %v6938_v35, %s7529_s29  ;;  %1746 = vrot.lane.b32.xlu1 %v6939_v37, %s7529_s29  ;;  %v6970_v35 = vld [vmem:[%s11890_s0 + $0x2ba] sm:$0xff]  ;;  %v6971_v37 = vld [vmem:[%s11890_s0 + $0x2c2] sm:$0xff] }
 0x1ec   :  { %v1408_v43 = vpop.permute.xlu0 %1407  ;;  %v1410_v44 = vpop.permute.xlu1 %1409 }
 0x1ed   :  { %1556 = vst.msk [vmem:[#allocation2 + $0xa0] sm:$0xff] %vm1535_vm4, %v1408_v43  ;;  %1557 = vst.msk [vmem:[#allocation2 + $0xa8] sm:$0xff] %vm1535_vm4, %v1410_v44 }
 0x1ee   :  { %1748 = vrot.lane.b32.xlu0 %v6940_v41, %s7529_s29  ;;  %1750 = vrot.lane.b32.xlu1 %v6941_v42, %s7529_s29  ;;  %v6972_v41 = vld [vmem:[%s11890_s0 + $0x2d2] sm:$0xff]  ;;  %v6973_v42 = vld [vmem:[%s11890_s0 + $0x2da] sm:$0xff] }
 0x1f0   :  { %v1412_v49 = vpop.permute.xlu0 %1411  ;;  %v1414_v50 = vpop.permute.xlu1 %1413 }
 0x1f1   :  { %1558 = vst.msk [vmem:[#allocation2 + $0xb0] sm:$0xff] %vm1535_vm4, %v1412_v49  ;;  %1559 = vst.msk [vmem:[#allocation2 + $0xb8] sm:$0xff] %vm1535_vm4, %v1414_v50 }
 0x1f2   :  { %1752 = vrot.lane.b32.xlu0 %v6942_v47, %s7529_s29  ;;  %1754 = vrot.lane.b32.xlu1 %v6943_v48, %s7529_s29  ;;  %v6974_v47 = vld [vmem:[%s11890_s0 + $0x30] sm:$0xff]  ;;  %v6975_v48 = vld [vmem:[%s11890_s0 + $0x38] sm:$0xff] }
 0x1f4   :  { %v1416_v53 = vpop.permute.xlu0 %1415  ;;  %v1418_v54 = vpop.permute.xlu1 %1417 }
 0x1f5   :  { %1560 = vst.msk [vmem:[#allocation2 + $0xc0] sm:$0xff] %vm1535_vm4, %v1416_v53  ;;  %1561 = vst.msk [vmem:[#allocation2 + $0xc8] sm:$0xff] %vm1535_vm4, %v1418_v54 }
 0x1f6   :  { %1756 = vrot.lane.b32.xlu0 %v6944_v45, %s7529_s29  ;;  %1758 = vrot.lane.b32.xlu1 %v6945_v46, %s7529_s29  ;;  %v6976_v45 = vld [vmem:[%s11890_s0 + $0x48] sm:$0xff]  ;;  %v6977_v46 = vld [vmem:[%s11890_s0 + $0x50] sm:$0xff] }
 0x1f8   :  { %v1420_v61 = vpop.permute.xlu0 %1419  ;;  %v1422_v62 = vpop.permute.xlu1 %1421 }
 0x1f9   :  { %1562 = vst.msk [vmem:[#allocation2 + $0xd0] sm:$0xff] %vm1535_vm4, %v1420_v61  ;;  %1563 = vst.msk [vmem:[#allocation2 + $0xd8] sm:$0xff] %vm1535_vm4, %v1422_v62 }
 0x1fa   :  { %1760 = vrot.lane.b32.xlu0 %v6946_v57, %s7529_s29  ;;  %1762 = vrot.lane.b32.xlu1 %v6947_v58, %s7529_s29  ;;  %v6978_v57 = vld [vmem:[%s11890_s0 + $0x60] sm:$0xff]  ;;  %v6979_v58 = vld [vmem:[%s11890_s0 + $0x68] sm:$0xff] }
 0x1fc   :  { %v1424_v5 = vpop.permute.xlu0 %1423  ;;  %v1426_v6 = vpop.permute.xlu1 %1425 }
 0x1fd   :  { %1564 = vst.msk [vmem:[#allocation2 + $0xe0] sm:$0xff] %vm1535_vm4, %v1424_v5  ;;  %1565 = vst.msk [vmem:[#allocation2 + $0xe8] sm:$0xff] %vm1535_vm4, %v1426_v6 }
 0x1fe   :  { %1764 = vrot.lane.b32.xlu0 %v6948_v1, %s7529_s29  ;;  %1766 = vrot.lane.b32.xlu1 %v6949_v2, %s7529_s29  ;;  %v6980_v1 = vld [vmem:[%s11890_s0 + $0x78] sm:$0xff]  ;;  %v6981_v2 = vld [vmem:[%s11890_s0 + $0x80] sm:$0xff] }
 0x200   :  { %v1428_v13 = vpop.permute.xlu0 %1427  ;;  %v1430_v15 = vpop.permute.xlu1 %1429 }
 0x201   :  { %1566 = vst.msk [vmem:[#allocation2 + $0xf0] sm:$0xff] %vm1535_vm4, %v1428_v13  ;;  %1567 = vst.msk [vmem:[#allocation2 + $0xf8] sm:$0xff] %vm1535_vm4, %v1430_v15 }
 0x202   :  { %1768 = vrot.lane.b32.xlu0 %v6950_v9, %s7529_s29  ;;  %1770 = vrot.lane.b32.xlu1 %v6951_v10, %s7529_s29  ;;  %v6982_v9 = vld [vmem:[%s11890_s0 + $0x90] sm:$0xff]  ;;  %v6983_v10 = vld [vmem:[%s11890_s0 + $0x98] sm:$0xff] }
 0x204   :  { %v1432_v36 = vpop.permute.xlu0 %1431  ;;  %v1434_v38 = vpop.permute.xlu1 %1433 }
 0x205   :  { %1568 = vst.msk [vmem:[#allocation2 + $0x100] sm:$0xff] %vm1535_vm4, %v1432_v36  ;;  %1569 = vst.msk [vmem:[#allocation2 + $0x108] sm:$0xff] %vm1535_vm4, %v1434_v38 }
 0x206   :  { %1772 = vrot.lane.b32.xlu0 %v6952_v22, %s7529_s29  ;;  %1774 = vrot.lane.b32.xlu1 %v6953_v23, %s7529_s29  ;;  %v6984_v22 = vld [vmem:[%s11890_s0 + $0xa8] sm:$0xff]  ;;  %v6985_v23 = vld [vmem:[%s11890_s0 + $0xb0] sm:$0xff] }
 0x208   :  { %v1436_v55 = vpop.permute.xlu0 %1435  ;;  %v1438_v56 = vpop.permute.xlu1 %1437 }
 0x209   :  { %1570 = vst.msk [vmem:[#allocation2 + $0x110] sm:$0xff] %vm1535_vm4, %v1436_v55  ;;  %1571 = vst.msk [vmem:[#allocation2 + $0x118] sm:$0xff] %vm1535_vm4, %v1438_v56 }
 0x20a   :  { %1776 = vrot.lane.b32.xlu0 %v6954_v51, %s7529_s29  ;;  %1778 = vrot.lane.b32.xlu1 %v6955_v52, %s7529_s29  ;;  %v6986_v51 = vld [vmem:[%s11890_s0 + $0xc0] sm:$0xff]  ;;  %v6987_v52 = vld [vmem:[%s11890_s0 + $0xc8] sm:$0xff] }
 0x20c   :  { %v1440_v7 = vpop.permute.xlu0 %1439  ;;  %v1442_v8 = vpop.permute.xlu1 %1441 }
 0x20d   :  { %1572 = vst.msk [vmem:[#allocation2 + $0x120] sm:$0xff] %vm1535_vm4, %v1440_v7  ;;  %1573 = vst.msk [vmem:[#allocation2 + $0x128] sm:$0xff] %vm1535_vm4, %v1442_v8 }
 0x20e   :  { %1780 = vrot.lane.b32.xlu0 %v6956_v63, %s7529_s29  ;;  %1782 = vrot.lane.b32.xlu1 %v6957_v0, %s7529_s29  ;;  %v6988_v63 = vld [vmem:[%s11890_s0 + $0xd8] sm:$0xff]  ;;  %v6989_v0 = vld [vmem:[%s11890_s0 + $0xe0] sm:$0xff] }
 0x210   :  { %v1444_v59 = vpop.permute.xlu0 %1443  ;;  %v1446_v60 = vpop.permute.xlu1 %1445 }
 0x211   :  { %1574 = vst.msk [vmem:[#allocation2 + $0x130] sm:$0xff] %vm1535_vm4, %v1444_v59  ;;  %1575 = vst.msk [vmem:[#allocation2 + $0x138] sm:$0xff] %vm1535_vm4, %v1446_v60 }
 0x212   :  { %1784 = vrot.lane.b32.xlu0 %v6958_v16, %s7529_s29  ;;  %1786 = vrot.lane.b32.xlu1 %v6959_v17, %s7529_s29  ;;  %v6990_v16 = vld [vmem:[%s11890_s0 + $0xf0] sm:$0xff]  ;;  %v6991_v17 = vld [vmem:[%s11890_s0 + $0xf8] sm:$0xff] }
 0x214   :  { %v1448_v11 = vpop.permute.xlu0 %1447  ;;  %v1450_v12 = vpop.permute.xlu1 %1449 }
 0x215   :  { %1576 = vst.msk [vmem:[#allocation2 + $0x140] sm:$0xff] %vm1535_vm4, %v1448_v11  ;;  %1577 = vst.msk [vmem:[#allocation2 + $0x148] sm:$0xff] %vm1535_vm4, %v1450_v12 }
 0x216   :  { %1788 = vrot.lane.b32.xlu0 %v6960_v3, %s7529_s29  ;;  %1790 = vrot.lane.b32.xlu1 %v6961_v4, %s7529_s29  ;;  %v6992_v3 = vld [vmem:[%s11890_s0 + $0x108] sm:$0xff]  ;;  %v6993_v4 = vld [vmem:[%s11890_s0 + $0x110] sm:$0xff] }
 0x218   :  { %v1452_v14 = vpop.permute.xlu0 %1451  ;;  %v1454_v18 = vpop.permute.xlu1 %1453 }
 0x219   :  { %1578 = vst.msk [vmem:[#allocation2 + $0x150] sm:$0xff] %vm1535_vm4, %v1452_v14  ;;  %1579 = vst.msk [vmem:[#allocation2 + $0x158] sm:$0xff] %vm1535_vm4, %v1454_v18 }
 0x21a   :  { %1792 = vrot.lane.b32.xlu0 %v6962_v29, %s7529_s29  ;;  %1794 = vrot.lane.b32.xlu1 %v6963_v30, %s7529_s29  ;;  %v6994_v29 = vld [vmem:[%s11890_s0 + $0x120] sm:$0xff]  ;;  %v6995_v30 = vld [vmem:[%s11890_s0 + $0x128] sm:$0xff] }
 0x21c   :  { %v1456_v21 = vpop.permute.xlu0 %1455  ;;  %v1458_v24 = vpop.permute.xlu1 %1457 }
 0x21d   :  { %1580 = vst.msk [vmem:[#allocation2 + $0x160] sm:$0xff] %vm1535_vm4, %v1456_v21  ;;  %1581 = vst.msk [vmem:[#allocation2 + $0x168] sm:$0xff] %vm1535_vm4, %v1458_v24 }
 0x21e   :  { %1796 = vrot.lane.b32.xlu0 %v6964_v19, %s7529_s29  ;;  %1798 = vrot.lane.b32.xlu1 %v6965_v20, %s7529_s29  ;;  %v6996_v19 = vld [vmem:[%s11890_s0 + $0x138] sm:$0xff]  ;;  %v6997_v20 = vld [vmem:[%s11890_s0 + $0x140] sm:$0xff] }
 0x220   :  { %v1460_v27 = vpop.permute.xlu0 %1459  ;;  %v1462_v28 = vpop.permute.xlu1 %1461 }
 0x221   :  { %1582 = vst.msk [vmem:[#allocation2 + $0x170] sm:$0xff] %vm1535_vm4, %v1460_v27  ;;  %1583 = vst.msk [vmem:[#allocation2 + $0x178] sm:$0xff] %vm1535_vm4, %v1462_v28 }
 0x222   :  { %1800 = vrot.lane.b32.xlu0 %v6966_v25, %s7529_s29  ;;  %1802 = vrot.lane.b32.xlu1 %v6967_v26, %s7529_s29  ;;  %v6998_v25 = vld [vmem:[%s11890_s0 + $0x150] sm:$0xff]  ;;  %v6999_v26 = vld [vmem:[%s11890_s0 + $0x158] sm:$0xff] }
 0x224   :  { %v1464_v33 = vpop.permute.xlu0 %1463  ;;  %v1466_v34 = vpop.permute.xlu1 %1465 }
 0x225   :  { %1584 = vst.msk [vmem:[#allocation2 + $0x180] sm:$0xff] %vm1535_vm4, %v1464_v33  ;;  %1585 = vst.msk [vmem:[#allocation2 + $0x188] sm:$0xff] %vm1535_vm4, %v1466_v34 }
 0x226   :  { %1804 = vrot.lane.b32.xlu0 %v6968_v31, %s7529_s29  ;;  %1806 = vrot.lane.b32.xlu1 %v6969_v32, %s7529_s29  ;;  %v7000_v31 = vld [vmem:[%s11890_s0 + $0x168] sm:$0xff]  ;;  %v7001_v32 = vld [vmem:[%s11890_s0 + $0x170] sm:$0xff] }
 0x228   :  { %v1468_v39 = vpop.permute.xlu0 %1467  ;;  %v1470_v40 = vpop.permute.xlu1 %1469 }
 0x229   :  { %1586 = vst.msk [vmem:[#allocation2 + $0x190] sm:$0xff] %vm1535_vm4, %v1468_v39  ;;  %1587 = vst.msk [vmem:[#allocation2 + $0x198] sm:$0xff] %vm1535_vm4, %v1470_v40 }
 0x22a   :  { %1808 = vrot.lane.b32.xlu0 %v6970_v35, %s7529_s29  ;;  %1810 = vrot.lane.b32.xlu1 %v6971_v37, %s7529_s29  ;;  %v7002_v35 = vld [vmem:[%s11890_s0 + $0x1b0] sm:$0xff]  ;;  %v7003_v37 = vld [vmem:[%s11890_s0 + $0x1b8] sm:$0xff] }
 0x22c   :  { %v1472_v43 = vpop.permute.xlu0 %1471  ;;  %v1474_v44 = vpop.permute.xlu1 %1473 }
 0x22d   :  { %1588 = vst.msk [vmem:[#allocation2 + $0x1a0] sm:$0xff] %vm1535_vm4, %v1472_v43  ;;  %1589 = vst.msk [vmem:[#allocation2 + $0x1a8] sm:$0xff] %vm1535_vm4, %v1474_v44 }
 0x22e   :  { %1812 = vrot.lane.b32.xlu0 %v6972_v41, %s7529_s29  ;;  %1814 = vrot.lane.b32.xlu1 %v6973_v42, %s7529_s29  ;;  %v7004_v41 = vld [vmem:[%s11890_s0 + $0x1c8] sm:$0xff]  ;;  %v7005_v42 = vld [vmem:[%s11890_s0 + $0x1d0] sm:$0xff] }
 0x230   :  { %v1476_v49 = vpop.permute.xlu0 %1475  ;;  %v1478_v50 = vpop.permute.xlu1 %1477 }
 0x231   :  { %1590 = vst.msk [vmem:[#allocation2 + $0x1b0] sm:$0xff] %vm1535_vm4, %v1476_v49  ;;  %1591 = vst.msk [vmem:[#allocation2 + $0x1b8] sm:$0xff] %vm1535_vm4, %v1478_v50  ;;  %vm4976_vm4 = vcmask 392512  }
 0x232   :  { %2042 = vrot.lane.b32.xlu0 %v6974_v47, %s7530_s13  ;;  %2044 = vrot.lane.b32.xlu1 %v6975_v48, %s7530_s13  ;;  %v7006_v47 = vld [vmem:[%s11890_s0 + $0x1e0] sm:$0xff]  ;;  %v7007_v48 = vld [vmem:[%s11890_s0 + $0x1e8] sm:$0xff] }
 0x234   :  { %v1705_v53 = vpop.permute.xlu0 %1704  ;;  %v1707_v54 = vpop.permute.xlu1 %1706 }
 0x235   :  { %1873 = vst.msk [vmem:[#allocation2] sm:$0xff] %vm1872_vm5, %v1705_v53  ;;  %1874 = vst.msk [vmem:[#allocation2 + $0x8] sm:$0xff] %vm1872_vm5, %v1707_v54 }
 0x236   :  { %2046 = vrot.lane.b32.xlu0 %v6976_v45, %s7530_s13  ;;  %2048 = vrot.lane.b32.xlu1 %v6977_v46, %s7530_s13  ;;  %v7008_v45 = vld [vmem:[%s11890_s0 + $0x1f8] sm:$0xff]  ;;  %v7009_v46 = vld [vmem:[%s11890_s0 + $0x200] sm:$0xff] }
 0x238   :  { %v1709_v61 = vpop.permute.xlu0 %1708  ;;  %v1711_v62 = vpop.permute.xlu1 %1710 }
 0x239   :  { %1875 = vst.msk [vmem:[#allocation2 + $0x10] sm:$0xff] %vm1872_vm5, %v1709_v61  ;;  %1876 = vst.msk [vmem:[#allocation2 + $0x18] sm:$0xff] %vm1872_vm5, %v1711_v62 }
 0x23a   :  { %2050 = vrot.lane.b32.xlu0 %v6978_v57, %s7530_s13  ;;  %2052 = vrot.lane.b32.xlu1 %v6979_v58, %s7530_s13  ;;  %v7010_v57 = vld [vmem:[%s11890_s0 + $0x210] sm:$0xff]  ;;  %v7011_v58 = vld [vmem:[%s11890_s0 + $0x218] sm:$0xff] }
 0x23c   :  { %v1713_v5 = vpop.permute.xlu0 %1712  ;;  %v1715_v6 = vpop.permute.xlu1 %1714 }
 0x23d   :  { %1877 = vst.msk [vmem:[#allocation2 + $0x20] sm:$0xff] %vm1872_vm5, %v1713_v5  ;;  %1878 = vst.msk [vmem:[#allocation2 + $0x28] sm:$0xff] %vm1872_vm5, %v1715_v6 }
 0x23e   :  { %2054 = vrot.lane.b32.xlu0 %v6980_v1, %s7530_s13  ;;  %2056 = vrot.lane.b32.xlu1 %v6981_v2, %s7530_s13  ;;  %v7012_v1 = vld [vmem:[%s11890_s0 + $0x228] sm:$0xff]  ;;  %v7013_v2 = vld [vmem:[%s11890_s0 + $0x230] sm:$0xff] }
 0x240   :  { %v1717_v13 = vpop.permute.xlu0 %1716  ;;  %v1719_v15 = vpop.permute.xlu1 %1718 }
 0x241   :  { %1879 = vst.msk [vmem:[#allocation2 + $0x30] sm:$0xff] %vm1872_vm5, %v1717_v13  ;;  %1880 = vst.msk [vmem:[#allocation2 + $0x38] sm:$0xff] %vm1872_vm5, %v1719_v15 }
 0x242   :  { %2058 = vrot.lane.b32.xlu0 %v6982_v9, %s7530_s13  ;;  %2060 = vrot.lane.b32.xlu1 %v6983_v10, %s7530_s13  ;;  %v7014_v9 = vld [vmem:[%s11890_s0 + $0x240] sm:$0xff]  ;;  %v7015_v10 = vld [vmem:[%s11890_s0 + $0x248] sm:$0xff] }
 0x244   :  { %v1721_v36 = vpop.permute.xlu0 %1720  ;;  %v1723_v38 = vpop.permute.xlu1 %1722 }
 0x245   :  { %1881 = vst.msk [vmem:[#allocation2 + $0x40] sm:$0xff] %vm1872_vm5, %v1721_v36  ;;  %1882 = vst.msk [vmem:[#allocation2 + $0x48] sm:$0xff] %vm1872_vm5, %v1723_v38 }
 0x246   :  { %2062 = vrot.lane.b32.xlu0 %v6984_v22, %s7530_s13  ;;  %2064 = vrot.lane.b32.xlu1 %v6985_v23, %s7530_s13  ;;  %v7016_v22 = vld [vmem:[%s11890_s0 + $0x258] sm:$0xff]  ;;  %v7017_v23 = vld [vmem:[%s11890_s0 + $0x260] sm:$0xff] }
 0x248   :  { %v1725_v55 = vpop.permute.xlu0 %1724  ;;  %v1727_v56 = vpop.permute.xlu1 %1726 }
 0x249   :  { %1883 = vst.msk [vmem:[#allocation2 + $0x50] sm:$0xff] %vm1872_vm5, %v1725_v55  ;;  %1884 = vst.msk [vmem:[#allocation2 + $0x58] sm:$0xff] %vm1872_vm5, %v1727_v56 }
 0x24a   :  { %2066 = vrot.lane.b32.xlu0 %v6986_v51, %s7530_s13  ;;  %2068 = vrot.lane.b32.xlu1 %v6987_v52, %s7530_s13  ;;  %v7018_v51 = vld [vmem:[%s11890_s0 + $0x270] sm:$0xff]  ;;  %v7019_v52 = vld [vmem:[%s11890_s0 + $0x278] sm:$0xff] }
 0x24c   :  { %v1729_v7 = vpop.permute.xlu0 %1728  ;;  %v1731_v8 = vpop.permute.xlu1 %1730 }
 0x24d   :  { %1885 = vst.msk [vmem:[#allocation2 + $0x60] sm:$0xff] %vm1872_vm5, %v1729_v7  ;;  %1886 = vst.msk [vmem:[#allocation2 + $0x68] sm:$0xff] %vm1872_vm5, %v1731_v8 }
 0x24e   :  { %2070 = vrot.lane.b32.xlu0 %v6988_v63, %s7530_s13  ;;  %2072 = vrot.lane.b32.xlu1 %v6989_v0, %s7530_s13  ;;  %v7020_v63 = vld [vmem:[%s11890_s0 + $0x288] sm:$0xff]  ;;  %v7021_v0 = vld [vmem:[%s11890_s0 + $0x290] sm:$0xff] }
 0x250   :  { %v1733_v59 = vpop.permute.xlu0 %1732  ;;  %v1735_v60 = vpop.permute.xlu1 %1734 }
 0x251   :  { %1887 = vst.msk [vmem:[#allocation2 + $0x70] sm:$0xff] %vm1872_vm5, %v1733_v59  ;;  %1888 = vst.msk [vmem:[#allocation2 + $0x78] sm:$0xff] %vm1872_vm5, %v1735_v60 }
 0x252   :  { %2074 = vrot.lane.b32.xlu0 %v6990_v16, %s7530_s13  ;;  %2076 = vrot.lane.b32.xlu1 %v6991_v17, %s7530_s13  ;;  %v7022_v16 = vld [vmem:[%s11890_s0 + $0x2a0] sm:$0xff]  ;;  %v7023_v17 = vld [vmem:[%s11890_s0 + $0x2a8] sm:$0xff] }
 0x254   :  { %v1737_v11 = vpop.permute.xlu0 %1736  ;;  %v1739_v12 = vpop.permute.xlu1 %1738 }
 0x255   :  { %1889 = vst.msk [vmem:[#allocation2 + $0x80] sm:$0xff] %vm1872_vm5, %v1737_v11  ;;  %1890 = vst.msk [vmem:[#allocation2 + $0x88] sm:$0xff] %vm1872_vm5, %v1739_v12 }
 0x256   :  { %2078 = vrot.lane.b32.xlu0 %v6992_v3, %s7530_s13  ;;  %2080 = vrot.lane.b32.xlu1 %v6993_v4, %s7530_s13  ;;  %v7024_v3 = vld [vmem:[%s11890_s0 + $0x2b8] sm:$0xff]  ;;  %v7025_v4 = vld [vmem:[%s11890_s0 + $0x2c0] sm:$0xff] }
 0x258   :  { %v1741_v14 = vpop.permute.xlu0 %1740  ;;  %v1743_v18 = vpop.permute.xlu1 %1742 }
 0x259   :  { %1891 = vst.msk [vmem:[#allocation2 + $0x90] sm:$0xff] %vm1872_vm5, %v1741_v14  ;;  %1892 = vst.msk [vmem:[#allocation2 + $0x98] sm:$0xff] %vm1872_vm5, %v1743_v18 }
 0x25a   :  { %2082 = vrot.lane.b32.xlu0 %v6994_v29, %s7530_s13  ;;  %2084 = vrot.lane.b32.xlu1 %v6995_v30, %s7530_s13  ;;  %v7026_v29 = vld [vmem:[%s11890_s0 + $0x2d0] sm:$0xff]  ;;  %v7027_v30 = vld [vmem:[%s11890_s0 + $0x2d8] sm:$0xff] }
 0x25c   :  { %v1745_v21 = vpop.permute.xlu0 %1744  ;;  %v1747_v24 = vpop.permute.xlu1 %1746 }
 0x25d   :  { %1893 = vst.msk [vmem:[#allocation2 + $0xa0] sm:$0xff] %vm1872_vm5, %v1745_v21  ;;  %1894 = vst.msk [vmem:[#allocation2 + $0xa8] sm:$0xff] %vm1872_vm5, %v1747_v24 }
 0x25e   :  { %2086 = vrot.lane.b32.xlu0 %v6996_v19, %s7530_s13  ;;  %2088 = vrot.lane.b32.xlu1 %v6997_v20, %s7530_s13  ;;  %v7028_v19 = vld [vmem:[%s11890_s0 + $0x2e8] sm:$0xff]  ;;  %v7029_v20 = vld [vmem:[%s11890_s0 + $0x2f0] sm:$0xff] }
 0x260   :  { %v1749_v27 = vpop.permute.xlu0 %1748  ;;  %v1751_v28 = vpop.permute.xlu1 %1750 }
 0x261   :  { %1895 = vst.msk [vmem:[#allocation2 + $0xb0] sm:$0xff] %vm1872_vm5, %v1749_v27  ;;  %1896 = vst.msk [vmem:[#allocation2 + $0xb8] sm:$0xff] %vm1872_vm5, %v1751_v28 }
 0x262   :  { %2090 = vrot.lane.b32.xlu0 %v6998_v25, %s7530_s13  ;;  %2092 = vrot.lane.b32.xlu1 %v6999_v26, %s7530_s13  ;;  %v7030_v25 = vld [vmem:[%s11890_s0 + $0x31] sm:$0xff]  ;;  %v7031_v26 = vld [vmem:[%s11890_s0 + $0x39] sm:$0xff] }
 0x264   :  { %v1753_v33 = vpop.permute.xlu0 %1752  ;;  %v1755_v34 = vpop.permute.xlu1 %1754 }
 0x265   :  { %1897 = vst.msk [vmem:[#allocation2 + $0xc0] sm:$0xff] %vm1872_vm5, %v1753_v33  ;;  %1898 = vst.msk [vmem:[#allocation2 + $0xc8] sm:$0xff] %vm1872_vm5, %v1755_v34 }
 0x266   :  { %2094 = vrot.lane.b32.xlu0 %v7000_v31, %s7530_s13  ;;  %2096 = vrot.lane.b32.xlu1 %v7001_v32, %s7530_s13  ;;  %v7032_v31 = vld [vmem:[%s11890_s0 + $0x49] sm:$0xff]  ;;  %v7033_v32 = vld [vmem:[%s11890_s0 + $0x51] sm:$0xff] }
 0x268   :  { %v1757_v39 = vpop.permute.xlu0 %1756  ;;  %v1759_v40 = vpop.permute.xlu1 %1758 }
 0x269   :  { %1899 = vst.msk [vmem:[#allocation2 + $0xd0] sm:$0xff] %vm1872_vm5, %v1757_v39  ;;  %1900 = vst.msk [vmem:[#allocation2 + $0xd8] sm:$0xff] %vm1872_vm5, %v1759_v40 }
 0x26a   :  { %2098 = vrot.lane.b32.xlu0 %v7002_v35, %s7530_s13  ;;  %2100 = vrot.lane.b32.xlu1 %v7003_v37, %s7530_s13  ;;  %v7034_v35 = vld [vmem:[%s11890_s0 + $0x61] sm:$0xff]  ;;  %v7035_v37 = vld [vmem:[%s11890_s0 + $0x69] sm:$0xff] }
 0x26c   :  { %v1761_v43 = vpop.permute.xlu0 %1760  ;;  %v1763_v44 = vpop.permute.xlu1 %1762 }
 0x26d   :  { %1901 = vst.msk [vmem:[#allocation2 + $0xe0] sm:$0xff] %vm1872_vm5, %v1761_v43  ;;  %1902 = vst.msk [vmem:[#allocation2 + $0xe8] sm:$0xff] %vm1872_vm5, %v1763_v44 }
 0x26e   :  { %2102 = vrot.lane.b32.xlu0 %v7004_v41, %s7530_s13  ;;  %2104 = vrot.lane.b32.xlu1 %v7005_v42, %s7530_s13  ;;  %v7036_v41 = vld [vmem:[%s11890_s0 + $0x79] sm:$0xff]  ;;  %v7037_v42 = vld [vmem:[%s11890_s0 + $0x81] sm:$0xff] }
 0x270   :  { %v1765_v49 = vpop.permute.xlu0 %1764  ;;  %v1767_v50 = vpop.permute.xlu1 %1766 }
 0x271   :  { %1903 = vst.msk [vmem:[#allocation2 + $0xf0] sm:$0xff] %vm1872_vm5, %v1765_v49  ;;  %1904 = vst.msk [vmem:[#allocation2 + $0xf8] sm:$0xff] %vm1872_vm5, %v1767_v50 }
 0x272   :  { %2106 = vrot.lane.b32.xlu0 %v7006_v47, %s7530_s13  ;;  %2108 = vrot.lane.b32.xlu1 %v7007_v48, %s7530_s13  ;;  %v7038_v47 = vld [vmem:[%s11890_s0 + $0x91] sm:$0xff]  ;;  %v7039_v48 = vld [vmem:[%s11890_s0 + $0x99] sm:$0xff] }
 0x274   :  { %v1769_v53 = vpop.permute.xlu0 %1768  ;;  %v1771_v54 = vpop.permute.xlu1 %1770 }
 0x275   :  { %1905 = vst.msk [vmem:[#allocation2 + $0x100] sm:$0xff] %vm1872_vm5, %v1769_v53  ;;  %1906 = vst.msk [vmem:[#allocation2 + $0x108] sm:$0xff] %vm1872_vm5, %v1771_v54 }
 0x276   :  { %2110 = vrot.lane.b32.xlu0 %v7008_v45, %s7530_s13  ;;  %2112 = vrot.lane.b32.xlu1 %v7009_v46, %s7530_s13  ;;  %v7040_v45 = vld [vmem:[%s11890_s0 + $0xa9] sm:$0xff]  ;;  %v7041_v46 = vld [vmem:[%s11890_s0 + $0xb1] sm:$0xff] }
 0x278   :  { %v1773_v61 = vpop.permute.xlu0 %1772  ;;  %v1775_v62 = vpop.permute.xlu1 %1774 }
 0x279   :  { %1907 = vst.msk [vmem:[#allocation2 + $0x110] sm:$0xff] %vm1872_vm5, %v1773_v61  ;;  %1908 = vst.msk [vmem:[#allocation2 + $0x118] sm:$0xff] %vm1872_vm5, %v1775_v62 }
 0x27a   :  { %2114 = vrot.lane.b32.xlu0 %v7010_v57, %s7530_s13  ;;  %2116 = vrot.lane.b32.xlu1 %v7011_v58, %s7530_s13  ;;  %v7042_v57 = vld [vmem:[%s11890_s0 + $0xc1] sm:$0xff]  ;;  %v7043_v58 = vld [vmem:[%s11890_s0 + $0xc9] sm:$0xff] }
 0x27c   :  { %v1777_v5 = vpop.permute.xlu0 %1776  ;;  %v1779_v6 = vpop.permute.xlu1 %1778 }
 0x27d   :  { %1909 = vst.msk [vmem:[#allocation2 + $0x120] sm:$0xff] %vm1872_vm5, %v1777_v5  ;;  %1910 = vst.msk [vmem:[#allocation2 + $0x128] sm:$0xff] %vm1872_vm5, %v1779_v6 }
 0x27e   :  { %2118 = vrot.lane.b32.xlu0 %v7012_v1, %s7530_s13  ;;  %2120 = vrot.lane.b32.xlu1 %v7013_v2, %s7530_s13  ;;  %v7044_v1 = vld [vmem:[%s11890_s0 + $0xd9] sm:$0xff]  ;;  %v7045_v2 = vld [vmem:[%s11890_s0 + $0xe1] sm:$0xff] }
 0x280   :  { %v1781_v13 = vpop.permute.xlu0 %1780  ;;  %v1783_v15 = vpop.permute.xlu1 %1782 }
 0x281   :  { %1911 = vst.msk [vmem:[#allocation2 + $0x130] sm:$0xff] %vm1872_vm5, %v1781_v13  ;;  %1912 = vst.msk [vmem:[#allocation2 + $0x138] sm:$0xff] %vm1872_vm5, %v1783_v15 }
 0x282   :  { %2122 = vrot.lane.b32.xlu0 %v7014_v9, %s7530_s13  ;;  %2124 = vrot.lane.b32.xlu1 %v7015_v10, %s7530_s13  ;;  %v7046_v9 = vld [vmem:[%s11890_s0 + $0xf1] sm:$0xff]  ;;  %v7047_v10 = vld [vmem:[%s11890_s0 + $0xf9] sm:$0xff] }
 0x284   :  { %v1785_v36 = vpop.permute.xlu0 %1784  ;;  %v1787_v38 = vpop.permute.xlu1 %1786 }
 0x285   :  { %1913 = vst.msk [vmem:[#allocation2 + $0x140] sm:$0xff] %vm1872_vm5, %v1785_v36  ;;  %1914 = vst.msk [vmem:[#allocation2 + $0x148] sm:$0xff] %vm1872_vm5, %v1787_v38 }
 0x286   :  { %2126 = vrot.lane.b32.xlu0 %v7016_v22, %s7530_s13  ;;  %2128 = vrot.lane.b32.xlu1 %v7017_v23, %s7530_s13  ;;  %v7048_v22 = vld [vmem:[%s11890_s0 + $0x109] sm:$0xff]  ;;  %v7049_v23 = vld [vmem:[%s11890_s0 + $0x111] sm:$0xff] }
 0x288   :  { %v1789_v55 = vpop.permute.xlu0 %1788  ;;  %v1791_v56 = vpop.permute.xlu1 %1790 }
 0x289   :  { %1915 = vst.msk [vmem:[#allocation2 + $0x150] sm:$0xff] %vm1872_vm5, %v1789_v55  ;;  %1916 = vst.msk [vmem:[#allocation2 + $0x158] sm:$0xff] %vm1872_vm5, %v1791_v56 }
 0x28a   :  { %2130 = vrot.lane.b32.xlu0 %v7018_v51, %s7530_s13  ;;  %2132 = vrot.lane.b32.xlu1 %v7019_v52, %s7530_s13  ;;  %v7050_v51 = vld [vmem:[%s11890_s0 + $0x121] sm:$0xff]  ;;  %v7051_v52 = vld [vmem:[%s11890_s0 + $0x129] sm:$0xff] }
 0x28c   :  { %v1793_v7 = vpop.permute.xlu0 %1792  ;;  %v1795_v8 = vpop.permute.xlu1 %1794 }
 0x28d   :  { %1917 = vst.msk [vmem:[#allocation2 + $0x160] sm:$0xff] %vm1872_vm5, %v1793_v7  ;;  %1918 = vst.msk [vmem:[#allocation2 + $0x168] sm:$0xff] %vm1872_vm5, %v1795_v8 }
 0x28e   :  { %2134 = vrot.lane.b32.xlu0 %v7020_v63, %s7530_s13  ;;  %2136 = vrot.lane.b32.xlu1 %v7021_v0, %s7530_s13  ;;  %v7052_v63 = vld [vmem:[%s11890_s0 + $0x139] sm:$0xff]  ;;  %v7053_v0 = vld [vmem:[%s11890_s0 + $0x141] sm:$0xff] }
 0x290   :  { %v1797_v59 = vpop.permute.xlu0 %1796  ;;  %v1799_v60 = vpop.permute.xlu1 %1798 }
 0x291   :  { %1919 = vst.msk [vmem:[#allocation2 + $0x170] sm:$0xff] %vm1872_vm5, %v1797_v59  ;;  %1920 = vst.msk [vmem:[#allocation2 + $0x178] sm:$0xff] %vm1872_vm5, %v1799_v60 }
 0x292   :  { %2138 = vrot.lane.b32.xlu0 %v7022_v16, %s7530_s13  ;;  %2140 = vrot.lane.b32.xlu1 %v7023_v17, %s7530_s13  ;;  %v7054_v16 = vld [vmem:[%s11890_s0 + $0x151] sm:$0xff]  ;;  %v7055_v17 = vld [vmem:[%s11890_s0 + $0x159] sm:$0xff] }
 0x294   :  { %v1801_v11 = vpop.permute.xlu0 %1800  ;;  %v1803_v12 = vpop.permute.xlu1 %1802 }
 0x295   :  { %1921 = vst.msk [vmem:[#allocation2 + $0x180] sm:$0xff] %vm1872_vm5, %v1801_v11  ;;  %1922 = vst.msk [vmem:[#allocation2 + $0x188] sm:$0xff] %vm1872_vm5, %v1803_v12 }
 0x296   :  { %2142 = vrot.lane.b32.xlu0 %v7024_v3, %s7530_s13  ;;  %2144 = vrot.lane.b32.xlu1 %v7025_v4, %s7530_s13  ;;  %v7056_v3 = vld [vmem:[%s11890_s0 + $0x169] sm:$0xff]  ;;  %v7057_v4 = vld [vmem:[%s11890_s0 + $0x171] sm:$0xff] }
 0x298   :  { %v1805_v14 = vpop.permute.xlu0 %1804  ;;  %v1807_v18 = vpop.permute.xlu1 %1806 }
 0x299   :  { %1923 = vst.msk [vmem:[#allocation2 + $0x190] sm:$0xff] %vm1872_vm5, %v1805_v14  ;;  %1924 = vst.msk [vmem:[#allocation2 + $0x198] sm:$0xff] %vm1872_vm5, %v1807_v18 }
 0x29a   :  { %2146 = vrot.lane.b32.xlu0 %v7026_v29, %s7530_s13  ;;  %2148 = vrot.lane.b32.xlu1 %v7027_v30, %s7530_s13  ;;  %v7058_v29 = vld [vmem:[%s11890_s0 + $0x1b1] sm:$0xff]  ;;  %v7059_v30 = vld [vmem:[%s11890_s0 + $0x1b9] sm:$0xff] }
 0x29c   :  { %v1809_v21 = vpop.permute.xlu0 %1808  ;;  %v1811_v24 = vpop.permute.xlu1 %1810 }
 0x29d   :  { %1925 = vst.msk [vmem:[#allocation2 + $0x1a0] sm:$0xff] %vm1872_vm5, %v1809_v21  ;;  %1926 = vst.msk [vmem:[#allocation2 + $0x1a8] sm:$0xff] %vm1872_vm5, %v1811_v24 }
 0x29e   :  { %2150 = vrot.lane.b32.xlu0 %v7028_v19, %s7530_s13  ;;  %2152 = vrot.lane.b32.xlu1 %v7029_v20, %s7530_s13  ;;  %v7060_v19 = vld [vmem:[%s11890_s0 + $0x1c9] sm:$0xff]  ;;  %v7061_v20 = vld [vmem:[%s11890_s0 + $0x1d1] sm:$0xff] }
 0x2a0   :  { %v1813_v27 = vpop.permute.xlu0 %1812  ;;  %v1815_v28 = vpop.permute.xlu1 %1814 }
 0x2a1   :  { %1927 = vst.msk [vmem:[#allocation2 + $0x1b0] sm:$0xff] %vm1872_vm5, %v1813_v27  ;;  %1928 = vst.msk [vmem:[#allocation2 + $0x1b8] sm:$0xff] %vm1872_vm5, %v1815_v28  ;;  %vm5269_vm5 = vcmask 454016  }
 0x2a2   :  { %2379 = vrot.lane.b32.xlu0 %v7030_v25, %s7531_s21  ;;  %2381 = vrot.lane.b32.xlu1 %v7031_v26, %s7531_s21  ;;  %v7062_v25 = vld [vmem:[%s11890_s0 + $0x1e1] sm:$0xff]  ;;  %v7063_v26 = vld [vmem:[%s11890_s0 + $0x1e9] sm:$0xff] }
 0x2a4   :  { %v2043_v33 = vpop.permute.xlu0 %2042  ;;  %v2045_v34 = vpop.permute.xlu1 %2044 }
 0x2a5   :  { %2211 = vst.msk [vmem:[#allocation2] sm:$0xff] %vm2210_vm6, %v2043_v33  ;;  %2212 = vst.msk [vmem:[#allocation2 + $0x8] sm:$0xff] %vm2210_vm6, %v2045_v34 }
 0x2a6   :  { %2383 = vrot.lane.b32.xlu0 %v7032_v31, %s7531_s21  ;;  %2385 = vrot.lane.b32.xlu1 %v7033_v32, %s7531_s21  ;;  %v7064_v31 = vld [vmem:[%s11890_s0 + $0x1f9] sm:$0xff]  ;;  %v7065_v32 = vld [vmem:[%s11890_s0 + $0x201] sm:$0xff] }
 0x2a8   :  { %v2047_v39 = vpop.permute.xlu0 %2046  ;;  %v2049_v40 = vpop.permute.xlu1 %2048 }
 0x2a9   :  { %2213 = vst.msk [vmem:[#allocation2 + $0x10] sm:$0xff] %vm2210_vm6, %v2047_v39  ;;  %2214 = vst.msk [vmem:[#allocation2 + $0x18] sm:$0xff] %vm2210_vm6, %v2049_v40 }
 0x2aa   :  { %2387 = vrot.lane.b32.xlu0 %v7034_v35, %s7531_s21  ;;  %2389 = vrot.lane.b32.xlu1 %v7035_v37, %s7531_s21  ;;  %v7066_v35 = vld [vmem:[%s11890_s0 + $0x211] sm:$0xff]  ;;  %v7067_v37 = vld [vmem:[%s11890_s0 + $0x219] sm:$0xff] }
 0x2ac   :  { %v2051_v43 = vpop.permute.xlu0 %2050  ;;  %v2053_v44 = vpop.permute.xlu1 %2052 }
 0x2ad   :  { %2215 = vst.msk [vmem:[#allocation2 + $0x20] sm:$0xff] %vm2210_vm6, %v2051_v43  ;;  %2216 = vst.msk [vmem:[#allocation2 + $0x28] sm:$0xff] %vm2210_vm6, %v2053_v44 }
 0x2ae   :  { %2391 = vrot.lane.b32.xlu0 %v7036_v41, %s7531_s21  ;;  %2393 = vrot.lane.b32.xlu1 %v7037_v42, %s7531_s21  ;;  %v7068_v41 = vld [vmem:[%s11890_s0 + $0x229] sm:$0xff]  ;;  %v7069_v42 = vld [vmem:[%s11890_s0 + $0x231] sm:$0xff] }
 0x2b0   :  { %v2055_v49 = vpop.permute.xlu0 %2054  ;;  %v2057_v50 = vpop.permute.xlu1 %2056 }
 0x2b1   :  { %2217 = vst.msk [vmem:[#allocation2 + $0x30] sm:$0xff] %vm2210_vm6, %v2055_v49  ;;  %2218 = vst.msk [vmem:[#allocation2 + $0x38] sm:$0xff] %vm2210_vm6, %v2057_v50  ;;  %v7070_v49 = vld [vmem:[%s11890_s0 + $0x241] sm:$0xff]  ;;  %v7071_v50 = vld [vmem:[%s11890_s0 + $0x249] sm:$0xff] }
 0x2b2   :  { %2395 = vrot.lane.b32.xlu0 %v7038_v47, %s7531_s21  ;;  %2397 = vrot.lane.b32.xlu1 %v7039_v48, %s7531_s21  ;;  %v3012_v47 = vld [vmem:[%s11891_s1 + $0x78] sm:$0xff]  ;;  %v3011_v48 = vld [vmem:[%s11891_s1 + $0x70] sm:$0xff] }
 0x2b3   :  { %7301 = vmatprep.subr.mxu0 %v3012_v47 }
 0x2b4   :  { %v2059_v53 = vpop.permute.xlu0 %2058  ;;  %v2061_v54 = vpop.permute.xlu1 %2060  ;;  %7302 = vmatpush3.msra.mxu0 %v3012_v47  ;;  %v7094_v47 = vld [vmem:[%s11890_s0 + $0x92] sm:$0xff] }
 0x2b5   :  { %2219 = vst.msk [vmem:[#allocation2 + $0x40] sm:$0xff] %vm2210_vm6, %v2059_v53  ;;  %2220 = vst.msk [vmem:[#allocation2 + $0x48] sm:$0xff] %vm2210_vm6, %v2061_v54  ;;  %7303 = vmatprep.subr.mxu0 %v3011_v48  ;;  %v3010_v53 = vld [vmem:[%s11891_s1 + $0x68] sm:$0xff]  ;;  %v7072_v54 = vld [vmem:[%s11890_s0 + $0x259] sm:$0xff] }
 0x2b6   :  { %2399 = vrot.lane.b32.xlu0 %v7040_v45, %s7531_s21  ;;  %2401 = vrot.lane.b32.xlu1 %v7041_v46, %s7531_s21 }
 0x2b7   :  { %7304 = vmatpush3.msra.mxu0 %v3011_v48  ;;  %v7095_v48 = vld [vmem:[%s11890_s0 + $0x9a] sm:$0xff] }
 0x2b8   :  { %v2063_v61 = vpop.permute.xlu0 %2062  ;;  %v2065_v62 = vpop.permute.xlu1 %2064  ;;  %7305 = vmatprep.subr.mxu0 %v3010_v53 }
 0x2b9   :  { %2221 = vst.msk [vmem:[#allocation2 + $0x50] sm:$0xff] %vm2210_vm6, %v2063_v61  ;;  %2222 = vst.msk [vmem:[#allocation2 + $0x58] sm:$0xff] %vm2210_vm6, %v2065_v62  ;;  %v3009_v62 = vld [vmem:[%s11891_s1 + $0x60] sm:$0xff]  ;;  %7306 = vmatpush3.msra.mxu0 %v3010_v53 }
 0x2ba   :  { %2403 = vrot.lane.b32.xlu0 %v7042_v57, %s7531_s21  ;;  %2405 = vrot.lane.b32.xlu1 %v7043_v58, %s7531_s21  ;;  %v7073_v57 = vld [vmem:[%s11890_s0 + $0x261] sm:$0xff] }
 0x2bb   :  { %7307 = vmatprep.subr.mxu0 %v3009_v62 }
 0x2bc   :  { %v2067_v5 = vpop.permute.xlu0 %2066  ;;  %v2069_v6 = vpop.permute.xlu1 %2068  ;;  %7308 = vmatpush3.msra.mxu0 %v3009_v62 }
 0x2bd   :  { %2223 = vst.msk [vmem:[#allocation2 + $0x60] sm:$0xff] %vm2210_vm6, %v2067_v5  ;;  %2224 = vst.msk [vmem:[#allocation2 + $0x68] sm:$0xff] %vm2210_vm6, %v2069_v6  ;;  %v7075_v5 = vld [vmem:[%s11890_s0 + $0x279] sm:$0xff] }
 0x2be   :  { %2407 = vrot.lane.b32.xlu0 %v7044_v1, %s7531_s21  ;;  %2409 = vrot.lane.b32.xlu1 %v7045_v2, %s7531_s21  ;;  %v3008_v1 = vld [vmem:[%s11891_s1 + $0x58] sm:$0xff] }
 0x2bf   :  { %v7074_v2 = vld [vmem:[%s11890_s0 + $0x271] sm:$0xff]  ;;  %7309 = vmatprep.subr.mxu0 %v3008_v1 }
 0x2c0   :  { %v2071_v13 = vpop.permute.xlu0 %2070  ;;  %v2073_v15 = vpop.permute.xlu1 %2072  ;;  %7310 = vmatpush3.msra.mxu0 %v3008_v1  ;;  %v7100_v1 = vld [vmem:[%s11890_s0 + $0xda] sm:$0xff] }
 0x2c1   :  { %2225 = vst.msk [vmem:[#allocation2 + $0x70] sm:$0xff] %vm2210_vm6, %v2071_v13  ;;  %2226 = vst.msk [vmem:[#allocation2 + $0x78] sm:$0xff] %vm2210_vm6, %v2073_v15  ;;  %v7076_v13 = vld [vmem:[%s11890_s0 + $0x289] sm:$0xff]  ;;  %v7077_v15 = vld [vmem:[%s11890_s0 + $0x291] sm:$0xff] }
 0x2c2   :  { %2411 = vrot.lane.b32.xlu0 %v7046_v9, %s7531_s21  ;;  %2413 = vrot.lane.b32.xlu1 %v7047_v10, %s7531_s21  ;;  %v3007_v10 = vld [vmem:[%s11891_s1 + $0x50] sm:$0xff] }
 0x2c3   :  { %7311 = vmatprep.subr.mxu0 %v3007_v10 }
 0x2c4   :  { %v2075_v36 = vpop.permute.xlu0 %2074  ;;  %v2077_v38 = vpop.permute.xlu1 %2076  ;;  %7312 = vmatpush3.msra.mxu0 %v3007_v10  ;;  %v7103_v10 = vld [vmem:[%s11890_s0 + $0xfa] sm:$0xff] }
 0x2c5   :  { %2227 = vst.msk [vmem:[#allocation2 + $0x80] sm:$0xff] %vm2210_vm6, %v2075_v36  ;;  %2228 = vst.msk [vmem:[#allocation2 + $0x88] sm:$0xff] %vm2210_vm6, %v2077_v38  ;;  %v3006_v36 = vld [vmem:[%s11891_s1 + $0x48] sm:$0xff]  ;;  %v3005_v38 = vld [vmem:[%s11891_s1 + $0x40] sm:$0xff] }
 0x2c6   :  { %2415 = vrot.lane.b32.xlu0 %v7048_v22, %s7531_s21  ;;  %2417 = vrot.lane.b32.xlu1 %v7049_v23, %s7531_s21 }
 0x2c7   :  { %7313 = vmatprep.subr.mxu0 %v3006_v36 }
 0x2c8   :  { %v2079_v55 = vpop.permute.xlu0 %2078  ;;  %v2081_v56 = vpop.permute.xlu1 %2080  ;;  %7314 = vmatpush3.msra.mxu0 %v3006_v36 }
 0x2c9   :  { %2229 = vst.msk [vmem:[#allocation2 + $0x90] sm:$0xff] %vm2210_vm6, %v2079_v55  ;;  %2230 = vst.msk [vmem:[#allocation2 + $0x98] sm:$0xff] %vm2210_vm6, %v2081_v56  ;;  %7315 = vmatprep.subr.mxu0 %v3005_v38 }
 0x2ca   :  { %2419 = vrot.lane.b32.xlu0 %v7050_v51, %s7531_s21  ;;  %2421 = vrot.lane.b32.xlu1 %v7051_v52, %s7531_s21  ;;  %v7078_v51 = vld [vmem:[%s11890_s0 + $0x2a1] sm:$0xff]  ;;  %v7079_v52 = vld [vmem:[%s11890_s0 + $0x2a9] sm:$0xff] }
 0x2cb   :  { %7316 = vmatpush3.msra.mxu0 %v3005_v38 }
 0x2cc   :  { %v2083_v7 = vpop.permute.xlu0 %2082  ;;  %v2085_v8 = vpop.permute.xlu1 %2084 }
 0x2cd   :  { %2231 = vst.msk [vmem:[#allocation2 + $0xa0] sm:$0xff] %vm2210_vm6, %v2083_v7  ;;  %2232 = vst.msk [vmem:[#allocation2 + $0xa8] sm:$0xff] %vm2210_vm6, %v2085_v8  ;;  %v7081_v7 = vld [vmem:[%s11890_s0 + $0x2c1] sm:$0xff] }
 0x2ce   :  { %2423 = vrot.lane.b32.xlu0 %v7052_v63, %s7531_s21  ;;  %2425 = vrot.lane.b32.xlu1 %v7053_v0, %s7531_s21  ;;  %v3004_v63 = vld [vmem:[%s11891_s1 + $0x38] sm:$0xff] }
 0x2cf   :  { %v7080_v0 = vld [vmem:[%s11890_s0 + $0x2b9] sm:$0xff]  ;;  %7317 = vmatprep.subr.mxu0 %v3004_v63 }
 0x2d0   :  { %v2087_v59 = vpop.permute.xlu0 %2086  ;;  %v2089_v60 = vpop.permute.xlu1 %2088  ;;  %7318 = vmatpush3.msra.mxu0 %v3004_v63  ;;  %v7108_v63 = vld [vmem:[%s11890_s0 + $0x13a] sm:$0xff] }
 0x2d1   :  { %2233 = vst.msk [vmem:[#allocation2 + $0xb0] sm:$0xff] %vm2210_vm6, %v2087_v59  ;;  %2234 = vst.msk [vmem:[#allocation2 + $0xb8] sm:$0xff] %vm2210_vm6, %v2089_v60  ;;  %v3002_v59 = vld [vmem:[%s11891_s1 + $0x28] sm:$0xff]  ;;  %v7082_v60 = vld [vmem:[%s11890_s0 + $0x2d1] sm:$0xff] }
 0x2d2   :  { %2427 = vrot.lane.b32.xlu0 %v7054_v16, %s7531_s21  ;;  %2429 = vrot.lane.b32.xlu1 %v7055_v17, %s7531_s21  ;;  %v3003_v17 = vld [vmem:[%s11891_s1 + $0x30] sm:$0xff] }
 0x2d3   :  { %7319 = vmatprep.subr.mxu0 %v3003_v17 }
 0x2d4   :  { %v2091_v11 = vpop.permute.xlu0 %2090  ;;  %v2093_v12 = vpop.permute.xlu1 %2092  ;;  %7320 = vmatpush3.msra.mxu0 %v3003_v17  ;;  %v7111_v17 = vld [vmem:[%s11890_s0 + $0x15a] sm:$0xff] }
 0x2d5   :  { %2235 = vst.msk [vmem:[#allocation2 + $0xc0] sm:$0xff] %vm2210_vm6, %v2091_v11  ;;  %2236 = vst.msk [vmem:[#allocation2 + $0xc8] sm:$0xff] %vm2210_vm6, %v2093_v12  ;;  %7321 = vmatprep.subr.mxu0 %v3002_v59  ;;  %v3001_v12 = vld [vmem:[%s11891_s1 + $0x20] sm:$0xff] }
 0x2d6   :  { %2431 = vrot.lane.b32.xlu0 %v7056_v3, %s7531_s21  ;;  %2433 = vrot.lane.b32.xlu1 %v7057_v4, %s7531_s21  ;;  %v7083_v3 = vld [vmem:[%s11890_s0 + $0x2d9] sm:$0xff] }
 0x2d7   :  { %7322 = vmatpush3.msra.mxu0 %v3002_v59 }
 0x2d8   :  { %v2095_v14 = vpop.permute.xlu0 %2094  ;;  %v2097_v18 = vpop.permute.xlu1 %2096  ;;  %7323 = vmatprep.subr.mxu0 %v3001_v12 }
 0x2d9   :  { %2237 = vst.msk [vmem:[#allocation2 + $0xd0] sm:$0xff] %vm2210_vm6, %v2095_v14  ;;  %2238 = vst.msk [vmem:[#allocation2 + $0xd8] sm:$0xff] %vm2210_vm6, %v2097_v18  ;;  %7324 = vmatpush3.msra.mxu0 %v3001_v12 }
 0x2da   :  { %2435 = vrot.lane.b32.xlu0 %v7058_v29, %s7531_s21  ;;  %2437 = vrot.lane.b32.xlu1 %v7059_v30, %s7531_s21  ;;  %v7084_v29 = vld [vmem:[%s11890_s0 + $0x2e9] sm:$0xff]  ;;  %v7085_v30 = vld [vmem:[%s11890_s0 + $0x2f1] sm:$0xff] }
 0x2dc   :  { %v2099_v21 = vpop.permute.xlu0 %2098  ;;  %v2101_v24 = vpop.permute.xlu1 %2100 }
 0x2dd   :  { %2239 = vst.msk [vmem:[#allocation2 + $0xe0] sm:$0xff] %vm2210_vm6, %v2099_v21  ;;  %2240 = vst.msk [vmem:[#allocation2 + $0xe8] sm:$0xff] %vm2210_vm6, %v2101_v24  ;;  %v7086_v21 = vld [vmem:[%s11890_s0 + $0x32] sm:$0xff]  ;;  %v7087_v24 = vld [vmem:[%s11890_s0 + $0x3a] sm:$0xff] }
 0x2de   :  { %2439 = vrot.lane.b32.xlu0 %v7060_v19, %s7531_s21  ;;  %2441 = vrot.lane.b32.xlu1 %v7061_v20, %s7531_s21  ;;  %v3000_v19 = vld [vmem:[%s11891_s1 + $0x18] sm:$0xff]  ;;  %v2999_v20 = vld [vmem:[%s11891_s1 + $0x10] sm:$0xff] }
 0x2df   :  { %7325 = vmatprep.subr.mxu0 %v3000_v19 }
 0x2e0   :  { %v2103_v27 = vpop.permute.xlu0 %2102  ;;  %v2105_v28 = vpop.permute.xlu1 %2104  ;;  %7326 = vmatpush3.msra.mxu0 %v3000_v19  ;;  %v7116_v19 = vld [vmem:[%s11890_s0 + $0x1ca] sm:$0xff] }
 0x2e1   :  { %2241 = vst.msk [vmem:[#allocation2 + $0xf0] sm:$0xff] %vm2210_vm6, %v2103_v27  ;;  %2242 = vst.msk [vmem:[#allocation2 + $0xf8] sm:$0xff] %vm2210_vm6, %v2105_v28  ;;  %7327 = vmatprep.subr.mxu0 %v2999_v20  ;;  %v2998_v27 = vld [vmem:[%s11891_s1 + $0x8] sm:$0xff] }
 0x2e2   :  { %2443 = vrot.lane.b32.xlu0 %v7062_v25, %s7531_s21  ;;  %2445 = vrot.lane.b32.xlu1 %v7063_v26, %s7531_s21  ;;  %v7088_v28 = vld [vmem:[%s11890_s0 + $0x4a] sm:$0xff] }
 0x2e3   :  { %7328 = vmatpush3.msra.mxu0 %v2999_v20  ;;  %v7117_v20 = vld [vmem:[%s11890_s0 + $0x1d2] sm:$0xff] }
 0x2e4   :  { %v2107_v33 = vpop.permute.xlu0 %2106  ;;  %v2109_v34 = vpop.permute.xlu1 %2108  ;;  %7329 = vmatprep.subr.mxu0 %v2998_v27 }
 0x2e5   :  { %2243 = vst.msk [vmem:[#allocation2 + $0x100] sm:$0xff] %vm2210_vm6, %v2107_v33  ;;  %2244 = vst.msk [vmem:[#allocation2 + $0x108] sm:$0xff] %vm2210_vm6, %v2109_v34  ;;  %v2997_v34 = vld [vmem:[%s11891_s1] sm:$0xff]  ;;  %7330 = vmatpush3.msra.mxu0 %v2998_v27 }
 0x2e6   :  { %2447 = vrot.lane.b32.xlu0 %v7064_v31, %s7531_s21  ;;  %2449 = vrot.lane.b32.xlu1 %v7065_v32, %s7531_s21  ;;  %v7089_v31 = vld [vmem:[%s11890_s0 + $0x52] sm:$0xff] }
 0x2e7   :  { %7331 = vmatprep.subr.mxu0 %v2997_v34 }
 0x2e8   :  { %v2111_v39 = vpop.permute.xlu0 %2110  ;;  %v2113_v40 = vpop.permute.xlu1 %2112  ;;  %7332 = vmatpush3.msra.mxu0 %v2997_v34 }
 0x2e9   :  { %2245 = vst.msk [vmem:[#allocation2 + $0x110] sm:$0xff] %vm2210_vm6, %v2111_v39  ;;  %2246 = vst.msk [vmem:[#allocation2 + $0x118] sm:$0xff] %vm2210_vm6, %v2113_v40 }
 0x2ea   :  { %2451 = vrot.lane.b32.xlu0 %v7066_v35, %s7531_s21  ;;  %2453 = vrot.lane.b32.xlu1 %v7067_v37, %s7531_s21  ;;  %v7090_v35 = vld [vmem:[%s11890_s0 + $0x62] sm:$0xff]  ;;  %v7091_v37 = vld [vmem:[%s11890_s0 + $0x6a] sm:$0xff] }
 0x2ec   :  { %v2115_v43 = vpop.permute.xlu0 %2114  ;;  %v2117_v44 = vpop.permute.xlu1 %2116 }
 0x2ed   :  { %2247 = vst.msk [vmem:[#allocation2 + $0x120] sm:$0xff] %vm2210_vm6, %v2115_v43  ;;  %2248 = vst.msk [vmem:[#allocation2 + $0x128] sm:$0xff] %vm2210_vm6, %v2117_v44 }
 0x2ee   :  { %2455 = vrot.lane.b32.xlu0 %v7068_v41, %s7531_s21  ;;  %2457 = vrot.lane.b32.xlu1 %v7069_v42, %s7531_s21  ;;  %v7092_v41 = vld [vmem:[%s11890_s0 + $0x7a] sm:$0xff]  ;;  %v7093_v42 = vld [vmem:[%s11890_s0 + $0x82] sm:$0xff] }
 0x2f0   :  { %v2119_v45 = vpop.permute.xlu0 %2118  ;;  %v2121_v46 = vpop.permute.xlu1 %2120 }
 0x2f1   :  { %2249 = vst.msk [vmem:[#allocation2 + $0x130] sm:$0xff] %vm2210_vm6, %v2119_v45  ;;  %2250 = vst.msk [vmem:[#allocation2 + $0x138] sm:$0xff] %vm2210_vm6, %v2121_v46  ;;  %v7096_v45 = vld [vmem:[%s11890_s0 + $0xaa] sm:$0xff]  ;;  %v7097_v46 = vld [vmem:[%s11890_s0 + $0xb2] sm:$0xff] }
 0x2f2   :  { %2459 = vrot.lane.b32.xlu0 %v7070_v49, %s7531_s21  ;;  %2461 = vrot.lane.b32.xlu1 %v7071_v50, %s7531_s21 }
 0x2f4   :  { %v2123_v58 = vpop.permute.xlu0 %2122  ;;  %v2125_v61 = vpop.permute.xlu1 %2124 }
 0x2f5   :  { %2251 = vst.msk [vmem:[#allocation2 + $0x140] sm:$0xff] %vm2210_vm6, %v2123_v58  ;;  %2252 = vst.msk [vmem:[#allocation2 + $0x148] sm:$0xff] %vm2210_vm6, %v2125_v61  ;;  %v7099_v58 = vld [vmem:[%s11890_s0 + $0xca] sm:$0xff] }
 0x2f6   :  { %2463 = vrot.lane.b32.xlu0 %v7072_v54, %s7531_s21  ;;  %2465 = vrot.lane.b32.xlu1 %v7073_v57, %s7531_s21  ;;  %v7098_v57 = vld [vmem:[%s11890_s0 + $0xc2] sm:$0xff] }
 0x2f8   :  { %v2127_v6 = vpop.permute.xlu0 %2126  ;;  %v2129_v9 = vpop.permute.xlu1 %2128 }
 0x2f9   :  { %2253 = vst.msk [vmem:[#allocation2 + $0x150] sm:$0xff] %vm2210_vm6, %v2127_v6  ;;  %2254 = vst.msk [vmem:[#allocation2 + $0x158] sm:$0xff] %vm2210_vm6, %v2129_v9  ;;  %v7102_v9 = vld [vmem:[%s11890_s0 + $0xf2] sm:$0xff] }
 0x2fa   :  { %2467 = vrot.lane.b32.xlu0 %v7074_v2, %s7531_s21  ;;  %2469 = vrot.lane.b32.xlu1 %v7075_v5, %s7531_s21  ;;  %v7101_v2 = vld [vmem:[%s11890_s0 + $0xe2] sm:$0xff] }
 0x2fc   :  { %v2131_v22 = vpop.permute.xlu0 %2130  ;;  %v2133_v23 = vpop.permute.xlu1 %2132 }
 0x2fd   :  { %2255 = vst.msk [vmem:[#allocation2 + $0x160] sm:$0xff] %vm2210_vm6, %v2131_v22  ;;  %2256 = vst.msk [vmem:[#allocation2 + $0x168] sm:$0xff] %vm2210_vm6, %v2133_v23  ;;  %v7104_v22 = vld [vmem:[%s11890_s0 + $0x10a] sm:$0xff]  ;;  %v7105_v23 = vld [vmem:[%s11890_s0 + $0x112] sm:$0xff] }
 0x2fe   :  { %2471 = vrot.lane.b32.xlu0 %v7076_v13, %s7531_s21  ;;  %2473 = vrot.lane.b32.xlu1 %v7077_v15, %s7531_s21 }
 0x300   :  { %v2135_v55 = vpop.permute.xlu0 %2134  ;;  %v2137_v56 = vpop.permute.xlu1 %2136 }
 0x301   :  { %2257 = vst.msk [vmem:[#allocation2 + $0x170] sm:$0xff] %vm2210_vm6, %v2135_v55  ;;  %2258 = vst.msk [vmem:[#allocation2 + $0x178] sm:$0xff] %vm2210_vm6, %v2137_v56 }
 0x302   :  { %2475 = vrot.lane.b32.xlu0 %v7078_v51, %s7531_s21  ;;  %2477 = vrot.lane.b32.xlu1 %v7079_v52, %s7531_s21  ;;  %v7106_v51 = vld [vmem:[%s11890_s0 + $0x122] sm:$0xff]  ;;  %v7107_v52 = vld [vmem:[%s11890_s0 + $0x12a] sm:$0xff] }
 0x304   :  { %v2139_v8 = vpop.permute.xlu0 %2138  ;;  %v2141_v16 = vpop.permute.xlu1 %2140 }
 0x305   :  { %2259 = vst.msk [vmem:[#allocation2 + $0x180] sm:$0xff] %vm2210_vm6, %v2139_v8  ;;  %2260 = vst.msk [vmem:[#allocation2 + $0x188] sm:$0xff] %vm2210_vm6, %v2141_v16  ;;  %v7110_v16 = vld [vmem:[%s11890_s0 + $0x152] sm:$0xff] }
 0x306   :  { %2479 = vrot.lane.b32.xlu0 %v7080_v0, %s7531_s21  ;;  %2481 = vrot.lane.b32.xlu1 %v7081_v7, %s7531_s21  ;;  %v7109_v0 = vld [vmem:[%s11890_s0 + $0x142] sm:$0xff] }
 0x308   :  { %v2143_v4 = vpop.permute.xlu0 %2142  ;;  %v2145_v11 = vpop.permute.xlu1 %2144 }
 0x309   :  { %2261 = vst.msk [vmem:[#allocation2 + $0x190] sm:$0xff] %vm2210_vm6, %v2143_v4  ;;  %2262 = vst.msk [vmem:[#allocation2 + $0x198] sm:$0xff] %vm2210_vm6, %v2145_v11  ;;  %v7113_v4 = vld [vmem:[%s11890_s0 + $0x172] sm:$0xff] }
 0x30a   :  { %2483 = vrot.lane.b32.xlu0 %v7082_v60, %s7531_s21  ;;  %2485 = vrot.lane.b32.xlu1 %v7083_v3, %s7531_s21  ;;  %v7112_v3 = vld [vmem:[%s11890_s0 + $0x16a] sm:$0xff] }
 0x30c   :  { %v2147_v14 = vpop.permute.xlu0 %2146  ;;  %v2149_v18 = vpop.permute.xlu1 %2148 }
 0x30d   :  { %2263 = vst.msk [vmem:[#allocation2 + $0x1a0] sm:$0xff] %vm2210_vm6, %v2147_v14  ;;  %2264 = vst.msk [vmem:[#allocation2 + $0x1a8] sm:$0xff] %vm2210_vm6, %v2149_v18 }
 0x30e   :  { %2487 = vrot.lane.b32.xlu0 %v7084_v29, %s7531_s21  ;;  %2489 = vrot.lane.b32.xlu1 %v7085_v30, %s7531_s21  ;;  %v7114_v29 = vld [vmem:[%s11890_s0 + $0x1b2] sm:$0xff]  ;;  %v7115_v30 = vld [vmem:[%s11890_s0 + $0x1ba] sm:$0xff] }
 0x310   :  { %v2151_v25 = vpop.permute.xlu0 %2150  ;;  %v2153_v26 = vpop.permute.xlu1 %2152 }
 0x311   :  { %2265 = vst.msk [vmem:[#allocation2 + $0x1b0] sm:$0xff] %vm2210_vm6, %v2151_v25  ;;  %2266 = vst.msk [vmem:[#allocation2 + $0x1b8] sm:$0xff] %vm2210_vm6, %v2153_v26  ;;  %v7118_v25 = vld [vmem:[%s11890_s0 + $0x1e2] sm:$0xff]  ;;  %v7119_v26 = vld [vmem:[%s11890_s0 + $0x1ea] sm:$0xff]  ;;  %vm5267_vm6 = vcmask 458112  }
 0x312   :  { %2716 = vrot.lane.b32.xlu0 %v7086_v21, %s7532_s25  ;;  %2718 = vrot.lane.b32.xlu1 %v7087_v24, %s7532_s25 }
 0x314   :  { %v2380_v32 = vpop.permute.xlu0 %2379  ;;  %v2382_v33 = vpop.permute.xlu1 %2381 }
 0x315   :  { %2548 = vst.msk [vmem:[#allocation2] sm:$0xff] %vm2547_vm7, %v2380_v32  ;;  %2549 = vst.msk [vmem:[#allocation2 + $0x8] sm:$0xff] %vm2547_vm7, %v2382_v33  ;;  %v7121_v32 = vld [vmem:[%s11890_s0 + $0x202] sm:$0xff] }
 0x316   :  { %2720 = vrot.lane.b32.xlu0 %v7088_v28, %s7532_s25  ;;  %2722 = vrot.lane.b32.xlu1 %v7089_v31, %s7532_s25  ;;  %v7120_v31 = vld [vmem:[%s11890_s0 + $0x1fa] sm:$0xff] }
 0x318   :  { %v2384_v39 = vpop.permute.xlu0 %2383  ;;  %v2386_v40 = vpop.permute.xlu1 %2385 }
 0x319   :  { %2550 = vst.msk [vmem:[#allocation2 + $0x10] sm:$0xff] %vm2547_vm7, %v2384_v39  ;;  %2551 = vst.msk [vmem:[#allocation2 + $0x18] sm:$0xff] %vm2547_vm7, %v2386_v40 }
 0x31a   :  { %2724 = vrot.lane.b32.xlu0 %v7090_v35, %s7532_s25  ;;  %2726 = vrot.lane.b32.xlu1 %v7091_v37, %s7532_s25  ;;  %v7122_v35 = vld [vmem:[%s11890_s0 + $0x212] sm:$0xff]  ;;  %v7123_v37 = vld [vmem:[%s11890_s0 + $0x21a] sm:$0xff] }
 0x31c   :  { %v2388_v43 = vpop.permute.xlu0 %2387  ;;  %v2390_v44 = vpop.permute.xlu1 %2389 }
 0x31d   :  { %2552 = vst.msk [vmem:[#allocation2 + $0x20] sm:$0xff] %vm2547_vm7, %v2388_v43  ;;  %2553 = vst.msk [vmem:[#allocation2 + $0x28] sm:$0xff] %vm2547_vm7, %v2390_v44 }
 0x31e   :  { %2728 = vrot.lane.b32.xlu0 %v7092_v41, %s7532_s25  ;;  %2730 = vrot.lane.b32.xlu1 %v7093_v42, %s7532_s25  ;;  %v7124_v41 = vld [vmem:[%s11890_s0 + $0x22a] sm:$0xff]  ;;  %v7125_v42 = vld [vmem:[%s11890_s0 + $0x232] sm:$0xff] }
 0x320   :  { %v2392_v49 = vpop.permute.xlu0 %2391  ;;  %v2394_v50 = vpop.permute.xlu1 %2393 }
 0x321   :  { %2554 = vst.msk [vmem:[#allocation2 + $0x30] sm:$0xff] %vm2547_vm7, %v2392_v49  ;;  %2555 = vst.msk [vmem:[#allocation2 + $0x38] sm:$0xff] %vm2547_vm7, %v2394_v50 }
 0x322   :  { %2732 = vrot.lane.b32.xlu0 %v7094_v47, %s7532_s25  ;;  %2734 = vrot.lane.b32.xlu1 %v7095_v48, %s7532_s25  ;;  %v7126_v47 = vld [vmem:[%s11890_s0 + $0x242] sm:$0xff]  ;;  %v7127_v48 = vld [vmem:[%s11890_s0 + $0x24a] sm:$0xff] }
 0x324   :  { %v2396_v53 = vpop.permute.xlu0 %2395  ;;  %v2398_v54 = vpop.permute.xlu1 %2397 }
 0x325   :  { %2556 = vst.msk [vmem:[#allocation2 + $0x40] sm:$0xff] %vm2547_vm7, %v2396_v53  ;;  %2557 = vst.msk [vmem:[#allocation2 + $0x48] sm:$0xff] %vm2547_vm7, %v2398_v54 }
 0x326   :  { %2736 = vrot.lane.b32.xlu0 %v7096_v45, %s7532_s25  ;;  %2738 = vrot.lane.b32.xlu1 %v7097_v46, %s7532_s25  ;;  %v7128_v45 = vld [vmem:[%s11890_s0 + $0x25a] sm:$0xff]  ;;  %v7129_v46 = vld [vmem:[%s11890_s0 + $0x262] sm:$0xff] }
 0x328   :  { %v2400_v61 = vpop.permute.xlu0 %2399  ;;  %v2402_v62 = vpop.permute.xlu1 %2401 }
 0x329   :  { %2558 = vst.msk [vmem:[#allocation2 + $0x50] sm:$0xff] %vm2547_vm7, %v2400_v61  ;;  %2559 = vst.msk [vmem:[#allocation2 + $0x58] sm:$0xff] %vm2547_vm7, %v2402_v62 }
 0x32a   :  { %2740 = vrot.lane.b32.xlu0 %v7098_v57, %s7532_s25  ;;  %2742 = vrot.lane.b32.xlu1 %v7099_v58, %s7532_s25  ;;  %v7130_v57 = vld [vmem:[%s11890_s0 + $0x272] sm:$0xff]  ;;  %v7131_v58 = vld [vmem:[%s11890_s0 + $0x27a] sm:$0xff] }
 0x32c   :  { %v2404_v5 = vpop.permute.xlu0 %2403  ;;  %v2406_v6 = vpop.permute.xlu1 %2405 }
 0x32d   :  { %2560 = vst.msk [vmem:[#allocation2 + $0x60] sm:$0xff] %vm2547_vm7, %v2404_v5  ;;  %2561 = vst.msk [vmem:[#allocation2 + $0x68] sm:$0xff] %vm2547_vm7, %v2406_v6 }
 0x32e   :  { %2744 = vrot.lane.b32.xlu0 %v7100_v1, %s7532_s25  ;;  %2746 = vrot.lane.b32.xlu1 %v7101_v2, %s7532_s25  ;;  %v7132_v1 = vld [vmem:[%s11890_s0 + $0x28a] sm:$0xff]  ;;  %v7133_v2 = vld [vmem:[%s11890_s0 + $0x292] sm:$0xff] }
 0x330   :  { %v2408_v13 = vpop.permute.xlu0 %2407  ;;  %v2410_v15 = vpop.permute.xlu1 %2409 }
 0x331   :  { %2562 = vst.msk [vmem:[#allocation2 + $0x70] sm:$0xff] %vm2547_vm7, %v2408_v13  ;;  %2563 = vst.msk [vmem:[#allocation2 + $0x78] sm:$0xff] %vm2547_vm7, %v2410_v15 }
 0x332   :  { %2748 = vrot.lane.b32.xlu0 %v7102_v9, %s7532_s25  ;;  %2750 = vrot.lane.b32.xlu1 %v7103_v10, %s7532_s25  ;;  %v7134_v9 = vld [vmem:[%s11890_s0 + $0x2a2] sm:$0xff]  ;;  %v7135_v10 = vld [vmem:[%s11890_s0 + $0x2aa] sm:$0xff] }
 0x334   :  { %v2412_v36 = vpop.permute.xlu0 %2411  ;;  %v2414_v38 = vpop.permute.xlu1 %2413 }
 0x335   :  { %2564 = vst.msk [vmem:[#allocation2 + $0x80] sm:$0xff] %vm2547_vm7, %v2412_v36  ;;  %2565 = vst.msk [vmem:[#allocation2 + $0x88] sm:$0xff] %vm2547_vm7, %v2414_v38 }
 0x336   :  { %2752 = vrot.lane.b32.xlu0 %v7104_v22, %s7532_s25  ;;  %2754 = vrot.lane.b32.xlu1 %v7105_v23, %s7532_s25  ;;  %v7136_v22 = vld [vmem:[%s11890_s0 + $0x2ba] sm:$0xff]  ;;  %v7137_v23 = vld [vmem:[%s11890_s0 + $0x2c2] sm:$0xff] }
 0x338   :  { %v2416_v55 = vpop.permute.xlu0 %2415  ;;  %v2418_v56 = vpop.permute.xlu1 %2417 }
 0x339   :  { %2566 = vst.msk [vmem:[#allocation2 + $0x90] sm:$0xff] %vm2547_vm7, %v2416_v55  ;;  %2567 = vst.msk [vmem:[#allocation2 + $0x98] sm:$0xff] %vm2547_vm7, %v2418_v56 }
 0x33a   :  { %2756 = vrot.lane.b32.xlu0 %v7106_v51, %s7532_s25  ;;  %2758 = vrot.lane.b32.xlu1 %v7107_v52, %s7532_s25  ;;  %v7138_v51 = vld [vmem:[%s11890_s0 + $0x2d2] sm:$0xff]  ;;  %v7139_v52 = vld [vmem:[%s11890_s0 + $0x2da] sm:$0xff] }
 0x33c   :  { %v2420_v7 = vpop.permute.xlu0 %2419  ;;  %v2422_v8 = vpop.permute.xlu1 %2421 }
 0x33d   :  { %2568 = vst.msk [vmem:[#allocation2 + $0xa0] sm:$0xff] %vm2547_vm7, %v2420_v7  ;;  %2569 = vst.msk [vmem:[#allocation2 + $0xa8] sm:$0xff] %vm2547_vm7, %v2422_v8 }
 0x33e   :  { %2760 = vrot.lane.b32.xlu0 %v7108_v63, %s7532_s25  ;;  %2762 = vrot.lane.b32.xlu1 %v7109_v0, %s7532_s25 }
 0x340   :  { %v2424_v59 = vpop.permute.xlu0 %2423  ;;  %v2426_v60 = vpop.permute.xlu1 %2425 }
 0x341   :  { %2570 = vst.msk [vmem:[#allocation2 + $0xb0] sm:$0xff] %vm2547_vm7, %v2424_v59  ;;  %2571 = vst.msk [vmem:[#allocation2 + $0xb8] sm:$0xff] %vm2547_vm7, %v2426_v60 }
 0x342   :  { %2764 = vrot.lane.b32.xlu0 %v7110_v16, %s7532_s25  ;;  %2766 = vrot.lane.b32.xlu1 %v7111_v17, %s7532_s25 }
 0x344   :  { %v2428_v11 = vpop.permute.xlu0 %2427  ;;  %v2430_v12 = vpop.permute.xlu1 %2429 }
 0x345   :  { %2572 = vst.msk [vmem:[#allocation2 + $0xc0] sm:$0xff] %vm2547_vm7, %v2428_v11  ;;  %2573 = vst.msk [vmem:[#allocation2 + $0xc8] sm:$0xff] %vm2547_vm7, %v2430_v12 }
 0x346   :  { %2768 = vrot.lane.b32.xlu0 %v7112_v3, %s7532_s25  ;;  %2770 = vrot.lane.b32.xlu1 %v7113_v4, %s7532_s25 }
 0x348   :  { %v2432_v14 = vpop.permute.xlu0 %2431  ;;  %v2434_v18 = vpop.permute.xlu1 %2433 }
 0x349   :  { %2574 = vst.msk [vmem:[#allocation2 + $0xd0] sm:$0xff] %vm2547_vm7, %v2432_v14  ;;  %2575 = vst.msk [vmem:[#allocation2 + $0xd8] sm:$0xff] %vm2547_vm7, %v2434_v18 }
 0x34a   :  { %2772 = vrot.lane.b32.xlu0 %v7114_v29, %s7532_s25  ;;  %2774 = vrot.lane.b32.xlu1 %v7115_v30, %s7532_s25 }
 0x34c   :  { %v2436_v21 = vpop.permute.xlu0 %2435  ;;  %v2438_v24 = vpop.permute.xlu1 %2437 }
 0x34d   :  { %2576 = vst.msk [vmem:[#allocation2 + $0xe0] sm:$0xff] %vm2547_vm7, %v2436_v21  ;;  %2577 = vst.msk [vmem:[#allocation2 + $0xe8] sm:$0xff] %vm2547_vm7, %v2438_v24 }
 0x34e   :  { %2776 = vrot.lane.b32.xlu0 %v7116_v19, %s7532_s25  ;;  %2778 = vrot.lane.b32.xlu1 %v7117_v20, %s7532_s25 }
 0x350   :  { %v2440_v27 = vpop.permute.xlu0 %2439  ;;  %v2442_v28 = vpop.permute.xlu1 %2441 }
 0x351   :  { %2578 = vst.msk [vmem:[#allocation2 + $0xf0] sm:$0xff] %vm2547_vm7, %v2440_v27  ;;  %2579 = vst.msk [vmem:[#allocation2 + $0xf8] sm:$0xff] %vm2547_vm7, %v2442_v28 }
 0x352   :  { %2780 = vrot.lane.b32.xlu0 %v7118_v25, %s7532_s25  ;;  %2782 = vrot.lane.b32.xlu1 %v7119_v26, %s7532_s25 }
 0x354   :  { %v2444_v33 = vpop.permute.xlu0 %2443  ;;  %v2446_v34 = vpop.permute.xlu1 %2445 }
 0x355   :  { %2580 = vst.msk [vmem:[#allocation2 + $0x100] sm:$0xff] %vm2547_vm7, %v2444_v33  ;;  %2581 = vst.msk [vmem:[#allocation2 + $0x108] sm:$0xff] %vm2547_vm7, %v2446_v34 }
 0x356   :  { %2784 = vrot.lane.b32.xlu0 %v7120_v31, %s7532_s25  ;;  %2786 = vrot.lane.b32.xlu1 %v7121_v32, %s7532_s25 }
 0x358   :  { %v2448_v39 = vpop.permute.xlu0 %2447  ;;  %v2450_v40 = vpop.permute.xlu1 %2449 }
 0x359   :  { %2582 = vst.msk [vmem:[#allocation2 + $0x110] sm:$0xff] %vm2547_vm7, %v2448_v39  ;;  %2583 = vst.msk [vmem:[#allocation2 + $0x118] sm:$0xff] %vm2547_vm7, %v2450_v40 }
 0x35a   :  { %2788 = vrot.lane.b32.xlu0 %v7122_v35, %s7532_s25  ;;  %2790 = vrot.lane.b32.xlu1 %v7123_v37, %s7532_s25 }
 0x35c   :  { %v2452_v43 = vpop.permute.xlu0 %2451  ;;  %v2454_v44 = vpop.permute.xlu1 %2453 }
 0x35d   :  { %2584 = vst.msk [vmem:[#allocation2 + $0x120] sm:$0xff] %vm2547_vm7, %v2452_v43  ;;  %2585 = vst.msk [vmem:[#allocation2 + $0x128] sm:$0xff] %vm2547_vm7, %v2454_v44 }
 0x35e   :  { %2792 = vrot.lane.b32.xlu0 %v7124_v41, %s7532_s25  ;;  %2794 = vrot.lane.b32.xlu1 %v7125_v42, %s7532_s25 }
 0x360   :  { %v2456_v49 = vpop.permute.xlu0 %2455  ;;  %v2458_v50 = vpop.permute.xlu1 %2457 }
 0x361   :  { %2586 = vst.msk [vmem:[#allocation2 + $0x130] sm:$0xff] %vm2547_vm7, %v2456_v49  ;;  %2587 = vst.msk [vmem:[#allocation2 + $0x138] sm:$0xff] %vm2547_vm7, %v2458_v50 }
 0x362   :  { %2796 = vrot.lane.b32.xlu0 %v7126_v47, %s7532_s25  ;;  %2798 = vrot.lane.b32.xlu1 %v7127_v48, %s7532_s25 }
 0x364   :  { %v2460_v53 = vpop.permute.xlu0 %2459  ;;  %v2462_v54 = vpop.permute.xlu1 %2461 }
 0x365   :  { %2588 = vst.msk [vmem:[#allocation2 + $0x140] sm:$0xff] %vm2547_vm7, %v2460_v53  ;;  %2589 = vst.msk [vmem:[#allocation2 + $0x148] sm:$0xff] %vm2547_vm7, %v2462_v54 }
 0x366   :  { %2800 = vrot.lane.b32.xlu0 %v7128_v45, %s7532_s25  ;;  %2802 = vrot.lane.b32.xlu1 %v7129_v46, %s7532_s25 }
 0x368   :  { %v2464_v61 = vpop.permute.xlu0 %2463  ;;  %v2466_v62 = vpop.permute.xlu1 %2465 }
 0x369   :  { %2590 = vst.msk [vmem:[#allocation2 + $0x150] sm:$0xff] %vm2547_vm7, %v2464_v61  ;;  %2591 = vst.msk [vmem:[#allocation2 + $0x158] sm:$0xff] %vm2547_vm7, %v2466_v62 }
 0x36a   :  { %2804 = vrot.lane.b32.xlu0 %v7130_v57, %s7532_s25  ;;  %2806 = vrot.lane.b32.xlu1 %v7131_v58, %s7532_s25 }
 0x36c   :  { %v2468_v5 = vpop.permute.xlu0 %2467  ;;  %v2470_v6 = vpop.permute.xlu1 %2469 }
 0x36d   :  { %2592 = vst.msk [vmem:[#allocation2 + $0x160] sm:$0xff] %vm2547_vm7, %v2468_v5  ;;  %2593 = vst.msk [vmem:[#allocation2 + $0x168] sm:$0xff] %vm2547_vm7, %v2470_v6 }
 0x36e   :  { %2808 = vrot.lane.b32.xlu0 %v7132_v1, %s7532_s25  ;;  %2810 = vrot.lane.b32.xlu1 %v7133_v2, %s7532_s25 }
 0x370   :  { %v2472_v13 = vpop.permute.xlu0 %2471  ;;  %v2474_v15 = vpop.permute.xlu1 %2473 }
 0x371   :  { %2594 = vst.msk [vmem:[#allocation2 + $0x170] sm:$0xff] %vm2547_vm7, %v2472_v13  ;;  %2595 = vst.msk [vmem:[#allocation2 + $0x178] sm:$0xff] %vm2547_vm7, %v2474_v15 }
 0x372   :  { %2812 = vrot.lane.b32.xlu0 %v7134_v9, %s7532_s25  ;;  %2814 = vrot.lane.b32.xlu1 %v7135_v10, %s7532_s25 }
 0x374   :  { %v2476_v36 = vpop.permute.xlu0 %2475  ;;  %v2478_v38 = vpop.permute.xlu1 %2477 }
 0x375   :  { %2596 = vst.msk [vmem:[#allocation2 + $0x180] sm:$0xff] %vm2547_vm7, %v2476_v36  ;;  %2597 = vst.msk [vmem:[#allocation2 + $0x188] sm:$0xff] %vm2547_vm7, %v2478_v38 }
 0x376   :  { %2816 = vrot.lane.b32.xlu0 %v7136_v22, %s7532_s25  ;;  %2818 = vrot.lane.b32.xlu1 %v7137_v23, %s7532_s25 }
 0x378   :  { %v2480_v55 = vpop.permute.xlu0 %2479  ;;  %v2482_v56 = vpop.permute.xlu1 %2481 }
 0x379   :  { %2598 = vst.msk [vmem:[#allocation2 + $0x190] sm:$0xff] %vm2547_vm7, %v2480_v55  ;;  %2599 = vst.msk [vmem:[#allocation2 + $0x198] sm:$0xff] %vm2547_vm7, %v2482_v56 }
 0x37a   :  { %2820 = vrot.lane.b32.xlu0 %v7138_v51, %s7532_s25  ;;  %2822 = vrot.lane.b32.xlu1 %v7139_v52, %s7532_s25 }
 0x37c   :  { %v2484_v63 = vpop.permute.xlu0 %2483  ;;  %v2486_v0 = vpop.permute.xlu1 %2485 }
 0x37d   :  { %2600 = vst.msk [vmem:[#allocation2 + $0x1a0] sm:$0xff] %vm2547_vm7, %v2484_v63  ;;  %2601 = vst.msk [vmem:[#allocation2 + $0x1a8] sm:$0xff] %vm2547_vm7, %v2486_v0 }
 0x380   :  { %v2488_v7 = vpop.permute.xlu0 %2487  ;;  %v2490_v8 = vpop.permute.xlu1 %2489 }
 0x381   :  { %2602 = vst.msk [vmem:[#allocation2 + $0x1b0] sm:$0xff] %vm2547_vm7, %v2488_v7  ;;  %2603 = vst.msk [vmem:[#allocation2 + $0x1b8] sm:$0xff] %vm2547_vm7, %v2490_v8  ;;  %vm5557_vm7 = vcmask 523712  }
 0x384   :  { %v2717_v16 = vpop.permute.xlu0 %2716  ;;  %v2719_v17 = vpop.permute.xlu1 %2718 }
 0x385   :  { %2885 = vst.msk [vmem:[#allocation2] sm:$0xff] %vm2884_vm8, %v2717_v16  ;;  %2886 = vst.msk [vmem:[#allocation2 + $0x8] sm:$0xff] %vm2884_vm8, %v2719_v17 }
 0x388   :  { %v2721_v59 = vpop.permute.xlu0 %2720  ;;  %v2723_v60 = vpop.permute.xlu1 %2722 }
 0x389   :  { %2887 = vst.msk [vmem:[#allocation2 + $0x10] sm:$0xff] %vm2884_vm8, %v2721_v59  ;;  %2888 = vst.msk [vmem:[#allocation2 + $0x18] sm:$0xff] %vm2884_vm8, %v2723_v60 }
 0x38c   :  { %v2725_v3 = vpop.permute.xlu0 %2724  ;;  %v2727_v4 = vpop.permute.xlu1 %2726  ;;  %v2941_v11 = vld [vmem:[#allocation2] sm:$0xff]  ;;  %v2942_v12 = vld [vmem:[#allocation2 + $0x8] sm:$0xff] }
 0x38d   :  { %2889 = vst.msk [vmem:[#allocation2 + $0x20] sm:$0xff] %vm2884_vm8, %v2725_v3  ;;  %2890 = vst.msk [vmem:[#allocation2 + $0x28] sm:$0xff] %vm2884_vm8, %v2727_v4  ;;  %7333 = vmatprep.mubr.f32.mxu0 %v2941_v11 }
 0x38e   :  { %7334 = vmatmul.mubr.f32.vlgmr.msra.gmra.mxu0 %v2942_v12 }
 0x390   :  { %v2729_v29 = vpop.permute.xlu0 %2728  ;;  %v2731_v30 = vpop.permute.xlu1 %2730  ;;  %v2943_v14 = vld [vmem:[#allocation2 + $0x10] sm:$0xff]  ;;  %v2944_v18 = vld [vmem:[#allocation2 + $0x18] sm:$0xff] }
 0x391   :  { %2891 = vst.msk [vmem:[#allocation2 + $0x30] sm:$0xff] %vm2884_vm8, %v2729_v29  ;;  %2892 = vst.msk [vmem:[#allocation2 + $0x38] sm:$0xff] %vm2884_vm8, %v2731_v30  ;;  %7336 = vmatprep.mubr.f32.mxu0 %v2943_v14 }
 0x392   :  { %7337 = vmatmul.mubr.f32.gmra.mxu0 %v2944_v18 }
 0x394   :  { %v2733_v19 = vpop.permute.xlu0 %2732  ;;  %v2735_v20 = vpop.permute.xlu1 %2734  ;;  %v2945_v21 = vld [vmem:[#allocation2 + $0x20] sm:$0xff]  ;;  %v2946_v24 = vld [vmem:[#allocation2 + $0x28] sm:$0xff] }
 0x395   :  { %2893 = vst.msk [vmem:[#allocation2 + $0x40] sm:$0xff] %vm2884_vm8, %v2733_v19  ;;  %2894 = vst.msk [vmem:[#allocation2 + $0x48] sm:$0xff] %vm2884_vm8, %v2735_v20  ;;  %7339 = vmatprep.mubr.f32.mxu0 %v2945_v21 }
 0x396   :  { %7340 = vmatmul.mubr.f32.gmra.mxu0 %v2946_v24 }
 0x398   :  { %v2737_v25 = vpop.permute.xlu0 %2736  ;;  %v2739_v26 = vpop.permute.xlu1 %2738  ;;  %v2947_v27 = vld [vmem:[#allocation2 + $0x30] sm:$0xff]  ;;  %v2948_v28 = vld [vmem:[#allocation2 + $0x38] sm:$0xff] }
 0x399   :  { %2895 = vst.msk [vmem:[#allocation2 + $0x50] sm:$0xff] %vm2884_vm8, %v2737_v25  ;;  %2896 = vst.msk [vmem:[#allocation2 + $0x58] sm:$0xff] %vm2884_vm8, %v2739_v26  ;;  %7342 = vmatprep.mubr.f32.mxu0 %v2947_v27  ;;  %v7141_v25 = vld [vmem:[%s11890_s0 + $0x2f2] sm:$0xff] }
 0x39a   :  { %7343 = vmatmul.mubr.f32.gmra.mxu0 %v2948_v28  ;;  %2826 = vrot.lane.b32.xlu1 %v7141_v25, %s7532_s25 }
 0x39c   :  { %v2741_v31 = vpop.permute.xlu0 %2740  ;;  %v2743_v32 = vpop.permute.xlu1 %2742  ;;  %v2949_v33 = vld [vmem:[#allocation2 + $0x40] sm:$0xff]  ;;  %v2950_v34 = vld [vmem:[#allocation2 + $0x48] sm:$0xff] }
 0x39d   :  { %2897 = vst.msk [vmem:[#allocation2 + $0x60] sm:$0xff] %vm2884_vm8, %v2741_v31  ;;  %2898 = vst.msk [vmem:[#allocation2 + $0x68] sm:$0xff] %vm2884_vm8, %v2743_v32  ;;  %7345 = vmatprep.mubr.f32.mxu0 %v2949_v33  ;;  %v7140_v32 = vld [vmem:[%s11890_s0 + $0x2ea] sm:$0xff] }
 0x39e   :  { %7346 = vmatmul.mubr.f32.gmra.mxu0 %v2950_v34  ;;  %2824 = vrot.lane.b32.xlu0 %v7140_v32, %s7532_s25 }
 0x3a0   :  { %v2745_v35 = vpop.permute.xlu0 %2744  ;;  %v2747_v37 = vpop.permute.xlu1 %2746  ;;  %v2951_v39 = vld [vmem:[#allocation2 + $0x50] sm:$0xff]  ;;  %v2952_v40 = vld [vmem:[#allocation2 + $0x58] sm:$0xff] }
 0x3a1   :  { %2899 = vst.msk [vmem:[#allocation2 + $0x70] sm:$0xff] %vm2884_vm8, %v2745_v35  ;;  %2900 = vst.msk [vmem:[#allocation2 + $0x78] sm:$0xff] %vm2884_vm8, %v2747_v37  ;;  %7348 = vmatprep.mubr.f32.mxu0 %v2951_v39 }
 0x3a2   :  { %7349 = vmatmul.mubr.f32.gmra.mxu0 %v2952_v40 }
 0x3a4   :  { %v2749_v41 = vpop.permute.xlu0 %2748  ;;  %v2751_v42 = vpop.permute.xlu1 %2750  ;;  %v2953_v43 = vld [vmem:[#allocation2 + $0x60] sm:$0xff]  ;;  %v2954_v44 = vld [vmem:[#allocation2 + $0x68] sm:$0xff] }
 0x3a5   :  { %2901 = vst.msk [vmem:[#allocation2 + $0x80] sm:$0xff] %vm2884_vm8, %v2749_v41  ;;  %2902 = vst.msk [vmem:[#allocation2 + $0x88] sm:$0xff] %vm2884_vm8, %v2751_v42  ;;  %7351 = vmatprep.mubr.f32.mxu0 %v2953_v43 }
 0x3a6   :  { %7352 = vmatmul.mubr.f32.gmra.mxu0 %v2954_v44 }
 0x3a8   :  { %v2753_v47 = vpop.permute.xlu0 %2752  ;;  %v2755_v48 = vpop.permute.xlu1 %2754  ;;  %v2955_v49 = vld [vmem:[#allocation2 + $0x70] sm:$0xff]  ;;  %v2956_v50 = vld [vmem:[#allocation2 + $0x78] sm:$0xff] }
 0x3a9   :  { %2903 = vst.msk [vmem:[#allocation2 + $0x90] sm:$0xff] %vm2884_vm8, %v2753_v47  ;;  %2904 = vst.msk [vmem:[#allocation2 + $0x98] sm:$0xff] %vm2884_vm8, %v2755_v48  ;;  %7354 = vmatprep.mubr.f32.mxu0 %v2955_v49 }
 0x3aa   :  { %7355 = vmatmul.mubr.f32.gmra.mxu0 %v2956_v50 }
 0x3ac   :  { %v2757_v45 = vpop.permute.xlu0 %2756  ;;  %v2759_v46 = vpop.permute.xlu1 %2758  ;;  %v2957_v53 = vld [vmem:[#allocation2 + $0x80] sm:$0xff]  ;;  %v2958_v54 = vld [vmem:[#allocation2 + $0x88] sm:$0xff] }
 0x3ad   :  { %2905 = vst.msk [vmem:[#allocation2 + $0xa0] sm:$0xff] %vm2884_vm8, %v2757_v45  ;;  %2906 = vst.msk [vmem:[#allocation2 + $0xa8] sm:$0xff] %vm2884_vm8, %v2759_v46  ;;  %7357 = vmatprep.mubr.f32.mxu0 %v2957_v53 }
 0x3ae   :  { %7358 = vmatmul.mubr.f32.gmra.mxu0 %v2958_v54 }
 0x3b0   :  { %v2761_v57 = vpop.permute.xlu0 %2760  ;;  %v2763_v58 = vpop.permute.xlu1 %2762  ;;  %v2959_v61 = vld [vmem:[#allocation2 + $0x90] sm:$0xff]  ;;  %v2960_v62 = vld [vmem:[#allocation2 + $0x98] sm:$0xff] }
 0x3b1   :  { %2907 = vst.msk [vmem:[#allocation2 + $0xb0] sm:$0xff] %vm2884_vm8, %v2761_v57  ;;  %2908 = vst.msk [vmem:[#allocation2 + $0xb8] sm:$0xff] %vm2884_vm8, %v2763_v58  ;;  %7360 = vmatprep.mubr.f32.mxu0 %v2959_v61 }
 0x3b2   :  { %7361 = vmatmul.mubr.f32.gmra.mxu0 %v2960_v62 }
 0x3b4   :  { %v2765_v1 = vpop.permute.xlu0 %2764  ;;  %v2767_v2 = vpop.permute.xlu1 %2766  ;;  %v2961_v5 = vld [vmem:[#allocation2 + $0xa0] sm:$0xff]  ;;  %v2962_v6 = vld [vmem:[#allocation2 + $0xa8] sm:$0xff] }
 0x3b5   :  { %2909 = vst.msk [vmem:[#allocation2 + $0xc0] sm:$0xff] %vm2884_vm8, %v2765_v1  ;;  %2910 = vst.msk [vmem:[#allocation2 + $0xc8] sm:$0xff] %vm2884_vm8, %v2767_v2  ;;  %7363 = vmatprep.mubr.f32.mxu0 %v2961_v5 }
 0x3b6   :  { %7364 = vmatmul.mubr.f32.gmra.mxu0 %v2962_v6 }
 0x3b8   :  { %v2769_v9 = vpop.permute.xlu0 %2768  ;;  %v2771_v10 = vpop.permute.xlu1 %2770  ;;  %v2963_v13 = vld [vmem:[#allocation2 + $0xb0] sm:$0xff]  ;;  %v2964_v15 = vld [vmem:[#allocation2 + $0xb8] sm:$0xff] }
 0x3b9   :  { %2911 = vst.msk [vmem:[#allocation2 + $0xd0] sm:$0xff] %vm2884_vm8, %v2769_v9  ;;  %2912 = vst.msk [vmem:[#allocation2 + $0xd8] sm:$0xff] %vm2884_vm8, %v2771_v10  ;;  %7366 = vmatprep.mubr.f32.mxu0 %v2963_v13  ;;  %v10250_v9 = vld [vmem:[%s11892_s2] ss:$0 sm:$0xff] }
 0x3ba   :  { %7367 = vmatmul.mubr.f32.gmra.mxu0 %v2964_v15 }
 0x3bc   :  { %v2773_v22 = vpop.permute.xlu0 %2772  ;;  %v2775_v23 = vpop.permute.xlu1 %2774  ;;  %v2965_v36 = vld [vmem:[#allocation2 + $0xc0] sm:$0xff]  ;;  %v2966_v38 = vld [vmem:[#allocation2 + $0xc8] sm:$0xff] }
 0x3bd   :  { %2913 = vst.msk [vmem:[#allocation2 + $0xe0] sm:$0xff] %vm2884_vm8, %v2773_v22  ;;  %2914 = vst.msk [vmem:[#allocation2 + $0xe8] sm:$0xff] %vm2884_vm8, %v2775_v23  ;;  %7369 = vmatprep.mubr.f32.mxu0 %v2965_v36 }
 0x3be   :  { %7370 = vmatmul.mubr.f32.gmra.mxu0 %v2966_v38 }
 0x3c0   :  { %v2777_v51 = vpop.permute.xlu0 %2776  ;;  %v2779_v52 = vpop.permute.xlu1 %2778  ;;  %v2967_v55 = vld [vmem:[#allocation2 + $0xd0] sm:$0xff]  ;;  %v2968_v56 = vld [vmem:[#allocation2 + $0xd8] sm:$0xff] }
 0x3c1   :  { %2915 = vst.msk [vmem:[#allocation2 + $0xf0] sm:$0xff] %vm2884_vm8, %v2777_v51  ;;  %2916 = vst.msk [vmem:[#allocation2 + $0xf8] sm:$0xff] %vm2884_vm8, %v2779_v52  ;;  %7372 = vmatprep.mubr.f32.mxu0 %v2967_v55 }
 0x3c2   :  { %7373 = vmatmul.mubr.f32.gmra.mxu0 %v2968_v56 }
 0x3c4   :  { %v2781_v63 = vpop.permute.xlu0 %2780  ;;  %v2783_v0 = vpop.permute.xlu1 %2782  ;;  %v2969_v7 = vld [vmem:[#allocation2 + $0xe0] sm:$0xff]  ;;  %v2970_v8 = vld [vmem:[#allocation2 + $0xe8] sm:$0xff] }
 0x3c5   :  { %2917 = vst.msk [vmem:[#allocation2 + $0x100] sm:$0xff] %vm2884_vm8, %v2781_v63  ;;  %2918 = vst.msk [vmem:[#allocation2 + $0x108] sm:$0xff] %vm2884_vm8, %v2783_v0  ;;  %7375 = vmatprep.mubr.f32.mxu0 %v2969_v7 }
 0x3c6   :  { %7376 = vmatmul.mubr.f32.gmra.mxu0 %v2970_v8 }
 0x3c8   :  { %v2785_v16 = vpop.permute.xlu0 %2784  ;;  %v2787_v17 = vpop.permute.xlu1 %2786  ;;  %v2971_v59 = vld [vmem:[#allocation2 + $0xf0] sm:$0xff]  ;;  %v2972_v60 = vld [vmem:[#allocation2 + $0xf8] sm:$0xff] }
 0x3c9   :  { %2919 = vst.msk [vmem:[#allocation2 + $0x110] sm:$0xff] %vm2884_vm8, %v2785_v16  ;;  %2920 = vst.msk [vmem:[#allocation2 + $0x118] sm:$0xff] %vm2884_vm8, %v2787_v17  ;;  %7378 = vmatprep.mubr.f32.mxu0 %v2971_v59 }
 0x3ca   :  { %7379 = vmatmul.mubr.f32.gmra.mxu0 %v2972_v60 }
 0x3cc   :  { %v2789_v3 = vpop.permute.xlu0 %2788  ;;  %v2791_v4 = vpop.permute.xlu1 %2790  ;;  %v2973_v11 = vld [vmem:[#allocation2 + $0x100] sm:$0xff]  ;;  %v2974_v12 = vld [vmem:[#allocation2 + $0x108] sm:$0xff] }
 0x3cd   :  { %2921 = vst.msk [vmem:[#allocation2 + $0x120] sm:$0xff] %vm2884_vm8, %v2789_v3  ;;  %2922 = vst.msk [vmem:[#allocation2 + $0x128] sm:$0xff] %vm2884_vm8, %v2791_v4  ;;  %7381 = vmatprep.mubr.f32.mxu0 %v2973_v11 }
 0x3ce   :  { %7382 = vmatmul.mubr.f32.gmra.mxu0 %v2974_v12 }
 0x3d0   :  { %v2793_v29 = vpop.permute.xlu0 %2792  ;;  %v2795_v30 = vpop.permute.xlu1 %2794  ;;  %v2975_v14 = vld [vmem:[#allocation2 + $0x110] sm:$0xff]  ;;  %v2976_v18 = vld [vmem:[#allocation2 + $0x118] sm:$0xff] }
 0x3d1   :  { %2923 = vst.msk [vmem:[#allocation2 + $0x130] sm:$0xff] %vm2884_vm8, %v2793_v29  ;;  %2924 = vst.msk [vmem:[#allocation2 + $0x138] sm:$0xff] %vm2884_vm8, %v2795_v30  ;;  %7384 = vmatprep.mubr.f32.mxu0 %v2975_v14 }
 0x3d2   :  { %7385 = vmatmul.mubr.f32.gmra.mxu0 %v2976_v18 }
 0x3d4   :  { %v2797_v19 = vpop.permute.xlu0 %2796  ;;  %v2799_v20 = vpop.permute.xlu1 %2798  ;;  %v2977_v21 = vld [vmem:[#allocation2 + $0x120] sm:$0xff]  ;;  %v2978_v24 = vld [vmem:[#allocation2 + $0x128] sm:$0xff] }
 0x3d5   :  { %2925 = vst.msk [vmem:[#allocation2 + $0x140] sm:$0xff] %vm2884_vm8, %v2797_v19  ;;  %2926 = vst.msk [vmem:[#allocation2 + $0x148] sm:$0xff] %vm2884_vm8, %v2799_v20  ;;  %7387 = vmatprep.mubr.f32.mxu0 %v2977_v21 }
 0x3d6   :  { %7388 = vmatmul.mubr.f32.gmra.mxu0 %v2978_v24 }
 0x3d8   :  { %v2801_v26 = vpop.permute.xlu0 %2800  ;;  %v2803_v27 = vpop.permute.xlu1 %2802  ;;  %v2979_v28 = vld [vmem:[#allocation2 + $0x130] sm:$0xff]  ;;  %v2980_v31 = vld [vmem:[#allocation2 + $0x138] sm:$0xff] }
 0x3d9   :  { %2927 = vst.msk [vmem:[#allocation2 + $0x150] sm:$0xff] %vm2884_vm8, %v2801_v26  ;;  %2928 = vst.msk [vmem:[#allocation2 + $0x158] sm:$0xff] %vm2884_vm8, %v2803_v27  ;;  %7390 = vmatprep.mubr.f32.mxu0 %v2979_v28 }
 0x3da   :  { %7391 = vmatmul.mubr.f32.gmra.mxu0 %v2980_v31 }
 0x3dc   :  { %v2805_v33 = vpop.permute.xlu0 %2804  ;;  %v2807_v34 = vpop.permute.xlu1 %2806  ;;  %v2981_v35 = vld [vmem:[#allocation2 + $0x140] sm:$0xff]  ;;  %v2982_v37 = vld [vmem:[#allocation2 + $0x148] sm:$0xff] }
 0x3dd   :  { %2929 = vst.msk [vmem:[#allocation2 + $0x160] sm:$0xff] %vm2884_vm8, %v2805_v33  ;;  %2930 = vst.msk [vmem:[#allocation2 + $0x168] sm:$0xff] %vm2884_vm8, %v2807_v34  ;;  %7393 = vmatprep.mubr.f32.mxu0 %v2981_v35 }
 0x3de   :  { %7394 = vmatmul.mubr.f32.gmra.mxu0 %v2982_v37 }
 0x3e0   :  { %v2809_v39 = vpop.permute.xlu0 %2808  ;;  %v2811_v40 = vpop.permute.xlu1 %2810  ;;  %v2983_v41 = vld [vmem:[#allocation2 + $0x150] sm:$0xff]  ;;  %v2984_v42 = vld [vmem:[#allocation2 + $0x158] sm:$0xff] }
 0x3e1   :  { %2931 = vst.msk [vmem:[#allocation2 + $0x170] sm:$0xff] %vm2884_vm8, %v2809_v39  ;;  %2932 = vst.msk [vmem:[#allocation2 + $0x178] sm:$0xff] %vm2884_vm8, %v2811_v40  ;;  %7396 = vmatprep.mubr.f32.mxu0 %v2983_v41 }
 0x3e2   :  { %7397 = vmatmul.mubr.f32.gmra.mxu0 %v2984_v42 }
 0x3e4   :  { %v2813_v43 = vpop.permute.xlu0 %2812  ;;  %v2815_v44 = vpop.permute.xlu1 %2814  ;;  %v2985_v47 = vld [vmem:[#allocation2 + $0x160] sm:$0xff]  ;;  %v2986_v48 = vld [vmem:[#allocation2 + $0x168] sm:$0xff] }
 0x3e5   :  { %2933 = vst.msk [vmem:[#allocation2 + $0x180] sm:$0xff] %vm2884_vm8, %v2813_v43  ;;  %2934 = vst.msk [vmem:[#allocation2 + $0x188] sm:$0xff] %vm2884_vm8, %v2815_v44  ;;  %7399 = vmatprep.mubr.f32.mxu0 %v2985_v47 }
 0x3e6   :  { %7400 = vmatmul.mubr.f32.gmra.mxu0 %v2986_v48 }
 0x3e8   :  { %v2817_v49 = vpop.permute.xlu0 %2816  ;;  %v2819_v50 = vpop.permute.xlu1 %2818  ;;  %v2987_v45 = vld [vmem:[#allocation2 + $0x170] sm:$0xff]  ;;  %v2988_v46 = vld [vmem:[#allocation2 + $0x178] sm:$0xff] }
 0x3e9   :  { %2935 = vst.msk [vmem:[#allocation2 + $0x190] sm:$0xff] %vm2884_vm8, %v2817_v49  ;;  %2936 = vst.msk [vmem:[#allocation2 + $0x198] sm:$0xff] %vm2884_vm8, %v2819_v50  ;;  %7402 = vmatprep.mubr.f32.mxu0 %v2987_v45 }
 0x3ea   :  { %7403 = vmatmul.mubr.f32.gmra.mxu0 %v2988_v46 }
 0x3ec   :  { %v2989_v53 = vld [vmem:[#allocation2 + $0x180] sm:$0xff]  ;;  %v2990_v54 = vld [vmem:[#allocation2 + $0x188] sm:$0xff]  ;;  %v2821_v61 = vpop.permute.xlu0 %2820  ;;  %v2823_v62 = vpop.permute.xlu1 %2822 }
 0x3ed   :  { %7405 = vmatprep.mubr.f32.mxu0 %v2989_v53  ;;  %2937 = vst.msk [vmem:[#allocation2 + $0x1a0] sm:$0xff] %vm2884_vm8, %v2821_v61  ;;  %2938 = vst.msk [vmem:[#allocation2 + $0x1a8] sm:$0xff] %vm2884_vm8, %v2823_v62 }
 0x3ee   :  { %7406 = vmatmul.mubr.f32.gmra.mxu0 %v2990_v54 }
 0x3f0   :  { %v2991_v57 = vld [vmem:[#allocation2 + $0x190] sm:$0xff]  ;;  %v2992_v58 = vld [vmem:[#allocation2 + $0x198] sm:$0xff] }
 0x3f1   :  { %7408 = vmatprep.mubr.f32.mxu0 %v2991_v57 }
 0x3f2   :  { %7409 = vmatmul.mubr.f32.gmra.mxu0 %v2992_v58 }
 0x3f4   :  { %v2993_v1 = vld [vmem:[#allocation2 + $0x1a0] sm:$0xff]  ;;  %v2994_v2 = vld [vmem:[#allocation2 + $0x1a8] sm:$0xff] }
 0x3f5   :  { %7411 = vmatprep.mubr.f32.mxu0 %v2993_v1 }
 0x3f6   :  { %7412 = vmatmul.mubr.f32.gmra.mxu0 %v2994_v2 }
 0x40c   :  { %v2827_v5 = vpop.permute.xlu1 %2826 }
 0x40d   :  { %2940 = vst.msk [vmem:[#allocation2 + $0x1b8] sm:$0xff] %vm2884_vm8, %v2827_v5 }
 0x410   :  { %v2825_v6 = vpop.permute.xlu0 %2824 }
 0x411   :  { %2939 = vst.msk [vmem:[#allocation2 + $0x1b0] sm:$0xff] %vm2884_vm8, %v2825_v6  ;;  %vm5559_vm8 = vcmask 519616  }
 0x414   :  { %v2996_v16 = vld [vmem:[#allocation2 + $0x1b8] sm:$0xff] }
 0x418   :  { %v2995_v0 = vld [vmem:[#allocation2 + $0x1b0] sm:$0xff] }
 0x419   :  { %7414 = vmatprep.mubr.f32.mxu0 %v2995_v0 }
 0x41a   :  { %7415 = vmatmul.mubr.f32.gmra.mxu0 %v2996_v16 }
 0x44e   :  { %v7335_v10 = vpop.f32.mrf.mxu0 }
 0x44f   :  { %v3092_v13 = vadd.f32 %v7335_v10, %v10250_v9 }
 0x450   :  { %v3086_v15 = vpop.f32.mrf.mxu0 }
 0x451   :  { %v3366_v22 = vmax.f32 %v3092_v13, 0.0  ;;  %v3087_v23 = vadd.f32 %v10250_v9, %v3086_v15 }
 0x452   :  { %v7338_v36 = vpop.f32.mrf.mxu0 }
 0x453   :  { %3422 = vst [vmem:[#allocation3 + $0x8] sm:$0xff] %v3366_v22  ;;  %v3365_v38 = vmax.f32 %v3087_v23, 0.0  ;;  %v3102_v51 = vadd.f32 %v7338_v36, %v10250_v9 }
 0x454   :  { %v3096_v52 = vpop.f32.mrf.mxu0 }
 0x455   :  { %3421 = vst [vmem:[#allocation3] sm:$0xff] %v3365_v38  ;;  %v3368_v55 = vmax.f32 %v3102_v51, 0.0  ;;  %v3097_v56 = vadd.f32 %v10250_v9, %v3096_v52  ;;  %3526 = vst.msk [vmem:[#allocation4] sm:$0xff] %vm3525_vm9, %v3365_v38 }
 0x456   :  { %v7341_v63 = vpop.f32.mrf.mxu0 }
 0x457   :  { %3424 = vst [vmem:[#allocation3 + $0x18] sm:$0xff] %v3368_v55  ;;  %v3367_v7 = vmax.f32 %v3097_v56, 0.0  ;;  %v3112_v8 = vadd.f32 %v7341_v63, %v10250_v9 }
 0x458   :  { %v3106_v17 = vpop.f32.mrf.mxu0 }
 0x459   :  { %3423 = vst [vmem:[#allocation3 + $0x10] sm:$0xff] %v3367_v7  ;;  %v3370_v59 = vmax.f32 %v3112_v8, 0.0  ;;  %v3107_v60 = vadd.f32 %v10250_v9, %v3106_v17  ;;  %3529 = vst.msk [vmem:[#allocation4 + $0x10] sm:$0xff] %vm3525_vm9, %v3367_v7 }
 0x45a   :  { %v7344_v3 = vpop.f32.mrf.mxu0  ;;  %v3576_v4 = vld [vmem:[#allocation3 + $0x9] sm:$0xf] }
 0x45b   :  { %v3478_v11 = vld [vmem:[#allocation3 + $0x8] sm:$0xf]  ;;  %3426 = vst [vmem:[#allocation3 + $0x28] sm:$0xff] %v3370_v59  ;;  %v3369_v12 = vmax.f32 %v3107_v60, 0.0  ;;  %v3122_v29 = vadd.f32 %v7344_v3, %v10250_v9  ;;  %3673 = vrot.lane.b32.xlu1 %v3576_v4, %s7526_s19 }
 0x45c   :  { %3528 = vst.msk [vmem:[#allocation4 + $0x8] sm:$0xf] %vm3527_vm10, %v3478_v11  ;;  %v3116_v30 = vpop.f32.mrf.mxu0  ;;  %v3575_v14 = vld [vmem:[#allocation3 + $0x1] sm:$0xff] }
 0x45d   :  { %3425 = vst [vmem:[#allocation3 + $0x20] sm:$0xff] %v3369_v12  ;;  %v3372_v18 = vmax.f32 %v3122_v29, 0.0  ;;  %v3117_v19 = vadd.f32 %v10250_v9, %v3116_v30  ;;  %3671 = vrot.lane.b32.xlu0 %v3575_v14, %s7526_s19  ;;  %3531 = vst.msk [vmem:[#allocation4 + $0x20] sm:$0xff] %vm3525_vm9, %v3369_v12 }
 0x45e   :  { %v7347_v20 = vpop.f32.mrf.mxu0  ;;  %v3578_v21 = vld [vmem:[#allocation3 + $0x19] sm:$0xf] }
 0x45f   :  { %v3480_v24 = vld [vmem:[#allocation3 + $0x18] sm:$0xf]  ;;  %3428 = vst [vmem:[#allocation3 + $0x38] sm:$0xff] %v3372_v18  ;;  %v3371_v25 = vmax.f32 %v3117_v19, 0.0  ;;  %v3132_v26 = vadd.f32 %v7347_v20, %v10250_v9  ;;  %3677 = vrot.lane.b32.xlu1 %v3578_v21, %s7526_s19 }
 0x460   :  { %3530 = vst.msk [vmem:[#allocation4 + $0x18] sm:$0xf] %vm3527_vm10, %v3480_v24  ;;  %v3126_v27 = vpop.f32.mrf.mxu0  ;;  %v3577_v28 = vld [vmem:[#allocation3 + $0x11] sm:$0xff] }
 0x461   :  { %3427 = vst [vmem:[#allocation3 + $0x30] sm:$0xff] %v3371_v25  ;;  %v3374_v31 = vmax.f32 %v3132_v26, 0.0  ;;  %v3127_v32 = vadd.f32 %v10250_v9, %v3126_v27  ;;  %3675 = vrot.lane.b32.xlu0 %v3577_v28, %s7526_s19  ;;  %3533 = vst.msk [vmem:[#allocation4 + $0x30] sm:$0xff] %vm3525_vm9, %v3371_v25 }
 0x462   :  { %v7350_v33 = vpop.f32.mrf.mxu0  ;;  %v3580_v34 = vld [vmem:[#allocation3 + $0x29] sm:$0xf] }
 0x463   :  { %v3482_v35 = vld [vmem:[#allocation3 + $0x28] sm:$0xf]  ;;  %3430 = vst [vmem:[#allocation3 + $0x48] sm:$0xff] %v3374_v31  ;;  %v3373_v37 = vmax.f32 %v3127_v32, 0.0  ;;  %v3142_v39 = vadd.f32 %v7350_v33, %v10250_v9  ;;  %3681 = vrot.lane.b32.xlu1 %v3580_v34, %s7526_s19 }
 0x464   :  { %3532 = vst.msk [vmem:[#allocation4 + $0x28] sm:$0xf] %vm3527_vm10, %v3482_v35  ;;  %v3136_v40 = vpop.f32.mrf.mxu0  ;;  %v3579_v41 = vld [vmem:[#allocation3 + $0x21] sm:$0xff] }
 0x465   :  { %3429 = vst [vmem:[#allocation3 + $0x40] sm:$0xff] %v3373_v37  ;;  %v3376_v42 = vmax.f32 %v3142_v39, 0.0  ;;  %v3137_v43 = vadd.f32 %v10250_v9, %v3136_v40  ;;  %3679 = vrot.lane.b32.xlu0 %v3579_v41, %s7526_s19  ;;  %3535 = vst.msk [vmem:[#allocation4 + $0x40] sm:$0xff] %vm3525_vm9, %v3373_v37 }
 0x466   :  { %v7353_v44 = vpop.f32.mrf.mxu0  ;;  %v3582_v47 = vld [vmem:[#allocation3 + $0x39] sm:$0xf] }
 0x467   :  { %v3484_v48 = vld [vmem:[#allocation3 + $0x38] sm:$0xf]  ;;  %3432 = vst [vmem:[#allocation3 + $0x58] sm:$0xff] %v3376_v42  ;;  %v3375_v49 = vmax.f32 %v3137_v43, 0.0  ;;  %v3152_v50 = vadd.f32 %v7353_v44, %v10250_v9  ;;  %3685 = vrot.lane.b32.xlu1 %v3582_v47, %s7526_s19 }
 0x468   :  { %3534 = vst.msk [vmem:[#allocation4 + $0x38] sm:$0xf] %vm3527_vm10, %v3484_v48  ;;  %v3146_v45 = vpop.f32.mrf.mxu0  ;;  %v3581_v46 = vld [vmem:[#allocation3 + $0x31] sm:$0xff] }
 0x469   :  { %3431 = vst [vmem:[#allocation3 + $0x50] sm:$0xff] %v3375_v49  ;;  %v3378_v53 = vmax.f32 %v3152_v50, 0.0  ;;  %v3147_v54 = vadd.f32 %v10250_v9, %v3146_v45  ;;  %3683 = vrot.lane.b32.xlu0 %v3581_v46, %s7526_s19  ;;  %3537 = vst.msk [vmem:[#allocation4 + $0x50] sm:$0xff] %vm3525_vm9, %v3375_v49 }
 0x46a   :  { %v7356_v57 = vpop.f32.mrf.mxu0  ;;  %v3584_v58 = vld [vmem:[#allocation3 + $0x49] sm:$0xf] }
 0x46b   :  { %v3486_v61 = vld [vmem:[#allocation3 + $0x48] sm:$0xf]  ;;  %3434 = vst [vmem:[#allocation3 + $0x68] sm:$0xff] %v3378_v53  ;;  %v3377_v62 = vmax.f32 %v3147_v54, 0.0  ;;  %v3162_v1 = vadd.f32 %v7356_v57, %v10250_v9  ;;  %3689 = vrot.lane.b32.xlu1 %v3584_v58, %s7526_s19 }
 0x46c   :  { %3536 = vst.msk [vmem:[#allocation4 + $0x48] sm:$0xf] %vm3527_vm10, %v3486_v61  ;;  %v3156_v2 = vpop.f32.mrf.mxu0  ;;  %v3583_v5 = vld [vmem:[#allocation3 + $0x41] sm:$0xff] }
 0x46d   :  { %3433 = vst [vmem:[#allocation3 + $0x60] sm:$0xff] %v3377_v62  ;;  %v3380_v6 = vmax.f32 %v3162_v1, 0.0  ;;  %v3157_v10 = vadd.f32 %v10250_v9, %v3156_v2  ;;  %3687 = vrot.lane.b32.xlu0 %v3583_v5, %s7526_s19  ;;  %3539 = vst.msk [vmem:[#allocation4 + $0x60] sm:$0xff] %vm3525_vm9, %v3377_v62 }
 0x46e   :  { %v7359_v13 = vpop.f32.mrf.mxu0  ;;  %v3586_v15 = vld [vmem:[#allocation3 + $0x59] sm:$0xf] }
 0x46f   :  { %v3488_v22 = vld [vmem:[#allocation3 + $0x58] sm:$0xf]  ;;  %3436 = vst [vmem:[#allocation3 + $0x78] sm:$0xff] %v3380_v6  ;;  %v3379_v23 = vmax.f32 %v3157_v10, 0.0  ;;  %v3172_v36 = vadd.f32 %v7359_v13, %v10250_v9  ;;  %3693 = vrot.lane.b32.xlu1 %v3586_v15, %s7526_s19 }
 0x470   :  { %3538 = vst.msk [vmem:[#allocation4 + $0x58] sm:$0xf] %vm3527_vm10, %v3488_v22  ;;  %v3166_v38 = vpop.f32.mrf.mxu0  ;;  %v3585_v51 = vld [vmem:[#allocation3 + $0x51] sm:$0xff] }
 0x471   :  { %3435 = vst [vmem:[#allocation3 + $0x70] sm:$0xff] %v3379_v23  ;;  %v3382_v52 = vmax.f32 %v3172_v36, 0.0  ;;  %v3167_v55 = vadd.f32 %v10250_v9, %v3166_v38  ;;  %3691 = vrot.lane.b32.xlu0 %v3585_v51, %s7526_s19  ;;  %3541 = vst.msk [vmem:[#allocation4 + $0x70] sm:$0xff] %vm3525_vm9, %v3379_v23 }
 0x472   :  { %v7362_v56 = vpop.f32.mrf.mxu0  ;;  %v3588_v63 = vld [vmem:[#allocation3 + $0x69] sm:$0xf] }
 0x473   :  { %v3490_v0 = vld [vmem:[#allocation3 + $0x68] sm:$0xf]  ;;  %3438 = vst [vmem:[#allocation3 + $0x88] sm:$0xff] %v3382_v52  ;;  %v3381_v7 = vmax.f32 %v3167_v55, 0.0  ;;  %v3182_v8 = vadd.f32 %v7362_v56, %v10250_v9  ;;  %3697 = vrot.lane.b32.xlu1 %v3588_v63, %s7526_s19 }
 0x474   :  { %3540 = vst.msk [vmem:[#allocation4 + $0x68] sm:$0xf] %vm3527_vm10, %v3490_v0  ;;  %v3176_v16 = vpop.f32.mrf.mxu0  ;;  %v3587_v17 = vld [vmem:[#allocation3 + $0x61] sm:$0xff] }
 0x475   :  { %3437 = vst [vmem:[#allocation3 + $0x80] sm:$0xff] %v3381_v7  ;;  %v3384_v59 = vmax.f32 %v3182_v8, 0.0  ;;  %v3177_v60 = vadd.f32 %v10250_v9, %v3176_v16  ;;  %3695 = vrot.lane.b32.xlu0 %v3587_v17, %s7526_s19  ;;  %3543 = vst.msk [vmem:[#allocation4 + $0x80] sm:$0xff] %vm3525_vm9, %v3381_v7 }
 0x476   :  { %v7365_v3 = vpop.f32.mrf.mxu0  ;;  %v3590_v4 = vld [vmem:[#allocation3 + $0x79] sm:$0xf] }
 0x477   :  { %v3492_v11 = vld [vmem:[#allocation3 + $0x78] sm:$0xf]  ;;  %3440 = vst [vmem:[#allocation3 + $0x98] sm:$0xff] %v3384_v59  ;;  %v3383_v12 = vmax.f32 %v3177_v60, 0.0  ;;  %v3192_v29 = vadd.f32 %v7365_v3, %v10250_v9  ;;  %3701 = vrot.lane.b32.xlu1 %v3590_v4, %s7526_s19 }
 0x478   :  { %3542 = vst.msk [vmem:[#allocation4 + $0x78] sm:$0xf] %vm3527_vm10, %v3492_v11  ;;  %v3186_v30 = vpop.f32.mrf.mxu0  ;;  %v3589_v14 = vld [vmem:[#allocation3 + $0x71] sm:$0xff] }
 0x479   :  { %3439 = vst [vmem:[#allocation3 + $0x90] sm:$0xff] %v3383_v12  ;;  %v3386_v18 = vmax.f32 %v3192_v29, 0.0  ;;  %v3187_v19 = vadd.f32 %v10250_v9, %v3186_v30  ;;  %3699 = vrot.lane.b32.xlu0 %v3589_v14, %s7526_s19  ;;  %3545 = vst.msk [vmem:[#allocation4 + $0x90] sm:$0xff] %vm3525_vm9, %v3383_v12 }
 0x47a   :  { %v7368_v20 = vpop.f32.mrf.mxu0  ;;  %v3592_v21 = vld [vmem:[#allocation3 + $0x89] sm:$0xf] }
 0x47b   :  { %v3494_v24 = vld [vmem:[#allocation3 + $0x88] sm:$0xf]  ;;  %3442 = vst [vmem:[#allocation3 + $0xa8] sm:$0xff] %v3386_v18  ;;  %v3385_v25 = vmax.f32 %v3187_v19, 0.0  ;;  %v3202_v26 = vadd.f32 %v7368_v20, %v10250_v9  ;;  %3705 = vrot.lane.b32.xlu1 %v3592_v21, %s7526_s19 }
 0x47c   :  { %3544 = vst.msk [vmem:[#allocation4 + $0x88] sm:$0xf] %vm3527_vm10, %v3494_v24  ;;  %v3196_v27 = vpop.f32.mrf.mxu0  ;;  %v3591_v28 = vld [vmem:[#allocation3 + $0x81] sm:$0xff] }
 0x47d   :  { %3441 = vst [vmem:[#allocation3 + $0xa0] sm:$0xff] %v3385_v25  ;;  %v3388_v31 = vmax.f32 %v3202_v26, 0.0  ;;  %v3197_v32 = vadd.f32 %v10250_v9, %v3196_v27  ;;  %3703 = vrot.lane.b32.xlu0 %v3591_v28, %s7526_s19  ;;  %3547 = vst.msk [vmem:[#allocation4 + $0xa0] sm:$0xff] %vm3525_vm9, %v3385_v25 }
 0x47e   :  { %v7371_v33 = vpop.f32.mrf.mxu0  ;;  %v3594_v34 = vld [vmem:[#allocation3 + $0x99] sm:$0xf] }
 0x47f   :  { %v3496_v35 = vld [vmem:[#allocation3 + $0x98] sm:$0xf]  ;;  %3444 = vst [vmem:[#allocation3 + $0xb8] sm:$0xff] %v3388_v31  ;;  %v3387_v37 = vmax.f32 %v3197_v32, 0.0  ;;  %v3212_v39 = vadd.f32 %v7371_v33, %v10250_v9  ;;  %3709 = vrot.lane.b32.xlu1 %v3594_v34, %s7526_s19 }
 0x480   :  { %3546 = vst.msk [vmem:[#allocation4 + $0x98] sm:$0xf] %vm3527_vm10, %v3496_v35  ;;  %v3206_v40 = vpop.f32.mrf.mxu0  ;;  %v3593_v41 = vld [vmem:[#allocation3 + $0x91] sm:$0xff] }
 0x481   :  { %3443 = vst [vmem:[#allocation3 + $0xb0] sm:$0xff] %v3387_v37  ;;  %v3390_v42 = vmax.f32 %v3212_v39, 0.0  ;;  %v3207_v43 = vadd.f32 %v10250_v9, %v3206_v40  ;;  %3707 = vrot.lane.b32.xlu0 %v3593_v41, %s7526_s19  ;;  %3549 = vst.msk [vmem:[#allocation4 + $0xb0] sm:$0xff] %vm3525_vm9, %v3387_v37 }
 0x482   :  { %v7374_v44 = vpop.f32.mrf.mxu0  ;;  %v3596_v47 = vld [vmem:[#allocation3 + $0xa9] sm:$0xf] }
 0x483   :  { %v3498_v48 = vld [vmem:[#allocation3 + $0xa8] sm:$0xf]  ;;  %3446 = vst [vmem:[#allocation3 + $0xc8] sm:$0xff] %v3390_v42  ;;  %v3389_v49 = vmax.f32 %v3207_v43, 0.0  ;;  %v3222_v50 = vadd.f32 %v7374_v44, %v10250_v9  ;;  %3713 = vrot.lane.b32.xlu1 %v3596_v47, %s7526_s19 }
 0x484   :  { %3548 = vst.msk [vmem:[#allocation4 + $0xa8] sm:$0xf] %vm3527_vm10, %v3498_v48  ;;  %v3216_v45 = vpop.f32.mrf.mxu0  ;;  %v3595_v46 = vld [vmem:[#allocation3 + $0xa1] sm:$0xff] }
 0x485   :  { %3445 = vst [vmem:[#allocation3 + $0xc0] sm:$0xff] %v3389_v49  ;;  %v3392_v53 = vmax.f32 %v3222_v50, 0.0  ;;  %v3217_v54 = vadd.f32 %v10250_v9, %v3216_v45  ;;  %3711 = vrot.lane.b32.xlu0 %v3595_v46, %s7526_s19 }
 0x486   :  { %v7377_v57 = vpop.f32.mrf.mxu0  ;;  %v3598_v58 = vld [vmem:[#allocation3 + $0xb9] sm:$0xf] }
 0x487   :  { %v3500_v61 = vld [vmem:[#allocation3 + $0xb8] sm:$0xf]  ;;  %3448 = vst [vmem:[#allocation3 + $0xd8] sm:$0xff] %v3392_v53  ;;  %v3391_v62 = vmax.f32 %v3217_v54, 0.0  ;;  %v3232_v1 = vadd.f32 %v7377_v57, %v10250_v9  ;;  %3717 = vrot.lane.b32.xlu1 %v3598_v58, %s7526_s19 }
 0x488   :  { %3550 = vst.msk [vmem:[#allocation4 + $0xb8] sm:$0xf] %vm3527_vm10, %v3500_v61  ;;  %v3226_v2 = vpop.f32.mrf.mxu0  ;;  %v3597_v5 = vld [vmem:[#allocation3 + $0xb1] sm:$0xff] }
 0x489   :  { %3447 = vst [vmem:[#allocation3 + $0xd0] sm:$0xff] %v3391_v62  ;;  %v3394_v6 = vmax.f32 %v3232_v1, 0.0  ;;  %v3227_v10 = vadd.f32 %v10250_v9, %v3226_v2  ;;  %3715 = vrot.lane.b32.xlu0 %v3597_v5, %s7526_s19 }
 0x48a   :  { %v7380_v13 = vpop.f32.mrf.mxu0 }
 0x48b   :  { %3450 = vst [vmem:[#allocation3 + $0xe8] sm:$0xff] %v3394_v6  ;;  %v3393_v15 = vmax.f32 %v3227_v10, 0.0  ;;  %v3242_v22 = vadd.f32 %v7380_v13, %v10250_v9 }
 0x48c   :  { %v3236_v23 = vpop.f32.mrf.mxu0 }
 0x48d   :  { %3449 = vst [vmem:[#allocation3 + $0xe0] sm:$0xff] %v3393_v15  ;;  %v3396_v36 = vmax.f32 %v3242_v22, 0.0  ;;  %v3237_v38 = vadd.f32 %v10250_v9, %v3236_v23  ;;  %3551 = vst.msk [vmem:[#allocation4 + $0xc0] sm:$0xff] %vm3525_vm9, %v3393_v15 }
 0x48e   :  { %v7383_v51 = vpop.f32.mrf.mxu0 }
 0x48f   :  { %3452 = vst [vmem:[#allocation3 + $0xf8] sm:$0xff] %v3396_v36  ;;  %v3395_v52 = vmax.f32 %v3237_v38, 0.0  ;;  %v3252_v55 = vadd.f32 %v7383_v51, %v10250_v9 }
 0x490   :  { %v3246_v56 = vpop.f32.mrf.mxu0 }
 0x491   :  { %3451 = vst [vmem:[#allocation3 + $0xf0] sm:$0xff] %v3395_v52  ;;  %v3398_v63 = vmax.f32 %v3252_v55, 0.0  ;;  %v3247_v0 = vadd.f32 %v10250_v9, %v3246_v56  ;;  %3553 = vst.msk [vmem:[#allocation4 + $0xd0] sm:$0xff] %vm3525_vm9, %v3395_v52 }
 0x492   :  { %v7386_v7 = vpop.f32.mrf.mxu0  ;;  %v3600_v8 = vld [vmem:[#allocation3 + $0xe9] sm:$0xf] }
 0x493   :  { %v3502_v16 = vld [vmem:[#allocation3 + $0xe8] sm:$0xf]  ;;  %3454 = vst [vmem:[#allocation3 + $0x108] sm:$0xff] %v3398_v63  ;;  %v3397_v17 = vmax.f32 %v3247_v0, 0.0  ;;  %v3262_v59 = vadd.f32 %v7386_v7, %v10250_v9  ;;  %3721 = vrot.lane.b32.xlu1 %v3600_v8, %s7526_s19 }
 0x494   :  { %3552 = vst.msk [vmem:[#allocation4 + $0xc8] sm:$0xf] %vm3527_vm10, %v3502_v16  ;;  %v3256_v60 = vpop.f32.mrf.mxu0  ;;  %v3599_v3 = vld [vmem:[#allocation3 + $0xe1] sm:$0xff] }
 0x495   :  { %3453 = vst [vmem:[#allocation3 + $0x100] sm:$0xff] %v3397_v17  ;;  %v3400_v4 = vmax.f32 %v3262_v59, 0.0  ;;  %v3257_v11 = vadd.f32 %v10250_v9, %v3256_v60  ;;  %3719 = vrot.lane.b32.xlu0 %v3599_v3, %s7526_s19  ;;  %3555 = vst.msk [vmem:[#allocation4 + $0xe0] sm:$0xff] %vm3525_vm9, %v3397_v17 }
 0x496   :  { %v7389_v12 = vpop.f32.mrf.mxu0  ;;  %v3602_v29 = vld [vmem:[#allocation3 + $0xf9] sm:$0xf] }
 0x497   :  { %v3504_v30 = vld [vmem:[#allocation3 + $0xf8] sm:$0xf]  ;;  %3456 = vst [vmem:[#allocation3 + $0x118] sm:$0xff] %v3400_v4  ;;  %v3399_v14 = vmax.f32 %v3257_v11, 0.0  ;;  %v3272_v18 = vadd.f32 %v7389_v12, %v10250_v9  ;;  %3725 = vrot.lane.b32.xlu1 %v3602_v29, %s7526_s19 }
 0x498   :  { %3554 = vst.msk [vmem:[#allocation4 + $0xd8] sm:$0xf] %vm3527_vm10, %v3504_v30  ;;  %v3266_v19 = vpop.f32.mrf.mxu0  ;;  %v3601_v20 = vld [vmem:[#allocation3 + $0xf1] sm:$0xff] }
 0x499   :  { %3455 = vst [vmem:[#allocation3 + $0x110] sm:$0xff] %v3399_v14  ;;  %v3402_v21 = vmax.f32 %v3272_v18, 0.0  ;;  %v3267_v24 = vadd.f32 %v10250_v9, %v3266_v19  ;;  %3723 = vrot.lane.b32.xlu0 %v3601_v20, %s7526_s19  ;;  %3557 = vst.msk [vmem:[#allocation4 + $0xf0] sm:$0xff] %vm3525_vm9, %v3399_v14 }
 0x49a   :  { %v7392_v25 = vpop.f32.mrf.mxu0  ;;  %v3604_v26 = vld [vmem:[#allocation3 + $0x109] sm:$0xf] }
 0x49b   :  { %v3506_v27 = vld [vmem:[#allocation3 + $0x108] sm:$0xf]  ;;  %3458 = vst [vmem:[#allocation3 + $0x128] sm:$0xff] %v3402_v21  ;;  %v3401_v28 = vmax.f32 %v3267_v24, 0.0  ;;  %v3282_v31 = vadd.f32 %v7392_v25, %v10250_v9  ;;  %3729 = vrot.lane.b32.xlu1 %v3604_v26, %s7526_s19 }
 0x49c   :  { %3556 = vst.msk [vmem:[#allocation4 + $0xe8] sm:$0xf] %vm3527_vm10, %v3506_v27  ;;  %v3276_v32 = vpop.f32.mrf.mxu0  ;;  %v3603_v33 = vld [vmem:[#allocation3 + $0x101] sm:$0xff] }
 0x49d   :  { %3457 = vst [vmem:[#allocation3 + $0x120] sm:$0xff] %v3401_v28  ;;  %v3404_v34 = vmax.f32 %v3282_v31, 0.0  ;;  %v3277_v35 = vadd.f32 %v10250_v9, %v3276_v32  ;;  %3727 = vrot.lane.b32.xlu0 %v3603_v33, %s7526_s19  ;;  %3559 = vst.msk [vmem:[#allocation4 + $0x100] sm:$0xff] %vm3525_vm9, %v3401_v28 }
 0x49e   :  { %v7395_v37 = vpop.f32.mrf.mxu0  ;;  %v3606_v39 = vld [vmem:[#allocation3 + $0x119] sm:$0xf] }
 0x49f   :  { %v3508_v40 = vld [vmem:[#allocation3 + $0x118] sm:$0xf]  ;;  %3460 = vst [vmem:[#allocation3 + $0x138] sm:$0xff] %v3404_v34  ;;  %v3403_v41 = vmax.f32 %v3277_v35, 0.0  ;;  %v3292_v42 = vadd.f32 %v7395_v37, %v10250_v9  ;;  %3733 = vrot.lane.b32.xlu1 %v3606_v39, %s7526_s19  ;;  %v3866_v39 = vld [vmem:[#allocation3 + $0xa] sm:$0xf] }
 0x4a0   :  { %3558 = vst.msk [vmem:[#allocation4 + $0xf8] sm:$0xf] %vm3527_vm10, %v3508_v40  ;;  %v3286_v43 = vpop.f32.mrf.mxu0  ;;  %v3605_v44 = vld [vmem:[#allocation3 + $0x111] sm:$0xff]  ;;  %v3865_v40 = vld [vmem:[#allocation3 + $0x2] sm:$0xff] }
 0x4a1   :  { %3459 = vst [vmem:[#allocation3 + $0x130] sm:$0xff] %v3403_v41  ;;  %v3406_v47 = vmax.f32 %v3292_v42, 0.0  ;;  %v3287_v48 = vadd.f32 %v10250_v9, %v3286_v43  ;;  %3731 = vrot.lane.b32.xlu0 %v3605_v44, %s7526_s19  ;;  %3561 = vst.msk [vmem:[#allocation4 + $0x110] sm:$0xff] %vm3525_vm9, %v3403_v41  ;;  %v3868_v41 = vld [vmem:[#allocation3 + $0x1a] sm:$0xf]  ;;  %v3867_v42 = vld [vmem:[#allocation3 + $0x12] sm:$0xff] }
 0x4a2   :  { %v7398_v49 = vpop.f32.mrf.mxu0  ;;  %v3608_v50 = vld [vmem:[#allocation3 + $0x129] sm:$0xf] }
 0x4a3   :  { %v3510_v45 = vld [vmem:[#allocation3 + $0x128] sm:$0xf]  ;;  %3462 = vst [vmem:[#allocation3 + $0x148] sm:$0xff] %v3406_v47  ;;  %v10361_v46 = vmax.f32 %v3287_v48, 0.0  ;;  %v3302_v53 = vadd.f32 %v7398_v49, %v10250_v9  ;;  %3737 = vrot.lane.b32.xlu1 %v3608_v50, %s7526_s19  ;;  %v3872_v48 = vld [vmem:[#allocation3 + $0x3a] sm:$0xf] }
 0x4a4   :  { %3560 = vst.msk [vmem:[#allocation4 + $0x108] sm:$0xf] %vm3527_vm10, %v3510_v45  ;;  %v3296_v54 = vpop.f32.mrf.mxu0  ;;  %v3607_v57 = vld [vmem:[#allocation3 + $0x121] sm:$0xff]  ;;  %v3870_v43 = vld [vmem:[#allocation3 + $0x2a] sm:$0xf]  ;;  %v3871_v50 = vld [vmem:[#allocation3 + $0x32] sm:$0xff] }
 0x4a5   :  { %3461 = vst [vmem:[#allocation3 + $0x140] sm:$0xff] %v10361_v46  ;;  %v3408_v58 = vmax.f32 %v3302_v53, 0.0  ;;  %v3297_v61 = vadd.f32 %v10250_v9, %v3296_v54  ;;  %3735 = vrot.lane.b32.xlu0 %v3607_v57, %s7526_s19  ;;  %3563 = vst.msk [vmem:[#allocation4 + $0x120] sm:$0xff] %vm3525_vm9, %v10361_v46  ;;  %v3869_v44 = vld [vmem:[#allocation3 + $0x22] sm:$0xff]  ;;  %v3874_v53 = vld [vmem:[#allocation3 + $0x4a] sm:$0xf] }
 0x4a6   :  { %v7401_v62 = vpop.f32.mrf.mxu0  ;;  %v3610_v1 = vld [vmem:[#allocation3 + $0x139] sm:$0xf]  ;;  %v3873_v57 = vld [vmem:[#allocation3 + $0x42] sm:$0xff] }
 0x4a7   :  { %v3512_v2 = vld [vmem:[#allocation3 + $0x138] sm:$0xf]  ;;  %3464 = vst [vmem:[#allocation3 + $0x158] sm:$0xff] %v3408_v58  ;;  %v10371_v5 = vmax.f32 %v3297_v61, 0.0  ;;  %v3312_v6 = vadd.f32 %v7401_v62, %v10250_v9  ;;  %3741 = vrot.lane.b32.xlu1 %v3610_v1, %s7526_s19 }
 0x4a8   :  { %3562 = vst.msk [vmem:[#allocation4 + $0x118] sm:$0xf] %vm3527_vm10, %v3512_v2  ;;  %v3306_v10 = vpop.f32.mrf.mxu0  ;;  %v3609_v13 = vld [vmem:[#allocation3 + $0x131] sm:$0xff]  ;;  %v3876_v61 = vld [vmem:[#allocation3 + $0x5a] sm:$0xf] }
 0x4a9   :  { %3463 = vst [vmem:[#allocation3 + $0x150] sm:$0xff] %v10371_v5  ;;  %v3410_v15 = vmax.f32 %v3312_v6, 0.0  ;;  %v3307_v22 = vadd.f32 %v10250_v9, %v3306_v10  ;;  %3739 = vrot.lane.b32.xlu0 %v3609_v13, %s7526_s19  ;;  %3565 = vst.msk [vmem:[#allocation4 + $0x130] sm:$0xff] %vm3525_vm9, %v10371_v5  ;;  %v3875_v1 = vld [vmem:[#allocation3 + $0x52] sm:$0xff]  ;;  %v3878_v6 = vld [vmem:[#allocation3 + $0x6a] sm:$0xf] }
 0x4aa   :  { %v7404_v23 = vpop.f32.mrf.mxu0  ;;  %v3612_v36 = vld [vmem:[#allocation3 + $0x149] sm:$0xf] }
 0x4ab   :  { %v3514_v38 = vld [vmem:[#allocation3 + $0x148] sm:$0xf]  ;;  %3466 = vst [vmem:[#allocation3 + $0x168] sm:$0xff] %v3410_v15  ;;  %v10381_v51 = vmax.f32 %v3307_v22, 0.0  ;;  %v3322_v52 = vadd.f32 %v7404_v23, %v10250_v9  ;;  %3745 = vrot.lane.b32.xlu1 %v3612_v36, %s7526_s19  ;;  %v3880_v22 = vld [vmem:[#allocation3 + $0x7a] sm:$0xf] }
 0x4ac   :  { %3564 = vst.msk [vmem:[#allocation4 + $0x128] sm:$0xf] %vm3527_vm10, %v3514_v38  ;;  %v3316_v55 = vpop.f32.mrf.mxu0  ;;  %v3611_v56 = vld [vmem:[#allocation3 + $0x141] sm:$0xff]  ;;  %v3879_v36 = vld [vmem:[#allocation3 + $0x72] sm:$0xff] }
 0x4ad   :  { %3465 = vst [vmem:[#allocation3 + $0x160] sm:$0xff] %v10381_v51  ;;  %v3412_v63 = vmax.f32 %v3322_v52, 0.0  ;;  %v3317_v0 = vadd.f32 %v10250_v9, %v3316_v55  ;;  %3743 = vrot.lane.b32.xlu0 %v3611_v56, %s7526_s19  ;;  %3567 = vst.msk [vmem:[#allocation4 + $0x140] sm:$0xff] %vm3525_vm9, %v10381_v51  ;;  %v3877_v13 = vld [vmem:[#allocation3 + $0x62] sm:$0xff]  ;;  %v3882_v52 = vld [vmem:[#allocation3 + $0x8a] sm:$0xf] }
 0x4ae   :  { %v7407_v7 = vpop.f32.mrf.mxu0  ;;  %v3614_v8 = vld [vmem:[#allocation3 + $0x159] sm:$0xf]  ;;  %v3881_v56 = vld [vmem:[#allocation3 + $0x82] sm:$0xff] }
 0x4af   :  { %v3516_v16 = vld [vmem:[#allocation3 + $0x158] sm:$0xf]  ;;  %3468 = vst [vmem:[#allocation3 + $0x178] sm:$0xff] %v3412_v63  ;;  %v10391_v17 = vmax.f32 %v3317_v0, 0.0  ;;  %v3332_v59 = vadd.f32 %v7407_v7, %v10250_v9  ;;  %3749 = vrot.lane.b32.xlu1 %v3614_v8, %s7526_s19 }
 0x4b0   :  { %3566 = vst.msk [vmem:[#allocation4 + $0x138] sm:$0xf] %vm3527_vm10, %v3516_v16  ;;  %v3326_v60 = vpop.f32.mrf.mxu0  ;;  %v3613_v3 = vld [vmem:[#allocation3 + $0x151] sm:$0xff]  ;;  %v3884_v0 = vld [vmem:[#allocation3 + $0x9a] sm:$0xf] }
 0x4b1   :  { %3467 = vst [vmem:[#allocation3 + $0x170] sm:$0xff] %v10391_v17  ;;  %v3414_v4 = vmax.f32 %v3332_v59, 0.0  ;;  %v3327_v11 = vadd.f32 %v10250_v9, %v3326_v60  ;;  %3747 = vrot.lane.b32.xlu0 %v3613_v3, %s7526_s19  ;;  %3569 = vst.msk [vmem:[#allocation4 + $0x150] sm:$0xff] %vm3525_vm9, %v10391_v17  ;;  %v3883_v8 = vld [vmem:[#allocation3 + $0x92] sm:$0xff]  ;;  %v3886_v59 = vld [vmem:[#allocation3 + $0xaa] sm:$0xf] }
 0x4b2   :  { %v7410_v12 = vpop.f32.mrf.mxu0  ;;  %v3616_v29 = vld [vmem:[#allocation3 + $0x169] sm:$0xf] }
 0x4b3   :  { %v3518_v30 = vld [vmem:[#allocation3 + $0x168] sm:$0xf]  ;;  %3470 = vst [vmem:[#allocation3 + $0x188] sm:$0xff] %v3414_v4  ;;  %v10401_v14 = vmax.f32 %v3327_v11, 0.0  ;;  %v3342_v18 = vadd.f32 %v7410_v12, %v10250_v9  ;;  %3753 = vrot.lane.b32.xlu1 %v3616_v29, %s7526_s19  ;;  %v3888_v11 = vld [vmem:[#allocation3 + $0xba] sm:$0xf] }
 0x4b4   :  { %3568 = vst.msk [vmem:[#allocation4 + $0x148] sm:$0xf] %vm3527_vm10, %v3518_v30  ;;  %v3336_v19 = vpop.f32.mrf.mxu0  ;;  %v3615_v20 = vld [vmem:[#allocation3 + $0x161] sm:$0xff]  ;;  %v3887_v29 = vld [vmem:[#allocation3 + $0xb2] sm:$0xff] }
 0x4b5   :  { %3469 = vst [vmem:[#allocation3 + $0x180] sm:$0xff] %v10401_v14  ;;  %v3416_v21 = vmax.f32 %v3342_v18, 0.0  ;;  %v3337_v24 = vadd.f32 %v10250_v9, %v3336_v19  ;;  %3751 = vrot.lane.b32.xlu0 %v3615_v20, %s7526_s19  ;;  %3571 = vst.msk [vmem:[#allocation4 + $0x160] sm:$0xff] %vm3525_vm9, %v10401_v14  ;;  %v3885_v3 = vld [vmem:[#allocation3 + $0xa2] sm:$0xff]  ;;  %v3890_v20 = vld [vmem:[#allocation3 + $0xea] sm:$0xf] }
 0x4b6   :  { %v3618_v25 = vld [vmem:[#allocation3 + $0x179] sm:$0xf]  ;;  %v7413_v30 = vpop.f32.mrf.mxu0 }
 0x4b7   :  { %v3520_v26 = vld [vmem:[#allocation3 + $0x178] sm:$0xf]  ;;  %3472 = vst [vmem:[#allocation3 + $0x198] sm:$0xff] %v3416_v21  ;;  %v10411_v27 = vmax.f32 %v3337_v24, 0.0  ;;  %3757 = vrot.lane.b32.xlu1 %v3618_v25, %s7526_s19  ;;  %v3352_v19 = vadd.f32 %v7413_v30, %v10250_v9 }
 0x4b8   :  { %3570 = vst.msk [vmem:[#allocation4 + $0x158] sm:$0xf] %vm3527_vm10, %v3520_v26  ;;  %v3617_v28 = vld [vmem:[#allocation3 + $0x171] sm:$0xff]  ;;  %v3346_v21 = vpop.f32.mrf.mxu0 }
 0x4b9   :  { %3471 = vst [vmem:[#allocation3 + $0x190] sm:$0xff] %v10411_v27  ;;  %3755 = vrot.lane.b32.xlu0 %v3617_v28, %s7526_s19  ;;  %3573 = vst.msk [vmem:[#allocation4 + $0x170] sm:$0xff] %vm3525_vm9, %v10411_v27  ;;  %v3418_v25 = vmax.f32 %v3352_v19, 0.0  ;;  %v10471_v26 = vadd.f32 %v10250_v9, %v3346_v21  ;;  %v3889_v28 = vld [vmem:[#allocation3 + $0xe2] sm:$0xff]  ;;  %v3891_v9 = vld [vmem:[#allocation3 + $0xf2] sm:$0xff]  ;;  %vm5847_vm9 = vcmask 589312  }
 0x4ba   :  { %v3620_v31 = vld [vmem:[#allocation3 + $0x189] sm:$0xf]  ;;  %v4157_v30 = vld [vmem:[#allocation3 + $0x18] sm:$0xf]  ;;  %v4156_v19 = vld [vmem:[#allocation3 + $0x10] sm:$0xff] }
 0x4bb   :  { %v3522_v32 = vld [vmem:[#allocation3 + $0x188] sm:$0xf]  ;;  %3761 = vrot.lane.b32.xlu1 %v3620_v31, %s7526_s19  ;;  %3474 = vst [vmem:[#allocation3 + $0x1a8] sm:$0xff] %v3418_v25  ;;  %v4158_v25 = vld [vmem:[#allocation3 + $0x20] sm:$0xff] }
 0x4bc   :  { %3572 = vst.msk [vmem:[#allocation4 + $0x168] sm:$0xf] %vm3527_vm10, %v3522_v32  ;;  %v3619_v33 = vld [vmem:[#allocation3 + $0x181] sm:$0xff]  ;;  %v3417_v32 = vmax.f32 %v10471_v26, 0.0 }
 0x4bd   :  { %3759 = vrot.lane.b32.xlu0 %v3619_v33, %s7526_s19  ;;  %v3892_v33 = vld [vmem:[#allocation3 + $0xfa] sm:$0xf]  ;;  %v4159_v21 = vld [vmem:[#allocation3 + $0x28] sm:$0xf] }
 0x4be   :  { %v3622_v34 = vld [vmem:[#allocation3 + $0x199] sm:$0xf]  ;;  %3473 = vst [vmem:[#allocation3 + $0x1a0] sm:$0xff] %v3417_v32  ;;  %v4448_v26 = vld [vmem:[#allocation3 + $0x21] sm:$0xff] }
 0x4bf   :  { %v3524_v35 = vld [vmem:[#allocation3 + $0x198] sm:$0xf]  ;;  %3765 = vrot.lane.b32.xlu1 %v3622_v34, %s7526_s19 }
 0x4c0   :  { %3574 = vst.msk [vmem:[#allocation4 + $0x178] sm:$0xf] %vm3527_vm10, %v3524_v35  ;;  %v3621_v37 = vld [vmem:[#allocation3 + $0x191] sm:$0xff]  ;;  %vm5849_vm10 = vcmask 585216  }
 0x4c1   :  { %3763 = vrot.lane.b32.xlu0 %v3621_v37, %s7526_s19  ;;  %v3894_v37 = vld [vmem:[#allocation3 + $0x10a] sm:$0xf] }
 0x4c3   :  { %3963 = vrot.lane.b32.xlu1 %v3866_v39, %s7528_s26 }
 0x4c5   :  { %3961 = vrot.lane.b32.xlu0 %v3865_v40, %s7528_s26  ;;  %v3893_v40 = vld [vmem:[#allocation3 + $0x102] sm:$0xff] }
 0x4c7   :  { %3967 = vrot.lane.b32.xlu1 %v3868_v41, %s7528_s26  ;;  %v3896_v41 = vld [vmem:[#allocation3 + $0x11a] sm:$0xf] }
 0x4c9   :  { %3965 = vrot.lane.b32.xlu0 %v3867_v42, %s7528_s26  ;;  %v3895_v42 = vld [vmem:[#allocation3 + $0x112] sm:$0xff] }
 0x4cb   :  { %3971 = vrot.lane.b32.xlu1 %v3870_v43, %s7528_s26  ;;  %v3898_v43 = vld [vmem:[#allocation3 + $0x12a] sm:$0xf] }
 0x4cd   :  { %v3674_v47 = vpop.permute.xlu1 %3673  ;;  %3969 = vrot.lane.b32.xlu0 %v3869_v44, %s7528_s26  ;;  %v3897_v44 = vld [vmem:[#allocation3 + $0x122] sm:$0xff] }
 0x4ce   :  { %3818 = vst.msk [vmem:[#allocation4 + $0x8] sm:$0xf] %vm3817_vm11, %v3674_v47 }
 0x4cf   :  { %3975 = vrot.lane.b32.xlu1 %v3872_v48, %s7528_s26  ;;  %v3672_v49 = vpop.permute.xlu0 %3671  ;;  %v3900_v48 = vld [vmem:[#allocation3 + $0x13a] sm:$0xf] }
 0x4d0   :  { %3816 = vst.msk [vmem:[#allocation4] sm:$0xff] %vm3815_vm12, %v3672_v49 }
 0x4d1   :  { %v3678_v45 = vpop.permute.xlu1 %3677  ;;  %3973 = vrot.lane.b32.xlu0 %v3871_v50, %s7528_s26  ;;  %v3899_v50 = vld [vmem:[#allocation3 + $0x132] sm:$0xff] }
 0x4d2   :  { %3820 = vst.msk [vmem:[#allocation4 + $0x18] sm:$0xf] %vm3817_vm11, %v3678_v45 }
 0x4d3   :  { %3979 = vrot.lane.b32.xlu1 %v3874_v53, %s7528_s26  ;;  %v3676_v54 = vpop.permute.xlu0 %3675  ;;  %v3902_v53 = vld [vmem:[#allocation3 + $0x14a] sm:$0xf] }
 0x4d4   :  { %3819 = vst.msk [vmem:[#allocation4 + $0x10] sm:$0xff] %vm3815_vm12, %v3676_v54 }
 0x4d5   :  { %v3682_v58 = vpop.permute.xlu1 %3681  ;;  %3977 = vrot.lane.b32.xlu0 %v3873_v57, %s7528_s26  ;;  %v3901_v57 = vld [vmem:[#allocation3 + $0x142] sm:$0xff] }
 0x4d6   :  { %3822 = vst.msk [vmem:[#allocation4 + $0x28] sm:$0xf] %vm3817_vm11, %v3682_v58 }
 0x4d7   :  { %3983 = vrot.lane.b32.xlu1 %v3876_v61, %s7528_s26  ;;  %v3680_v62 = vpop.permute.xlu0 %3679  ;;  %v3904_v61 = vld [vmem:[#allocation3 + $0x15a] sm:$0xf] }
 0x4d8   :  { %3821 = vst.msk [vmem:[#allocation4 + $0x20] sm:$0xff] %vm3815_vm12, %v3680_v62 }
 0x4d9   :  { %v3686_v2 = vpop.permute.xlu1 %3685  ;;  %3981 = vrot.lane.b32.xlu0 %v3875_v1, %s7528_s26  ;;  %v3903_v1 = vld [vmem:[#allocation3 + $0x152] sm:$0xff] }
 0x4da   :  { %3824 = vst.msk [vmem:[#allocation4 + $0x38] sm:$0xf] %vm3817_vm11, %v3686_v2 }
 0x4db   :  { %3987 = vrot.lane.b32.xlu1 %v3878_v6, %s7528_s26  ;;  %v3684_v10 = vpop.permute.xlu0 %3683  ;;  %v3906_v6 = vld [vmem:[#allocation3 + $0x16a] sm:$0xf] }
 0x4dc   :  { %3823 = vst.msk [vmem:[#allocation4 + $0x30] sm:$0xff] %vm3815_vm12, %v3684_v10 }
 0x4dd   :  { %v3690_v15 = vpop.permute.xlu1 %3689  ;;  %3985 = vrot.lane.b32.xlu0 %v3877_v13, %s7528_s26  ;;  %v3905_v13 = vld [vmem:[#allocation3 + $0x162] sm:$0xff] }
 0x4de   :  { %3826 = vst.msk [vmem:[#allocation4 + $0x48] sm:$0xf] %vm3817_vm11, %v3690_v15 }
 0x4df   :  { %3991 = vrot.lane.b32.xlu1 %v3880_v22, %s7528_s26  ;;  %v3688_v23 = vpop.permute.xlu0 %3687  ;;  %v3908_v22 = vld [vmem:[#allocation3 + $0x17a] sm:$0xf] }
 0x4e0   :  { %3825 = vst.msk [vmem:[#allocation4 + $0x40] sm:$0xff] %vm3815_vm12, %v3688_v23 }
 0x4e1   :  { %v3694_v38 = vpop.permute.xlu1 %3693  ;;  %3989 = vrot.lane.b32.xlu0 %v3879_v36, %s7528_s26  ;;  %v3907_v36 = vld [vmem:[#allocation3 + $0x172] sm:$0xff] }
 0x4e2   :  { %3828 = vst.msk [vmem:[#allocation4 + $0x58] sm:$0xf] %vm3817_vm11, %v3694_v38  ;;  %v7416_v38 = vpop.f32.mrf.mxu0 }
 0x4e3   :  { %3995 = vrot.lane.b32.xlu1 %v3882_v52, %s7528_s26  ;;  %v3692_v55 = vpop.permute.xlu0 %3691 }
 0x4e4   :  { %3827 = vst.msk [vmem:[#allocation4 + $0x50] sm:$0xff] %vm3815_vm12, %v3692_v55  ;;  %v7522_v55 = vld [vmem:[%s11892_s2] ss:$0 sm:$0xff]  ;;  %s7533_s2 = smov 40  }
 0x4e5   :  { %v3698_v63 = vpop.permute.xlu1 %3697  ;;  %3993 = vrot.lane.b32.xlu0 %v3881_v56, %s7528_s26  ;;  %v3362_v56 = vadd.f32 %v7522_v55, %v7416_v38  ;;  %v4177_v38 = vld [vmem:[#allocation3 + $0xb8] sm:$0xf] }
 0x4e6   :  { %3830 = vst.msk [vmem:[#allocation4 + $0x68] sm:$0xf] %vm3817_vm11, %v3698_v63  ;;  %v3910_v63 = vld [vmem:[#allocation3 + $0x18a] sm:$0xf] }
 0x4e7   :  { %3999 = vrot.lane.b32.xlu1 %v3884_v0, %s7528_s26  ;;  %v3696_v7 = vpop.permute.xlu0 %3695  ;;  %v3356_v0 = vpop.f32.mrf.mxu0 }
 0x4e8   :  { %3829 = vst.msk [vmem:[#allocation4 + $0x60] sm:$0xff] %vm3815_vm12, %v3696_v7 }
 0x4e9   :  { %v3702_v16 = vpop.permute.xlu1 %3701  ;;  %3997 = vrot.lane.b32.xlu0 %v3883_v8, %s7528_s26  ;;  %v3420_v8 = vmax.f32 %v3362_v56, 0.0 }
 0x4ea   :  { %3832 = vst.msk [vmem:[#allocation4 + $0x78] sm:$0xf] %vm3817_vm11, %v3702_v16  ;;  %v3357_v16 = vadd.f32 %v7522_v55, %v3356_v0  ;;  %v4176_v55 = vld [vmem:[#allocation3 + $0xb0] sm:$0xff] }
 0x4eb   :  { %4003 = vrot.lane.b32.xlu1 %v3886_v59, %s7528_s26  ;;  %v3700_v60 = vpop.permute.xlu0 %3699  ;;  %v3909_v59 = vld [vmem:[#allocation3 + $0x182] sm:$0xff]  ;;  %3476 = vst [vmem:[#allocation3 + $0x1b8] sm:$0xff] %v3420_v8 }
 0x4ec   :  { %3831 = vst.msk [vmem:[#allocation4 + $0x70] sm:$0xff] %vm3815_vm12, %v3700_v60 }
 0x4ed   :  { %v3706_v4 = vpop.permute.xlu1 %3705  ;;  %4001 = vrot.lane.b32.xlu0 %v3885_v3, %s7528_s26  ;;  %v3419_v3 = vmax.f32 %v3357_v16, 0.0  ;;  %v4181_v16 = vld [vmem:[#allocation3 + $0xf8] sm:$0xf] }
 0x4ee   :  { %3834 = vst.msk [vmem:[#allocation4 + $0x88] sm:$0xf] %vm3817_vm11, %v3706_v4  ;;  %v3912_v4 = vld [vmem:[#allocation3 + $0x19a] sm:$0xf] }
 0x4ef   :  { %4007 = vrot.lane.b32.xlu1 %v3888_v11, %s7528_s26  ;;  %v3704_v12 = vpop.permute.xlu0 %3703  ;;  %3475 = vst [vmem:[#allocation3 + $0x1b0] sm:$0xff] %v3419_v3 }
 0x4f0   :  { %3833 = vst.msk [vmem:[#allocation4 + $0x80] sm:$0xff] %vm3815_vm12, %v3704_v12  ;;  %v3911_v12 = vld [vmem:[#allocation3 + $0x192] sm:$0xff] }
 0x4f1   :  { %v3710_v18 = vpop.permute.xlu1 %3709  ;;  %4005 = vrot.lane.b32.xlu0 %v3887_v29, %s7528_s26 }
 0x4f2   :  { %3836 = vst.msk [vmem:[#allocation4 + $0x98] sm:$0xf] %vm3817_vm11, %v3710_v18 }
 0x4f3   :  { %4011 = vrot.lane.b32.xlu1 %v3890_v20, %s7528_s26  ;;  %v3708_v24 = vpop.permute.xlu0 %3707 }
 0x4f4   :  { %3835 = vst.msk [vmem:[#allocation4 + $0x90] sm:$0xff] %vm3815_vm12, %v3708_v24 }
 0x4f5   :  { %v3714_v31 = vpop.permute.xlu1 %3713  ;;  %4009 = vrot.lane.b32.xlu0 %v3889_v28, %s7528_s26 }
 0x4f6   :  { %3838 = vst.msk [vmem:[#allocation4 + $0xa8] sm:$0xf] %vm3817_vm11, %v3714_v31  ;;  %v4161_v31 = vld [vmem:[#allocation3 + $0x38] sm:$0xf] }
 0x4f7   :  { %4015 = vrot.lane.b32.xlu1 %v3892_v33, %s7528_s26  ;;  %v3712_v34 = vpop.permute.xlu0 %3711 }
 0x4f8   :  { %3837 = vst.msk [vmem:[#allocation4 + $0xa0] sm:$0xff] %vm3815_vm12, %v3712_v34  ;;  %v4160_v34 = vld [vmem:[#allocation3 + $0x30] sm:$0xff] }
 0x4f9   :  { %v3718_v35 = vpop.permute.xlu1 %3717  ;;  %4013 = vrot.lane.b32.xlu0 %v3891_v9, %s7528_s26 }
 0x4fa   :  { %3840 = vst.msk [vmem:[#allocation4 + $0xb8] sm:$0xf] %vm3817_vm11, %v3718_v35  ;;  %v4163_v35 = vld [vmem:[#allocation3 + $0x48] sm:$0xf] }
 0x4fb   :  { %4019 = vrot.lane.b32.xlu1 %v3894_v37, %s7528_s26  ;;  %v3716_v39 = vpop.permute.xlu0 %3715 }
 0x4fc   :  { %3839 = vst.msk [vmem:[#allocation4 + $0xb0] sm:$0xff] %vm3815_vm12, %v3716_v39  ;;  %v4162_v39 = vld [vmem:[#allocation3 + $0x40] sm:$0xff] }
 0x4fd   :  { %4017 = vrot.lane.b32.xlu0 %v3893_v40, %s7528_s26 }
 0x4ff   :  { %4023 = vrot.lane.b32.xlu1 %v3896_v41, %s7528_s26  ;;  %v4165_v41 = vld [vmem:[#allocation3 + $0x58] sm:$0xf] }
 0x501   :  { %4021 = vrot.lane.b32.xlu0 %v3895_v42, %s7528_s26 }
 0x503   :  { %4027 = vrot.lane.b32.xlu1 %v3898_v43, %s7528_s26  ;;  %v4164_v43 = vld [vmem:[#allocation3 + $0x50] sm:$0xff] }
 0x505   :  { %v3722_v47 = vpop.permute.xlu1 %3721  ;;  %4025 = vrot.lane.b32.xlu0 %v3897_v44, %s7528_s26 }
 0x506   :  { %3842 = vst.msk [vmem:[#allocation4 + $0xc8] sm:$0xf] %vm3817_vm11, %v3722_v47  ;;  %v4167_v47 = vld [vmem:[#allocation3 + $0x68] sm:$0xf] }
 0x507   :  { %4031 = vrot.lane.b32.xlu1 %v3900_v48, %s7528_s26  ;;  %v3720_v49 = vpop.permute.xlu0 %3719 }
 0x508   :  { %3841 = vst.msk [vmem:[#allocation4 + $0xc0] sm:$0xff] %vm3815_vm12, %v3720_v49  ;;  %v4166_v49 = vld [vmem:[#allocation3 + $0x60] sm:$0xff] }
 0x509   :  { %v3726_v45 = vpop.permute.xlu1 %3725  ;;  %4029 = vrot.lane.b32.xlu0 %v3899_v50, %s7528_s26 }
 0x50a   :  { %3844 = vst.msk [vmem:[#allocation4 + $0xd8] sm:$0xf] %vm3817_vm11, %v3726_v45  ;;  %v4169_v45 = vld [vmem:[#allocation3 + $0x78] sm:$0xf] }
 0x50b   :  { %4035 = vrot.lane.b32.xlu1 %v3902_v53, %s7528_s26  ;;  %v3724_v54 = vpop.permute.xlu0 %3723 }
 0x50c   :  { %3843 = vst.msk [vmem:[#allocation4 + $0xd0] sm:$0xff] %vm3815_vm12, %v3724_v54  ;;  %v4168_v54 = vld [vmem:[#allocation3 + $0x70] sm:$0xff] }
 0x50d   :  { %v3730_v58 = vpop.permute.xlu1 %3729  ;;  %4033 = vrot.lane.b32.xlu0 %v3901_v57, %s7528_s26 }
 0x50e   :  { %3846 = vst.msk [vmem:[#allocation4 + $0xe8] sm:$0xf] %vm3817_vm11, %v3730_v58  ;;  %v4171_v58 = vld [vmem:[#allocation3 + $0x88] sm:$0xf] }
 0x50f   :  { %4039 = vrot.lane.b32.xlu1 %v3904_v61, %s7528_s26  ;;  %v3728_v62 = vpop.permute.xlu0 %3727 }
 0x510   :  { %3845 = vst.msk [vmem:[#allocation4 + $0xe0] sm:$0xff] %vm3815_vm12, %v3728_v62  ;;  %v4170_v62 = vld [vmem:[#allocation3 + $0x80] sm:$0xff] }
 0x511   :  { %v3734_v2 = vpop.permute.xlu1 %3733  ;;  %4037 = vrot.lane.b32.xlu0 %v3903_v1, %s7528_s26 }
 0x512   :  { %3848 = vst.msk [vmem:[#allocation4 + $0xf8] sm:$0xf] %vm3817_vm11, %v3734_v2  ;;  %v4173_v2 = vld [vmem:[#allocation3 + $0x98] sm:$0xf] }
 0x513   :  { %4043 = vrot.lane.b32.xlu1 %v3906_v6, %s7528_s26  ;;  %v3732_v10 = vpop.permute.xlu0 %3731 }
 0x514   :  { %3847 = vst.msk [vmem:[#allocation4 + $0xf0] sm:$0xff] %vm3815_vm12, %v3732_v10  ;;  %v4172_v10 = vld [vmem:[#allocation3 + $0x90] sm:$0xff] }
 0x515   :  { %v3738_v15 = vpop.permute.xlu1 %3737  ;;  %4041 = vrot.lane.b32.xlu0 %v3905_v13, %s7528_s26 }
 0x516   :  { %3850 = vst.msk [vmem:[#allocation4 + $0x108] sm:$0xf] %vm3817_vm11, %v3738_v15  ;;  %v4175_v15 = vld [vmem:[#allocation3 + $0xa8] sm:$0xf] }
 0x517   :  { %4047 = vrot.lane.b32.xlu1 %v3908_v22, %s7528_s26  ;;  %v3736_v23 = vpop.permute.xlu0 %3735 }
 0x518   :  { %3849 = vst.msk [vmem:[#allocation4 + $0x100] sm:$0xff] %vm3815_vm12, %v3736_v23  ;;  %v4174_v23 = vld [vmem:[#allocation3 + $0xa0] sm:$0xff] }
 0x519   :  { %v3742_v52 = vpop.permute.xlu1 %3741  ;;  %4045 = vrot.lane.b32.xlu0 %v3907_v36, %s7528_s26 }
 0x51a   :  { %3852 = vst.msk [vmem:[#allocation4 + $0x118] sm:$0xf] %vm3817_vm11, %v3742_v52 }
 0x51b   :  { %4051 = vrot.lane.b32.xlu1 %v3910_v63, %s7528_s26  ;;  %v3740_v7 = vpop.permute.xlu0 %3739  ;;  %v4179_v63 = vld [vmem:[#allocation3 + $0xc8] sm:$0xf] }
 0x51c   :  { %3851 = vst.msk [vmem:[#allocation4 + $0x110] sm:$0xff] %vm3815_vm12, %v3740_v7  ;;  %v4178_v7 = vld [vmem:[#allocation3 + $0xc0] sm:$0xff] }
 0x51d   :  { %v3746_v60 = vpop.permute.xlu1 %3745  ;;  %4049 = vrot.lane.b32.xlu0 %v3909_v59, %s7528_s26 }
 0x51e   :  { %3854 = vst.msk [vmem:[#allocation4 + $0x128] sm:$0xf] %vm3817_vm11, %v3746_v60  ;;  %v4180_v60 = vld [vmem:[#allocation3 + $0xf0] sm:$0xff] }
 0x51f   :  { %4055 = vrot.lane.b32.xlu1 %v3912_v4, %s7528_s26  ;;  %v3744_v11 = vpop.permute.xlu0 %3743  ;;  %v4183_v4 = vld [vmem:[#allocation3 + $0x108] sm:$0xf] }
 0x520   :  { %3853 = vst.msk [vmem:[#allocation4 + $0x120] sm:$0xff] %vm3815_vm12, %v3744_v11 }
 0x521   :  { %v3750_v29 = vpop.permute.xlu1 %3749  ;;  %4053 = vrot.lane.b32.xlu0 %v3911_v12, %s7528_s26  ;;  %v4182_v12 = vld [vmem:[#allocation3 + $0x100] sm:$0xff]  ;;  %s7534_s26 = smov 48  }
 0x522   :  { %3856 = vst.msk [vmem:[#allocation4 + $0x138] sm:$0xf] %vm3817_vm11, %v3750_v29 }
 0x523   :  { %4254 = vrot.lane.b32.xlu1 %v4157_v30, %s7530_s13  ;;  %v3748_v18 = vpop.permute.xlu0 %3747  ;;  %v4185_v30 = vld [vmem:[#allocation3 + $0x118] sm:$0xf] }
 0x524   :  { %3855 = vst.msk [vmem:[#allocation4 + $0x130] sm:$0xff] %vm3815_vm12, %v3748_v18 }
 0x525   :  { %v3754_v20 = vpop.permute.xlu1 %3753  ;;  %4252 = vrot.lane.b32.xlu0 %v4156_v19, %s7530_s13  ;;  %v4184_v19 = vld [vmem:[#allocation3 + $0x110] sm:$0xff] }
 0x526   :  { %3858 = vst.msk [vmem:[#allocation4 + $0x148] sm:$0xf] %vm3817_vm11, %v3754_v20 }
 0x527   :  { %4258 = vrot.lane.b32.xlu1 %v4159_v21, %s7530_s13  ;;  %v3752_v24 = vpop.permute.xlu0 %3751  ;;  %v4187_v21 = vld [vmem:[#allocation3 + $0x128] sm:$0xf] }
 0x528   :  { %3857 = vst.msk [vmem:[#allocation4 + $0x140] sm:$0xff] %vm3815_vm12, %v3752_v24 }
 0x529   :  { %v3758_v28 = vpop.permute.xlu1 %3757  ;;  %4256 = vrot.lane.b32.xlu0 %v4158_v25, %s7530_s13  ;;  %v4186_v25 = vld [vmem:[#allocation3 + $0x120] sm:$0xff] }
 0x52a   :  { %3860 = vst.msk [vmem:[#allocation4 + $0x158] sm:$0xf] %vm3817_vm11, %v3758_v28 }
 0x52b   :  { %4262 = vrot.lane.b32.xlu1 %v4161_v31, %s7530_s13  ;;  %v3756_v33 = vpop.permute.xlu0 %3755  ;;  %v4189_v31 = vld [vmem:[#allocation3 + $0x138] sm:$0xf] }
 0x52c   :  { %3859 = vst.msk [vmem:[#allocation4 + $0x150] sm:$0xff] %vm3815_vm12, %v3756_v33 }
 0x52d   :  { %v3762_v9 = vpop.permute.xlu1 %3761  ;;  %4260 = vrot.lane.b32.xlu0 %v4160_v34, %s7530_s13  ;;  %v4188_v34 = vld [vmem:[#allocation3 + $0x130] sm:$0xff] }
 0x52e   :  { %3862 = vst.msk [vmem:[#allocation4 + $0x168] sm:$0xf] %vm3817_vm11, %v3762_v9 }
 0x52f   :  { %4266 = vrot.lane.b32.xlu1 %v4163_v35, %s7530_s13  ;;  %v3760_v37 = vpop.permute.xlu0 %3759  ;;  %v4191_v35 = vld [vmem:[#allocation3 + $0x148] sm:$0xf] }
 0x530   :  { %3861 = vst.msk [vmem:[#allocation4 + $0x160] sm:$0xff] %vm3815_vm12, %v3760_v37 }
 0x531   :  { %v3766_v40 = vpop.permute.xlu1 %3765  ;;  %4264 = vrot.lane.b32.xlu0 %v4162_v39, %s7530_s13 }
 0x532   :  { %3864 = vst.msk [vmem:[#allocation4 + $0x178] sm:$0xf] %vm3817_vm11, %v3766_v40  ;;  %v4193_v40 = vld [vmem:[#allocation3 + $0x158] sm:$0xf]  ;;  %vm6783_vm11 = vcmask 130048  }
 0x533   :  { %4270 = vrot.lane.b32.xlu1 %v4165_v41, %s7530_s13  ;;  %v3764_v42 = vpop.permute.xlu0 %3763 }
 0x534   :  { %3863 = vst.msk [vmem:[#allocation4 + $0x170] sm:$0xff] %vm3815_vm12, %v3764_v42  ;;  %vm6540_vm12 = vcmask 261120  }
 0x535   :  { %v3964_v44 = vpop.permute.xlu1 %3963  ;;  %4268 = vrot.lane.b32.xlu0 %v4164_v43, %s7530_s13  ;;  %v4195_v43 = vld [vmem:[#allocation3 + $0x168] sm:$0xf] }
 0x536   :  { %4108 = vst.msk [vmem:[#allocation4 + $0x8] sm:$0xf] %vm4107_vm13, %v3964_v44 }
 0x537   :  { %4274 = vrot.lane.b32.xlu1 %v4167_v47, %s7530_s13  ;;  %v3962_v48 = vpop.permute.xlu0 %3961  ;;  %v4197_v47 = vld [vmem:[#allocation3 + $0x178] sm:$0xf] }
 0x538   :  { %4106 = vst.msk [vmem:[#allocation4] sm:$0xff] %vm4105_vm14, %v3962_v48 }
 0x539   :  { %v3968_v50 = vpop.permute.xlu1 %3967  ;;  %4272 = vrot.lane.b32.xlu0 %v4166_v49, %s7530_s13  ;;  %v4199_v49 = vld [vmem:[#allocation3 + $0x188] sm:$0xf] }
 0x53a   :  { %4110 = vst.msk [vmem:[#allocation4 + $0x18] sm:$0xf] %vm4107_vm13, %v3968_v50 }
 0x53b   :  { %4278 = vrot.lane.b32.xlu1 %v4169_v45, %s7530_s13  ;;  %v3966_v53 = vpop.permute.xlu0 %3965  ;;  %v4201_v45 = vld [vmem:[#allocation3 + $0x198] sm:$0xf] }
 0x53c   :  { %4109 = vst.msk [vmem:[#allocation4 + $0x10] sm:$0xff] %vm4105_vm14, %v3966_v53 }
 0x53d   :  { %v3972_v57 = vpop.permute.xlu1 %3971  ;;  %4276 = vrot.lane.b32.xlu0 %v4168_v54, %s7530_s13 }
 0x53e   :  { %4112 = vst.msk [vmem:[#allocation4 + $0x28] sm:$0xf] %vm4107_vm13, %v3972_v57 }
 0x53f   :  { %4282 = vrot.lane.b32.xlu1 %v4171_v58, %s7530_s13  ;;  %v3970_v61 = vpop.permute.xlu0 %3969  ;;  %v4447_v58 = vld [vmem:[#allocation3 + $0x19] sm:$0xf] }
 0x540   :  { %4111 = vst.msk [vmem:[#allocation4 + $0x20] sm:$0xff] %vm4105_vm14, %v3970_v61 }
 0x541   :  { %v3976_v1 = vpop.permute.xlu1 %3975  ;;  %4280 = vrot.lane.b32.xlu0 %v4170_v62, %s7530_s13 }
 0x542   :  { %4114 = vst.msk [vmem:[#allocation4 + $0x38] sm:$0xf] %vm4107_vm13, %v3976_v1  ;;  %v4449_v1 = vld [vmem:[#allocation3 + $0x29] sm:$0xf] }
 0x543   :  { %4286 = vrot.lane.b32.xlu1 %v4173_v2, %s7530_s13  ;;  %v3974_v6 = vpop.permute.xlu0 %3973 }
 0x544   :  { %4113 = vst.msk [vmem:[#allocation4 + $0x30] sm:$0xff] %vm4105_vm14, %v3974_v6  ;;  %v4451_v6 = vld [vmem:[#allocation3 + $0x39] sm:$0xf] }
 0x545   :  { %v3980_v13 = vpop.permute.xlu1 %3979  ;;  %4284 = vrot.lane.b32.xlu0 %v4172_v10, %s7530_s13 }
 0x546   :  { %4116 = vst.msk [vmem:[#allocation4 + $0x48] sm:$0xf] %vm4107_vm13, %v3980_v13  ;;  %v4450_v13 = vld [vmem:[#allocation3 + $0x31] sm:$0xff] }
 0x547   :  { %4290 = vrot.lane.b32.xlu1 %v4175_v15, %s7530_s13  ;;  %v3978_v22 = vpop.permute.xlu0 %3977 }
 0x548   :  { %4115 = vst.msk [vmem:[#allocation4 + $0x40] sm:$0xff] %vm4105_vm14, %v3978_v22  ;;  %v4453_v22 = vld [vmem:[#allocation3 + $0x49] sm:$0xf] }
 0x549   :  { %v3984_v36 = vpop.permute.xlu1 %3983  ;;  %4288 = vrot.lane.b32.xlu0 %v4174_v23, %s7530_s13 }
 0x54a   :  { %4118 = vst.msk [vmem:[#allocation4 + $0x58] sm:$0xf] %vm4107_vm13, %v3984_v36  ;;  %v4452_v36 = vld [vmem:[#allocation3 + $0x41] sm:$0xff] }
 0x54b   :  { %4294 = vrot.lane.b32.xlu1 %v4177_v38, %s7530_s13  ;;  %v3982_v52 = vpop.permute.xlu0 %3981 }
 0x54c   :  { %4117 = vst.msk [vmem:[#allocation4 + $0x50] sm:$0xff] %vm4105_vm14, %v3982_v52  ;;  %v4455_v52 = vld [vmem:[#allocation3 + $0x59] sm:$0xf] }
 0x54d   :  { %v3988_v56 = vpop.permute.xlu1 %3987  ;;  %4292 = vrot.lane.b32.xlu0 %v4176_v55, %s7530_s13 }
 0x54e   :  { %4120 = vst.msk [vmem:[#allocation4 + $0x68] sm:$0xf] %vm4107_vm13, %v3988_v56  ;;  %v4454_v56 = vld [vmem:[#allocation3 + $0x51] sm:$0xff] }
 0x54f   :  { %4298 = vrot.lane.b32.xlu1 %v4179_v63, %s7530_s13  ;;  %v3986_v0 = vpop.permute.xlu0 %3985 }
 0x550   :  { %4119 = vst.msk [vmem:[#allocation4 + $0x60] sm:$0xff] %vm4105_vm14, %v3986_v0  ;;  %v4457_v0 = vld [vmem:[#allocation3 + $0x69] sm:$0xf] }
 0x551   :  { %v3992_v8 = vpop.permute.xlu1 %3991  ;;  %4296 = vrot.lane.b32.xlu0 %v4178_v7, %s7530_s13 }
 0x552   :  { %4122 = vst.msk [vmem:[#allocation4 + $0x78] sm:$0xf] %vm4107_vm13, %v3992_v8  ;;  %v4456_v8 = vld [vmem:[#allocation3 + $0x61] sm:$0xff] }
 0x553   :  { %4302 = vrot.lane.b32.xlu1 %v4181_v16, %s7530_s13  ;;  %v3990_v59 = vpop.permute.xlu0 %3989 }
 0x554   :  { %4121 = vst.msk [vmem:[#allocation4 + $0x70] sm:$0xff] %vm4105_vm14, %v3990_v59  ;;  %v4459_v59 = vld [vmem:[#allocation3 + $0x79] sm:$0xf] }
 0x555   :  { %v3996_v3 = vpop.permute.xlu1 %3995  ;;  %4300 = vrot.lane.b32.xlu0 %v4180_v60, %s7530_s13 }
 0x556   :  { %4124 = vst.msk [vmem:[#allocation4 + $0x88] sm:$0xf] %vm4107_vm13, %v3996_v3  ;;  %v4458_v3 = vld [vmem:[#allocation3 + $0x71] sm:$0xff] }
 0x557   :  { %4306 = vrot.lane.b32.xlu1 %v4183_v4, %s7530_s13  ;;  %v3994_v11 = vpop.permute.xlu0 %3993 }
 0x558   :  { %4123 = vst.msk [vmem:[#allocation4 + $0x80] sm:$0xff] %vm4105_vm14, %v3994_v11  ;;  %v4461_v11 = vld [vmem:[#allocation3 + $0x89] sm:$0xf] }
 0x559   :  { %v4000_v29 = vpop.permute.xlu1 %3999  ;;  %4304 = vrot.lane.b32.xlu0 %v4182_v12, %s7530_s13 }
 0x55a   :  { %4126 = vst.msk [vmem:[#allocation4 + $0x98] sm:$0xf] %vm4107_vm13, %v4000_v29  ;;  %v4460_v29 = vld [vmem:[#allocation3 + $0x81] sm:$0xff] }
 0x55b   :  { %4310 = vrot.lane.b32.xlu1 %v4185_v30, %s7530_s13  ;;  %v3998_v18 = vpop.permute.xlu0 %3997 }
 0x55c   :  { %4125 = vst.msk [vmem:[#allocation4 + $0x90] sm:$0xff] %vm4105_vm14, %v3998_v18  ;;  %v4463_v18 = vld [vmem:[#allocation3 + $0x99] sm:$0xf] }
 0x55d   :  { %v4004_v20 = vpop.permute.xlu1 %4003  ;;  %4308 = vrot.lane.b32.xlu0 %v4184_v19, %s7530_s13 }
 0x55e   :  { %4128 = vst.msk [vmem:[#allocation4 + $0xa8] sm:$0xf] %vm4107_vm13, %v4004_v20  ;;  %v10660_v20 = vld [vmem:[#allocation3 + $0x91] sm:$0xff] }
 0x55f   :  { %4314 = vrot.lane.b32.xlu1 %v4187_v21, %s7530_s13  ;;  %v4002_v24 = vpop.permute.xlu0 %4001 }
 0x560   :  { %4127 = vst.msk [vmem:[#allocation4 + $0xa0] sm:$0xff] %vm4105_vm14, %v4002_v24  ;;  %v4465_v24 = vld [vmem:[#allocation3 + $0xa9] sm:$0xf] }
 0x561   :  { %v4008_v28 = vpop.permute.xlu1 %4007  ;;  %4312 = vrot.lane.b32.xlu0 %v4186_v25, %s7530_s13 }
 0x562   :  { %4130 = vst.msk [vmem:[#allocation4 + $0xb8] sm:$0xf] %vm4107_vm13, %v4008_v28  ;;  %v10667_v28 = vld [vmem:[#allocation3 + $0xa1] sm:$0xff] }
 0x563   :  { %4318 = vrot.lane.b32.xlu1 %v4189_v31, %s7530_s13  ;;  %v4006_v33 = vpop.permute.xlu0 %4005 }
 0x564   :  { %4129 = vst.msk [vmem:[#allocation4 + $0xb0] sm:$0xff] %vm4105_vm14, %v4006_v33  ;;  %v4467_v33 = vld [vmem:[#allocation3 + $0xb9] sm:$0xf] }
 0x565   :  { %v4012_v9 = vpop.permute.xlu1 %4011  ;;  %4316 = vrot.lane.b32.xlu0 %v4188_v34, %s7530_s13 }
 0x566   :  { %4132 = vst.msk [vmem:[#allocation4 + $0xc8] sm:$0xf] %vm4107_vm13, %v4012_v9  ;;  %v10674_v9 = vld [vmem:[#allocation3 + $0xb1] sm:$0xff] }
 0x567   :  { %4322 = vrot.lane.b32.xlu1 %v4191_v35, %s7530_s13  ;;  %v4010_v37 = vpop.permute.xlu0 %4009 }
 0x568   :  { %4131 = vst.msk [vmem:[#allocation4 + $0xc0] sm:$0xff] %vm4105_vm14, %v4010_v37  ;;  %v4469_v37 = vld [vmem:[#allocation3 + $0xc9] sm:$0xf] }
 0x569   :  { %v4016_v39 = vpop.permute.xlu1 %4015  ;;  %4320 = vrot.lane.b32.xlu0 %v10361_v46, %s7530_s13 }
 0x56a   :  { %4134 = vst.msk [vmem:[#allocation4 + $0xd8] sm:$0xf] %vm4107_vm13, %v4016_v39 }
 0x56b   :  { %4326 = vrot.lane.b32.xlu1 %v4193_v40, %s7530_s13  ;;  %v4014_v41 = vpop.permute.xlu0 %4013  ;;  %v10681_v40 = vld [vmem:[#allocation3 + $0xc1] sm:$0xff] }
 0x56c   :  { %4133 = vst.msk [vmem:[#allocation4 + $0xd0] sm:$0xff] %vm4105_vm14, %v4014_v41 }
 0x56d   :  { %v4020_v42 = vpop.permute.xlu1 %4019  ;;  %4324 = vrot.lane.b32.xlu0 %v10371_v5, %s7530_s13 }
 0x56e   :  { %4136 = vst.msk [vmem:[#allocation4 + $0xe8] sm:$0xf] %vm4107_vm13, %v4020_v42  ;;  %v4471_v42 = vld [vmem:[#allocation3 + $0xf9] sm:$0xf] }
 0x56f   :  { %4330 = vrot.lane.b32.xlu1 %v4195_v43, %s7530_s13  ;;  %v4018_v44 = vpop.permute.xlu0 %4017 }
 0x570   :  { %4135 = vst.msk [vmem:[#allocation4 + $0xe0] sm:$0xff] %vm4105_vm14, %v4018_v44  ;;  %v4470_v44 = vld [vmem:[#allocation3 + $0xf1] sm:$0xff] }
 0x571   :  { %v4024_v46 = vpop.permute.xlu1 %4023  ;;  %4328 = vrot.lane.b32.xlu0 %v10381_v51, %s7530_s13 }
 0x572   :  { %4138 = vst.msk [vmem:[#allocation4 + $0xf8] sm:$0xf] %vm4107_vm13, %v4024_v46 }
 0x573   :  { %4334 = vrot.lane.b32.xlu1 %v4197_v47, %s7530_s13  ;;  %v4022_v48 = vpop.permute.xlu0 %4021  ;;  %v4473_v47 = vld [vmem:[#allocation3 + $0x109] sm:$0xf] }
 0x574   :  { %4137 = vst.msk [vmem:[#allocation4 + $0xf0] sm:$0xff] %vm4105_vm14, %v4022_v48 }
 0x575   :  { %v4028_v5 = vpop.permute.xlu1 %4027  ;;  %4332 = vrot.lane.b32.xlu0 %v10391_v17, %s7530_s13  ;;  %v4203_v17 = vld [vmem:[#allocation3 + $0x1a8] sm:$0xf] }
 0x576   :  { %4140 = vst.msk [vmem:[#allocation4 + $0x108] sm:$0xf] %vm4107_vm13, %v4028_v5  ;;  %v4472_v5 = vld [vmem:[#allocation3 + $0x101] sm:$0xff] }
 0x577   :  { %4338 = vrot.lane.b32.xlu1 %v4199_v49, %s7530_s13  ;;  %v4026_v50 = vpop.permute.xlu0 %4025 }
 0x578   :  { %4139 = vst.msk [vmem:[#allocation4 + $0x100] sm:$0xff] %vm4105_vm14, %v4026_v50  ;;  %v4475_v50 = vld [vmem:[#allocation3 + $0x119] sm:$0xf] }
 0x579   :  { %v4032_v51 = vpop.permute.xlu1 %4031  ;;  %4336 = vrot.lane.b32.xlu0 %v10401_v14, %s7530_s13 }
 0x57a   :  { %4142 = vst.msk [vmem:[#allocation4 + $0x118] sm:$0xf] %vm4107_vm13, %v4032_v51 }
 0x57b   :  { %4342 = vrot.lane.b32.xlu1 %v4201_v45, %s7530_s13  ;;  %v4030_v53 = vpop.permute.xlu0 %4029  ;;  %v4474_v45 = vld [vmem:[#allocation3 + $0x111] sm:$0xff] }
 0x57c   :  { %4141 = vst.msk [vmem:[#allocation4 + $0x110] sm:$0xff] %vm4105_vm14, %v4030_v53 }
 0x57d   :  { %v4036_v54 = vpop.permute.xlu1 %4035  ;;  %4340 = vrot.lane.b32.xlu0 %v10411_v27, %s7530_s13  ;;  %v4446_v27 = vld [vmem:[#allocation3 + $0x11] sm:$0xff] }
 0x57e   :  { %4144 = vst.msk [vmem:[#allocation4 + $0x128] sm:$0xf] %vm4107_vm13, %v4036_v54 }
 0x57f   :  { %4346 = vrot.lane.b32.xlu1 %v4203_v17, %s7530_s13  ;;  %v4034_v57 = vpop.permute.xlu0 %4033  ;;  %v4477_v17 = vld [vmem:[#allocation3 + $0x129] sm:$0xf] }
 0x580   :  { %4143 = vst.msk [vmem:[#allocation4 + $0x120] sm:$0xff] %vm4105_vm14, %v4034_v57  ;;  %v4476_v57 = vld [vmem:[#allocation3 + $0x121] sm:$0xff] }
 0x581   :  { %v4040_v14 = vpop.permute.xlu1 %4039  ;;  %4344 = vrot.lane.b32.xlu0 %v3417_v32, %s7530_s13  ;;  %s7535_s13 = smov 56  }
 0x582   :  { %4146 = vst.msk [vmem:[#allocation4 + $0x138] sm:$0xf] %vm4107_vm13, %v4040_v14 }
 0x583   :  { %4544 = vrot.lane.b32.xlu1 %v4447_v58, %s7532_s25  ;;  %v4038_v61 = vpop.permute.xlu0 %4037  ;;  %v4479_v58 = vld [vmem:[#allocation3 + $0x139] sm:$0xf] }
 0x584   :  { %4145 = vst.msk [vmem:[#allocation4 + $0x130] sm:$0xff] %vm4105_vm14, %v4038_v61 }
 0x585   :  { %v4044_v62 = vpop.permute.xlu1 %4043  ;;  %4542 = vrot.lane.b32.xlu0 %v4446_v27, %s7532_s25  ;;  %v4478_v27 = vld [vmem:[#allocation3 + $0x131] sm:$0xff] }
 0x586   :  { %4148 = vst.msk [vmem:[#allocation4 + $0x148] sm:$0xf] %vm4107_vm13, %v4044_v62 }
 0x587   :  { %4548 = vrot.lane.b32.xlu1 %v4449_v1, %s7532_s25  ;;  %v4042_v2 = vpop.permute.xlu0 %4041  ;;  %v4481_v1 = vld [vmem:[#allocation3 + $0x149] sm:$0xf] }
 0x588   :  { %4147 = vst.msk [vmem:[#allocation4 + $0x140] sm:$0xff] %vm4105_vm14, %v4042_v2 }
 0x589   :  { %v4048_v32 = vpop.permute.xlu1 %4047  ;;  %4546 = vrot.lane.b32.xlu0 %v4448_v26, %s7532_s25  ;;  %v10708_v26 = vld [vmem:[#allocation3 + $0x141] sm:$0xff] }
 0x58a   :  { %4150 = vst.msk [vmem:[#allocation4 + $0x158] sm:$0xf] %vm4107_vm13, %v4048_v32 }
 0x58b   :  { %4552 = vrot.lane.b32.xlu1 %v4451_v6, %s7532_s25  ;;  %v4046_v10 = vpop.permute.xlu0 %4045  ;;  %v4483_v6 = vld [vmem:[#allocation3 + $0x159] sm:$0xf] }
 0x58c   :  { %4149 = vst.msk [vmem:[#allocation4 + $0x150] sm:$0xff] %vm4105_vm14, %v4046_v10 }
 0x58d   :  { %v4052_v15 = vpop.permute.xlu1 %4051  ;;  %4550 = vrot.lane.b32.xlu0 %v4450_v13, %s7532_s25  ;;  %v10715_v13 = vld [vmem:[#allocation3 + $0x151] sm:$0xff] }
 0x58e   :  { %4152 = vst.msk [vmem:[#allocation4 + $0x168] sm:$0xf] %vm4107_vm13, %v4052_v15 }
 0x58f   :  { %4556 = vrot.lane.b32.xlu1 %v4453_v22, %s7532_s25  ;;  %v4050_v23 = vpop.permute.xlu0 %4049  ;;  %v4485_v22 = vld [vmem:[#allocation3 + $0x169] sm:$0xf] }
 0x590   :  { %4151 = vst.msk [vmem:[#allocation4 + $0x160] sm:$0xff] %vm4105_vm14, %v4050_v23 }
 0x591   :  { %v4056_v38 = vpop.permute.xlu1 %4055  ;;  %4554 = vrot.lane.b32.xlu0 %v4452_v36, %s7532_s25  ;;  %v10722_v36 = vld [vmem:[#allocation3 + $0x161] sm:$0xff] }
 0x592   :  { %4154 = vst.msk [vmem:[#allocation4 + $0x178] sm:$0xf] %vm4107_vm13, %v4056_v38  ;;  %vm6620_vm13 = vcmask 7168  }
 0x593   :  { %4560 = vrot.lane.b32.xlu1 %v4455_v52, %s7532_s25  ;;  %v4054_v55 = vpop.permute.xlu0 %4053  ;;  %v4487_v52 = vld [vmem:[#allocation3 + $0x179] sm:$0xf] }
 0x594   :  { %4153 = vst.msk [vmem:[#allocation4 + $0x170] sm:$0xff] %vm4105_vm14, %v4054_v55  ;;  %vm6765_vm14 = vcmask 15368  }
 0x595   :  { %v4255_v63 = vpop.permute.xlu1 %4254  ;;  %4558 = vrot.lane.b32.xlu0 %v4454_v56, %s7532_s25  ;;  %v10729_v56 = vld [vmem:[#allocation3 + $0x171] sm:$0xff] }
 0x596   :  { %4399 = vst.msk [vmem:[#allocation4 + $0x8] sm:$0xf] %vm4398_vm15, %v4255_v63 }
 0x597   :  { %4564 = vrot.lane.b32.xlu1 %v4457_v0, %s7532_s25  ;;  %v4253_v7 = vpop.permute.xlu0 %4252  ;;  %v4489_v0 = vld [vmem:[#allocation3 + $0x189] sm:$0xf] }
 0x598   :  { %4397 = vst.msk [vmem:[#allocation4] sm:$0xff] %vm4396_vm0, %v4253_v7 }
 0x599   :  { %v4259_v16 = vpop.permute.xlu1 %4258  ;;  %4562 = vrot.lane.b32.xlu0 %v4456_v8, %s7532_s25  ;;  %v10736_v8 = vld [vmem:[#allocation3 + $0x181] sm:$0xff] }
 0x59a   :  { %4401 = vst.msk [vmem:[#allocation4 + $0x18] sm:$0xf] %vm4398_vm15, %v4259_v16 }
 0x59b   :  { %4568 = vrot.lane.b32.xlu1 %v4459_v59, %s7532_s25  ;;  %v4257_v60 = vpop.permute.xlu0 %4256  ;;  %v4491_v59 = vld [vmem:[#allocation3 + $0x199] sm:$0xf] }
 0x59c   :  { %4400 = vst.msk [vmem:[#allocation4 + $0x10] sm:$0xff] %vm4396_vm0, %v4257_v60 }
 0x59d   :  { %v4263_v4 = vpop.permute.xlu1 %4262  ;;  %4566 = vrot.lane.b32.xlu0 %v4458_v3, %s7532_s25  ;;  %v10743_v3 = vld [vmem:[#allocation3 + $0x191] sm:$0xff] }
 0x59e   :  { %4403 = vst.msk [vmem:[#allocation4 + $0x28] sm:$0xf] %vm4398_vm15, %v4263_v4 }
 0x59f   :  { %4572 = vrot.lane.b32.xlu1 %v4461_v11, %s7532_s25  ;;  %v4261_v12 = vpop.permute.xlu0 %4260  ;;  %v4493_v11 = vld [vmem:[#allocation3 + $0x1a9] sm:$0xf] }
 0x5a0   :  { %4402 = vst.msk [vmem:[#allocation4 + $0x20] sm:$0xff] %vm4396_vm0, %v4261_v12 }
 0x5a1   :  { %v4267_v30 = vpop.permute.xlu1 %4266  ;;  %4570 = vrot.lane.b32.xlu0 %v4460_v29, %s7532_s25  ;;  %v4492_v29 = vld [vmem:[#allocation3 + $0x1a1] sm:$0xff] }
 0x5a2   :  { %4405 = vst.msk [vmem:[#allocation4 + $0x38] sm:$0xf] %vm4398_vm15, %v4267_v30 }
 0x5a3   :  { %4576 = vrot.lane.b32.xlu1 %v4463_v18, %s7532_s25  ;;  %v4265_v19 = vpop.permute.xlu0 %4264  ;;  %v4737_v18 = vld [vmem:[#allocation3 + $0x1a] sm:$0xf] }
 0x5a4   :  { %4404 = vst.msk [vmem:[#allocation4 + $0x30] sm:$0xff] %vm4396_vm0, %v4265_v19 }
 0x5a5   :  { %v4271_v21 = vpop.permute.xlu1 %4270  ;;  %4574 = vrot.lane.b32.xlu0 %v10660_v20, %s7532_s25 }
 0x5a6   :  { %4407 = vst.msk [vmem:[#allocation4 + $0x48] sm:$0xf] %vm4398_vm15, %v4271_v21  ;;  %v4736_v21 = vld [vmem:[#allocation3 + $0x12] sm:$0xff] }
 0x5a7   :  { %4580 = vrot.lane.b32.xlu1 %v4465_v24, %s7532_s25  ;;  %v4269_v25 = vpop.permute.xlu0 %4268 }
 0x5a8   :  { %4406 = vst.msk [vmem:[#allocation4 + $0x40] sm:$0xff] %vm4396_vm0, %v4269_v25  ;;  %v4739_v25 = vld [vmem:[#allocation3 + $0x2a] sm:$0xf] }
 0x5a9   :  { %v4275_v31 = vpop.permute.xlu1 %4274  ;;  %4578 = vrot.lane.b32.xlu0 %v10667_v28, %s7532_s25 }
 0x5aa   :  { %4409 = vst.msk [vmem:[#allocation4 + $0x58] sm:$0xf] %vm4398_vm15, %v4275_v31 }
 0x5ab   :  { %4584 = vrot.lane.b32.xlu1 %v4467_v33, %s7532_s25  ;;  %v4273_v34 = vpop.permute.xlu0 %4272  ;;  %v4738_v33 = vld [vmem:[#allocation3 + $0x22] sm:$0xff] }
 0x5ac   :  { %4408 = vst.msk [vmem:[#allocation4 + $0x50] sm:$0xff] %vm4396_vm0, %v4273_v34 }
 0x5ad   :  { %v4279_v35 = vpop.permute.xlu1 %4278  ;;  %4582 = vrot.lane.b32.xlu0 %v10674_v9, %s7532_s25 }
 0x5ae   :  { %4411 = vst.msk [vmem:[#allocation4 + $0x68] sm:$0xf] %vm4398_vm15, %v4279_v35  ;;  %v4741_v35 = vld [vmem:[#allocation3 + $0x3a] sm:$0xf] }
 0x5af   :  { %4588 = vrot.lane.b32.xlu1 %v4469_v37, %s7532_s25  ;;  %v4277_v39 = vpop.permute.xlu0 %4276 }
 0x5b0   :  { %4410 = vst.msk [vmem:[#allocation4 + $0x60] sm:$0xff] %vm4396_vm0, %v4277_v39  ;;  %v4740_v39 = vld [vmem:[#allocation3 + $0x32] sm:$0xff] }
 0x5b1   :  { %v4283_v41 = vpop.permute.xlu1 %4282  ;;  %4586 = vrot.lane.b32.xlu0 %v10681_v40, %s7532_s25 }
 0x5b2   :  { %4413 = vst.msk [vmem:[#allocation4 + $0x78] sm:$0xf] %vm4398_vm15, %v4283_v41 }
 0x5b3   :  { %4592 = vrot.lane.b32.xlu1 %v4471_v42, %s7532_s25  ;;  %v4281_v43 = vpop.permute.xlu0 %4280  ;;  %v4743_v42 = vld [vmem:[#allocation3 + $0x4a] sm:$0xf] }
 0x5b4   :  { %4412 = vst.msk [vmem:[#allocation4 + $0x70] sm:$0xff] %vm4396_vm0, %v4281_v43 }
 0x5b5   :  { %v4287_v46 = vpop.permute.xlu1 %4286  ;;  %4590 = vrot.lane.b32.xlu0 %v4470_v44, %s7532_s25  ;;  %v4742_v44 = vld [vmem:[#allocation3 + $0x42] sm:$0xff] }
 0x5b6   :  { %4415 = vst.msk [vmem:[#allocation4 + $0x88] sm:$0xf] %vm4398_vm15, %v4287_v46 }
 0x5b7   :  { %4596 = vrot.lane.b32.xlu1 %v4473_v47, %s7532_s25  ;;  %v4285_v48 = vpop.permute.xlu0 %4284  ;;  %v4745_v47 = vld [vmem:[#allocation3 + $0x5a] sm:$0xf] }
 0x5b8   :  { %4414 = vst.msk [vmem:[#allocation4 + $0x80] sm:$0xff] %vm4396_vm0, %v4285_v48 }
 0x5b9   :  { %v4291_v49 = vpop.permute.xlu1 %4290  ;;  %4594 = vrot.lane.b32.xlu0 %v4472_v5, %s7532_s25  ;;  %v4744_v5 = vld [vmem:[#allocation3 + $0x52] sm:$0xff] }
 0x5ba   :  { %4417 = vst.msk [vmem:[#allocation4 + $0x98] sm:$0xf] %vm4398_vm15, %v4291_v49 }
 0x5bb   :  { %4600 = vrot.lane.b32.xlu1 %v4475_v50, %s7532_s25  ;;  %v4289_v51 = vpop.permute.xlu0 %4288  ;;  %v4747_v50 = vld [vmem:[#allocation3 + $0x6a] sm:$0xf] }
 0x5bc   :  { %4416 = vst.msk [vmem:[#allocation4 + $0x90] sm:$0xff] %vm4396_vm0, %v4289_v51 }
 0x5bd   :  { %v4295_v53 = vpop.permute.xlu1 %4294  ;;  %4598 = vrot.lane.b32.xlu0 %v4474_v45, %s7532_s25  ;;  %v10774_v45 = vld [vmem:[#allocation3 + $0x62] sm:$0xff] }
 0x5be   :  { %4419 = vst.msk [vmem:[#allocation4 + $0xa8] sm:$0xf] %vm4398_vm15, %v4295_v53 }
 0x5bf   :  { %4604 = vrot.lane.b32.xlu1 %v4477_v17, %s7532_s25  ;;  %v4293_v54 = vpop.permute.xlu0 %4292  ;;  %v4749_v17 = vld [vmem:[#allocation3 + $0x7a] sm:$0xf] }
 0x5c0   :  { %4418 = vst.msk [vmem:[#allocation4 + $0xa0] sm:$0xff] %vm4396_vm0, %v4293_v54 }
 0x5c1   :  { %v4299_v14 = vpop.permute.xlu1 %4298  ;;  %4602 = vrot.lane.b32.xlu0 %v4476_v57, %s7532_s25  ;;  %v10781_v57 = vld [vmem:[#allocation3 + $0x72] sm:$0xff] }
 0x5c2   :  { %4421 = vst.msk [vmem:[#allocation4 + $0xb8] sm:$0xf] %vm4398_vm15, %v4299_v14 }
 0x5c3   :  { %4608 = vrot.lane.b32.xlu1 %v4479_v58, %s7532_s25  ;;  %v4297_v61 = vpop.permute.xlu0 %4296  ;;  %v4751_v58 = vld [vmem:[#allocation3 + $0x8a] sm:$0xf] }
 0x5c4   :  { %4420 = vst.msk [vmem:[#allocation4 + $0xb0] sm:$0xff] %vm4396_vm0, %v4297_v61 }
 0x5c5   :  { %v4303_v62 = vpop.permute.xlu1 %4302  ;;  %4606 = vrot.lane.b32.xlu0 %v4478_v27, %s7532_s25  ;;  %v10788_v27 = vld [vmem:[#allocation3 + $0x82] sm:$0xff] }
 0x5c6   :  { %4423 = vst.msk [vmem:[#allocation4 + $0xc8] sm:$0xf] %vm4398_vm15, %v4303_v62 }
 0x5c7   :  { %4612 = vrot.lane.b32.xlu1 %v4481_v1, %s7532_s25  ;;  %v4301_v2 = vpop.permute.xlu0 %4300  ;;  %v4753_v1 = vld [vmem:[#allocation3 + $0x9a] sm:$0xf] }
 0x5c8   :  { %4422 = vst.msk [vmem:[#allocation4 + $0xc0] sm:$0xff] %vm4396_vm0, %v4301_v2 }
 0x5c9   :  { %v4307_v32 = vpop.permute.xlu1 %4306  ;;  %4610 = vrot.lane.b32.xlu0 %v10708_v26, %s7532_s25 }
 0x5ca   :  { %4425 = vst.msk [vmem:[#allocation4 + $0xd8] sm:$0xf] %vm4398_vm15, %v4307_v32  ;;  %v10795_v32 = vld [vmem:[#allocation3 + $0x92] sm:$0xff] }
 0x5cb   :  { %4616 = vrot.lane.b32.xlu1 %v4483_v6, %s7532_s25  ;;  %v4305_v10 = vpop.permute.xlu0 %4304 }
 0x5cc   :  { %4424 = vst.msk [vmem:[#allocation4 + $0xd0] sm:$0xff] %vm4396_vm0, %v4305_v10  ;;  %v4755_v10 = vld [vmem:[#allocation3 + $0xaa] sm:$0xf] }
 0x5cd   :  { %v4311_v15 = vpop.permute.xlu1 %4310  ;;  %4614 = vrot.lane.b32.xlu0 %v10715_v13, %s7532_s25 }
 0x5ce   :  { %4427 = vst.msk [vmem:[#allocation4 + $0xe8] sm:$0xf] %vm4398_vm15, %v4311_v15 }
 0x5cf   :  { %4620 = vrot.lane.b32.xlu1 %v4485_v22, %s7532_s25  ;;  %v4309_v23 = vpop.permute.xlu0 %4308  ;;  %v10802_v22 = vld [vmem:[#allocation3 + $0xa2] sm:$0xff] }
 0x5d0   :  { %4426 = vst.msk [vmem:[#allocation4 + $0xe0] sm:$0xff] %vm4396_vm0, %v4309_v23 }
 0x5d1   :  { %v4315_v38 = vpop.permute.xlu1 %4314  ;;  %4618 = vrot.lane.b32.xlu0 %v10722_v36, %s7532_s25 }
 0x5d2   :  { %4429 = vst.msk [vmem:[#allocation4 + $0xf8] sm:$0xf] %vm4398_vm15, %v4315_v38  ;;  %v4757_v38 = vld [vmem:[#allocation3 + $0xba] sm:$0xf] }
 0x5d3   :  { %4624 = vrot.lane.b32.xlu1 %v4487_v52, %s7532_s25  ;;  %v4313_v55 = vpop.permute.xlu0 %4312 }
 0x5d4   :  { %4428 = vst.msk [vmem:[#allocation4 + $0xf0] sm:$0xff] %vm4396_vm0, %v4313_v55  ;;  %v10809_v55 = vld [vmem:[#allocation3 + $0xb2] sm:$0xff] }
 0x5d5   :  { %v4319_v63 = vpop.permute.xlu1 %4318  ;;  %4622 = vrot.lane.b32.xlu0 %v10729_v56, %s7532_s25 }
 0x5d6   :  { %4431 = vst.msk [vmem:[#allocation4 + $0x108] sm:$0xf] %vm4398_vm15, %v4319_v63 }
 0x5d7   :  { %4628 = vrot.lane.b32.xlu1 %v4489_v0, %s7532_s25  ;;  %v4317_v7 = vpop.permute.xlu0 %4316  ;;  %v4759_v0 = vld [vmem:[#allocation3 + $0xca] sm:$0xf] }
 0x5d8   :  { %4430 = vst.msk [vmem:[#allocation4 + $0x100] sm:$0xff] %vm4396_vm0, %v4317_v7 }
 0x5d9   :  { %v4323_v16 = vpop.permute.xlu1 %4322  ;;  %4626 = vrot.lane.b32.xlu0 %v10736_v8, %s7532_s25 }
 0x5da   :  { %4433 = vst.msk [vmem:[#allocation4 + $0x118] sm:$0xf] %vm4398_vm15, %v4323_v16  ;;  %v10816_v16 = vld [vmem:[#allocation3 + $0xc2] sm:$0xff] }
 0x5db   :  { %4632 = vrot.lane.b32.xlu1 %v4491_v59, %s7532_s25  ;;  %v4321_v60 = vpop.permute.xlu0 %4320 }
 0x5dc   :  { %4432 = vst.msk [vmem:[#allocation4 + $0x110] sm:$0xff] %vm4396_vm0, %v4321_v60  ;;  %v4761_v60 = vld [vmem:[#allocation3 + $0xfa] sm:$0xf] }
 0x5dd   :  { %v4327_v4 = vpop.permute.xlu1 %4326  ;;  %4630 = vrot.lane.b32.xlu0 %v10743_v3, %s7532_s25 }
 0x5de   :  { %4435 = vst.msk [vmem:[#allocation4 + $0x128] sm:$0xf] %vm4398_vm15, %v4327_v4 }
 0x5df   :  { %4636 = vrot.lane.b32.xlu1 %v4493_v11, %s7532_s25  ;;  %v4325_v12 = vpop.permute.xlu0 %4324  ;;  %v4760_v11 = vld [vmem:[#allocation3 + $0xf2] sm:$0xff] }
 0x5e0   :  { %4434 = vst.msk [vmem:[#allocation4 + $0x120] sm:$0xff] %vm4396_vm0, %v4325_v12 }
 0x5e1   :  { %v4331_v30 = vpop.permute.xlu1 %4330  ;;  %4634 = vrot.lane.b32.xlu0 %v4492_v29, %s7532_s25  ;;  %v4763_v29 = vld [vmem:[#allocation3 + $0x10a] sm:$0xf]  ;;  %s7536_s25 = smov 64  }
 0x5e2   :  { %4437 = vst.msk [vmem:[#allocation4 + $0x138] sm:$0xf] %vm4398_vm15, %v4331_v30 }
 0x5e3   :  { %4834 = vrot.lane.b32.xlu1 %v4737_v18, %s7533_s2  ;;  %v4329_v19 = vpop.permute.xlu0 %4328  ;;  %v4762_v18 = vld [vmem:[#allocation3 + $0x102] sm:$0xff] }
 0x5e4   :  { %4436 = vst.msk [vmem:[#allocation4 + $0x130] sm:$0xff] %vm4396_vm0, %v4329_v19 }
 0x5e5   :  { %v4335_v24 = vpop.permute.xlu1 %4334  ;;  %4832 = vrot.lane.b32.xlu0 %v4736_v21, %s7533_s2  ;;  %v4765_v21 = vld [vmem:[#allocation3 + $0x11a] sm:$0xf] }
 0x5e6   :  { %4439 = vst.msk [vmem:[#allocation4 + $0x148] sm:$0xf] %vm4398_vm15, %v4335_v24 }
 0x5e7   :  { %4838 = vrot.lane.b32.xlu1 %v4739_v25, %s7533_s2  ;;  %v4333_v31 = vpop.permute.xlu0 %4332  ;;  %v10831_v25 = vld [vmem:[#allocation3 + $0x112] sm:$0xff] }
 0x5e8   :  { %4438 = vst.msk [vmem:[#allocation4 + $0x140] sm:$0xff] %vm4396_vm0, %v4333_v31 }
 0x5e9   :  { %v4339_v34 = vpop.permute.xlu1 %4338  ;;  %4836 = vrot.lane.b32.xlu0 %v4738_v33, %s7533_s2  ;;  %v4767_v33 = vld [vmem:[#allocation3 + $0x12a] sm:$0xf] }
 0x5ea   :  { %4441 = vst.msk [vmem:[#allocation4 + $0x158] sm:$0xf] %vm4398_vm15, %v4339_v34 }
 0x5eb   :  { %4842 = vrot.lane.b32.xlu1 %v4741_v35, %s7533_s2  ;;  %v4337_v37 = vpop.permute.xlu0 %4336  ;;  %v10838_v35 = vld [vmem:[#allocation3 + $0x122] sm:$0xff] }
 0x5ec   :  { %4440 = vst.msk [vmem:[#allocation4 + $0x150] sm:$0xff] %vm4396_vm0, %v4337_v37 }
 0x5ed   :  { %v4343_v41 = vpop.permute.xlu1 %4342  ;;  %4840 = vrot.lane.b32.xlu0 %v4740_v39, %s7533_s2  ;;  %v4769_v39 = vld [vmem:[#allocation3 + $0x13a] sm:$0xf] }
 0x5ee   :  { %4443 = vst.msk [vmem:[#allocation4 + $0x168] sm:$0xf] %vm4398_vm15, %v4343_v41 }
 0x5ef   :  { %4846 = vrot.lane.b32.xlu1 %v4743_v42, %s7533_s2  ;;  %v4341_v43 = vpop.permute.xlu0 %4340  ;;  %v10845_v42 = vld [vmem:[#allocation3 + $0x132] sm:$0xff] }
 0x5f0   :  { %4442 = vst.msk [vmem:[#allocation4 + $0x160] sm:$0xff] %vm4396_vm0, %v4341_v43 }
 0x5f1   :  { %v4347_v46 = vpop.permute.xlu1 %4346  ;;  %4844 = vrot.lane.b32.xlu0 %v4742_v44, %s7533_s2  ;;  %v4771_v44 = vld [vmem:[#allocation3 + $0x14a] sm:$0xf] }
 0x5f2   :  { %4445 = vst.msk [vmem:[#allocation4 + $0x178] sm:$0xf] %vm4398_vm15, %v4347_v46  ;;  %vm6791_vm15 = vcmask 916480  }
 0x5f3   :  { %4850 = vrot.lane.b32.xlu1 %v4745_v47, %s7533_s2  ;;  %v4345_v48 = vpop.permute.xlu0 %4344  ;;  %v10852_v47 = vld [vmem:[#allocation3 + $0x142] sm:$0xff] }
 0x5f4   :  { %4444 = vst.msk [vmem:[#allocation4 + $0x170] sm:$0xff] %vm4396_vm0, %v4345_v48 }
 0x5f5   :  { %v4545_v49 = vpop.permute.xlu1 %4544  ;;  %4848 = vrot.lane.b32.xlu0 %v4744_v5, %s7533_s2  ;;  %v4773_v5 = vld [vmem:[#allocation3 + $0x15a] sm:$0xf] }
 0x5f6   :  { %4689 = vst.msk [vmem:[#allocation4 + $0x8] sm:$0xf] %vm4688_vm1, %v4545_v49 }
 0x5f7   :  { %4854 = vrot.lane.b32.xlu1 %v4747_v50, %s7533_s2  ;;  %v4543_v51 = vpop.permute.xlu0 %4542  ;;  %v10859_v50 = vld [vmem:[#allocation3 + $0x152] sm:$0xff] }
 0x5f8   :  { %4687 = vst.msk [vmem:[#allocation4] sm:$0xff] %vm4686_vm2, %v4543_v51 }
 0x5f9   :  { %v4549_v53 = vpop.permute.xlu1 %4548  ;;  %4852 = vrot.lane.b32.xlu0 %v10774_v45, %s7533_s2 }
 0x5fa   :  { %4691 = vst.msk [vmem:[#allocation4 + $0x18] sm:$0xf] %vm4688_vm1, %v4549_v53  ;;  %v4775_v53 = vld [vmem:[#allocation3 + $0x16a] sm:$0xf] }
 0x5fb   :  { %4858 = vrot.lane.b32.xlu1 %v4749_v17, %s7533_s2  ;;  %v4547_v54 = vpop.permute.xlu0 %4546 }
 0x5fc   :  { %4690 = vst.msk [vmem:[#allocation4 + $0x10] sm:$0xff] %vm4686_vm2, %v4547_v54  ;;  %v10866_v54 = vld [vmem:[#allocation3 + $0x162] sm:$0xff] }
 0x5fd   :  { %v4553_v14 = vpop.permute.xlu1 %4552  ;;  %4856 = vrot.lane.b32.xlu0 %v10781_v57, %s7533_s2 }
 0x5fe   :  { %4693 = vst.msk [vmem:[#allocation4 + $0x28] sm:$0xf] %vm4688_vm1, %v4553_v14 }
 0x5ff   :  { %4862 = vrot.lane.b32.xlu1 %v4751_v58, %s7533_s2  ;;  %v4551_v61 = vpop.permute.xlu0 %4550  ;;  %v4777_v58 = vld [vmem:[#allocation3 + $0x17a] sm:$0xf] }
 0x600   :  { %4692 = vst.msk [vmem:[#allocation4 + $0x20] sm:$0xff] %vm4686_vm2, %v4551_v61 }
 0x601   :  { %v4557_v62 = vpop.permute.xlu1 %4556  ;;  %4860 = vrot.lane.b32.xlu0 %v10788_v27, %s7533_s2 }
 0x602   :  { %4695 = vst.msk [vmem:[#allocation4 + $0x38] sm:$0xf] %vm4688_vm1, %v4557_v62  ;;  %v10873_v62 = vld [vmem:[#allocation3 + $0x172] sm:$0xff] }
 0x603   :  { %4866 = vrot.lane.b32.xlu1 %v4753_v1, %s7533_s2  ;;  %v4555_v2 = vpop.permute.xlu0 %4554 }
 0x604   :  { %4694 = vst.msk [vmem:[#allocation4 + $0x30] sm:$0xff] %vm4686_vm2, %v4555_v2  ;;  %v4779_v2 = vld [vmem:[#allocation3 + $0x18a] sm:$0xf] }
 0x605   :  { %v4561_v6 = vpop.permute.xlu1 %4560  ;;  %4864 = vrot.lane.b32.xlu0 %v10795_v32, %s7533_s2 }
 0x606   :  { %4697 = vst.msk [vmem:[#allocation4 + $0x48] sm:$0xf] %vm4688_vm1, %v4561_v6 }
 0x607   :  { %4870 = vrot.lane.b32.xlu1 %v4755_v10, %s7533_s2  ;;  %v4559_v15 = vpop.permute.xlu0 %4558  ;;  %v10880_v10 = vld [vmem:[#allocation3 + $0x182] sm:$0xff] }
 0x608   :  { %4696 = vst.msk [vmem:[#allocation4 + $0x40] sm:$0xff] %vm4686_vm2, %v4559_v15 }
 0x609   :  { %v4565_v23 = vpop.permute.xlu1 %4564  ;;  %4868 = vrot.lane.b32.xlu0 %v10802_v22, %s7533_s2 }
 0x60a   :  { %4699 = vst.msk [vmem:[#allocation4 + $0x58] sm:$0xf] %vm4688_vm1, %v4565_v23  ;;  %v4781_v23 = vld [vmem:[#allocation3 + $0x19a] sm:$0xf] }
 0x60b   :  { %4874 = vrot.lane.b32.xlu1 %v4757_v38, %s7533_s2  ;;  %v4563_v52 = vpop.permute.xlu0 %4562 }
 0x60c   :  { %4698 = vst.msk [vmem:[#allocation4 + $0x50] sm:$0xff] %vm4686_vm2, %v4563_v52  ;;  %v4780_v52 = vld [vmem:[#allocation3 + $0x192] sm:$0xff] }
 0x60d   :  { %v4569_v63 = vpop.permute.xlu1 %4568  ;;  %4872 = vrot.lane.b32.xlu0 %v10809_v55, %s7533_s2 }
 0x60e   :  { %4701 = vst.msk [vmem:[#allocation4 + $0x68] sm:$0xf] %vm4688_vm1, %v4569_v63 }
 0x60f   :  { %4878 = vrot.lane.b32.xlu1 %v4759_v0, %s7533_s2  ;;  %v4567_v7 = vpop.permute.xlu0 %4566  ;;  %v4783_v0 = vld [vmem:[#allocation3 + $0x1aa] sm:$0xf] }
 0x610   :  { %4700 = vst.msk [vmem:[#allocation4 + $0x60] sm:$0xff] %vm4686_vm2, %v4567_v7 }
 0x611   :  { %v4573_v59 = vpop.permute.xlu1 %4572  ;;  %4876 = vrot.lane.b32.xlu0 %v10816_v16, %s7533_s2 }
 0x612   :  { %4703 = vst.msk [vmem:[#allocation4 + $0x78] sm:$0xf] %vm4688_vm1, %v4573_v59  ;;  %v4782_v59 = vld [vmem:[#allocation3 + $0x1a2] sm:$0xff] }
 0x613   :  { %4882 = vrot.lane.b32.xlu1 %v4761_v60, %s7533_s2  ;;  %v4571_v4 = vpop.permute.xlu0 %4570 }
 0x614   :  { %4702 = vst.msk [vmem:[#allocation4 + $0x70] sm:$0xff] %vm4686_vm2, %v4571_v4  ;;  %v5028_v4 = vld [vmem:[#allocation3 + $0x28] sm:$0xf] }
 0x615   :  { %v4577_v12 = vpop.permute.xlu1 %4576  ;;  %4880 = vrot.lane.b32.xlu0 %v4760_v11, %s7533_s2 }
 0x616   :  { %4705 = vst.msk [vmem:[#allocation4 + $0x88] sm:$0xf] %vm4688_vm1, %v4577_v12  ;;  %v5027_v12 = vld [vmem:[#allocation3 + $0x20] sm:$0xff] }
 0x617   :  { %4886 = vrot.lane.b32.xlu1 %v4763_v29, %s7533_s2  ;;  %v4575_v30 = vpop.permute.xlu0 %4574 }
 0x618   :  { %4704 = vst.msk [vmem:[#allocation4 + $0x80] sm:$0xff] %vm4686_vm2, %v4575_v30  ;;  %v5068_v30 = vld [vmem:[#allocation3 + $0x188] sm:$0xf] }
 0x619   :  { %v4581_v19 = vpop.permute.xlu1 %4580  ;;  %4884 = vrot.lane.b32.xlu0 %v4762_v18, %s7533_s2 }
 0x61a   :  { %4707 = vst.msk [vmem:[#allocation4 + $0x98] sm:$0xf] %vm4688_vm1, %v4581_v19  ;;  %v5047_v19 = vld [vmem:[#allocation3 + $0xc0] sm:$0xff] }
 0x61b   :  { %4890 = vrot.lane.b32.xlu1 %v4765_v21, %s7533_s2  ;;  %v4579_v24 = vpop.permute.xlu0 %4578 }
 0x61c   :  { %4706 = vst.msk [vmem:[#allocation4 + $0x90] sm:$0xff] %vm4686_vm2, %v4579_v24 }
 0x61d   :  { %v4585_v31 = vpop.permute.xlu1 %4584  ;;  %4888 = vrot.lane.b32.xlu0 %v10831_v25, %s7533_s2 }
 0x61e   :  { %4709 = vst.msk [vmem:[#allocation4 + $0xa8] sm:$0xf] %vm4688_vm1, %v4585_v31  ;;  %v5069_v31 = vld [vmem:[#allocation3 + $0x190] sm:$0xff] }
 0x61f   :  { %4894 = vrot.lane.b32.xlu1 %v4767_v33, %s7533_s2  ;;  %v4583_v34 = vpop.permute.xlu0 %4582 }
 0x620   :  { %4708 = vst.msk [vmem:[#allocation4 + $0xa0] sm:$0xff] %vm4686_vm2, %v4583_v34 }
 0x621   :  { %v4589_v37 = vpop.permute.xlu1 %4588  ;;  %4892 = vrot.lane.b32.xlu0 %v10838_v35, %s7533_s2 }
 0x622   :  { %4711 = vst.msk [vmem:[#allocation4 + $0xb8] sm:$0xf] %vm4688_vm1, %v4589_v37  ;;  %v5358_v37 = vld [vmem:[#allocation3 + $0x189] sm:$0xf] }
 0x623   :  { %4898 = vrot.lane.b32.xlu1 %v4769_v39, %s7533_s2  ;;  %v4587_v41 = vpop.permute.xlu0 %4586 }
 0x624   :  { %4710 = vst.msk [vmem:[#allocation4 + $0xb0] sm:$0xff] %vm4686_vm2, %v4587_v41 }
 0x625   :  { %v4593_v43 = vpop.permute.xlu1 %4592  ;;  %4896 = vrot.lane.b32.xlu0 %v10845_v42, %s7533_s2 }
 0x626   :  { %4713 = vst.msk [vmem:[#allocation4 + $0xc8] sm:$0xf] %vm4688_vm1, %v4593_v43 }
 0x627   :  { %4902 = vrot.lane.b32.xlu1 %v4771_v44, %s7533_s2  ;;  %v4591_v46 = vpop.permute.xlu0 %4590  ;;  %v5648_v44 = vld [vmem:[#allocation3 + $0x18a] sm:$0xf] }
 0x628   :  { %4712 = vst.msk [vmem:[#allocation4 + $0xc0] sm:$0xff] %vm4686_vm2, %v4591_v46 }
 0x629   :  { %v4597_v48 = vpop.permute.xlu1 %4596  ;;  %4900 = vrot.lane.b32.xlu0 %v10852_v47, %s7533_s2 }
 0x62a   :  { %4715 = vst.msk [vmem:[#allocation4 + $0xd8] sm:$0xf] %vm4688_vm1, %v4597_v48 }
 0x62b   :  { %4906 = vrot.lane.b32.xlu1 %v4773_v5, %s7533_s2  ;;  %v4595_v49 = vpop.permute.xlu0 %4594 }
 0x62c   :  { %4714 = vst.msk [vmem:[#allocation4 + $0xd0] sm:$0xff] %vm4686_vm2, %v4595_v49 }
 0x62d   :  { %v4601_v51 = vpop.permute.xlu1 %4600  ;;  %4904 = vrot.lane.b32.xlu0 %v10859_v50, %s7533_s2 }
 0x62e   :  { %4717 = vst.msk [vmem:[#allocation4 + $0xe8] sm:$0xf] %vm4688_vm1, %v4601_v51 }
 0x62f   :  { %4910 = vrot.lane.b32.xlu1 %v4775_v53, %s7533_s2  ;;  %v4599_v17 = vpop.permute.xlu0 %4598  ;;  %v5046_v53 = vld [vmem:[#allocation3 + $0xb8] sm:$0xf] }
 0x630   :  { %4716 = vst.msk [vmem:[#allocation4 + $0xe0] sm:$0xff] %vm4686_vm2, %v4599_v17 }
 0x631   :  { %v4605_v14 = vpop.permute.xlu1 %4604  ;;  %4908 = vrot.lane.b32.xlu0 %v10866_v54, %s7533_s2 }
 0x632   :  { %4719 = vst.msk [vmem:[#allocation4 + $0xf8] sm:$0xf] %vm4688_vm1, %v4605_v14  ;;  %v5336_v14 = vld [vmem:[#allocation3 + $0xb9] sm:$0xf] }
 0x633   :  { %4914 = vrot.lane.b32.xlu1 %v4777_v58, %s7533_s2  ;;  %v4603_v61 = vpop.permute.xlu0 %4602 }
 0x634   :  { %4718 = vst.msk [vmem:[#allocation4 + $0xf0] sm:$0xff] %vm4686_vm2, %v4603_v61 }
 0x635   :  { %v4609_v1 = vpop.permute.xlu1 %4608  ;;  %4912 = vrot.lane.b32.xlu0 %v10873_v62, %s7533_s2 }
 0x636   :  { %4721 = vst.msk [vmem:[#allocation4 + $0x108] sm:$0xf] %vm4688_vm1, %v4609_v1 }
 0x637   :  { %4918 = vrot.lane.b32.xlu1 %v4779_v2, %s7533_s2  ;;  %v4607_v6 = vpop.permute.xlu0 %4606 }
 0x638   :  { %4720 = vst.msk [vmem:[#allocation4 + $0x100] sm:$0xff] %vm4686_vm2, %v4607_v6 }
 0x639   :  { %v4613_v15 = vpop.permute.xlu1 %4612  ;;  %4916 = vrot.lane.b32.xlu0 %v10880_v10, %s7533_s2 }
 0x63a   :  { %4723 = vst.msk [vmem:[#allocation4 + $0x118] sm:$0xf] %vm4688_vm1, %v4613_v15 }
 0x63b   :  { %4922 = vrot.lane.b32.xlu1 %v4781_v23, %s7533_s2  ;;  %v4611_v38 = vpop.permute.xlu0 %4610  ;;  %v5356_v23 = vld [vmem:[#allocation3 + $0x179] sm:$0xf] }
 0x63c   :  { %4722 = vst.msk [vmem:[#allocation4 + $0x110] sm:$0xff] %vm4686_vm2, %v4611_v38 }
 0x63d   :  { %v4617_v63 = vpop.permute.xlu1 %4616  ;;  %4920 = vrot.lane.b32.xlu0 %v4780_v52, %s7533_s2 }
 0x63e   :  { %4725 = vst.msk [vmem:[#allocation4 + $0x128] sm:$0xf] %vm4688_vm1, %v4617_v63 }
 0x63f   :  { %4926 = vrot.lane.b32.xlu1 %v4783_v0, %s7533_s2  ;;  %v4615_v7 = vpop.permute.xlu0 %4614  ;;  %v5334_v0 = vld [vmem:[#allocation3 + $0xa9] sm:$0xf] }
 0x640   :  { %4724 = vst.msk [vmem:[#allocation4 + $0x120] sm:$0xff] %vm4686_vm2, %v4615_v7 }
 0x641   :  { %v4621_v60 = vpop.permute.xlu1 %4620  ;;  %4924 = vrot.lane.b32.xlu0 %v4782_v59, %s7533_s2  ;;  %v5624_v59 = vld [vmem:[#allocation3 + $0xaa] sm:$0xf] }
 0x642   :  { %4727 = vst.msk [vmem:[#allocation4 + $0x138] sm:$0xf] %vm4688_vm1, %v4621_v60 }
 0x643   :  { %5125 = vrot.lane.b32.xlu1 %v5028_v4, %s7534_s26  ;;  %v4619_v11 = vpop.permute.xlu0 %4618  ;;  %v5043_v4 = vld [vmem:[#allocation3 + $0xa0] sm:$0xff] }
 0x644   :  { %4726 = vst.msk [vmem:[#allocation4 + $0x130] sm:$0xff] %vm4686_vm2, %v4619_v11 }
 0x645   :  { %v4625_v29 = vpop.permute.xlu1 %4624  ;;  %5123 = vrot.lane.b32.xlu0 %v5027_v12, %s7534_s26 }
 0x646   :  { %4729 = vst.msk [vmem:[#allocation4 + $0x148] sm:$0xf] %vm4688_vm1, %v4625_v29  ;;  %v5064_v29 = vld [vmem:[#allocation3 + $0x168] sm:$0xf] }
 0x647   :  { %5205 = vrot.lane.b32.xlu1 %v5068_v30, %s7534_s26  ;;  %v4623_v18 = vpop.permute.xlu0 %4622 }
 0x648   :  { %4728 = vst.msk [vmem:[#allocation4 + $0x140] sm:$0xff] %vm4686_vm2, %v4623_v18 }
 0x649   :  { %v4629_v21 = vpop.permute.xlu1 %4628  ;;  %5163 = vrot.lane.b32.xlu0 %v5047_v19, %s7534_s26  ;;  %v5354_v19 = vld [vmem:[#allocation3 + $0x169] sm:$0xf] }
 0x64a   :  { %4731 = vst.msk [vmem:[#allocation4 + $0x158] sm:$0xf] %vm4688_vm1, %v4629_v21 }
 0x64b   :  { %5453 = vrot.lane.b32.xlu1 %v10681_v40, %s7535_s13  ;;  %v4627_v24 = vpop.permute.xlu0 %4626  ;;  %v5067_v40 = vld [vmem:[#allocation3 + $0x180] sm:$0xff] }
 0x64c   :  { %4730 = vst.msk [vmem:[#allocation4 + $0x150] sm:$0xff] %vm4686_vm2, %v4627_v24 }
 0x64d   :  { %v4633_v33 = vpop.permute.xlu1 %4632  ;;  %5207 = vrot.lane.b32.xlu0 %v5069_v31, %s7534_s26  ;;  %v5063_v31 = vld [vmem:[#allocation3 + $0x160] sm:$0xff] }
 0x64e   :  { %4733 = vst.msk [vmem:[#allocation4 + $0x168] sm:$0xf] %vm4688_vm1, %v4633_v33 }
 0x64f   :  { %5497 = vrot.lane.b32.xlu1 %v10743_v3, %s7535_s13  ;;  %v4631_v34 = vpop.permute.xlu0 %4630 }
 0x650   :  { %4732 = vst.msk [vmem:[#allocation4 + $0x160] sm:$0xff] %vm4686_vm2, %v4631_v34  ;;  %v5041_v34 = vld [vmem:[#allocation3 + $0x90] sm:$0xff] }
 0x651   :  { %v4637_v39 = vpop.permute.xlu1 %4636  ;;  %5495 = vrot.lane.b32.xlu0 %v5358_v37, %s7535_s13 }
 0x652   :  { %4735 = vst.msk [vmem:[#allocation4 + $0x178] sm:$0xf] %vm4688_vm1, %v4637_v39 }
 0x653   :  { %5203 = vrot.lane.b32.xlu1 %v5067_v40, %s7534_s26  ;;  %v4635_v41 = vpop.permute.xlu0 %4634 }
 0x654   :  { %4734 = vst.msk [vmem:[#allocation4 + $0x170] sm:$0xff] %vm4686_vm2, %v4635_v41  ;;  %v5042_v41 = vld [vmem:[#allocation3 + $0x98] sm:$0xf] }
 0x655   :  { %v4835_v43 = vpop.permute.xlu1 %4834  ;;  %5743 = vrot.lane.b32.xlu0 %v10816_v16, %s7536_s25  ;;  %v5045_v16 = vld [vmem:[#allocation3 + $0xb0] sm:$0xff] }
 0x656   :  { %4979 = vst.msk [vmem:[#allocation4 + $0x8] sm:$0xf] %vm4978_vm3, %v4835_v43 }
 0x657   :  { %5787 = vrot.lane.b32.xlu1 %v4780_v52, %s7536_s25  ;;  %v4833_v3 = vpop.permute.xlu0 %4832 }
 0x658   :  { %4977 = vst.msk [vmem:[#allocation4] sm:$0xff] %vm4976_vm4, %v4833_v3 }
 0x659   :  { %v4839_v46 = vpop.permute.xlu1 %4838  ;;  %5785 = vrot.lane.b32.xlu0 %v5648_v44, %s7536_s25 }
 0x65a   :  { %4981 = vst.msk [vmem:[#allocation4 + $0x18] sm:$0xf] %vm4978_vm3, %v4839_v46 }
 0x65b   :  { %5493 = vrot.lane.b32.xlu1 %v10736_v8, %s7535_s13  ;;  %v4837_v48 = vpop.permute.xlu0 %4836 }
 0x65c   :  { %4980 = vst.msk [vmem:[#allocation4 + $0x10] sm:$0xff] %vm4976_vm4, %v4837_v48 }
 0x65d   :  { %v4843_v5 = vpop.permute.xlu1 %4842  ;;  %5159 = vrot.lane.b32.xlu0 %v5045_v16, %s7534_s26 }
 0x65e   :  { %4983 = vst.msk [vmem:[#allocation4 + $0x28] sm:$0xf] %vm4978_vm3, %v4843_v5  ;;  %v5062_v5 = vld [vmem:[#allocation3 + $0x158] sm:$0xf] }
 0x65f   :  { %5783 = vrot.lane.b32.xlu1 %v10880_v10, %s7536_s25  ;;  %v4841_v49 = vpop.permute.xlu0 %4840  ;;  %v5066_v10 = vld [vmem:[#allocation3 + $0x178] sm:$0xf] }
 0x660   :  { %4982 = vst.msk [vmem:[#allocation4 + $0x20] sm:$0xff] %vm4976_vm4, %v4841_v49 }
 0x661   :  { %v4847_v51 = vpop.permute.xlu1 %4846  ;;  %5449 = vrot.lane.b32.xlu0 %v10674_v9, %s7535_s13  ;;  %v5065_v9 = vld [vmem:[#allocation3 + $0x170] sm:$0xff] }
 0x662   :  { %4985 = vst.msk [vmem:[#allocation4 + $0x38] sm:$0xf] %vm4978_vm3, %v4847_v51  ;;  %v5352_v51 = vld [vmem:[#allocation3 + $0x159] sm:$0xf] }
 0x663   :  { %5739 = vrot.lane.b32.xlu1 %v10809_v55, %s7536_s25  ;;  %v4845_v8 = vpop.permute.xlu0 %4844  ;;  %v5626_v55 = vld [vmem:[#allocation3 + $0xba] sm:$0xf] }
 0x664   :  { %4984 = vst.msk [vmem:[#allocation4 + $0x30] sm:$0xff] %vm4976_vm4, %v4845_v8 }
 0x665   :  { %v4851_v17 = vpop.permute.xlu1 %4850  ;;  %5161 = vrot.lane.b32.xlu0 %v5046_v53, %s7534_s26 }
 0x666   :  { %4987 = vst.msk [vmem:[#allocation4 + $0x48] sm:$0xf] %vm4978_vm3, %v4851_v17 }
 0x667   :  { %5451 = vrot.lane.b32.xlu1 %v5336_v14, %s7535_s13  ;;  %v4849_v58 = vpop.permute.xlu0 %4848  ;;  %v5330_v14 = vld [vmem:[#allocation3 + $0x89] sm:$0xf] }
 0x668   :  { %4986 = vst.msk [vmem:[#allocation4 + $0x40] sm:$0xff] %vm4976_vm4, %v4849_v58 }
 0x669   :  { %v4855_v61 = vpop.permute.xlu1 %4854  ;;  %5199 = vrot.lane.b32.xlu0 %v5065_v9, %s7534_s26  ;;  %v5620_v9 = vld [vmem:[#allocation3 + $0x8a] sm:$0xf] }
 0x66a   :  { %4989 = vst.msk [vmem:[#allocation4 + $0x58] sm:$0xf] %vm4978_vm3, %v4855_v61 }
 0x66b   :  { %5741 = vrot.lane.b32.xlu1 %v5626_v55, %s7536_s25  ;;  %v4853_v1 = vpop.permute.xlu0 %4852  ;;  %v5039_v55 = vld [vmem:[#allocation3 + $0x80] sm:$0xff] }
 0x66c   :  { %4988 = vst.msk [vmem:[#allocation4 + $0x50] sm:$0xff] %vm4976_vm4, %v4853_v1 }
 0x66d   :  { %v4859_v2 = vpop.permute.xlu1 %4858  ;;  %5489 = vrot.lane.b32.xlu0 %v10729_v56, %s7535_s13  ;;  %v5044_v56 = vld [vmem:[#allocation3 + $0xa8] sm:$0xf] }
 0x66e   :  { %4991 = vst.msk [vmem:[#allocation4 + $0x68] sm:$0xf] %vm4978_vm3, %v4859_v2  ;;  %v5329_v2 = vld [vmem:[#allocation3 + $0x81] sm:$0xff] }
 0x66f   :  { %5779 = vrot.lane.b32.xlu1 %v10873_v62, %s7536_s25  ;;  %v4857_v6 = vpop.permute.xlu0 %4856  ;;  %v5646_v62 = vld [vmem:[#allocation3 + $0x17a] sm:$0xf] }
 0x670   :  { %4990 = vst.msk [vmem:[#allocation4 + $0x60] sm:$0xff] %vm4976_vm4, %v4857_v6 }
 0x671   :  { %v4863_v15 = vpop.permute.xlu1 %4862  ;;  %5201 = vrot.lane.b32.xlu0 %v5066_v10, %s7534_s26  ;;  %v5060_v10 = vld [vmem:[#allocation3 + $0x148] sm:$0xf] }
 0x672   :  { %4993 = vst.msk [vmem:[#allocation4 + $0x78] sm:$0xf] %vm4978_vm3, %v4863_v15 }
 0x673   :  { %5491 = vrot.lane.b32.xlu1 %v5356_v23, %s7535_s13  ;;  %v4861_v38 = vpop.permute.xlu0 %4860 }
 0x674   :  { %4992 = vst.msk [vmem:[#allocation4 + $0x70] sm:$0xff] %vm4976_vm4, %v4861_v38  ;;  %v5350_v38 = vld [vmem:[#allocation3 + $0x149] sm:$0xf] }
 0x675   :  { %v4867_v52 = vpop.permute.xlu1 %4866  ;;  %5157 = vrot.lane.b32.xlu0 %v5044_v56, %s7534_s26 }
 0x676   :  { %4995 = vst.msk [vmem:[#allocation4 + $0x88] sm:$0xf] %vm4978_vm3, %v4867_v52  ;;  %v5640_v52 = vld [vmem:[#allocation3 + $0x14a] sm:$0xf] }
 0x677   :  { %5781 = vrot.lane.b32.xlu1 %v5646_v62, %s7536_s25  ;;  %v4865_v63 = vpop.permute.xlu0 %4864 }
 0x678   :  { %4994 = vst.msk [vmem:[#allocation4 + $0x80] sm:$0xff] %vm4976_vm4, %v4865_v63  ;;  %v5059_v63 = vld [vmem:[#allocation3 + $0x140] sm:$0xff] }
 0x679   :  { %v4871_v7 = vpop.permute.xlu1 %4870  ;;  %5447 = vrot.lane.b32.xlu0 %v5334_v0, %s7535_s13 }
 0x67a   :  { %4997 = vst.msk [vmem:[#allocation4 + $0x98] sm:$0xf] %vm4978_vm3, %v4871_v7  ;;  %v5037_v7 = vld [vmem:[#allocation3 + $0x70] sm:$0xff] }
 0x67b   :  { %5737 = vrot.lane.b32.xlu1 %v5624_v59, %s7536_s25  ;;  %v4869_v60 = vpop.permute.xlu0 %4868 }
 0x67c   :  { %4996 = vst.msk [vmem:[#allocation4 + $0x90] sm:$0xff] %vm4976_vm4, %v4869_v60 }
 0x67d   :  { %v4875_v11 = vpop.permute.xlu1 %4874  ;;  %5155 = vrot.lane.b32.xlu0 %v5043_v4, %s7534_s26  ;;  %v5327_v4 = vld [vmem:[#allocation3 + $0x71] sm:$0xff] }
 0x67e   :  { %4999 = vst.msk [vmem:[#allocation4 + $0xa8] sm:$0xf] %vm4978_vm3, %v4875_v11 }
 0x67f   :  { %5445 = vrot.lane.b32.xlu1 %v10667_v28, %s7535_s13  ;;  %v4873_v12 = vpop.permute.xlu0 %4872  ;;  %v5644_v28 = vld [vmem:[#allocation3 + $0x16a] sm:$0xf] }
 0x680   :  { %4998 = vst.msk [vmem:[#allocation4 + $0xa0] sm:$0xff] %vm4976_vm4, %v4873_v12  ;;  %v5038_v12 = vld [vmem:[#allocation3 + $0x78] sm:$0xf] }
 0x681   :  { %v4879_v30 = vpop.permute.xlu1 %4878  ;;  %5197 = vrot.lane.b32.xlu0 %v5064_v29, %s7534_s26 }
 0x682   :  { %5001 = vst.msk [vmem:[#allocation4 + $0xb8] sm:$0xf] %vm4978_vm3, %v4879_v30 }
 0x683   :  { %5735 = vrot.lane.b32.xlu1 %v10802_v22, %s7536_s25  ;;  %v4877_v18 = vpop.permute.xlu0 %4876 }
 0x684   :  { %5000 = vst.msk [vmem:[#allocation4 + $0xb0] sm:$0xff] %vm4976_vm4, %v4877_v18  ;;  %v5057_v18 = vld [vmem:[#allocation3 + $0x130] sm:$0xff] }
 0x685   :  { %v4883_v21 = vpop.permute.xlu1 %4882  ;;  %5487 = vrot.lane.b32.xlu0 %v5354_v19, %s7535_s13 }
 0x686   :  { %5003 = vst.msk [vmem:[#allocation4 + $0xc8] sm:$0xf] %vm4978_vm3, %v4883_v21 }
 0x687   :  { %5777 = vrot.lane.b32.xlu1 %v5644_v28, %s7536_s25  ;;  %v4881_v24 = vpop.permute.xlu0 %4880  ;;  %v5347_v28 = vld [vmem:[#allocation3 + $0x131] sm:$0xff] }
 0x688   :  { %5002 = vst.msk [vmem:[#allocation4 + $0xc0] sm:$0xff] %vm4976_vm4, %v4881_v24 }
 0x689   :  { %v4887_v33 = vpop.permute.xlu1 %4886  ;;  %5195 = vrot.lane.b32.xlu0 %v5063_v31, %s7534_s26 }
 0x68a   :  { %5005 = vst.msk [vmem:[#allocation4 + $0xd8] sm:$0xf] %vm4978_vm3, %v4887_v33 }
 0x68b   :  { %5485 = vrot.lane.b32.xlu1 %v10722_v36, %s7535_s13  ;;  %v4885_v22 = vpop.permute.xlu0 %4884 }
 0x68c   :  { %5004 = vst.msk [vmem:[#allocation4 + $0xd0] sm:$0xff] %vm4976_vm4, %v4885_v22  ;;  %v5058_v22 = vld [vmem:[#allocation3 + $0x138] sm:$0xf] }
 0x68d   :  { %v4891_v37 = vpop.permute.xlu1 %4890  ;;  %5151 = vrot.lane.b32.xlu0 %v5041_v34, %s7534_s26 }
 0x68e   :  { %5007 = vst.msk [vmem:[#allocation4 + $0xe8] sm:$0xf] %vm4978_vm3, %v4891_v37 }
 0x68f   :  { %5775 = vrot.lane.b32.xlu1 %v10866_v54, %s7536_s25  ;;  %v4889_v39 = vpop.permute.xlu0 %4888  ;;  %v5332_v54 = vld [vmem:[#allocation3 + $0x99] sm:$0xf] }
 0x690   :  { %5006 = vst.msk [vmem:[#allocation4 + $0xe0] sm:$0xff] %vm4976_vm4, %v4889_v39  ;;  %v5348_v39 = vld [vmem:[#allocation3 + $0x139] sm:$0xf] }
 0x691   :  { %v4895_v40 = vpop.permute.xlu1 %4894  ;;  %5441 = vrot.lane.b32.xlu0 %v10660_v20, %s7535_s13  ;;  %v5061_v20 = vld [vmem:[#allocation3 + $0x150] sm:$0xff] }
 0x692   :  { %5009 = vst.msk [vmem:[#allocation4 + $0xf8] sm:$0xf] %vm4978_vm3, %v4895_v40 }
 0x693   :  { %5731 = vrot.lane.b32.xlu1 %v10795_v32, %s7536_s25  ;;  %v4893_v36 = vpop.permute.xlu0 %4892  ;;  %v5622_v32 = vld [vmem:[#allocation3 + $0x9a] sm:$0xf] }
 0x694   :  { %5008 = vst.msk [vmem:[#allocation4 + $0xf0] sm:$0xff] %vm4976_vm4, %v4893_v36 }
 0x695   :  { %v4899_v43 = vpop.permute.xlu1 %4898  ;;  %5153 = vrot.lane.b32.xlu0 %v5042_v41, %s7534_s26 }
 0x696   :  { %5011 = vst.msk [vmem:[#allocation4 + $0x108] sm:$0xf] %vm4978_vm3, %v4899_v43 }
 0x697   :  { %5443 = vrot.lane.b32.xlu1 %v5332_v54, %s7535_s13  ;;  %v4897_v3 = vpop.permute.xlu0 %4896 }
 0x698   :  { %5010 = vst.msk [vmem:[#allocation4 + $0x100] sm:$0xff] %vm4976_vm4, %v4897_v3 }
 0x699   :  { %v4903_v44 = vpop.permute.xlu1 %4902  ;;  %5191 = vrot.lane.b32.xlu0 %v5061_v20, %s7534_s26  ;;  %v5638_v20 = vld [vmem:[#allocation3 + $0x13a] sm:$0xf] }
 0x69a   :  { %5013 = vst.msk [vmem:[#allocation4 + $0x118] sm:$0xf] %vm4978_vm3, %v4903_v44 }
 0x69b   :  { %5733 = vrot.lane.b32.xlu1 %v5622_v32, %s7536_s25  ;;  %v4901_v46 = vpop.permute.xlu0 %4900  ;;  %v5326_v32 = vld [vmem:[#allocation3 + $0x69] sm:$0xf] }
 0x69c   :  { %5012 = vst.msk [vmem:[#allocation4 + $0x110] sm:$0xff] %vm4976_vm4, %v4901_v46 }
 0x69d   :  { %v4907_v48 = vpop.permute.xlu1 %4906  ;;  %5481 = vrot.lane.b32.xlu0 %v10715_v13, %s7535_s13  ;;  %v5040_v13 = vld [vmem:[#allocation3 + $0x88] sm:$0xf] }
 0x69e   :  { %5015 = vst.msk [vmem:[#allocation4 + $0x128] sm:$0xf] %vm4978_vm3, %v4907_v48 }
 0x69f   :  { %5771 = vrot.lane.b32.xlu1 %v10859_v50, %s7536_s25  ;;  %v4905_v16 = vpop.permute.xlu0 %4904  ;;  %v5642_v50 = vld [vmem:[#allocation3 + $0x15a] sm:$0xf] }
 0x6a0   :  { %5014 = vst.msk [vmem:[#allocation4 + $0x120] sm:$0xff] %vm4976_vm4, %v4905_v16  ;;  %v5616_v16 = vld [vmem:[#allocation3 + $0x6a] sm:$0xf] }
 0x6a1   :  { %v4911_v49 = vpop.permute.xlu1 %4910  ;;  %5193 = vrot.lane.b32.xlu0 %v5062_v5, %s7534_s26 }
 0x6a2   :  { %5017 = vst.msk [vmem:[#allocation4 + $0x138] sm:$0xf] %vm4978_vm3, %v4911_v49 }
 0x6a3   :  { %5483 = vrot.lane.b32.xlu1 %v5352_v51, %s7535_s13  ;;  %v4909_v8 = vpop.permute.xlu0 %4908  ;;  %v5035_v51 = vld [vmem:[#allocation3 + $0x60] sm:$0xff] }
 0x6a4   :  { %5016 = vst.msk [vmem:[#allocation4 + $0x130] sm:$0xff] %vm4976_vm4, %v4909_v8 }
 0x6a5   :  { %v4915_v53 = vpop.permute.xlu1 %4914  ;;  %5149 = vrot.lane.b32.xlu0 %v5040_v13, %s7534_s26 }
 0x6a6   :  { %5019 = vst.msk [vmem:[#allocation4 + $0x148] sm:$0xf] %vm4978_vm3, %v4915_v53  ;;  %v5325_v53 = vld [vmem:[#allocation3 + $0x61] sm:$0xff] }
 0x6a7   :  { %5773 = vrot.lane.b32.xlu1 %v5642_v50, %s7536_s25  ;;  %v4913_v17 = vpop.permute.xlu0 %4912 }
 0x6a8   :  { %5018 = vst.msk [vmem:[#allocation4 + $0x140] sm:$0xff] %vm4976_vm4, %v4913_v17  ;;  %v5056_v17 = vld [vmem:[#allocation3 + $0x128] sm:$0xf] }
 0x6a9   :  { %v4919_v58 = vpop.permute.xlu1 %4918  ;;  %5439 = vrot.lane.b32.xlu0 %v5330_v14, %s7535_s13 }
 0x6aa   :  { %5021 = vst.msk [vmem:[#allocation4 + $0x158] sm:$0xf] %vm4978_vm3, %v4919_v58 }
 0x6ab   :  { %5729 = vrot.lane.b32.xlu1 %v5620_v9, %s7536_s25  ;;  %v4917_v61 = vpop.permute.xlu0 %4916 }
 0x6ac   :  { %5020 = vst.msk [vmem:[#allocation4 + $0x150] sm:$0xff] %vm4976_vm4, %v4917_v61  ;;  %v5346_v61 = vld [vmem:[#allocation3 + $0x129] sm:$0xf] }
 0x6ad   :  { %v4923_v1 = vpop.permute.xlu1 %4922  ;;  %5147 = vrot.lane.b32.xlu0 %v5039_v55, %s7534_s26 }
 0x6ae   :  { %5023 = vst.msk [vmem:[#allocation4 + $0x168] sm:$0xf] %vm4978_vm3, %v4923_v1 }
 0x6af   :  { %5437 = vrot.lane.b32.xlu1 %v5329_v2, %s7535_s13  ;;  %v4921_v6 = vpop.permute.xlu0 %4920 }
 0x6b0   :  { %5022 = vst.msk [vmem:[#allocation4 + $0x160] sm:$0xff] %vm4976_vm4, %v4921_v6  ;;  %v5636_v6 = vld [vmem:[#allocation3 + $0x12a] sm:$0xf] }
 0x6b1   :  { %v4927_v15 = vpop.permute.xlu1 %4926  ;;  %5189 = vrot.lane.b32.xlu0 %v5060_v10, %s7534_s26 }
 0x6b2   :  { %5025 = vst.msk [vmem:[#allocation4 + $0x178] sm:$0xf] %vm4978_vm3, %v4927_v15 }
 0x6b3   :  { %5727 = vrot.lane.b32.xlu1 %v10788_v27, %s7536_s25  ;;  %v4925_v23 = vpop.permute.xlu0 %4924 }
 0x6b4   :  { %5024 = vst.msk [vmem:[#allocation4 + $0x170] sm:$0xff] %vm4976_vm4, %v4925_v23 }
 0x6b5   :  { %v5126_v56 = vpop.permute.xlu1 %5125  ;;  %5479 = vrot.lane.b32.xlu0 %v5350_v38, %s7535_s13  ;;  %v5345_v38 = vld [vmem:[#allocation3 + $0x121] sm:$0xff] }
 0x6b6   :  { %5270 = vst.msk [vmem:[#allocation4 + $0x8] sm:$0xf] %vm5269_vm5, %v5126_v56 }
 0x6b7   :  { %5769 = vrot.lane.b32.xlu1 %v5640_v52, %s7536_s25  ;;  %v5124_v62 = vpop.permute.xlu0 %5123  ;;  %v5033_v52 = vld [vmem:[#allocation3 + $0x50] sm:$0xff] }
 0x6b8   :  { %5268 = vst.msk [vmem:[#allocation4] sm:$0xff] %vm5267_vm6, %v5124_v62 }
 0x6b9   :  { %v5206_v0 = vpop.permute.xlu1 %5205  ;;  %5187 = vrot.lane.b32.xlu0 %v5059_v63, %s7534_s26 }
 0x6ba   :  { %5310 = vst.msk [vmem:[#allocation4 + $0x148] sm:$0xf] %vm5269_vm5, %v5206_v0 }
 0x6bb   :  { %5477 = vrot.lane.b32.xlu1 %v10708_v26, %s7535_s13  ;;  %v5164_v27 = vpop.permute.xlu0 %5163 }
 0x6bc   :  { %5289 = vst.msk [vmem:[#allocation4 + $0xa0] sm:$0xff] %vm5267_vm6, %v5164_v27  ;;  %v5323_v27 = vld [vmem:[#allocation3 + $0x51] sm:$0xff] }
 0x6bd   :  { %v5454_v59 = vpop.permute.xlu1 %5453  ;;  %5143 = vrot.lane.b32.xlu0 %v5037_v7, %s7534_s26 }
 0x6be   :  { %5579 = vst.msk [vmem:[#allocation4 + $0xa0] sm:$0xff] %vm5557_vm7, %v5454_v59 }
 0x6bf   :  { %5767 = vrot.lane.b32.xlu1 %v10852_v47, %s7536_s25  ;;  %v5208_v60 = vpop.permute.xlu0 %5207  ;;  %v5328_v47 = vld [vmem:[#allocation3 + $0x79] sm:$0xf] }
 0x6c0   :  { %5311 = vst.msk [vmem:[#allocation4 + $0x150] sm:$0xff] %vm5267_vm6, %v5208_v60 }
 0x6c1   :  { %v5498_v11 = vpop.permute.xlu1 %5497  ;;  %5433 = vrot.lane.b32.xlu0 %v5327_v4, %s7535_s13  ;;  %v5613_v4 = vld [vmem:[#allocation3 + $0x52] sm:$0xff] }
 0x6c2   :  { %5601 = vst.msk [vmem:[#allocation4 + $0x150] sm:$0xff] %vm5557_vm7, %v5498_v11 }
 0x6c3   :  { %5723 = vrot.lane.b32.xlu1 %v10781_v57, %s7536_s25  ;;  %v5496_v26 = vpop.permute.xlu0 %5495  ;;  %v5618_v57 = vld [vmem:[#allocation3 + $0x7a] sm:$0xf] }
 0x6c4   :  { %5600 = vst.msk [vmem:[#allocation4 + $0x148] sm:$0xf] %vm5559_vm8, %v5496_v26 }
 0x6c5   :  { %v5204_v29 = vpop.permute.xlu1 %5203  ;;  %5145 = vrot.lane.b32.xlu0 %v5038_v12, %s7534_s26 }
 0x6c6   :  { %5309 = vst.msk [vmem:[#allocation4 + $0x140] sm:$0xff] %vm5267_vm6, %v5204_v29 }
 0x6c7   :  { %5435 = vrot.lane.b32.xlu1 %v5328_v47, %s7535_s13  ;;  %v5744_v30 = vpop.permute.xlu0 %5743  ;;  %v5324_v47 = vld [vmem:[#allocation3 + $0x59] sm:$0xf] }
 0x6c8   :  { %5869 = vst.msk [vmem:[#allocation4 + $0xa0] sm:$0xff] %vm5847_vm9, %v5744_v30 }
 0x6c9   :  { %v5788_v19 = vpop.permute.xlu1 %5787  ;;  %5183 = vrot.lane.b32.xlu0 %v5057_v18, %s7534_s26 }
 0x6ca   :  { %5891 = vst.msk [vmem:[#allocation4 + $0x150] sm:$0xff] %vm5847_vm9, %v5788_v19  ;;  %v5053_v19 = vld [vmem:[#allocation3 + $0x110] sm:$0xff] }
 0x6cb   :  { %5725 = vrot.lane.b32.xlu1 %v5618_v57, %s7536_s25  ;;  %v5786_v21 = vpop.permute.xlu0 %5785 }
 0x6cc   :  { %5890 = vst.msk [vmem:[#allocation4 + $0x148] sm:$0xf] %vm5849_vm10, %v5786_v21  ;;  %v5614_v21 = vld [vmem:[#allocation3 + $0x5a] sm:$0xf] }
 0x6cd   :  { %v5494_v24 = vpop.permute.xlu1 %5493  ;;  %5473 = vrot.lane.b32.xlu0 %v5347_v28, %s7535_s13 }
 0x6ce   :  { %5599 = vst.msk [vmem:[#allocation4 + $0x140] sm:$0xff] %vm5557_vm7, %v5494_v24  ;;  %v5343_v24 = vld [vmem:[#allocation3 + $0x111] sm:$0xff] }
 0x6cf   :  { %5763 = vrot.lane.b32.xlu1 %v10845_v42, %s7536_s25  ;;  %v5160_v31 = vpop.permute.xlu0 %5159  ;;  %v5917_v33 = vld [vmem:[#allocation4 + $0xa0] sm:$0xff]  ;;  %v5036_v42 = vld [vmem:[#allocation3 + $0x68] sm:$0xf] }
 0x6d0   :  { %5287 = vst.msk [vmem:[#allocation4 + $0x90] sm:$0xff] %vm5267_vm6, %v5160_v31  ;;  %v6003_v37 = vcombine.high %v5917_v33, %v5917_v33 }
 0x6d1   :  { %v5784_v34 = vpop.permute.xlu1 %5783  ;;  %5185 = vrot.lane.b32.xlu0 %v5058_v22, %s7534_s26  ;;  %v5939_v41 = vld [vmem:[#allocation4 + $0x150] sm:$0xff] }
 0x6d2   :  { %5889 = vst.msk [vmem:[#allocation4 + $0x140] sm:$0xff] %vm5847_vm9, %v5784_v34  ;;  %v6176_v3 = vcombine.low %v5917_v33, %v6003_v37  ;;  %v5054_v37 = vld [vmem:[#allocation3 + $0x118] sm:$0xf] }
 0x6d3   :  { %5475 = vrot.lane.b32.xlu1 %v5348_v39, %s7535_s13  ;;  %v5450_v40 = vpop.permute.xlu0 %5449  ;;  %v5938_v36 = vld [vmem:[#allocation4 + $0x148] sm:$0xf] }
 0x6d4   :  { %5577 = vst.msk [vmem:[#allocation4 + $0x90] sm:$0xff] %vm5557_vm7, %v5450_v40  ;;  %v6192_v43 = vcombine.low %v5938_v36, %v5939_v41  ;;  %v5344_v36 = vld [vmem:[#allocation3 + $0x119] sm:$0xf] }
 0x6d5   :  { %v5740_v54 = vpop.permute.xlu1 %5739  ;;  %5141 = vrot.lane.b32.xlu0 %v5036_v42, %s7534_s26 }
 0x6d6   :  { %5867 = vst.msk [vmem:[#allocation4 + $0x90] sm:$0xff] %vm5847_vm9, %v5740_v54  ;;  %7217 = vmatprep.subr.mxu0 %v6192_v43  ;;  %7449 = vmatprep.subr.mxu1 %v6192_v43 }
 0x6d7   :  { %5765 = vrot.lane.b32.xlu1 %v5638_v20, %s7536_s25  ;;  %7218 = vmatpush3.xpose.msra.mxu0 %v6176_v3  ;;  %v5162_v44 = vpop.permute.xlu0 %5161 }
 0x6d8   :  { %7465 = vmatpush3.xpose.msra.mxu1 %v6176_v3  ;;  %5288 = vst.msk [vmem:[#allocation4 + $0x98] sm:$0xf] %vm5269_vm5, %v5162_v44  ;;  %v5634_v3 = vld [vmem:[#allocation3 + $0x11a] sm:$0xf]  ;;  %v5322_v44 = vld [vmem:[#allocation3 + $0x49] sm:$0xf] }
 0x6d9   :  { %v5452_v46 = vpop.permute.xlu1 %5451  ;;  %5431 = vrot.lane.b32.xlu0 %v5326_v32, %s7535_s13  ;;  %v5937_v48 = vld [vmem:[#allocation4 + $0x140] sm:$0xff] }
 0x6da   :  { %5578 = vst.msk [vmem:[#allocation4 + $0x98] sm:$0xf] %vm5559_vm8, %v5452_v46  ;;  %v6013_v5 = vcombine.high %v5937_v48, %v5937_v48 }
 0x6db   :  { %5721 = vrot.lane.b32.xlu1 %v5616_v16, %s7536_s25  ;;  %v5200_v49 = vpop.permute.xlu0 %5199 }
 0x6dc   :  { %5307 = vst.msk [vmem:[#allocation4 + $0x130] sm:$0xff] %vm5267_vm6, %v5200_v49  ;;  %v6191_v8 = vcombine.low %v5937_v48, %v6013_v5  ;;  %v5612_v48 = vld [vmem:[#allocation3 + $0x4a] sm:$0xf]  ;;  %v5031_v49 = vld [vmem:[#allocation3 + $0x40] sm:$0xff] }
 0x6dd   :  { %v5742_v13 = vpop.permute.xlu1 %5741  ;;  %5139 = vrot.lane.b32.xlu0 %v5035_v51, %s7534_s26  ;;  %v5915_v58 = vld [vmem:[#allocation4 + $0x90] sm:$0xff] }
 0x6de   :  { %5868 = vst.msk [vmem:[#allocation4 + $0x98] sm:$0xf] %vm5849_vm10, %v5742_v13  ;;  %7219 = vmatprep.subr.mxu0 %v6191_v8  ;;  %7450 = vmatprep.subr.mxu1 %v6191_v8  ;;  %v6002_v55 = vcombine.high %v5915_v58, %v5915_v58  ;;  %v5321_v13 = vld [vmem:[#allocation3 + $0x41] sm:$0xff] }
 0x6df   :  { %5429 = vrot.lane.b32.xlu1 %v5325_v53, %s7535_s13  ;;  %v5490_v50 = vpop.permute.xlu0 %5489 }
 0x6e0   :  { %5597 = vst.msk [vmem:[#allocation4 + $0x130] sm:$0xff] %vm5557_vm7, %v5490_v50  ;;  %v5052_v50 = vld [vmem:[#allocation3 + $0x108] sm:$0xf] }
 0x6e1   :  { %v5780_v14 = vpop.permute.xlu1 %5779  ;;  %5181 = vrot.lane.b32.xlu0 %v5056_v17, %s7534_s26 }
 0x6e2   :  { %5887 = vst.msk [vmem:[#allocation4 + $0x130] sm:$0xff] %vm5847_vm9, %v5780_v14 }
 0x6e3   :  { %5719 = vrot.lane.b32.xlu1 %v10774_v45, %s7536_s25  ;;  %v5202_v9 = vpop.permute.xlu0 %5201  ;;  %v5055_v45 = vld [vmem:[#allocation3 + $0x120] sm:$0xff] }
 0x6e4   :  { %5308 = vst.msk [vmem:[#allocation4 + $0x138] sm:$0xf] %vm5269_vm5, %v5202_v9 }
 0x6e5   :  { %v5492_v1 = vpop.permute.xlu1 %5491  ;;  %5471 = vrot.lane.b32.xlu0 %v5346_v61, %s7535_s13  ;;  %v5916_v2 = vld [vmem:[#allocation4 + $0x98] sm:$0xf]  ;;  %v5342_v61 = vld [vmem:[#allocation3 + $0x109] sm:$0xf] }
 0x6e6   :  { %5598 = vst.msk [vmem:[#allocation4 + $0x138] sm:$0xf] %vm5559_vm8, %v5492_v1  ;;  %v6175_v10 = vcombine.low %v6002_v55, %v5916_v2 }
 0x6e7   :  { %5761 = vrot.lane.b32.xlu1 %v5636_v6, %s7536_s25  ;;  %v5158_v15 = vpop.permute.xlu0 %5157  ;;  %v5632_v6 = vld [vmem:[#allocation3 + $0x10a] sm:$0xf] }
 0x6e8   :  { %5286 = vst.msk [vmem:[#allocation4 + $0x88] sm:$0xf] %vm5269_vm5, %v5158_v15  ;;  %7220 = vmatpush3.xpose.msra.mxu0 %v6175_v10  ;;  %7466 = vmatpush3.xpose.msra.mxu1 %v6175_v10 }
 0x6e9   :  { %v5782_v23 = vpop.permute.xlu1 %5781  ;;  %5179 = vrot.lane.b32.xlu0 %v5055_v45, %s7534_s26  ;;  %v5935_v63 = vld [vmem:[#allocation4 + $0x130] sm:$0xff]  ;;  %v5051_v45 = vld [vmem:[#allocation3 + $0x100] sm:$0xff] }
 0x6ea   :  { %5888 = vst.msk [vmem:[#allocation4 + $0x138] sm:$0xf] %vm5849_vm10, %v5782_v23  ;;  %v6012_v7 = vcombine.high %v5935_v63, %v5935_v63 }
 0x6eb   :  { %5469 = vrot.lane.b32.xlu1 %v5345_v38, %s7535_s13  ;;  %v5448_v56 = vpop.permute.xlu0 %5447  ;;  %v5341_v38 = vld [vmem:[#allocation3 + $0x101] sm:$0xff] }
 0x6ec   :  { %5576 = vst.msk [vmem:[#allocation4 + $0x88] sm:$0xf] %vm5559_vm8, %v5448_v56 }
 0x6ed   :  { %v5738_v62 = vpop.permute.xlu1 %5737  ;;  %5135 = vrot.lane.b32.xlu0 %v5033_v52, %s7534_s26  ;;  %v5029_v52 = vld [vmem:[#allocation3 + $0x30] sm:$0xff] }
 0x6ee   :  { %5866 = vst.msk [vmem:[#allocation4 + $0x88] sm:$0xf] %vm5849_vm10, %v5738_v62 }
 0x6ef   :  { %5759 = vrot.lane.b32.xlu1 %v10838_v35, %s7536_s25  ;;  %v5156_v0 = vpop.permute.xlu0 %5155  ;;  %v5034_v35 = vld [vmem:[#allocation3 + $0x58] sm:$0xf] }
 0x6f0   :  { %5285 = vst.msk [vmem:[#allocation4 + $0x80] sm:$0xff] %vm5267_vm6, %v5156_v0  ;;  %v5631_v0 = vld [vmem:[#allocation3 + $0x102] sm:$0xff] }
 0x6f1   :  { %v5446_v59 = vpop.permute.xlu1 %5445  ;;  %5425 = vrot.lane.b32.xlu0 %v5323_v27, %s7535_s13  ;;  %v5936_v60 = vld [vmem:[#allocation4 + $0x138] sm:$0xf] }
 0x6f2   :  { %5575 = vst.msk [vmem:[#allocation4 + $0x80] sm:$0xff] %vm5557_vm7, %v5446_v59  ;;  %v6190_v11 = vcombine.low %v6012_v7, %v5936_v60  ;;  %v5319_v7 = vld [vmem:[#allocation3 + $0x31] sm:$0xff] }
 0x6f3   :  { %5715 = vrot.lane.b32.xlu1 %v5613_v4, %s7536_s25  ;;  %v5198_v26 = vpop.permute.xlu0 %5197 }
 0x6f4   :  { %5306 = vst.msk [vmem:[#allocation4 + $0x128] sm:$0xf] %vm5269_vm5, %v5198_v26  ;;  %7221 = vmatprep.subr.mxu0 %v6190_v11  ;;  %7451 = vmatprep.subr.mxu1 %v6190_v11  ;;  %v5609_v11 = vld [vmem:[#allocation3 + $0x32] sm:$0xff] }
 0x6f5   :  { %v5736_v12 = vpop.permute.xlu1 %5735  ;;  %5137 = vrot.lane.b32.xlu0 %v5034_v35, %s7534_s26  ;;  %v5914_v29 = vld [vmem:[#allocation4 + $0x88] sm:$0xf] }
 0x6f6   :  { %5865 = vst.msk [vmem:[#allocation4 + $0x80] sm:$0xff] %vm5847_vm9, %v5736_v12  ;;  %v6174_v30 = vcombine.low %v5914_v29, %v5915_v58  ;;  %v5611_v58 = vld [vmem:[#allocation3 + $0x42] sm:$0xff]  ;;  %v5030_v12 = vld [vmem:[#allocation3 + $0x38] sm:$0xf] }
 0x6f7   :  { %5427 = vrot.lane.b32.xlu1 %v5324_v47, %s7535_s13  ;;  %v5488_v18 = vpop.permute.xlu0 %5487 }
 0x6f8   :  { %5596 = vst.msk [vmem:[#allocation4 + $0x128] sm:$0xf] %vm5559_vm8, %v5488_v18  ;;  %7222 = vmatpush3.xpose.msra.mxu0 %v6174_v30  ;;  %7467 = vmatpush3.xpose.msra.mxu1 %v6174_v30  ;;  %v5320_v30 = vld [vmem:[#allocation3 + $0x39] sm:$0xf] }
 0x6f9   :  { %v5778_v57 = vpop.permute.xlu1 %5777  ;;  %5175 = vrot.lane.b32.xlu0 %v5053_v19, %s7534_s26 }
 0x6fa   :  { %5886 = vst.msk [vmem:[#allocation4 + $0x128] sm:$0xf] %vm5849_vm10, %v5778_v57  ;;  %v5049_v57 = vld [vmem:[#allocation3 + $0xd0] sm:$0xff] }
 0x6fb   :  { %5717 = vrot.lane.b32.xlu1 %v5614_v21, %s7536_s25  ;;  %v5196_v28 = vpop.permute.xlu0 %5195 }
 0x6fc   :  { %5305 = vst.msk [vmem:[#allocation4 + $0x120] sm:$0xff] %vm5267_vm6, %v5196_v28  ;;  %v5610_v28 = vld [vmem:[#allocation3 + $0x3a] sm:$0xf] }
 0x6fd   :  { %v5486_v31 = vpop.permute.xlu1 %5485  ;;  %5465 = vrot.lane.b32.xlu0 %v5343_v24, %s7535_s13  ;;  %v5913_v33 = vld [vmem:[#allocation4 + $0x80] sm:$0xff] }
 0x6fe   :  { %5595 = vst.msk [vmem:[#allocation4 + $0x120] sm:$0xff] %vm5557_vm7, %v5486_v31  ;;  %v6001_v34 = vcombine.high %v5913_v33, %v5913_v33  ;;  %v5339_v31 = vld [vmem:[#allocation3 + $0xd1] sm:$0xff] }
 0x6ff   :  { %5755 = vrot.lane.b32.xlu1 %v10831_v25, %s7536_s25  ;;  %v5152_v22 = vpop.permute.xlu0 %5151  ;;  %v5032_v25 = vld [vmem:[#allocation3 + $0x48] sm:$0xf] }
 0x700   :  { %5283 = vst.msk [vmem:[#allocation4 + $0x70] sm:$0xff] %vm5267_vm6, %v5152_v22  ;;  %v6173_v43 = vcombine.low %v5913_v33, %v6001_v34  ;;  %v5629_v34 = vld [vmem:[#allocation3 + $0xd2] sm:$0xff] }
 0x701   :  { %v5776_v39 = vpop.permute.xlu1 %5775  ;;  %5177 = vrot.lane.b32.xlu0 %v5054_v37, %s7534_s26  ;;  %v5934_v40 = vld [vmem:[#allocation4 + $0x128] sm:$0xf] }
 0x702   :  { %5885 = vst.msk [vmem:[#allocation4 + $0x120] sm:$0xff] %vm5847_vm9, %v5776_v39  ;;  %v6189_v41 = vcombine.low %v5934_v40, %v5935_v63  ;;  %v5050_v40 = vld [vmem:[#allocation3 + $0xd8] sm:$0xf] }
 0x703   :  { %5467 = vrot.lane.b32.xlu1 %v5344_v36, %s7535_s13  ;;  %v5442_v42 = vpop.permute.xlu0 %5441 }
 0x704   :  { %5573 = vst.msk [vmem:[#allocation4 + $0x70] sm:$0xff] %vm5557_vm7, %v5442_v42  ;;  %7223 = vmatprep.subr.mxu0 %v6189_v41  ;;  %7452 = vmatprep.subr.mxu1 %v6189_v41  ;;  %v5318_v42 = vld [vmem:[#allocation3 + $0x29] sm:$0xf] }
 0x705   :  { %v5732_v54 = vpop.permute.xlu1 %5731  ;;  %5133 = vrot.lane.b32.xlu0 %v5032_v25, %s7534_s26  ;;  %7224 = vmatpush3.xpose.msra.mxu0 %v6173_v43 }
 0x706   :  { %5863 = vst.msk [vmem:[#allocation4 + $0x70] sm:$0xff] %vm5847_vm9, %v5732_v54  ;;  %7468 = vmatpush3.xpose.msra.mxu1 %v6173_v43 }
 0x707   :  { %5757 = vrot.lane.b32.xlu1 %v5634_v3, %s7536_s25  ;;  %v5154_v20 = vpop.permute.xlu0 %5153  ;;  %v5340_v3 = vld [vmem:[#allocation3 + $0xd9] sm:$0xf] }
 0x708   :  { %5284 = vst.msk [vmem:[#allocation4 + $0x78] sm:$0xf] %vm5269_vm5, %v5154_v20 }
 0x709   :  { %v5444_v32 = vpop.permute.xlu1 %5443  ;;  %5423 = vrot.lane.b32.xlu0 %v5322_v44, %s7535_s13  ;;  %v5933_v46 = vld [vmem:[#allocation4 + $0x120] sm:$0xff]  ;;  %v5608_v44 = vld [vmem:[#allocation3 + $0x2a] sm:$0xf] }
 0x70a   :  { %5574 = vst.msk [vmem:[#allocation4 + $0x78] sm:$0xf] %vm5559_vm8, %v5444_v32  ;;  %v6011_v16 = vcombine.high %v5933_v46, %v5933_v46 }
 0x70b   :  { %5713 = vrot.lane.b32.xlu1 %v5612_v48, %s7536_s25  ;;  %v5192_v5 = vpop.permute.xlu0 %5191 }
 0x70c   :  { %5303 = vst.msk [vmem:[#allocation4 + $0x110] sm:$0xff] %vm5267_vm6, %v5192_v5  ;;  %v6188_v51 = vcombine.low %v5933_v46, %v6011_v16  ;;  %v5630_v46 = vld [vmem:[#allocation3 + $0xda] sm:$0xf]  ;;  %v5317_v5 = vld [vmem:[#allocation3 + $0x21] sm:$0xff] }
 0x70d   :  { %v5734_v8 = vpop.permute.xlu1 %5733  ;;  %5131 = vrot.lane.b32.xlu0 %v5031_v49, %s7534_s26  ;;  %v5911_v14 = vld [vmem:[#allocation4 + $0x70] sm:$0xff] }
 0x70e   :  { %5864 = vst.msk [vmem:[#allocation4 + $0x78] sm:$0xf] %vm5849_vm10, %v5734_v8  ;;  %7225 = vmatprep.subr.mxu0 %v6188_v51  ;;  %7453 = vmatprep.subr.mxu1 %v6188_v51  ;;  %v6000_v55 = vcombine.high %v5911_v14, %v5911_v14  ;;  %v5048_v8 = vld [vmem:[#allocation3 + $0xc8] sm:$0xf] }
 0x70f   :  { %5421 = vrot.lane.b32.xlu1 %v5321_v13, %s7535_s13  ;;  %v5482_v53 = vpop.permute.xlu0 %5481 }
 0x710   :  { %5593 = vst.msk [vmem:[#allocation4 + $0x110] sm:$0xff] %vm5557_vm7, %v5482_v53 }
 0x711   :  { %v5772_v17 = vpop.permute.xlu1 %5771  ;;  %5173 = vrot.lane.b32.xlu0 %v5052_v50, %s7534_s26  ;;  %v5607_v50 = vld [vmem:[#allocation3 + $0x22] sm:$0xff] }
 0x712   :  { %5883 = vst.msk [vmem:[#allocation4 + $0x110] sm:$0xff] %vm5847_vm9, %v5772_v17 }
 0x713   :  { %5711 = vrot.lane.b32.xlu1 %v5611_v58, %s7536_s25  ;;  %v5194_v9 = vpop.permute.xlu0 %5193 }
 0x714   :  { %5304 = vst.msk [vmem:[#allocation4 + $0x118] sm:$0xf] %vm5269_vm5, %v5194_v9 }
 0x715   :  { %v5484_v1 = vpop.permute.xlu1 %5483  ;;  %5463 = vrot.lane.b32.xlu0 %v5342_v61, %s7535_s13  ;;  %v5912_v2 = vld [vmem:[#allocation4 + $0x78] sm:$0xf] }
 0x716   :  { %5594 = vst.msk [vmem:[#allocation4 + $0x118] sm:$0xf] %vm5559_vm8, %v5484_v1  ;;  %v6172_v10 = vcombine.low %v6000_v55, %v5912_v2  ;;  %v5628_v55 = vld [vmem:[#allocation3 + $0xca] sm:$0xf] }
 0x717   :  { %5753 = vrot.lane.b32.xlu1 %v5632_v6, %s7536_s25  ;;  %v5150_v15 = vpop.permute.xlu0 %5149 }
 0x718   :  { %5282 = vst.msk [vmem:[#allocation4 + $0x68] sm:$0xf] %vm5269_vm5, %v5150_v15  ;;  %7226 = vmatpush3.xpose.msra.mxu0 %v6172_v10  ;;  %7469 = vmatpush3.xpose.msra.mxu1 %v6172_v10 }
 0x719   :  { %v5774_v23 = vpop.permute.xlu1 %5773  ;;  %5171 = vrot.lane.b32.xlu0 %v5051_v45, %s7534_s26  ;;  %v5931_v63 = vld [vmem:[#allocation4 + $0x110] sm:$0xff] }
 0x71a   :  { %5884 = vst.msk [vmem:[#allocation4 + $0x118] sm:$0xf] %vm5849_vm10, %v5774_v23  ;;  %v6010_v59 = vcombine.high %v5931_v63, %v5931_v63  ;;  %v5073_v45 = vld [vmem:[#allocation3 + $0x1b0] sm:$0xff] }
 0x71b   :  { %5461 = vrot.lane.b32.xlu1 %v5341_v38, %s7535_s13  ;;  %v5440_v56 = vpop.permute.xlu0 %5439 }
 0x71c   :  { %5572 = vst.msk [vmem:[#allocation4 + $0x68] sm:$0xf] %vm5559_vm8, %v5440_v56  ;;  %v5363_v56 = vld [vmem:[#allocation3 + $0x1b1] sm:$0xff] }
 0x71d   :  { %v5730_v62 = vpop.permute.xlu1 %5729  ;;  %5127 = vrot.lane.b32.xlu0 %v5029_v52, %s7534_s26 }
 0x71e   :  { %5862 = vst.msk [vmem:[#allocation4 + $0x68] sm:$0xf] %vm5849_vm10, %v5730_v62 }
 0x71f   :  { %5751 = vrot.lane.b32.xlu1 %v5631_v0, %s7536_s25  ;;  %v5148_v27 = vpop.permute.xlu0 %5147  ;;  %v5074_v0 = vld [vmem:[#allocation3 + $0x1b8] sm:$0xf] }
 0x720   :  { %5281 = vst.msk [vmem:[#allocation4 + $0x60] sm:$0xff] %vm5267_vm6, %v5148_v27 }
 0x721   :  { %v5438_v60 = vpop.permute.xlu1 %5437  ;;  %5417 = vrot.lane.b32.xlu0 %v5319_v7, %s7535_s13  ;;  %v5932_v4 = vld [vmem:[#allocation4 + $0x118] sm:$0xf] }
 0x722   :  { %5571 = vst.msk [vmem:[#allocation4 + $0x60] sm:$0xff] %vm5557_vm7, %v5438_v60  ;;  %v6187_v26 = vcombine.low %v6010_v59, %v5932_v4 }
 0x723   :  { %5707 = vrot.lane.b32.xlu1 %v5609_v11, %s7536_s25  ;;  %v5190_v35 = vpop.permute.xlu0 %5189  ;;  %v5653_v11 = vld [vmem:[#allocation3 + $0x1b2] sm:$0xff] }
 0x724   :  { %5302 = vst.msk [vmem:[#allocation4 + $0x108] sm:$0xf] %vm5269_vm5, %v5190_v35  ;;  %7227 = vmatprep.subr.mxu0 %v6187_v26  ;;  %7454 = vmatprep.subr.mxu1 %v6187_v26 }
 0x725   :  { %v5728_v29 = vpop.permute.xlu1 %5727  ;;  %5129 = vrot.lane.b32.xlu0 %v5030_v12, %s7534_s26  ;;  %v5910_v47 = vld [vmem:[#allocation4 + $0x68] sm:$0xf] }
 0x726   :  { %5861 = vst.msk [vmem:[#allocation4 + $0x60] sm:$0xff] %vm5847_vm9, %v5728_v29  ;;  %v6171_v18 = vcombine.low %v5910_v47, %v5911_v14  ;;  %v5338_v14 = vld [vmem:[#allocation3 + $0xc9] sm:$0xf]  ;;  %v5364_v47 = vld [vmem:[#allocation3 + $0x1b9] sm:$0xf] }
 0x727   :  { %5419 = vrot.lane.b32.xlu1 %v5320_v30, %s7535_s13  ;;  %v5480_v19 = vpop.permute.xlu0 %5479 }
 0x728   :  { %5592 = vst.msk [vmem:[#allocation4 + $0x108] sm:$0xf] %vm5559_vm8, %v5480_v19  ;;  %7228 = vmatpush3.xpose.msra.mxu0 %v6171_v18  ;;  %7470 = vmatpush3.xpose.msra.mxu1 %v6171_v18  ;;  %v5654_v19 = vld [vmem:[#allocation3 + $0x1ba] sm:$0xf] }
 0x729   :  { %v5770_v21 = vpop.permute.xlu1 %5769  ;;  %5167 = vrot.lane.b32.xlu0 %v5049_v57, %s7534_s26 }
 0x72a   :  { %5882 = vst.msk [vmem:[#allocation4 + $0x108] sm:$0xf] %vm5849_vm10, %v5770_v21 }
 0x72b   :  { %5709 = vrot.lane.b32.xlu1 %v5610_v28, %s7536_s25  ;;  %v5188_v24 = vpop.permute.xlu0 %5187 }
 0x72c   :  { %5301 = vst.msk [vmem:[#allocation4 + $0x100] sm:$0xff] %vm5267_vm6, %v5188_v24 }
 0x72d   :  { %v5478_v33 = vpop.permute.xlu1 %5477  ;;  %5457 = vrot.lane.b32.xlu0 %v5339_v31, %s7535_s13  ;;  %v5909_v22 = vld [vmem:[#allocation4 + $0x60] sm:$0xff]  ;;  %v5072_v31 = vld [vmem:[#allocation3 + $0x1a8] sm:$0xf] }
 0x72e   :  { %5591 = vst.msk [vmem:[#allocation4 + $0x100] sm:$0xff] %vm5557_vm7, %v5478_v33  ;;  %v5999_v39 = vcombine.high %v5909_v22, %v5909_v22 }
 0x72f   :  { %5747 = vrot.lane.b32.xlu1 %v5629_v34, %s7536_s25  ;;  %v5144_v37 = vpop.permute.xlu0 %5143 }
 0x730   :  { %5279 = vst.msk [vmem:[#allocation4 + $0x50] sm:$0xff] %vm5267_vm6, %v5144_v37  ;;  %v6170_v54 = vcombine.low %v5909_v22, %v5999_v39 }
 0x731   :  { %v5768_v36 = vpop.permute.xlu1 %5767  ;;  %5169 = vrot.lane.b32.xlu0 %v5050_v40, %s7534_s26  ;;  %v5930_v41 = vld [vmem:[#allocation4 + $0x108] sm:$0xf] }
 0x732   :  { %5881 = vst.msk [vmem:[#allocation4 + $0x100] sm:$0xff] %vm5847_vm9, %v5768_v36  ;;  %v6186_v43 = vcombine.low %v5930_v41, %v5931_v63  ;;  %v5362_v40 = vld [vmem:[#allocation3 + $0x1a9] sm:$0xf]  ;;  %v6017_v41 = vld [vmem:[%s11893_s3] sm:$0xff] }
 0x733   :  { %5415 = vrot.lane.b32.xlu1 %v5318_v42, %s7535_s13  ;;  %v5434_v25 = vpop.permute.xlu0 %5433 }
 0x734   :  { %5569 = vst.msk [vmem:[#allocation4 + $0x50] sm:$0xff] %vm5557_vm7, %v5434_v25  ;;  %7229 = vmatprep.subr.mxu0 %v6186_v43  ;;  %7455 = vmatprep.subr.mxu1 %v6186_v43  ;;  %v5071_v43 = vld [vmem:[#allocation3 + $0x1a0] sm:$0xff] }
 0x735   :  { %v5724_v20 = vpop.permute.xlu1 %5723  ;;  %5459 = vrot.lane.b32.xlu0 %v5340_v3, %s7535_s13  ;;  %7230 = vmatpush3.xpose.msra.mxu0 %v6170_v54 }
 0x736   :  { %5859 = vst.msk [vmem:[#allocation4 + $0x50] sm:$0xff] %vm5847_vm9, %v5724_v20  ;;  %7471 = vmatpush3.xpose.msra.mxu1 %v6170_v54  ;;  %v6018_v54 = vld [vmem:[%s11893_s3 + $0x8] sm:$0xff] }
 0x737   :  { %5705 = vrot.lane.b32.xlu1 %v5608_v44, %s7536_s25  ;;  %v5146_v32 = vpop.permute.xlu0 %5145 }
 0x738   :  { %5280 = vst.msk [vmem:[#allocation4 + $0x58] sm:$0xf] %vm5269_vm5, %v5146_v32  ;;  %v5652_v32 = vld [vmem:[#allocation3 + $0x1aa] sm:$0xf] }
 0x739   :  { %v5436_v48 = vpop.permute.xlu1 %5435  ;;  %5749 = vrot.lane.b32.xlu0 %v5630_v46, %s7536_s25  ;;  %v5929_v16 = vld [vmem:[#allocation4 + $0x100] sm:$0xff] }
 0x73a   :  { %5570 = vst.msk [vmem:[#allocation4 + $0x58] sm:$0xf] %vm5559_vm8, %v5436_v48  ;;  %v6009_v49 = vcombine.high %v5929_v16, %v5929_v16 }
 0x73b   :  { %5413 = vrot.lane.b32.xlu1 %v5317_v5, %s7535_s13  ;;  %v5184_v51 = vpop.permute.xlu0 %5183 }
 0x73c   :  { %5299 = vst.msk [vmem:[#allocation4 + $0xf0] sm:$0xff] %vm5267_vm6, %v5184_v51  ;;  %v6185_v13 = vcombine.low %v5929_v16, %v6009_v49  ;;  %v6019_v16 = vld [vmem:[%s11893_s3 + $0x10] sm:$0xff]  ;;  %v5361_v49 = vld [vmem:[#allocation3 + $0x1a1] sm:$0xff] }
 0x73d   :  { %v5726_v53 = vpop.permute.xlu1 %5725  ;;  %5165 = vrot.lane.b32.xlu0 %v5048_v8, %s7534_s26  ;;  %v5907_v9 = vld [vmem:[#allocation4 + $0x50] sm:$0xff]  ;;  %v6020_v8 = vld [vmem:[%s11893_s3 + $0x18] sm:$0xff] }
 0x73e   :  { %5860 = vst.msk [vmem:[#allocation4 + $0x58] sm:$0xf] %vm5849_vm10, %v5726_v53  ;;  %7231 = vmatprep.subr.mxu0 %v6185_v13  ;;  %7456 = vmatprep.subr.mxu1 %v6185_v13  ;;  %v5998_v1 = vcombine.high %v5907_v9, %v5907_v9 }
 0x73f   :  { %5703 = vrot.lane.b32.xlu1 %v5607_v50, %s7536_s25  ;;  %v5474_v17 = vpop.permute.xlu0 %5473  ;;  %v5651_v50 = vld [vmem:[#allocation3 + $0x1a2] sm:$0xff] }
 0x740   :  { %5589 = vst.msk [vmem:[#allocation4 + $0xf0] sm:$0xff] %vm5557_vm7, %v5474_v17 }
 0x741   :  { %v5764_v58 = vpop.permute.xlu1 %5763  ;;  %5455 = vrot.lane.b32.xlu0 %v5338_v14, %s7535_s13 }
 0x742   :  { %5879 = vst.msk [vmem:[#allocation4 + $0xf0] sm:$0xff] %vm5847_vm9, %v5764_v58  ;;  %v6021_v58 = vld [vmem:[%s11893_s3 + $0x20] sm:$0xff] }
 0x743   :  { %v5186_v61 = vpop.permute.xlu0 %5185 }
 0x744   :  { %5300 = vst.msk [vmem:[#allocation4 + $0xf8] sm:$0xf] %vm5269_vm5, %v5186_v61 }
 0x745   :  { %v5476_v2 = vpop.permute.xlu1 %5475  ;;  %5745 = vrot.lane.b32.xlu0 %v5628_v55, %s7536_s25  ;;  %v5908_v6 = vld [vmem:[#allocation4 + $0x58] sm:$0xf] }
 0x746   :  { %5590 = vst.msk [vmem:[#allocation4 + $0xf8] sm:$0xf] %vm5559_vm8, %v5476_v2  ;;  %v6169_v10 = vcombine.low %v5998_v1, %v5908_v6  ;;  %v5070_v1 = vld [vmem:[#allocation3 + $0x198] sm:$0xf]  ;;  %v6022_v6 = vld [vmem:[%s11893_s3 + $0x28] sm:$0xff] }
 0x747   :  { %v5142_v15 = vpop.permute.xlu0 %5141 }
 0x748   :  { %5278 = vst.msk [vmem:[#allocation4 + $0x48] sm:$0xf] %vm5269_vm5, %v5142_v15  ;;  %7232 = vmatpush3.xpose.msra.mxu0 %v6169_v10  ;;  %7472 = vmatpush3.xpose.msra.mxu1 %v6169_v10  ;;  %v5360_v15 = vld [vmem:[#allocation3 + $0x199] sm:$0xf] }
 0x749   :  { %v5766_v23 = vpop.permute.xlu1 %5765  ;;  %5215 = vrot.lane.b32.xlu0 %v5073_v45, %s7534_s26  ;;  %v5927_v62 = vld [vmem:[#allocation4 + $0xf0] sm:$0xff] }
 0x74a   :  { %5880 = vst.msk [vmem:[#allocation4 + $0xf8] sm:$0xf] %vm5849_vm10, %v5766_v23  ;;  %v6008_v27 = vcombine.high %v5927_v62, %v5927_v62  ;;  %v6023_v23 = vld [vmem:[%s11893_s3 + $0x30] sm:$0xff] }
 0x74b   :  { %v5432_v38 = vpop.permute.xlu0 %5431 }
 0x74c   :  { %5568 = vst.msk [vmem:[#allocation4 + $0x48] sm:$0xf] %vm5559_vm8, %v5432_v38 }
 0x74d   :  { %v5722_v52 = vpop.permute.xlu1 %5721  ;;  %5505 = vrot.lane.b32.xlu0 %v5363_v56, %s7535_s13 }
 0x74e   :  { %5858 = vst.msk [vmem:[#allocation4 + $0x48] sm:$0xf] %vm5849_vm10, %v5722_v52  ;;  %v5650_v52 = vld [vmem:[#allocation3 + $0x19a] sm:$0xf] }
 0x74f   :  { %v5140_v63 = vpop.permute.xlu0 %5139 }
 0x750   :  { %5277 = vst.msk [vmem:[#allocation4 + $0x40] sm:$0xff] %vm5267_vm6, %v5140_v63 }
 0x751   :  { %v5430_v7 = vpop.permute.xlu1 %5429  ;;  %5217 = vrot.lane.b32.xlu0 %v5074_v0, %s7534_s26  ;;  %v5928_v59 = vld [vmem:[#allocation4 + $0xf8] sm:$0xf] }
 0x752   :  { %5567 = vst.msk [vmem:[#allocation4 + $0x40] sm:$0xff] %vm5557_vm7, %v5430_v7  ;;  %v6184_v60 = vcombine.low %v6008_v27, %v5928_v59  ;;  %v6024_v0 = vld [vmem:[%s11893_s3 + $0x38] sm:$0xff] }
 0x753   :  { %v5182_v4 = vpop.permute.xlu0 %5181 }
 0x754   :  { %5298 = vst.msk [vmem:[#allocation4 + $0xe8] sm:$0xf] %vm5269_vm5, %v5182_v4  ;;  %7233 = vmatprep.subr.mxu0 %v6184_v60  ;;  %7457 = vmatprep.subr.mxu1 %v6184_v60  ;;  %v6025_v4 = vld [vmem:[%s11893_s3 + $0x40] sm:$0xff] }
 0x755   :  { %v5720_v26 = vpop.permute.xlu1 %5719  ;;  %5795 = vrot.lane.b32.xlu0 %v5653_v11, %s7536_s25  ;;  %v5906_v35 = vld [vmem:[#allocation4 + $0x48] sm:$0xf] }
 0x756   :  { %5857 = vst.msk [vmem:[#allocation4 + $0x40] sm:$0xff] %vm5847_vm9, %v5720_v26  ;;  %v6168_v12 = vcombine.low %v5906_v35, %v5907_v9 }
 0x757   :  { %v5472_v29 = vpop.permute.xlu0 %5471 }
 0x758   :  { %5588 = vst.msk [vmem:[#allocation4 + $0xe8] sm:$0xf] %vm5559_vm8, %v5472_v29  ;;  %7234 = vmatpush3.xpose.msra.mxu0 %v6168_v12  ;;  %7473 = vmatpush3.xpose.msra.mxu1 %v6168_v12  ;;  %v6026_v29 = vld [vmem:[%s11893_s3 + $0x48] sm:$0xff] }
 0x759   :  { %v5762_v30 = vpop.permute.xlu1 %5761  ;;  %5507 = vrot.lane.b32.xlu0 %v5364_v47, %s7535_s13 }
 0x75a   :  { %5878 = vst.msk [vmem:[#allocation4 + $0xe8] sm:$0xf] %vm5849_vm10, %v5762_v30 }
 0x75b   :  { %v5180_v18 = vpop.permute.xlu0 %5179 }
 0x75c   :  { %5297 = vst.msk [vmem:[#allocation4 + $0xe0] sm:$0xff] %vm5267_vm6, %v5180_v18  ;;  %v6027_v18 = vld [vmem:[%s11893_s3 + $0x50] sm:$0xff] }
 0x75d   :  { %v5470_v57 = vpop.permute.xlu1 %5469  ;;  %5797 = vrot.lane.b32.xlu0 %v5654_v19, %s7536_s25  ;;  %v5905_v21 = vld [vmem:[#allocation4 + $0x40] sm:$0xff] }
 0x75e   :  { %5587 = vst.msk [vmem:[#allocation4 + $0xe0] sm:$0xff] %vm5557_vm7, %v5470_v57  ;;  %v5997_v24 = vcombine.high %v5905_v21, %v5905_v21 }
 0x75f   :  { %v5136_v28 = vpop.permute.xlu0 %5135 }
 0x760   :  { %5275 = vst.msk [vmem:[#allocation4 + $0x30] sm:$0xff] %vm5267_vm6, %v5136_v28  ;;  %v6167_v39 = vcombine.low %v5905_v21, %v5997_v24  ;;  %v6028_v24 = vld [vmem:[%s11893_s3 + $0x58] sm:$0xff] }
 0x761   :  { %v5760_v33 = vpop.permute.xlu1 %5759  ;;  %5213 = vrot.lane.b32.xlu0 %v5072_v31, %s7534_s26  ;;  %v5926_v22 = vld [vmem:[#allocation4 + $0xe8] sm:$0xf] }
 0x762   :  { %5877 = vst.msk [vmem:[#allocation4 + $0xe0] sm:$0xff] %vm5847_vm9, %v5760_v33  ;;  %v6183_v34 = vcombine.low %v5926_v22, %v5927_v62 }
 0x763   :  { %v5426_v37 = vpop.permute.xlu0 %5425 }
 0x764   :  { %5565 = vst.msk [vmem:[#allocation4 + $0x30] sm:$0xff] %vm5557_vm7, %v5426_v37  ;;  %7235 = vmatprep.subr.mxu0 %v6183_v34  ;;  %7458 = vmatprep.subr.mxu1 %v6183_v34 }
 0x765   :  { %v5716_v36 = vpop.permute.xlu1 %5715  ;;  %5503 = vrot.lane.b32.xlu0 %v5362_v40, %s7535_s13  ;;  %7236 = vmatpush3.xpose.msra.mxu0 %v6167_v39 }
 0x766   :  { %5855 = vst.msk [vmem:[#allocation4 + $0x30] sm:$0xff] %vm5847_vm9, %v5716_v36  ;;  %7474 = vmatpush3.xpose.msra.mxu1 %v6167_v39  ;;  %v6029_v39 = vld [vmem:[%s11893_s3 + $0x60] sm:$0xff] }
 0x767   :  { %v5138_v42 = vpop.permute.xlu0 %5137 }
 0x768   :  { %5276 = vst.msk [vmem:[#allocation4 + $0x38] sm:$0xf] %vm5269_vm5, %v5138_v42  ;;  %6129 = vxpose.xlu1.b32.start [1/16] %v6017_v41, 128  ;;  %v6030_v41 = vld [vmem:[%s11893_s3 + $0x68] sm:$0xff] }
 0x769   :  { %v5428_v25 = vpop.permute.xlu1 %5427  ;;  %5211 = vrot.lane.b32.xlu0 %v5071_v43, %s7534_s26  ;;  %v5925_v3 = vld [vmem:[#allocation4 + $0xe0] sm:$0xff] }
 0x76a   :  { %5566 = vst.msk [vmem:[#allocation4 + $0x38] sm:$0xf] %vm5559_vm8, %v5428_v25  ;;  %v6007_v20 = vcombine.high %v5925_v3, %v5925_v3 }
 0x76b   :  { %v5176_v44 = vpop.permute.xlu0 %5175 }
 0x76c   :  { %5295 = vst.msk [vmem:[#allocation4 + $0xd0] sm:$0xff] %vm5267_vm6, %v5176_v44  ;;  %6130 = vxpose.xlu1.b32.cont [2/16] %v6018_v54, 128  ;;  %v6182_v46 = vcombine.low %v5925_v3, %v6007_v20  ;;  %v7537_v54 = vmov 0   ;;  %v6031_v44 = vld [vmem:[%s11893_s3 + $0x70] sm:$0xff] }
 0x76d   :  { %v5718_v48 = vpop.permute.xlu1 %5717  ;;  %5793 = vrot.lane.b32.xlu0 %v5652_v32, %s7536_s25  ;;  %v5903_v13 = vld [vmem:[#allocation4 + $0x30] sm:$0xff]  ;;  %v6033_v32 = vld [vmem:[%s11894_s4] sm:$0xff] }
 0x76e   :  { %5856 = vst.msk [vmem:[#allocation4 + $0x38] sm:$0xf] %vm5849_vm10, %v5718_v48  ;;  %7237 = vmatprep.subr.mxu0 %v6182_v46  ;;  %7459 = vmatprep.subr.mxu1 %v6182_v46  ;;  %v5996_v17 = vcombine.high %v5903_v13, %v5903_v13  ;;  %v6034_v48 = vld [vmem:[%s11894_s4 + $0x8] sm:$0xff] }
 0x76f   :  { %v5466_v5 = vpop.permute.xlu0 %5465  ;;  %7496 = vset.pattern.permute.xlu0 %v7537_v54 }
 0x770   :  { %5585 = vst.msk [vmem:[#allocation4 + $0xd0] sm:$0xff] %vm5557_vm7, %v5466_v5  ;;  %6131 = vxpose.xlu1.b32.cont [3/16] %v6019_v16, 128  ;;  %v6032_v5 = vld [vmem:[%s11893_s3 + $0x78] sm:$0xff] }
 0x771   :  { %v5756_v51 = vpop.permute.xlu1 %5755  ;;  %5501 = vrot.lane.b32.xlu0 %v5361_v49, %s7535_s13 }
 0x772   :  { %5875 = vst.msk [vmem:[#allocation4 + $0xd0] sm:$0xff] %vm5847_vm9, %v5756_v51 }
 0x773   :  { %v5178_v53 = vpop.permute.xlu0 %5177 }
 0x774   :  { %5296 = vst.msk [vmem:[#allocation4 + $0xd8] sm:$0xf] %vm5269_vm5, %v5178_v53  ;;  %6132 = vxpose.xlu1.b32.cont [4/16] %v6020_v8, 128 }
 0x775   :  { %v5468_v14 = vpop.permute.xlu1 %5467  ;;  %5791 = vrot.lane.b32.xlu0 %v5651_v50, %s7536_s25  ;;  %v5904_v9 = vld [vmem:[#allocation4 + $0x38] sm:$0xf] }
 0x776   :  { %5586 = vst.msk [vmem:[#allocation4 + $0xd8] sm:$0xf] %vm5559_vm8, %v5468_v14  ;;  %v6166_v61 = vcombine.low %v5996_v17, %v5904_v9 }
 0x777   :  { %v5134_v55 = vpop.permute.xlu0 %5133 }
 0x778   :  { %5274 = vst.msk [vmem:[#allocation4 + $0x28] sm:$0xf] %vm5269_vm5, %v5134_v55  ;;  %6133 = vxpose.xlu1.b32.cont [5/16] %v6021_v58, 128  ;;  %7238 = vmatpush3.xpose.msra.mxu0 %v6166_v61  ;;  %v6036_v58 = vld [vmem:[%s11894_s4 + $0x18] sm:$0xff]  ;;  %v6037_v55 = vld [vmem:[%s11894_s4 + $0x20] sm:$0xff] }
 0x779   :  { %7475 = vmatpush3.xpose.msra.mxu1 %v6166_v61  ;;  %v5758_v2 = vpop.permute.xlu1 %5757  ;;  %5209 = vrot.lane.b32.xlu0 %v5070_v1, %s7534_s26  ;;  %v5923_v38 = vld [vmem:[#allocation4 + $0xd0] sm:$0xff] }
 0x77a   :  { %5876 = vst.msk [vmem:[#allocation4 + $0xd8] sm:$0xf] %vm5849_vm10, %v5758_v2  ;;  %v6006_v62 = vcombine.high %v5923_v38, %v5923_v38 }
 0x77b   :  { %v5424_v10 = vpop.permute.xlu0 %5423 }
 0x77c   :  { %5564 = vst.msk [vmem:[#allocation4 + $0x28] sm:$0xf] %vm5559_vm8, %v5424_v10  ;;  %6134 = vxpose.xlu1.b32.cont [6/16] %v6022_v6, 128  ;;  %v6038_v10 = vld [vmem:[%s11894_s4 + $0x28] sm:$0xff] }
 0x77d   :  { %v5714_v45 = vpop.permute.xlu1 %5713  ;;  %5499 = vrot.lane.b32.xlu0 %v5360_v15, %s7535_s13 }
 0x77e   :  { %5854 = vst.msk [vmem:[#allocation4 + $0x28] sm:$0xf] %vm5849_vm10, %v5714_v45 }
 0x77f   :  { %v5132_v56 = vpop.permute.xlu0 %5131 }
 0x780   :  { %5273 = vst.msk [vmem:[#allocation4 + $0x20] sm:$0xff] %vm5267_vm6, %v5132_v56  ;;  %6135 = vxpose.xlu1.b32.cont [7/16] %v6023_v23, 128 }
 0x781   :  { %v5422_v63 = vpop.permute.xlu1 %5421  ;;  %5789 = vrot.lane.b32.xlu0 %v5650_v52, %s7536_s25  ;;  %v5924_v27 = vld [vmem:[#allocation4 + $0xd8] sm:$0xf] }
 0x782   :  { %5563 = vst.msk [vmem:[#allocation4 + $0x20] sm:$0xff] %vm5557_vm7, %v5422_v63  ;;  %v6181_v7 = vcombine.low %v6006_v62, %v5924_v27  ;;  %v6039_v63 = vld [vmem:[%s11894_s4 + $0x30] sm:$0xff]  ;;  %v6040_v27 = vld [vmem:[%s11894_s4 + $0x38] sm:$0xff] }
 0x783   :  { %v5174_v59 = vpop.permute.xlu0 %5173 }
 0x784   :  { %5294 = vst.msk [vmem:[#allocation4 + $0xc8] sm:$0xf] %vm5269_vm5, %v5174_v59  ;;  %6136 = vxpose.xlu1.b32.cont [8/16] %v6024_v0, 128  ;;  %7239 = vmatprep.subr.mxu0 %v6181_v7 }
 0x785   :  { %7460 = vmatprep.subr.mxu1 %v6181_v7  ;;  %v5712_v60 = vpop.permute.xlu1 %5711  ;;  %v5902_v11 = vld [vmem:[#allocation4 + $0x28] sm:$0xf]  ;;  %6051 = vperm.xlu0 %7496, %v6033_v32  }
 0x786   :  { %5853 = vst.msk [vmem:[#allocation4 + $0x20] sm:$0xff] %vm5847_vm9, %v5712_v60  ;;  %v6165_v26 = vcombine.low %v5902_v11, %v5903_v13  ;;  %v6035_v13 = vld [vmem:[%s11894_s4 + $0x10] sm:$0xff] }
 0x787   :  { %v5464_v35 = vpop.permute.xlu0 %5463 }
 0x788   :  { %5584 = vst.msk [vmem:[#allocation4 + $0xc8] sm:$0xf] %vm5559_vm8, %v5464_v35  ;;  %6137 = vxpose.xlu1.b32.cont [9/16] %v6025_v4, 128  ;;  %7240 = vmatpush3.xpose.msra.mxu0 %v6165_v26  ;;  %v6041_v4 = vld [vmem:[%s11894_s4 + $0x40] sm:$0xff] }
 0x789   :  { %7476 = vmatpush3.xpose.msra.mxu1 %v6165_v26  ;;  %v5754_v12 = vpop.permute.xlu1 %5753  ;;  %6056 = vperm.xlu0 %7496, %v6034_v48  }
 0x78a   :  { %5874 = vst.msk [vmem:[#allocation4 + $0xc8] sm:$0xf] %vm5849_vm10, %v5754_v12 }
 0x78b   :  { %v5172_v47 = vpop.permute.xlu0 %5171 }
 0x78c   :  { %5293 = vst.msk [vmem:[#allocation4 + $0xc0] sm:$0xff] %vm5267_vm6, %v5172_v47  ;;  %6138 = vxpose.xlu1.b32.cont [10/16] %v6026_v29, 128  ;;  %v6043_v29 = vld [vmem:[%s11894_s4 + $0x50] sm:$0xff] }
 0x78d   :  { %v5462_v30 = vpop.permute.xlu1 %5461  ;;  %v5901_v19 = vld [vmem:[#allocation4 + $0x20] sm:$0xff]  ;;  %6061 = vperm.xlu0 %7496, %v6035_v13  }
 0x78e   :  { %5583 = vst.msk [vmem:[#allocation4 + $0xc0] sm:$0xff] %vm5557_vm7, %v5462_v30  ;;  %v5995_v21 = vcombine.high %v5901_v19, %v5901_v19  ;;  %v6042_v30 = vld [vmem:[%s11894_s4 + $0x48] sm:$0xff] }
 0x78f   :  { %v5128_v57 = vpop.permute.xlu0 %5127 }
 0x790   :  { %5271 = vst.msk [vmem:[#allocation4 + $0x10] sm:$0xff] %vm5267_vm6, %v5128_v57  ;;  %6139 = vxpose.xlu1.b32.cont [11/16] %v6027_v18, 128  ;;  %v6164_v34 = vcombine.low %v5901_v19, %v5995_v21  ;;  %v6044_v18 = vld [vmem:[%s11894_s4 + $0x58] sm:$0xff]  ;;  %v6045_v57 = vld [vmem:[%s11894_s4 + $0x60] sm:$0xff] }
 0x791   :  { %v5752_v28 = vpop.permute.xlu1 %5751  ;;  %v5922_v31 = vld [vmem:[#allocation4 + $0xc8] sm:$0xf]  ;;  %6066 = vperm.xlu0 %7496, %v6036_v58  }
 0x792   :  { %5873 = vst.msk [vmem:[#allocation4 + $0xc0] sm:$0xff] %vm5847_vm9, %v5752_v28  ;;  %v6180_v33 = vcombine.low %v5922_v31, %v5923_v38  ;;  %v6046_v28 = vld [vmem:[%s11894_s4 + $0x68] sm:$0xff]  ;;  %v6047_v31 = vld [vmem:[%s11894_s4 + $0x70] sm:$0xff] }
 0x793   :  { %v5418_v22 = vpop.permute.xlu0 %5417 }
 0x794   :  { %5561 = vst.msk [vmem:[#allocation4 + $0x10] sm:$0xff] %vm5557_vm7, %v5418_v22  ;;  %6140 = vxpose.xlu1.b32.cont [12/16] %v6028_v24, 128  ;;  %7241 = vmatprep.subr.mxu0 %v6180_v33 }
 0x795   :  { %7461 = vmatprep.subr.mxu1 %v6180_v33  ;;  %v5708_v37 = vpop.permute.xlu1 %5707  ;;  %7242 = vmatpush3.xpose.msra.mxu0 %v6164_v34 }
 0x796   :  { %5851 = vst.msk [vmem:[#allocation4 + $0x10] sm:$0xff] %vm5847_vm9, %v5708_v37  ;;  %7477 = vmatpush3.xpose.msra.mxu1 %v6164_v34  ;;  %6071 = vperm.xlu0 %7496, %v6037_v55   ;;  %v6048_v34 = vld [vmem:[%s11894_s4 + $0x78] sm:$0xff] }
 0x797   :  { %v5130_v40 = vpop.permute.xlu0 %5129 }
 0x798   :  { %5272 = vst.msk [vmem:[#allocation4 + $0x18] sm:$0xf] %vm5269_vm5, %v5130_v40  ;;  %6141 = vxpose.xlu1.b32.cont [13/16] %v6029_v39, 128 }
 0x799   :  { %v5420_v36 = vpop.permute.xlu1 %5419  ;;  %v5921_v42 = vld [vmem:[#allocation4 + $0xc0] sm:$0xff] }
 0x79a   :  { %5562 = vst.msk [vmem:[#allocation4 + $0x18] sm:$0xf] %vm5559_vm8, %v5420_v36  ;;  %v6005_v43 = vcombine.high %v5921_v42, %v5921_v42  ;;  %6076 = vperm.xlu0 %7496, %v6038_v10  }
 0x79b   :  { %v5168_v25 = vpop.permute.xlu0 %5167 }
 0x79c   :  { %5291 = vst.msk [vmem:[#allocation4 + $0xb0] sm:$0xff] %vm5267_vm6, %v5168_v25  ;;  %6142 = vxpose.xlu1.b32.cont [14/16] %v6030_v41, 128  ;;  %v6179_v3 = vcombine.low %v5921_v42, %v6005_v43 }
 0x79d   :  { %v5710_v20 = vpop.permute.xlu1 %5709  ;;  %v5899_v49 = vld [vmem:[#allocation4 + $0x10] sm:$0xff] }
 0x79e   :  { %5852 = vst.msk [vmem:[#allocation4 + $0x18] sm:$0xf] %vm5849_vm10, %v5710_v20  ;;  %7243 = vmatprep.subr.mxu0 %v6179_v3  ;;  %7462 = vmatprep.subr.mxu1 %v6179_v3  ;;  %v5994_v8 = vcombine.high %v5899_v49, %v5899_v49 }
 0x79f   :  { %v5458_v46 = vpop.permute.xlu0 %5457  ;;  %6081 = vperm.xlu0 %7496, %v6039_v63  }
 0x7a0   :  { %5581 = vst.msk [vmem:[#allocation4 + $0xb0] sm:$0xff] %vm5557_vm7, %v5458_v46  ;;  %6143 = vxpose.xlu1.b32.cont [15/16] %v6031_v44, 128 }
 0x7a1   :  { %v5748_v16 = vpop.permute.xlu1 %5747 }
 0x7a2   :  { %5871 = vst.msk [vmem:[#allocation4 + $0xb0] sm:$0xff] %vm5847_vm9, %v5748_v16 }
 0x7a3   :  { %v5170_v51 = vpop.permute.xlu0 %5169  ;;  %6086 = vperm.xlu0 %7496, %v6040_v27  }
 0x7a4   :  { %5292 = vst.msk [vmem:[#allocation4 + $0xb8] sm:$0xf] %vm5269_vm5, %v5170_v51  ;;  %6144 = vxpose.xlu1.b32.end [16/16] %v6032_v5, 128 }
 0x7a5   :  { %v5416_v53 = vpop.permute.xlu1 %5415  ;;  %v5900_v50 = vld [vmem:[#allocation4 + $0x18] sm:$0xf] }
 0x7a6   :  { %5560 = vst.msk [vmem:[#allocation4 + $0x8] sm:$0xf] %vm5559_vm8, %v5416_v53  ;;  %v6163_v17 = vcombine.low %v5994_v8, %v5900_v50  ;;  %v7523_v50 = vld [vmem:[#allocation4 + $0x150] sm:$0xff] }
 0x7a7   :  { %v5460_v14 = vpop.permute.xlu0 %5459  ;;  %6091 = vperm.xlu0 %7496, %v6041_v4  }
 0x7a8   :  { %5582 = vst.msk [vmem:[#allocation4 + $0xb8] sm:$0xf] %vm5559_vm8, %v5460_v14  ;;  %7244 = vmatpush3.xpose.msra.mxu0 %v6163_v17  ;;  %7478 = vmatpush3.xpose.msra.mxu1 %v6163_v17  ;;  %v6014_v17 = vcombine.high %v7523_v50, %v7523_v50 }
 0x7a9   :  { %v5706_v9 = vpop.permute.xlu1 %5705  ;;  %v5919_v6 = vld [vmem:[#allocation4 + $0xb0] sm:$0xff] }
 0x7aa   :  { %5850 = vst.msk [vmem:[#allocation4 + $0x8] sm:$0xf] %vm5849_vm10, %v5706_v9  ;;  %v6004_v45 = vcombine.high %v5919_v6, %v5919_v6 }
 0x7ab   :  { %v5750_v61 = vpop.permute.xlu0 %5749  ;;  %6101 = vperm.xlu0 %7496, %v6043_v29  }
 0x7ac   :  { %5872 = vst.msk [vmem:[#allocation4 + $0xb8] sm:$0xf] %vm5849_vm10, %v5750_v61 }
 0x7ad   :  { %v5414_v1 = vpop.permute.xlu1 %5413 }
 0x7ae   :  { %5558 = vst.msk [vmem:[#allocation4] sm:$0xff] %vm5557_vm7, %v5414_v1 }
 0x7af   :  { %v5166_v2 = vpop.permute.xlu0 %5165  ;;  %6106 = vperm.xlu0 %7496, %v6044_v18  }
 0x7b0   :  { %5290 = vst.msk [vmem:[#allocation4 + $0xa8] sm:$0xf] %vm5269_vm5, %v5166_v2 }
 0x7b1   :  { %v5704_v15 = vpop.permute.xlu1 %5703  ;;  %v5898_v23 = vld [vmem:[#allocation4 + $0x8] sm:$0xf] }
 0x7b2   :  { %5848 = vst.msk [vmem:[#allocation4] sm:$0xff] %vm5847_vm9, %v5704_v15  ;;  %v6162_v62 = vcombine.low %v5898_v23, %v5899_v49 }
 0x7b3   :  { %v5456_v38 = vpop.permute.xlu0 %5455  ;;  %v5920_v56 = vld [vmem:[#allocation4 + $0xb8] sm:$0xf]  ;;  %6111 = vperm.xlu0 %7496, %v6045_v57  }
 0x7b4   :  { %5580 = vst.msk [vmem:[#allocation4 + $0xa8] sm:$0xf] %vm5559_vm8, %v5456_v38  ;;  %v6178_v52 = vcombine.low %v6004_v45, %v5920_v56 }
 0x7b6   :  { %7245 = vmatprep.subr.mxu0 %v6178_v52  ;;  %7463 = vmatprep.subr.mxu1 %v6178_v52 }
 0x7b7   :  { %7246 = vmatpush3.xpose.msra.mxu0 %v6162_v62  ;;  %7479 = vmatpush3.xpose.msra.mxu1 %v6162_v62  ;;  %v5746_v0 = vpop.permute.xlu0 %5745 }
 0x7b8   :  { %5870 = vst.msk [vmem:[#allocation4 + $0xa8] sm:$0xf] %vm5849_vm10, %v5746_v0  ;;  %6116 = vperm.xlu0 %7496, %v6046_v28  }
 0x7b9   :  { %v5897_v7 = vld [vmem:[#allocation4] sm:$0xff] }
 0x7ba   :  { %v5993_v60 = vcombine.high %v5897_v7, %v5897_v7 }
 0x7bb   :  { %v5216_v59 = vpop.permute.xlu0 %5215 }
 0x7bc   :  { %5315 = vst.msk [vmem:[#allocation4 + $0x170] sm:$0xff] %vm5267_vm6, %v5216_v59  ;;  %v6161_v12 = vcombine.low %v5897_v7, %v5993_v60  ;;  %6121 = vperm.xlu0 %7496, %v6047_v31  }
 0x7bf   :  { %v5506_v11 = vpop.permute.xlu0 %5505  ;;  %v5918_v26 = vld [vmem:[#allocation4 + $0xa8] sm:$0xf] }
 0x7c0   :  { %5605 = vst.msk [vmem:[#allocation4 + $0x170] sm:$0xff] %vm5557_vm7, %v5506_v11  ;;  %v6177_v35 = vcombine.low %v5918_v26, %v5919_v6  ;;  %6126 = vperm.xlu0 %7496, %v6048_v34  }
 0x7c2   :  { %7247 = vmatprep.subr.mxu0 %v6177_v35  ;;  %7464 = vmatprep.subr.mxu1 %v6177_v35 }
 0x7c3   :  { %v5218_v47 = vpop.permute.xlu0 %5217  ;;  %7248 = vmatpush3.xpose.msra.mxu0 %v6161_v12  ;;  %7480 = vmatpush3.xpose.msra.mxu1 %v6161_v12 }
 0x7c4   :  { %5316 = vst.msk [vmem:[#allocation4 + $0x178] sm:$0xf] %vm5269_vm5, %v5218_v47  ;;  %7497 = vset.pattern.permute.xlu1 %v7537_v54 }
 0x7c5   :  { %6096 = vperm.xlu1 %7497, %v6042_v30  }
 0x7c7   :  { %v5796_v19 = vpop.permute.xlu0 %5795 }
 0x7c8   :  { %5895 = vst.msk [vmem:[#allocation4 + $0x170] sm:$0xff] %vm5847_vm9, %v5796_v19 }
 0x7cb   :  { %v5508_v21 = vpop.permute.xlu0 %5507 }
 0x7cc   :  { %5606 = vst.msk [vmem:[#allocation4 + $0x178] sm:$0xf] %vm5559_vm8, %v5508_v21 }
 0x7cf   :  { %v5798_v24 = vpop.permute.xlu0 %5797  ;;  %v5943_v22 = vld [vmem:[#allocation4 + $0x170] sm:$0xff] }
 0x7d0   :  { %5896 = vst.msk [vmem:[#allocation4 + $0x178] sm:$0xf] %vm5849_vm10, %v5798_v24  ;;  %v6016_v37 = vcombine.high %v5943_v22, %v5943_v22 }
 0x7d3   :  { %v5214_v33 = vpop.permute.xlu0 %5213 }
 0x7d4   :  { %5314 = vst.msk [vmem:[#allocation4 + $0x168] sm:$0xf] %vm5269_vm5, %v5214_v33 }
 0x7d7   :  { %v5504_v39 = vpop.permute.xlu0 %5503  ;;  %v5944_v40 = vld [vmem:[#allocation4 + $0x178] sm:$0xf] }
 0x7d8   :  { %5604 = vst.msk [vmem:[#allocation4 + $0x168] sm:$0xf] %vm5559_vm8, %v5504_v39  ;;  %v6196_v36 = vcombine.low %v6016_v37, %v5944_v40 }
 0x7da   :  { %7417 = vmatprep.subr.mxu1 %v6196_v36 }
 0x7db   :  { %v5212_v41 = vpop.permute.xlu0 %5211 }
 0x7dc   :  { %5313 = vst.msk [vmem:[#allocation4 + $0x160] sm:$0xff] %vm5267_vm6, %v5212_v41 }
 0x7df   :  { %v5794_v42 = vpop.permute.xlu0 %5793 }
 0x7e0   :  { %5894 = vst.msk [vmem:[#allocation4 + $0x168] sm:$0xf] %vm5849_vm10, %v5794_v42 }
 0x7e3   :  { %v5502_v43 = vpop.permute.xlu0 %5501 }
 0x7e4   :  { %5603 = vst.msk [vmem:[#allocation4 + $0x160] sm:$0xff] %vm5557_vm7, %v5502_v43  ;;  %v11357_v25 = vpop.trf.xlu1 }
 0x7e5   :  { %7249 = vmatprep.mubr.f32.mxu0 %v11357_v25 }
 0x7e6   :  { %7250 = vmatmul.mubr.f32.vlgmr.msra.gmra.mxu0 %v11357_v25 }
 0x7e7   :  { %v5792_v54 = vpop.permute.xlu0 %5791  ;;  %v5942_v44 = vld [vmem:[#allocation4 + $0x168] sm:$0xf] }
 0x7e8   :  { %5893 = vst.msk [vmem:[#allocation4 + $0x160] sm:$0xff] %vm5847_vm9, %v5792_v54  ;;  %v11362_v3 = vpop.trf.xlu1  ;;  %v6195_v46 = vcombine.low %v5942_v44, %v5943_v22 }
 0x7e9   :  { %7251 = vmatprep.mubr.f32.mxu0 %v11362_v3 }
 0x7ea   :  { %7252 = vmatmul.mubr.f32.gmra.mxu0 %v11362_v3 }
 0x7eb   :  { %v5210_v20 = vpop.permute.xlu0 %5209 }
 0x7ec   :  { %5312 = vst.msk [vmem:[#allocation4 + $0x158] sm:$0xf] %vm5269_vm5, %v5210_v20  ;;  %v6147_v32 = vpop.trf.xlu1 }
 0x7ed   :  { %7253 = vmatprep.mubr.f32.mxu1 %v6147_v32 }
 0x7ee   :  { %7254 = vmatmul.mubr.f32.vlgmr.msra.gmra.mxu1 %v6147_v32 }
 0x7ef   :  { %7418 = vmatpush3.xpose.msra.mxu1 %v6196_v36  ;;  %v5500_v48 = vpop.permute.xlu0 %5499  ;;  %v5941_v16 = vld [vmem:[#allocation4 + $0x160] sm:$0xff] }
 0x7f0   :  { %5602 = vst.msk [vmem:[#allocation4 + $0x158] sm:$0xf] %vm5559_vm8, %v5500_v48  ;;  %7419 = vmatprep.subr.mxu1 %v6195_v46  ;;  %v6148_v5 = vpop.trf.xlu1  ;;  %v6015_v49 = vcombine.high %v5941_v16, %v5941_v16 }
 0x7f1   :  { %7255 = vmatprep.mubr.f32.mxu1 %v6148_v5 }
 0x7f2   :  { %7256 = vmatmul.mubr.f32.gmra.mxu1 %v6148_v5  ;;  %v6194_v51 = vcombine.low %v5941_v16, %v6015_v49 }
 0x7f3   :  { %7420 = vmatpush3.xpose.msra.mxu1 %v6195_v46  ;;  %v5790_v8 = vpop.permute.xlu0 %5789 }
 0x7f4   :  { %5892 = vst.msk [vmem:[#allocation4 + $0x158] sm:$0xf] %vm5849_vm10, %v5790_v8  ;;  %v6149_v13 = vpop.trf.xlu1  ;;  %7421 = vmatprep.subr.mxu1 %v6194_v51 }
 0x7f5   :  { %7257 = vmatprep.mubr.f32.mxu1 %v6149_v13 }
 0x7f6   :  { %7258 = vmatmul.mubr.f32.gmra.mxu1 %v6149_v13 }
 0x7f7   :  { %7422 = vmatpush3.xpose.msra.mxu1 %v6194_v51 }
 0x7f8   :  { %v6150_v53 = vpop.trf.xlu1 }
 0x7f9   :  { %7259 = vmatprep.mubr.f32.mxu1 %v6150_v53 }
 0x7fa   :  { %7260 = vmatmul.mubr.f32.gmra.mxu1 %v6150_v53 }
 0x7fb   :  { %v5940_v14 = vld [vmem:[#allocation4 + $0x158] sm:$0xf] }
 0x7fc   :  { %v6151_v58 = vpop.trf.xlu1  ;;  %v6193_v9 = vcombine.low %v6014_v17, %v5940_v14 }
 0x7fd   :  { %7261 = vmatprep.mubr.f32.mxu1 %v6151_v58 }
 0x7fe   :  { %7262 = vmatmul.mubr.f32.gmra.mxu1 %v6151_v58  ;;  %7423 = vmatprep.subr.mxu1 %v6193_v9 }
 0x7ff   :  { %7424 = vmatpush3.xpose.msra.mxu1 %v6193_v9 }
 0x800   :  { %v6152_v61 = vpop.trf.xlu1  ;;  %v6052_v38 = vpop.permute.xlu0 %6051 }
 0x801   :  { %7263 = vmatprep.mubr.f32.mxu1 %v6152_v61 }
 0x802   :  { %7264 = vmatmul.mubr.f32.gmra.mxu1 %v6152_v61 }
 0x804   :  { %v6153_v55 = vpop.trf.xlu1  ;;  %v6057_v7 = vpop.permute.xlu0 %6056 }
 0x805   :  { %7265 = vmatprep.mubr.f32.mxu1 %v6153_v55 }
 0x806   :  { %7266 = vmatmul.mubr.f32.gmra.mxu1 %v6153_v55 }
 0x808   :  { %v6154_v1 = vpop.trf.xlu1  ;;  %v6062_v11 = vpop.permute.xlu0 %6061 }
 0x809   :  { %7267 = vmatprep.mubr.f32.mxu1 %v6154_v1 }
 0x80a   :  { %7268 = vmatmul.mubr.f32.gmra.mxu1 %v6154_v1 }
 0x80c   :  { %v6155_v2 = vpop.trf.xlu1  ;;  %v6067_v29 = vpop.permute.xlu0 %6066 }
 0x80d   :  { %7269 = vmatprep.mubr.f32.mxu1 %v6155_v2 }
 0x80e   :  { %7270 = vmatmul.mubr.f32.gmra.mxu1 %v6155_v2 }
 0x810   :  { %v6156_v6 = vpop.trf.xlu1 }
 0x811   :  { %7271 = vmatprep.mubr.f32.mxu1 %v6156_v6  ;;  %v11396_v19 = vpop.permute.xlu0 %6071 }
 0x812   :  { %7272 = vmatmul.mubr.f32.gmra.mxu1 %v6156_v6 }
 0x814   :  { %v6157_v10 = vpop.trf.xlu1 }
 0x815   :  { %7273 = vmatprep.mubr.f32.mxu1 %v6157_v10  ;;  %v6077_v24 = vpop.permute.xlu0 %6076 }
 0x816   :  { %7274 = vmatmul.mubr.f32.gmra.mxu1 %v6157_v10 }
 0x818   :  { %v6158_v15 = vpop.trf.xlu1 }
 0x819   :  { %7275 = vmatprep.mubr.f32.mxu1 %v6158_v15 }
 0x81a   :  { %7276 = vmatmul.mubr.f32.gmra.mxu1 %v6158_v15  ;;  %v11408_v34 = vpop.permute.xlu0 %6081 }
 0x81c   :  { %v6159_v45 = vpop.trf.xlu1 }
 0x81d   :  { %7277 = vmatprep.mubr.f32.mxu1 %v6159_v45 }
 0x81e   :  { %7278 = vmatmul.mubr.f32.gmra.mxu1 %v6159_v45  ;;  %v6087_v36 = vpop.permute.xlu0 %6086 }
 0x820   :  { %v6160_v23 = vpop.trf.xlu1 }
 0x821   :  { %7279 = vmatprep.mubr.f32.mxu1 %v6160_v23 }
 0x822   :  { %7280 = vmatmul.mubr.f32.gmra.mxu1 %v6160_v23 }
 0x823   :  { %7425 = vmatprep.mubr.f32.mxu1 %v11357_v25  ;;  %v11422_v25 = vpop.permute.xlu0 %6091 }
 0x826   :  { %7426 = vmatmul.mubr.f32.vlgmr.msra.gmra.mxu1 %v11362_v3 }
 0x827   :  { %7428 = vmatprep.mubr.f32.mxu1 %v6147_v32  ;;  %v11430_v46 = vpop.permute.xlu0 %6101 }
 0x82a   :  { %7429 = vmatmul.mubr.f32.gmra.mxu1 %v6148_v5 }
 0x82b   :  { %7431 = vmatprep.mubr.f32.mxu1 %v6149_v13  ;;  %v11440_v8 = vpop.permute.xlu0 %6106 }
 0x82e   :  { %7432 = vmatmul.mubr.f32.gmra.mxu1 %v6150_v53 }
 0x82f   :  { %7434 = vmatprep.mubr.f32.mxu1 %v6151_v58 }
 0x832   :  { %7435 = vmatmul.mubr.f32.gmra.mxu1 %v6152_v61 }
 0x833   :  { %7437 = vmatprep.mubr.f32.mxu1 %v6153_v55 }
 0x836   :  { %7438 = vmatmul.mubr.f32.gmra.mxu1 %v6154_v1 }
 0x837   :  { %7440 = vmatprep.mubr.f32.mxu1 %v6155_v2 }
 0x83a   :  { %7441 = vmatmul.mubr.f32.gmra.mxu1 %v6156_v6 }
 0x83b   :  { %7443 = vmatprep.mubr.f32.mxu1 %v6157_v10 }
 0x83e   :  { %7444 = vmatmul.mubr.f32.gmra.mxu1 %v6158_v15 }
 0x83f   :  { %7446 = vmatprep.mubr.f32.mxu1 %v6159_v45  ;;  %v11460_v45 = vpop.permute.xlu0 %6111 }
 0x842   :  { %7447 = vmatmul.mubr.f32.gmra.mxu1 %v6160_v23 }
 0x8a6   :  { %v6299_v56 = vpop.f32.mrf.mxu0 }
 0x8a7   :  { %v11371_v52 = vadd.f32 %v6299_v56, %v6052_v38 }
 0x8a8   :  { %v6301_v62 = vpop.f32.mrf.mxu0 }
 0x8a9   :  { %6782 = vst [vmem:[%s11895_s5] sm:$0xff] %v11371_v52  ;;  %v11377_v63 = vadd.f32 %v6301_v62, %v6052_v38 }
 0x8aa   :  { %v6305_v3 = vpop.f32.mrf.mxu0 }
 0x8ab   :  { %6784 = vst.msk [vmem:[%s11895_s5 + $0x8] sm:$0xff] %vm6783_vm11, %v11377_v63  ;;  %v11438_v49 = vadd.f32 %v6305_v3, %v6057_v7  ;;  %v6539_v55 = vadd.f32 %v11377_v63, %v11371_v52 }
 0x8ac   :  { %v6307_v32 = vpop.f32.mrf.mxu0 }
 0x8ad   :  { %v11434_v16 = vadd.f32 %v6307_v32, %v6057_v7 }
 0x8ae   :  { %v6311_v0 = vpop.f32.mrf.mxu1 }
 0x8af   :  { %v6545_v53 = vadd.f32 %v11434_v16, %v11438_v49  ;;  %v11456_v2 = vadd.f32 %v6311_v0, %v6062_v11 }
 0x8b0   :  { %v6313_v27 = vpop.f32.mrf.mxu1 }
 0x8b1   :  { %v11450_v58 = vadd.f32 %v6313_v27, %v6062_v11 }
 0x8b2   :  { %v11384_v59 = vpop.f32.mrf.mxu1 }
 0x8b3   :  { %v6550_v56 = vadd.f32 %v11450_v58, %v11456_v2  ;;  %v11477_v3 = vadd.f32 %v11384_v59, %v6067_v29 }
 0x8b4   :  { %v6319_v60 = vpop.f32.mrf.mxu1 }
 0x8b5   :  { %v11468_v62 = vadd.f32 %v6319_v60, %v6067_v29 }
 0x8b6   :  { %v11386_v4 = vpop.f32.mrf.mxu1 }
 0x8b7   :  { %v6555_v59 = vadd.f32 %v11468_v62, %v11477_v3 }
 0x8b8   :  { %v11388_v26 = vpop.f32.mrf.mxu1 }
 0x8ba   :  { %v6329_v35 = vpop.f32.mrf.mxu1 }
 0x8bb   :  { %v11470_v27 = vadd.f32 %v6329_v35, %v6077_v24 }
 0x8bc   :  { %v6331_v12 = vpop.f32.mrf.mxu1 }
 0x8bd   :  { %v11458_v6 = vadd.f32 %v6331_v12, %v6077_v24 }
 0x8be   :  { %v11390_v47 = vpop.f32.mrf.mxu1 }
 0x8c0   :  { %v11392_v30 = vpop.f32.mrf.mxu1 }
 0x8c2   :  { %v11394_v18 = vpop.f32.mrf.mxu1 }
 0x8c4   :  { %v6343_v57 = vpop.f32.mrf.mxu1 }
 0x8c5   :  { %v11481_v32 = vadd.f32 %v6343_v57, %v6087_v36  ;;  %v11497_v57 = vadd.f32 %v11394_v18, %v6087_v36 }
 0x8c6   :  { %v11398_v21 = vpop.f32.mrf.mxu1 }
 0x8c8   :  { %v11400_v28 = vpop.f32.mrf.mxu1 }
 0x8ca   :  { %v11402_v31 = vpop.f32.mrf.mxu1 }
 0x8cc   :  { %v11404_v33 = vpop.f32.mrf.mxu1 }
 0x8ce   :  { %v11406_v22 = vpop.f32.mrf.mxu1 }
 0x8d0   :  { %v11410_v37 = vpop.f32.mrf.mxu1 }
 0x8d2   :  { %v11412_v39 = vpop.f32.mrf.mxu1 }
 0x8d4   :  { %v11414_v40 = vpop.f32.mrf.mxu1 }
 0x8d6   :  { %v11416_v41 = vpop.f32.mrf.mxu1 }
 0x8d8   :  { %v11418_v42 = vpop.f32.mrf.mxu1 }
 0x8da   :  { %v11420_v43 = vpop.f32.mrf.mxu1 }
 0x8dc   :  { %v11424_v54 = vpop.f32.mrf.mxu1 }
 0x8de   :  { %v11426_v20 = vpop.f32.mrf.mxu1 }
 0x8e0   :  { %v11428_v44 = vpop.f32.mrf.mxu1 }
 0x8e2   :  { %v11432_v48 = vpop.f32.mrf.mxu1 }
 0x8e4   :  { %v11436_v5 = vpop.f32.mrf.mxu1 }
 0x8e6   :  { %v7427_v51 = vpop.f32.mrf.mxu1 }
 0x8e7   :  { %v11442_v13 = vadd.f32 %v7427_v51, %v6057_v7 }
 0x8e8   :  { %v6460_v50 = vpop.f32.mrf.mxu1 }
 0x8e9   :  { %v6546_v17 = vsel %vm6540_vm12, %v11442_v13, 0.0  ;;  %v11448_v14 = vadd.f32 %v6460_v50, %v6052_v38 }
 0x8ea   :  { %v6547_v9 = vadd.f32 %v6546_v17, %v6545_v53  ;;  %v7430_v61 = vpop.f32.mrf.mxu1 }
 0x8eb   :  { %v6541_v1 = vsel %vm6540_vm12, %v11448_v14, 0.0  ;;  %v11462_v23 = vadd.f32 %v7430_v61, %v6067_v29  ;;  %v11494_v29 = vadd.f32 %v11388_v26, %v11396_v19  ;;  %v6097_v61 = vpop.permute.xlu1 %6096 }
 0x8ec   :  { %v6470_v10 = vpop.f32.mrf.mxu1  ;;  %6548 = vadd.xlane.f32.xlu1 %v6547_v9  ;;  %v6542_v15 = vadd.f32 %v6541_v1, %v6539_v55  ;;  %v6117_v9 = vpop.permute.xlu0 %6116  ;;  %v11503_v1 = vadd.f32 %v11386_v4, %v11396_v19  ;;  %v11508_v26 = vadd.f32 %v11404_v33, %v6097_v61  ;;  %v11524_v33 = vadd.f32 %v11402_v31, %v6097_v61 }
 0x8ed   :  { %v11464_v38 = vadd.f32 %v6470_v10, %v6062_v11  ;;  %v6565_v11 = vadd.f32 %v11458_v6, %v11470_v27  ;;  %v6556_v35 = vsel %vm6540_vm12, %v11462_v23, 0.0  ;;  %v6575_v10 = vadd.f32 %v11481_v32, %v11497_v57 }
 0x8ee   :  { %v7433_v0 = vpop.f32.mrf.mxu1  ;;  %6543 = vadd.xlane.f32.xlu0 %v6542_v15  ;;  %v6557_v15 = vadd.f32 %v6556_v35, %v6555_v59  ;;  %v6560_v4 = vadd.f32 %v11494_v29, %v11503_v1  ;;  %v6585_v35 = vadd.f32 %v11508_v26, %v11524_v33 }
 0x8ef   :  { %v6551_v7 = vsel %vm6540_vm12, %v11464_v38, 0.0  ;;  %v11474_v12 = vadd.f32 %v7433_v0, %v6077_v24 }
 0x8f0   :  { %v6552_v51 = vadd.f32 %v6551_v7, %v6550_v56  ;;  %v6480_v60 = vpop.f32.mrf.mxu1  ;;  %v11538_v31 = vpop.permute.xlu0 %6121 }
 0x8f1   :  { %v6566_v53 = vsel %vm6540_vm12, %v11474_v12, 0.0  ;;  %v11488_v50 = vadd.f32 %v6480_v60, %v11396_v19  ;;  %v11521_v19 = vadd.f32 %v11392_v30, %v11408_v34  ;;  %v11530_v60 = vadd.f32 %v11390_v47, %v11408_v34 }
 0x8f2   :  { %v6567_v24 = vadd.f32 %v6566_v53, %v6565_v11  ;;  %v7436_v17 = vpop.f32.mrf.mxu1  ;;  %6553 = vadd.xlane.f32.xlu0 %v6552_v51  ;;  %v11536_v53 = vadd.f32 %v11414_v40, %v11440_v8  ;;  %v11551_v40 = vadd.f32 %v11400_v28, %v11422_v25  ;;  %v11567_v28 = vadd.f32 %v11424_v54, %v6117_v9 }
 0x8f3   :  { %v11499_v55 = vadd.f32 %v7436_v17, %v6087_v36  ;;  %v6561_v56 = vsel %vm6540_vm12, %v11488_v50, 0.0  ;;  %v11583_v54 = vadd.f32 %v11420_v43, %v6117_v9 }
 0x8f4   :  { %v6490_v18 = vpop.f32.mrf.mxu1  ;;  %6568 = vadd.xlane.f32.xlu1 %v6567_v24  ;;  %v6562_v30 = vadd.f32 %v6561_v56, %v6560_v4  ;;  %v11562_v56 = vadd.f32 %v11398_v21, %v11422_v25 }
 0x8f5   :  { %v6576_v36 = vsel %vm6540_vm12, %v11499_v55, 0.0  ;;  %v11515_v0 = vadd.f32 %v6490_v18, %v11408_v34  ;;  %v6570_v34 = vadd.f32 %v11521_v19, %v11530_v60 }
 0x8f6   :  { %v6577_v7 = vadd.f32 %v6576_v36, %v6575_v10  ;;  %v7439_v11 = vpop.f32.mrf.mxu1  ;;  %6558 = vadd.xlane.f32.xlu0 %v6557_v15  ;;  %v6580_v21 = vadd.f32 %v11551_v40, %v11562_v56 }
 0x8f7   :  { %v11526_v51 = vadd.f32 %v7439_v11, %v6097_v61  ;;  %v6571_v24 = vsel %vm6540_vm12, %v11515_v0, 0.0  ;;  %v11555_v61 = vadd.f32 %v11412_v39, %v11440_v8 }
 0x8f8   :  { %v6500_v59 = vpop.f32.mrf.mxu1  ;;  %6578 = vadd.xlane.f32.xlu1 %v6577_v7  ;;  %v6572_v4 = vadd.f32 %v6571_v24, %v6570_v34  ;;  %v6605_v34 = vadd.f32 %v11567_v28, %v11583_v54 }
 0x8f9   :  { %v6586_v17 = vsel %vm6540_vm12, %v11526_v51, 0.0  ;;  %v11545_v47 = vadd.f32 %v6500_v59, %v11422_v25  ;;  %v6595_v36 = vadd.f32 %v11536_v53, %v11555_v61  ;;  %v11580_v25 = vadd.f32 %v11410_v37, %v11430_v46  ;;  %v6127_v59 = vpop.permute.xlu0 %6126 }
 0x8fa   :  { %v6587_v10 = vadd.f32 %v6586_v17, %v6585_v35  ;;  %v7442_v15 = vpop.f32.mrf.mxu1  ;;  %6563 = vadd.xlane.f32.xlu0 %v6562_v30  ;;  %v11589_v17 = vadd.f32 %v11406_v22, %v11430_v46 }
 0x8fb   :  { %v11558_v18 = vadd.f32 %v7442_v15, %v11440_v8  ;;  %v6581_v39 = vsel %vm6540_vm12, %v11545_v47, 0.0 }
 0x8fc   :  { %v6510_v7 = vpop.f32.mrf.mxu1  ;;  %6588 = vadd.xlane.f32.xlu1 %v6587_v10  ;;  %v11594_v10 = vadd.f32 %v11436_v5, %v6127_v59  ;;  %v6582_v37 = vadd.f32 %v6581_v39, %v6580_v21  ;;  %v6590_v22 = vadd.f32 %v11580_v25, %v11589_v17  ;;  %v11610_v5 = vadd.f32 %v11432_v48, %v6127_v59 }
 0x8fd   :  { %v6596_v8 = vsel %vm6540_vm12, %v11558_v18, 0.0  ;;  %v11574_v11 = vadd.f32 %v6510_v7, %v11430_v46  ;;  %v11607_v46 = vadd.f32 %v11418_v42, %v11460_v45  ;;  %v6642_v39 = vmul.f32 %v11442_v13, %v11442_v13 }
 0x8fe   :  { %v6597_v35 = vadd.f32 %v6596_v8, %v6595_v36  ;;  %v7445_v30 = vpop.f32.mrf.mxu1  ;;  %6573 = vadd.xlane.f32.xlu0 %v6572_v4  ;;  %v6641_v21 = vmul.f32 %v11434_v16, %v11434_v16  ;;  %v6615_v42 = vadd.f32 %v11594_v10, %v11610_v5  ;;  %v6640_v16 = vmul.f32 %v11438_v49, %v11438_v49 }
 0x8ff   :  { %v11585_v24 = vadd.f32 %v7445_v30, %v6117_v9  ;;  %v6591_v43 = vsel %vm6540_vm12, %v11574_v11, 0.0  ;;  %v11646_v49 = vadd.f32 %v11426_v20, %v11538_v31  ;;  %v6638_v20 = vmul.f32 %v11377_v63, %v11377_v63 }
 0x900   :  { %v6520_v15 = vpop.f32.mrf.mxu1  ;;  %6598 = vadd.xlane.f32.xlu1 %v6597_v35  ;;  %v11620_v35 = vadd.f32 %v11416_v41, %v11460_v45  ;;  %v6592_v48 = vadd.f32 %v6591_v43, %v6590_v22  ;;  %v6648_v43 = vmul.f32 %v11462_v23, %v11462_v23  ;;  %v6647_v22 = vmul.f32 %v11468_v62, %v11468_v62 }
 0x901   :  { %v6606_v9 = vsel %vm6540_vm12, %v11585_v24, 0.0  ;;  %v11601_v36 = vadd.f32 %v6520_v15, %v11460_v45  ;;  %v11637_v45 = vadd.f32 %v11428_v44, %v11538_v31  ;;  %v6691_v15 = vsel %vm6540_vm12, %v6642_v39, 0.0 }
 0x902   :  { %v6607_v4 = vadd.f32 %v6606_v9, %v6605_v34  ;;  %v7448_v7 = vpop.f32.mrf.mxu1  ;;  %6583 = vadd.xlane.f32.xlu0 %v6582_v37  ;;  %v6600_v41 = vadd.f32 %v11607_v46, %v11620_v35  ;;  %v6690_v9 = vadd.f32 %v6641_v21, %v6640_v16  ;;  %v6639_v44 = vmul.f32 %v11448_v14, %v11448_v14 }
 0x903   :  { %v11614_v8 = vadd.f32 %v7448_v7, %v6127_v59  ;;  %v6601_v34 = vsel %vm6540_vm12, %v11601_v36, 0.0  ;;  %v6646_v39 = vmul.f32 %v11477_v3, %v11477_v3  ;;  %v6610_v23 = vadd.f32 %v11637_v45, %v11646_v49 }
 0x904   :  { %v6530_v30 = vpop.f32.mrf.mxu1  ;;  %6608 = vadd.xlane.f32.xlu1 %v6607_v4  ;;  %v6602_v4 = vadd.f32 %v6601_v34, %v6600_v41  ;;  %v6692_v62 = vadd.f32 %v6691_v15, %v6690_v9  ;;  %v6654_v21 = vmul.f32 %v11474_v12, %v11474_v12  ;;  %v6653_v3 = vmul.f32 %v11458_v6, %v11458_v6 }
 0x905   :  { %v6616_v13 = vsel %vm6540_vm12, %v11614_v8, 0.0  ;;  %v11629_v59 = vadd.f32 %v6530_v30, %v11538_v31  ;;  %v6701_v31 = vsel %vm6540_vm12, %v6648_v43, 0.0  ;;  %v6645_v34 = vmul.f32 %v11464_v38, %v11464_v38 }
 0x906   :  { %v6617_v37 = vadd.f32 %v6616_v13, %v6615_v42  ;;  %6593 = vadd.xlane.f32.xlu0 %v6592_v48  ;;  %v6637_v42 = vmul.f32 %v11371_v52, %v11371_v52  ;;  %v6700_v48 = vadd.f32 %v6647_v22, %v6646_v39  ;;  %v6686_v13 = vsel %vm6540_vm12, %v6639_v44, 0.0 }
 0x907   :  { %v6611_v7 = vsel %vm6540_vm12, %v11629_v59, 0.0  ;;  %v6644_v16 = vmul.f32 %v11450_v58, %v11450_v58  ;;  %v6652_v12 = vmul.f32 %v11470_v27, %v11470_v27  ;;  %v6660_v6 = vmul.f32 %v11499_v55, %v11499_v55 }
 0x908   :  { %6618 = vadd.xlane.f32.xlu1 %v6617_v37  ;;  %v6612_v30 = vadd.f32 %v6611_v7, %v6610_v23  ;;  %v6702_v41 = vadd.f32 %v6701_v31, %v6700_v48  ;;  %v6685_v52 = vadd.f32 %v6638_v20, %v6637_v42  ;;  %v6711_v37 = vsel %vm6540_vm12, %v6654_v21, 0.0 }
 0x909   :  { %v6643_v15 = vmul.f32 %v11456_v2, %v11456_v2  ;;  %v6710_v38 = vadd.f32 %v6653_v3, %v6652_v12  ;;  %v6659_v43 = vmul.f32 %v11481_v32, %v11481_v32  ;;  %v6696_v9 = vsel %vm6540_vm12, %v6645_v34, 0.0 }
 0x90a   :  { %6603 = vadd.xlane.f32.xlu0 %v6602_v4  ;;  %v6687_v58 = vadd.f32 %v6686_v13, %v6685_v52  ;;  %v6651_v27 = vmul.f32 %v11488_v50, %v11488_v50  ;;  %v6650_v4 = vmul.f32 %v11494_v29, %v11494_v29  ;;  %v6658_v55 = vmul.f32 %v11497_v57, %v11497_v57 }
 0x90b   :  { %v6695_v22 = vadd.f32 %v6644_v16, %v6643_v15  ;;  %v6712_v2 = vadd.f32 %v6711_v37, %v6710_v38  ;;  %v6721_v44 = vsel %vm6540_vm12, %v6660_v6, 0.0  ;;  %v6666_v32 = vmul.f32 %v11526_v51, %v11526_v51 }
 0x90c   :  { %6693 = vadd.xlane.f32.xlu1 %v6692_v62  ;;  %v6649_v7 = vmul.f32 %v11503_v1, %v11503_v1  ;;  %v6720_v39 = vadd.f32 %v6659_v43, %v6658_v55  ;;  %v6665_v50 = vmul.f32 %v11508_v26, %v11508_v26  ;;  %v6706_v29 = vsel %vm6540_vm12, %v6651_v27, 0.0 }
 0x90d   :  { %v6697_v23 = vadd.f32 %v6696_v9, %v6695_v22  ;;  %v6657_v57 = vmul.f32 %v11515_v0, %v11515_v0  ;;  %v6656_v20 = vmul.f32 %v11521_v19, %v11521_v19  ;;  %v6664_v51 = vmul.f32 %v11524_v33, %v11524_v33 }
 0x90e   :  { %6613 = vadd.xlane.f32.xlu0 %v6612_v30  ;;  %v6705_v62 = vadd.f32 %v6650_v4, %v6649_v7  ;;  %v6722_v1 = vadd.f32 %v6721_v44, %v6720_v39  ;;  %v6731_v31 = vsel %vm6540_vm12, %v6666_v32, 0.0  ;;  %v6672_v26 = vmul.f32 %v11558_v18, %v11558_v18 }
 0x90f   :  { %v6655_v21 = vmul.f32 %v11530_v60, %v11530_v60  ;;  %v6730_v42 = vadd.f32 %v6665_v50, %v6664_v51  ;;  %v6671_v0 = vmul.f32 %v11536_v53, %v11536_v53  ;;  %v6716_v19 = vsel %vm6540_vm12, %v6657_v57, 0.0 }
 0x910   :  { %6703 = vadd.xlane.f32.xlu1 %v6702_v41  ;;  %v6707_v48 = vadd.f32 %v6706_v29, %v6705_v62  ;;  %v6663_v33 = vmul.f32 %v11545_v47, %v11545_v47  ;;  %v6662_v30 = vmul.f32 %v11551_v40, %v11551_v40  ;;  %v6670_v18 = vmul.f32 %v11555_v61, %v11555_v61 }
 0x911   :  { %v6715_v3 = vadd.f32 %v6656_v20, %v6655_v21  ;;  %v6732_v60 = vadd.f32 %v6731_v31, %v6730_v42  ;;  %v6741_v34 = vsel %vm6540_vm12, %v6672_v26, 0.0  ;;  %v6678_v53 = vmul.f32 %v11585_v24, %v11585_v24 }
 0x912   :  { %6688 = vadd.xlane.f32.xlu0 %v6687_v58  ;;  %v6661_v13 = vmul.f32 %v11562_v56, %v11562_v56  ;;  %v6740_v16 = vadd.f32 %v6671_v0, %v6670_v18  ;;  %v6677_v47 = vmul.f32 %v11567_v28, %v11567_v28  ;;  %v6726_v40 = vsel %vm6540_vm12, %v6663_v33, 0.0 }
 0x913   :  { %v6717_v12 = vadd.f32 %v6716_v19, %v6715_v3  ;;  %v6669_v61 = vmul.f32 %v11574_v11, %v11574_v11  ;;  %v6668_v52 = vmul.f32 %v11580_v25, %v11580_v25  ;;  %v6676_v24 = vmul.f32 %v11583_v54, %v11583_v54 }
 0x914   :  { %6713 = vadd.xlane.f32.xlu1 %v6712_v2  ;;  %v6725_v41 = vadd.f32 %v6662_v30, %v6661_v13  ;;  %v6742_v56 = vadd.f32 %v6741_v34, %v6740_v16  ;;  %v6751_v37 = vsel %vm6540_vm12, %v6678_v53, 0.0  ;;  %v6684_v28 = vmul.f32 %v11614_v8, %v11614_v8 }
 0x915   :  { %v6667_v6 = vmul.f32 %v11589_v17, %v11589_v17  ;;  %v6750_v15 = vadd.f32 %v6677_v47, %v6676_v24  ;;  %v6683_v11 = vmul.f32 %v11594_v10, %v11594_v10  ;;  %v6736_v25 = vsel %vm6540_vm12, %v6669_v61, 0.0 }
 0x916   :  { %6698 = vadd.xlane.f32.xlu0 %v6697_v23  ;;  %v6727_v38 = vadd.f32 %v6726_v40, %v6725_v41  ;;  %v6675_v54 = vmul.f32 %v11601_v36, %v11601_v36  ;;  %v6674_v58 = vmul.f32 %v11607_v46, %v11607_v46  ;;  %v6682_v8 = vmul.f32 %v11610_v5, %v11610_v5 }
 0x917   :  { %v6735_v43 = vadd.f32 %v6668_v52, %v6667_v6  ;;  %v6752_v17 = vadd.f32 %v6751_v37, %v6750_v15  ;;  %v6761_v9 = vsel %vm6540_vm12, %v6684_v28, 0.0  ;;  %v6673_v10 = vmul.f32 %v11620_v35, %v11620_v35 }
 0x918   :  { %6723 = vadd.xlane.f32.xlu1 %v6722_v1  ;;  %v6760_v27 = vadd.f32 %v6683_v11, %v6682_v8  ;;  %v6746_v4 = vsel %vm6540_vm12, %v6675_v54, 0.0  ;;  %v6681_v36 = vmul.f32 %v11629_v59, %v11629_v59  ;;  %v6680_v46 = vmul.f32 %v11637_v45, %v11637_v45 }
 0x919   :  { %v6737_v22 = vadd.f32 %v6736_v25, %v6735_v43  ;;  %v6745_v55 = vadd.f32 %v6674_v58, %v6673_v10  ;;  %v6679_v2 = vmul.f32 %v11646_v49, %v11646_v49 }
 0x91a   :  { %6708 = vadd.xlane.f32.xlu0 %v6707_v48  ;;  %v6762_v5 = vadd.f32 %v6761_v9, %v6760_v27  ;;  %v6756_v35 = vsel %vm6540_vm12, %v6681_v36, 0.0 }
 0x91b   :  { %v6747_v44 = vadd.f32 %v6746_v4, %v6745_v55  ;;  %v6755_v32 = vadd.f32 %v6680_v46, %v6679_v2 }
 0x91c   :  { %6733 = vadd.xlane.f32.xlu1 %v6732_v60 }
 0x91d   :  { %v6757_v7 = vadd.f32 %v6756_v35, %v6755_v32 }
 0x91e   :  { %6718 = vadd.xlane.f32.xlu0 %v6717_v12 }
 0x920   :  { %6743 = vadd.xlane.f32.xlu1 %v6742_v56 }
 0x922   :  { %6728 = vadd.xlane.f32.xlu0 %v6727_v38 }
 0x924   :  { %6753 = vadd.xlane.f32.xlu1 %v6752_v17 }
 0x926   :  { %6738 = vadd.xlane.f32.xlu0 %v6737_v22 }
 0x928   :  { %6763 = vadd.xlane.f32.xlu1 %v6762_v5 }
 0x92a   :  { %6748 = vadd.xlane.f32.xlu0 %v6747_v44 }
 0x92e   :  { %6758 = vadd.xlane.f32.xlu0 %v6757_v7 }
 0x939   :  { %6789 = vrot.lane.b32.xlu1 %v11448_v14, %s7538_s20 }
 0x944   :  { %6787 = vrot.lane.b32.xlu0 %v11377_v63, %s7538_s20 }
 0x975   :  { %v6549_v59 = vpop.xlane.xlu1 %6548 }
 0x976   :  { %6622 = vst.msk [vmem:[%s11896_s6 + $0x8] sm:$0xff] %vm6620_vm13, %v6549_v59 }
 0x977   :  { %v6544_v45 = vpop.xlane.xlu0 %6543 }
 0x978   :  { %6621 = vst.msk [vmem:[%s11896_s6] sm:$0xff] %vm6620_vm13, %v6544_v45 }
 0x97b   :  { %v6554_v49 = vpop.xlane.xlu0 %6553 }
 0x97c   :  { %6623 = vst.msk [vmem:[%s11896_s6 + $0x10] sm:$0xff] %vm6620_vm13, %v6554_v49 }
 0x97d   :  { %v6569_v63 = vpop.xlane.xlu1 %6568 }
 0x97e   :  { %6626 = vst.msk [vmem:[%s11896_s6 + $0x28] sm:$0xff] %vm6620_vm13, %v6569_v63 }
 0x97f   :  { %v6559_v14 = vpop.xlane.xlu0 %6558 }
 0x980   :  { %6624 = vst.msk [vmem:[%s11896_s6 + $0x18] sm:$0xff] %vm6620_vm13, %v6559_v14 }
 0x981   :  { %v6579_v39 = vpop.xlane.xlu1 %6578 }
 0x982   :  { %6628 = vst.msk [vmem:[%s11896_s6 + $0x38] sm:$0xff] %vm6620_vm13, %v6579_v39 }
 0x983   :  { %v6564_v50 = vpop.xlane.xlu0 %6563 }
 0x984   :  { %6625 = vst.msk [vmem:[%s11896_s6 + $0x20] sm:$0xff] %vm6620_vm13, %v6564_v50 }
 0x985   :  { %v6589_v23 = vpop.xlane.xlu1 %6588 }
 0x986   :  { %6630 = vst.msk [vmem:[%s11896_s6 + $0x48] sm:$0xff] %vm6620_vm13, %v6589_v23 }
 0x987   :  { %v6574_v29 = vpop.xlane.xlu0 %6573 }
 0x988   :  { %6627 = vst.msk [vmem:[%s11896_s6 + $0x30] sm:$0xff] %vm6620_vm13, %v6574_v29 }
 0x989   :  { %v6599_v57 = vpop.xlane.xlu1 %6598 }
 0x98a   :  { %6632 = vst.msk [vmem:[%s11896_s6 + $0x58] sm:$0xff] %vm6620_vm13, %v6599_v57 }
 0x98b   :  { %v6584_v62 = vpop.xlane.xlu0 %6583 }
 0x98c   :  { %6629 = vst.msk [vmem:[%s11896_s6 + $0x40] sm:$0xff] %vm6620_vm13, %v6584_v62 }
 0x98d   :  { %v6609_v20 = vpop.xlane.xlu1 %6608 }
 0x98e   :  { %6634 = vst.msk [vmem:[%s11896_s6 + $0x68] sm:$0xff] %vm6620_vm13, %v6609_v20 }
 0x98f   :  { %v6594_v51 = vpop.xlane.xlu0 %6593 }
 0x990   :  { %6631 = vst.msk [vmem:[%s11896_s6 + $0x50] sm:$0xff] %vm6620_vm13, %v6594_v51 }
 0x991   :  { %v6619_v1 = vpop.xlane.xlu1 %6618 }
 0x992   :  { %6636 = vst.msk [vmem:[%s11896_s6 + $0x78] sm:$0xff] %vm6620_vm13, %v6619_v1 }
 0x993   :  { %v6604_v31 = vpop.xlane.xlu0 %6603 }
 0x994   :  { %6633 = vst.msk [vmem:[%s11896_s6 + $0x60] sm:$0xff] %vm6620_vm13, %v6604_v31 }
 0x995   :  { %v6694_v26 = vpop.xlane.xlu1 %6693 }
 0x996   :  { %6767 = vst.msk [vmem:[%s11896_s6 + $0x8] sm:$0xff] %vm6765_vm14, %v6694_v26 }
 0x997   :  { %v6614_v21 = vpop.xlane.xlu0 %6613 }
 0x998   :  { %6635 = vst.msk [vmem:[%s11896_s6 + $0x70] sm:$0xff] %vm6620_vm13, %v6614_v21 }
 0x999   :  { %v6704_v42 = vpop.xlane.xlu1 %6703 }
 0x99a   :  { %6769 = vst.msk [vmem:[%s11896_s6 + $0x18] sm:$0xff] %vm6765_vm14, %v6704_v42 }
 0x99b   :  { %v6689_v0 = vpop.xlane.xlu0 %6688 }
 0x99c   :  { %6766 = vst.msk [vmem:[%s11896_s6] sm:$0xff] %vm6765_vm14, %v6689_v0 }
 0x99d   :  { %v6714_v48 = vpop.xlane.xlu1 %6713 }
 0x99e   :  { %6771 = vst.msk [vmem:[%s11896_s6 + $0x28] sm:$0xff] %vm6765_vm14, %v6714_v48 }
 0x99f   :  { %v6699_v19 = vpop.xlane.xlu0 %6698 }
 0x9a0   :  { %6768 = vst.msk [vmem:[%s11896_s6 + $0x10] sm:$0xff] %vm6765_vm14, %v6699_v19 }
 0x9a1   :  { %v6724_v33 = vpop.xlane.xlu1 %6723 }
 0x9a2   :  { %6773 = vst.msk [vmem:[%s11896_s6 + $0x38] sm:$0xff] %vm6765_vm14, %v6724_v33 }
 0x9a3   :  { %v6709_v3 = vpop.xlane.xlu0 %6708 }
 0x9a4   :  { %6770 = vst.msk [vmem:[%s11896_s6 + $0x20] sm:$0xff] %vm6765_vm14, %v6709_v3 }
 0x9a5   :  { %v6734_v30 = vpop.xlane.xlu1 %6733 }
 0x9a6   :  { %6775 = vst.msk [vmem:[%s11896_s6 + $0x48] sm:$0xff] %vm6765_vm14, %v6734_v30 }
 0x9a7   :  { %v6719_v18 = vpop.xlane.xlu0 %6718 }
 0x9a8   :  { %6772 = vst.msk [vmem:[%s11896_s6 + $0x30] sm:$0xff] %vm6765_vm14, %v6719_v18 }
 0x9a9   :  { %v6744_v60 = vpop.xlane.xlu1 %6743 }
 0x9aa   :  { %6777 = vst.msk [vmem:[%s11896_s6 + $0x58] sm:$0xff] %vm6765_vm14, %v6744_v60 }
 0x9ab   :  { %v6729_v34 = vpop.xlane.xlu0 %6728 }
 0x9ac   :  { %6774 = vst.msk [vmem:[%s11896_s6 + $0x40] sm:$0xff] %vm6765_vm14, %v6729_v34 }
 0x9ad   :  { %v6754_v53 = vpop.xlane.xlu1 %6753 }
 0x9ae   :  { %6779 = vst.msk [vmem:[%s11896_s6 + $0x68] sm:$0xff] %vm6765_vm14, %v6754_v53 }
 0x9af   :  { %v6739_v13 = vpop.xlane.xlu0 %6738 }
 0x9b0   :  { %6776 = vst.msk [vmem:[%s11896_s6 + $0x50] sm:$0xff] %vm6765_vm14, %v6739_v13 }
 0x9b1   :  { %v6764_v16 = vpop.xlane.xlu1 %6763 }
 0x9b2   :  { %6781 = vst.msk [vmem:[%s11896_s6 + $0x78] sm:$0xff] %vm6765_vm14, %v6764_v16 }
 0x9b3   :  { %v6749_v47 = vpop.xlane.xlu0 %6748 }
 0x9b4   :  { %6778 = vst.msk [vmem:[%s11896_s6 + $0x60] sm:$0xff] %vm6765_vm14, %v6749_v47 }
 0x9b5   :  { %v6790_v12 = vpop.permute.xlu1 %6789 }
 0x9b6   :  { %7144 = vst.msk [vmem:[%s11895_s5 + $0x18] sm:$0xff] %vm6783_vm11, %v6790_v12 }
 0x9b7   :  { %v6759_v40 = vpop.xlane.xlu0 %6758 }
 0x9b8   :  { %6780 = vst.msk [vmem:[%s11896_s6 + $0x70] sm:$0xff] %vm6765_vm14, %v6759_v40 }
 0x9bb   :  { %v6788_v61 = vpop.permute.xlu0 %6787 }
 0x9bc   :  { %v6792_v41 = vsel %vm6791_vm15, %v6788_v61, %v6790_v12 }
 0x9bd   :  { %7143 = vst [vmem:[%s11895_s5 + $0x10] sm:$0xff] %v6792_v41 }

</bundles_post_ra>
